<compile_context>
chip_gen: v5e
topology: v5e:2x2
jax: 0.10.0
libtpu: 0.0.40
codegen_flags: <defaults>
</compile_context>

<pallas_src>
import jax
import jax.numpy as jnp
from jax.experimental import pallas as pl
from jax.experimental.pallas import tpu as pltpu

# ----------------------------- config (ModelArgs analogue) -------------------
VOCAB_SIZE = 256        # args.vocab_size
CODEBOOK_SIZE = 64      # args.audio_encoder_args.codebook_size
TOTAL_VOCAB = VOCAB_SIZE + 2 * CODEBOOK_SIZE   # fused [text | semantic | acoustic] table
HIDDEN = 128            # temporal_args.hidden_size
N_HEADS = 4
HEAD_DIM = HIDDEN // N_HEADS
FFN = 256
N_LAYERS = 2
EPS = 1e-6

TEXT_LEN = 8
SEM_LEN = 8
AC_LEN = 8
SEQ = TEXT_LEN + SEM_LEN + AC_LEN


# ----------------------------- fused forward kernel --------------------------
def _fused_forward_kernel(ids_ref, emb_tab_ref,
                          norm_w_ref, final_norm_w_ref,
                          norm1_ref, norm2_ref,
                          wqkv_ref, wo_ref, w13_ref, w2_ref,
                          o_ref):
    s = o_ref.shape[0]

    def rms(v, w):
        ms = jnp.mean(v * v, axis=-1, keepdims=True)
        return v * jax.lax.rsqrt(ms + EPS) * w

    # ---- fused embedding lookup: ONE one-hot matmul over the merged table ----
    ids = ids_ref[...]                                        # (S, 1) int32 (pre-offset)
    iota = jax.lax.broadcasted_iota(jnp.int32, (s, TOTAL_VOCAB), 1)
    onehot = jnp.where(ids == iota, 1.0, 0.0).astype(jnp.bfloat16)
    x = jnp.dot(onehot, emb_tab_ref[...],
                preferred_element_type=jnp.float32)           # (S, H) f32

    # ---- pre-transformer RMSNorm ----
    x = rms(x, norm_w_ref[...])

    # Causal mask, hoisted out of the layer loop (broadcast_in_dim is not CSE'd).
    row = jax.lax.broadcasted_iota(jnp.int32, (s, s), 0)
    col = jax.lax.broadcasted_iota(jnp.int32, (s, s), 1)
    mask = jnp.broadcast_to((row >= col)[None], (N_HEADS, s, s))
    scale = 1.0 / (HEAD_DIM ** 0.5)

    for li in range(N_LAYERS):                                # static unroll (tiny L)
        # ----------------- multi-head causal self-attention -----------------
        h = rms(x, norm1_ref[li])
        hb = h.astype(jnp.bfloat16)

        # Lane-dense fused QKV: (S,H) @ (H,3H) -> (S,3H). One MXU sequence.
        qkv = jnp.dot(hb, wqkv_ref[li], preferred_element_type=jnp.float32)
        # Single per-layer relayout to head-major (3*NH, S, HD).
        qkv_h = jnp.transpose(qkv.reshape(s, 3 * N_HEADS, HEAD_DIM), (1, 0, 2))
        q = qkv_h[:N_HEADS]
        k = qkv_h[N_HEADS:2 * N_HEADS]
        v = qkv_h[2 * N_HEADS:]

        sc = jax.lax.dot_general(                             # (NH, S, S)
            q.astype(jnp.bfloat16), k.astype(jnp.bfloat16),
            dimension_numbers=(((2,), (2,)), ((0,), (0,))),
            preferred_element_type=jnp.float32) * scale
        sc = jnp.where(mask, sc, -1e30)
        sc = sc - jnp.max(sc, axis=-1, keepdims=True)
        p = jnp.exp(sc)
        p = p * pl.reciprocal(jnp.sum(p, axis=-1, keepdims=True), approx=True)

        ctx = jax.lax.dot_general(                            # (NH, S, HD)
            p.astype(jnp.bfloat16), v.astype(jnp.bfloat16),
            dimension_numbers=(((2,), (1,)), ((0,), (0,))),
            preferred_element_type=jnp.float32)
        # One relayout back to (S, NH*HD), then a single lane-dense (S,H)@(H,H).
        ctx_flat = jnp.transpose(ctx, (1, 0, 2)).reshape(s, HIDDEN)
        proj = jnp.dot(ctx_flat.astype(jnp.bfloat16), wo_ref[li],
                       preferred_element_type=jnp.float32)    # (S, H)
        x = x + proj

        # ----------------------- SwiGLU feed-forward ------------------------
        h = rms(x, norm2_ref[li])
        gu = jnp.dot(h.astype(jnp.bfloat16), w13_ref[li],
                     preferred_element_type=jnp.float32)      # (S, 2F) lane-dense
        g = gu[:, :FFN]
        u = gu[:, FFN:]
        f = g * jax.lax.logistic(g) * u                       # silu(g) * u (f32 VPU)
        x = x + jnp.dot(f.astype(jnp.bfloat16), w2_ref[li],
                        preferred_element_type=jnp.float32)

    # ---- final RMSNorm ----
    o_ref[...] = rms(x, final_norm_w_ref[...]).astype(o_ref.dtype)


# ----------------------------- wrapper ----------------------------------------
def temporal_transformer_forward(params, text_tokens, semantic_tokens, acoustic_tokens):
    # Offset semantic / acoustic ids into the fused [text | semantic | acoustic] table.
    text_ids = text_tokens.reshape(-1).astype(jnp.int32)
    sem_ids = semantic_tokens.reshape(-1).astype(jnp.int32) + VOCAB_SIZE
    ac_ids = acoustic_tokens.reshape(-1).astype(jnp.int32) + VOCAB_SIZE + CODEBOOK_SIZE
    ids = jnp.concatenate([text_ids, sem_ids, ac_ids]).reshape(-1, 1)
    s = ids.shape[0]

    args = (ids, params["embedding"],
            params["norm"], params["final_norm"],
            params["norm1"], params["norm2"],
            params["wqkv"], params["wo"], params["w13"], params["w2"])

    # Advisory cost estimate so XLA schedules surrounding ops around this short call.
    in_bytes = sum(int(a.size) * a.dtype.itemsize for a in args)
    out_bytes = s * HIDDEN * 4
    per_layer_flops = (2 * s * HIDDEN * 3 * HIDDEN            # fused QKV
                       + 2 * 2 * N_HEADS * s * s * HEAD_DIM   # scores + ctx
                       + 2 * s * HIDDEN * HIDDEN              # output projection
                       + 2 * s * HIDDEN * 2 * FFN             # W1/W3
                       + 2 * s * FFN * HIDDEN)                # W2
    flops = 2 * s * TOTAL_VOCAB * HIDDEN + N_LAYERS * per_layer_flops
    transcendentals = N_LAYERS * (N_HEADS * s * s + s * FFN) + (2 * N_LAYERS + 2) * s

    vspec = pl.BlockSpec(memory_space=pltpu.MemorySpace.VMEM)
    out = pl.pallas_call(
        _fused_forward_kernel,
        out_shape=jax.ShapeDtypeStruct((s, HIDDEN), jnp.float32),
        in_specs=[vspec] * len(args),
        out_specs=vspec,
        cost_estimate=pl.CostEstimate(flops=flops,
                                      transcendentals=transcendentals,
                                      bytes_accessed=in_bytes + out_bytes),
        # Single gridless invocation: whole working set (<1 MiB) is VMEM-resident.
    )(*args)
    return out[None]                                          # (1, S, H)


# ----------------------------- parameters -------------------------------------
def init_params(key):
    def nrm(k, shape, scale=0.02):
        return scale * jax.random.normal(k, shape, dtype=jnp.float32)

    keys = jax.random.split(key, 3 + N_LAYERS)

    # Fused embedding table: rows [0:256)=text, [256:320)=semantic, [320:384)=acoustic.
    emb = jnp.concatenate([
        nrm(keys[0], (VOCAB_SIZE, HIDDEN)),
        nrm(keys[1], (CODEBOOK_SIZE, HIDDEN)),
        nrm(keys[2], (CODEBOOK_SIZE, HIDDEN)),
    ], axis=0)                                                # (TOTAL_VOCAB, H)

    wqkv_l, wo_l, w13_l, w2_l = [], [], [], []
    for li in range(N_LAYERS):
        lk = jax.random.split(keys[3 + li], 7)
        wq = nrm(lk[0], (HIDDEN, HIDDEN))
        wk = nrm(lk[1], (HIDDEN, HIDDEN))
        wv = nrm(lk[2], (HIDDEN, HIDDEN))
        wo = nrm(lk[3], (HIDDEN, HIDDEN))
        w1 = nrm(lk[4], (HIDDEN, FFN))
        w3 = nrm(lk[5], (HIDDEN, FFN))
        w2 = nrm(lk[6], (FFN, HIDDEN))
        # Lane-dense fused layouts (head-major columns within each Q/K/V block).
        wqkv_l.append(jnp.concatenate([wq, wk, wv], axis=1))  # (H, 3H)
        wo_l.append(wo)                                       # (H, H)  head-major rows
        w13_l.append(jnp.concatenate([w1, w3], axis=1))       # (H, 2F)
        w2_l.append(w2)                                       # (F, H)

    return {
        "embedding": emb.astype(jnp.bfloat16),                # (384, H) bf16
        "norm": jnp.ones((1, HIDDEN), jnp.float32),
        "final_norm": jnp.ones((1, HIDDEN), jnp.float32),
        "norm1": jnp.ones((N_LAYERS, 1, HIDDEN), jnp.float32),
        "norm2": jnp.ones((N_LAYERS, 1, HIDDEN), jnp.float32),
        "wqkv": jnp.stack(wqkv_l).astype(jnp.bfloat16),       # (L, H, 3H)
        "wo":   jnp.stack(wo_l).astype(jnp.bfloat16),         # (L, H, H)
        "w13":  jnp.stack(w13_l).astype(jnp.bfloat16),        # (L, H, 2F)
        "w2":   jnp.stack(w2_l).astype(jnp.bfloat16),         # (L, F, H)
    }


# ----------------------------- pure-JAX reference ------------------------------
def forward_ref(params, text_tokens, semantic_tokens, acoustic_tokens):
    def rms(v, w):
        ms = jnp.mean(v * v, axis=-1, keepdims=True)
        return v * jax.lax.rsqrt(ms + EPS) * w

    def bf16_rt(a):  # mirror the kernel's bf16 MXU-input cast
        return a.astype(jnp.bfloat16).astype(jnp.float32)

    text_ids = text_tokens.reshape(-1).astype(jnp.int32)
    sem_ids = semantic_tokens.reshape(-1).astype(jnp.int32) + VOCAB_SIZE
    ac_ids = acoustic_tokens.reshape(-1).astype(jnp.int32) + VOCAB_SIZE + CODEBOOK_SIZE
    ids = jnp.concatenate([text_ids, sem_ids, ac_ids])

    x = jnp.take(params["embedding"], ids, axis=0).astype(jnp.float32)
    x = rms(x, params["norm"])

    s = x.shape[0]
    mask = (jnp.arange(s)[:, None] >= jnp.arange(s)[None, :])[None]
    scale = 1.0 / (HEAD_DIM ** 0.5)
    for li in range(N_LAYERS):
        h = rms(x, params["norm1"][li])
        qkv = jnp.dot(bf16_rt(h), params["wqkv"][li].astype(jnp.float32))     # (S, 3H)
        qkv_h = jnp.transpose(qkv.reshape(s, 3 * N_HEADS, HEAD_DIM), (1, 0, 2))
        q, k, v = (qkv_h[:N_HEADS], qkv_h[N_HEADS:2 * N_HEADS], qkv_h[2 * N_HEADS:])
        sc = jnp.einsum("hqd,hkd->hqk", bf16_rt(q), bf16_rt(k)) * scale
        sc = jnp.where(mask, sc, -1e30)
        sc = sc - sc.max(-1, keepdims=True)
        p = jnp.exp(sc)
        p = p / p.sum(-1, keepdims=True)
        ctx = jnp.einsum("hqk,hkd->hqd", bf16_rt(p), bf16_rt(v))
        ctx_flat = jnp.transpose(ctx, (1, 0, 2)).reshape(s, HIDDEN)
        x = x + jnp.dot(bf16_rt(ctx_flat), params["wo"][li].astype(jnp.float32))

        h = rms(x, params["norm2"][li])
        gu = jnp.dot(bf16_rt(h), params["w13"][li].astype(jnp.float32))
        g, u = gu[:, :FFN], gu[:, FFN:]
        f = g * jax.nn.sigmoid(g) * u
        x = x + jnp.dot(bf16_rt(f), params["w2"][li].astype(jnp.float32))
    return rms(x, params["final_norm"])[None]


# ----------------------------- main ---------------------------------------------
if __name__ == "__main__":
    key = jax.random.PRNGKey(0)
    pkey, tk, sk, ak = jax.random.split(key, 4)
    params = init_params(pkey)

    text_tokens = jax.random.randint(tk, (1, TEXT_LEN), 0, VOCAB_SIZE, dtype=jnp.int32)
    semantic_tokens = jax.random.randint(sk, (SEM_LEN,), 0, CODEBOOK_SIZE, dtype=jnp.int32)
    acoustic_tokens = jax.random.randint(ak, (AC_LEN,), 0, CODEBOOK_SIZE, dtype=jnp.int32)

    out = temporal_transformer_forward(params, text_tokens, semantic_tokens, acoustic_tokens)
    out = jax.block_until_ready(out)
    assert out.shape == (1, SEQ, HIDDEN), out.shape
    assert bool(jnp.all(jnp.isfinite(out)))

    ref = forward_ref(params, text_tokens, semantic_tokens, acoustic_tokens)
    max_err = float(jnp.max(jnp.abs(out - ref)))
    assert jnp.allclose(out, ref, rtol=2e-2, atol=2e-2), max_err

    print("KERNEL_OK")
</pallas_src>

<mosaic_0001>
module attributes {stable_mosaic.version = 11 : i64} {
  func.func @_fused_forward_kernel(%arg0: memref<24x1xi32, #tpu.memory_space<vmem>>, %arg1: memref<384x128xbf16, #tpu.memory_space<vmem>>, %arg2: memref<1x128xf32, #tpu.memory_space<vmem>>, %arg3: memref<1x128xf32, #tpu.memory_space<vmem>>, %arg4: memref<2x1x128xf32, #tpu.memory_space<vmem>>, %arg5: memref<2x1x128xf32, #tpu.memory_space<vmem>>, %arg6: memref<2x128x384xbf16, #tpu.memory_space<vmem>>, %arg7: memref<2x128x128xbf16, #tpu.memory_space<vmem>>, %arg8: memref<2x128x512xbf16, #tpu.memory_space<vmem>>, %arg9: memref<2x256x128xbf16, #tpu.memory_space<vmem>>, %arg10: memref<24x128xf32, #tpu.memory_space<vmem>>) attributes {dimension_semantics = [], scalar_prefetch = 0 : i64, scratch_operands = 0 : i64, tpu.core_type = #tpu.core_type<tc>} {
    %c0 = arith.constant 0 : index
    %c0_0 = arith.constant 0 : index
    %0 = vector.load %arg0[%c0, %c0_0] : memref<24x1xi32, #tpu.memory_space<vmem>>, vector<24x1xi32>
    %1 = tpu.iota {dimensions = array<i32: 1>} : vector<24x384xi32>
    %2 = vector.broadcast %0 : vector<24x1xi32> to vector<24x384xi32>
    %3 = arith.cmpi eq, %2, %1 : vector<24x384xi32>
    %cst = arith.constant 1.000000e+00 : f32
    %cst_1 = arith.constant 0.000000e+00 : f32
    %4 = vector.broadcast %cst : f32 to vector<24x384xf32>
    %5 = vector.broadcast %cst_1 : f32 to vector<24x384xf32>
    %6 = arith.select %3, %4, %5 : vector<24x384xi1>, vector<24x384xf32>
    %7 = arith.truncf %6 : vector<24x384xf32> to vector<24x384xbf16>
    %c0_2 = arith.constant 0 : index
    %c0_3 = arith.constant 0 : index
    %8 = vector.load %arg1[%c0_2, %c0_3] : memref<384x128xbf16, #tpu.memory_space<vmem>>, vector<384x128xbf16>
    %cst_4 = arith.constant dense<0.000000e+00> : vector<24x128xf32>
    %9 = tpu.matmul %7, %8, %cst_4 {dimension_numbers = #tpu.dot_dimension_numbers<[1], [0], [0], [1], [0, 0, 1, 1], [], []>} : vector<24x384xbf16>, vector<384x128xbf16>, vector<24x128xf32> -> vector<24x128xf32>
    %c0_5 = arith.constant 0 : index
    %c0_6 = arith.constant 0 : index
    %10 = vector.load %arg2[%c0_5, %c0_6] : memref<1x128xf32, #tpu.memory_space<vmem>>, vector<1x128xf32>
    %11 = arith.mulf %9, %9 : vector<24x128xf32>
    %cst_7 = arith.constant dense<0.000000e+00> : vector<24xf32>
    %12 = vector.multi_reduction <add>, %11, %cst_7 [1] : vector<24x128xf32> to vector<24xf32>
    %13 = vector.shape_cast %12 : vector<24xf32> to vector<24x1xf32>
    %cst_8 = arith.constant 1.280000e+02 : f32
    %14 = vector.broadcast %cst_8 : f32 to vector<24x1xf32>
    %15 = arith.divf %13, %14 : vector<24x1xf32>
    %cst_9 = arith.constant 9.99999997E-7 : f32
    %16 = vector.broadcast %cst_9 : f32 to vector<24x1xf32>
    %17 = arith.addf %15, %16 : vector<24x1xf32>
    %18 = math.rsqrt %17 : vector<24x1xf32>
    %19 = vector.broadcast %18 : vector<24x1xf32> to vector<24x128xf32>
    %20 = arith.mulf %9, %19 : vector<24x128xf32>
    %21 = vector.broadcast %10 : vector<1x128xf32> to vector<24x128xf32>
    %22 = arith.mulf %20, %21 : vector<24x128xf32>
    %23 = tpu.iota {dimensions = array<i32: 0>} : vector<24x24xi32>
    %24 = tpu.iota {dimensions = array<i32: 1>} : vector<24x24xi32>
    %25 = arith.cmpi sge, %23, %24 : vector<24x24xi32>
    %26 = vector.shape_cast %25 : vector<24x24xi1> to vector<1x24x24xi1>
    %27 = vector.shape_cast %26 : vector<1x24x24xi1> to vector<1x24x24xi1>
    %28 = vector.broadcast %27 : vector<1x24x24xi1> to vector<4x24x24xi1>
    %c0_10 = arith.constant 0 : index
    %c0_11 = arith.constant 0 : index
    %c0_12 = arith.constant 0 : index
    %29 = vector.load %arg4[%c0_10, %c0_11, %c0_12] : memref<2x1x128xf32, #tpu.memory_space<vmem>>, vector<1x1x128xf32>
    %30 = vector.shape_cast %29 : vector<1x1x128xf32> to vector<1x128xf32>
    %31 = arith.mulf %22, %22 : vector<24x128xf32>
    %cst_13 = arith.constant dense<0.000000e+00> : vector<24xf32>
    %32 = vector.multi_reduction <add>, %31, %cst_13 [1] : vector<24x128xf32> to vector<24xf32>
    %33 = vector.shape_cast %32 : vector<24xf32> to vector<24x1xf32>
    %cst_14 = arith.constant 1.280000e+02 : f32
    %34 = vector.broadcast %cst_14 : f32 to vector<24x1xf32>
    %35 = arith.divf %33, %34 : vector<24x1xf32>
    %cst_15 = arith.constant 9.99999997E-7 : f32
    %36 = vector.broadcast %cst_15 : f32 to vector<24x1xf32>
    %37 = arith.addf %35, %36 : vector<24x1xf32>
    %38 = math.rsqrt %37 : vector<24x1xf32>
    %39 = vector.broadcast %38 : vector<24x1xf32> to vector<24x128xf32>
    %40 = arith.mulf %22, %39 : vector<24x128xf32>
    %41 = vector.broadcast %30 : vector<1x128xf32> to vector<24x128xf32>
    %42 = arith.mulf %40, %41 : vector<24x128xf32>
    %43 = arith.truncf %42 : vector<24x128xf32> to vector<24x128xbf16>
    %c0_16 = arith.constant 0 : index
    %c0_17 = arith.constant 0 : index
    %c0_18 = arith.constant 0 : index
    %44 = vector.load %arg6[%c0_16, %c0_17, %c0_18] : memref<2x128x384xbf16, #tpu.memory_space<vmem>>, vector<1x128x384xbf16>
    %45 = vector.shape_cast %44 : vector<1x128x384xbf16> to vector<128x384xbf16>
    %cst_19 = arith.constant dense<0.000000e+00> : vector<24x384xf32>
    %46 = tpu.matmul %43, %45, %cst_19 {dimension_numbers = #tpu.dot_dimension_numbers<[1], [0], [0], [1], [0, 0, 1, 1], [], []>} : vector<24x128xbf16>, vector<128x384xbf16>, vector<24x384xf32> -> vector<24x384xf32>
    %47 = vector.shape_cast %46 : vector<24x384xf32> to vector<24x12x32xf32>
    %48 = tpu.transpose %47, [1, 0, 2] : vector<24x12x32xf32> -> vector<12x24x32xf32>
    %49 = vector.extract_strided_slice %48 {offsets = [0, 0, 0], sizes = [4, 24, 32], strides = [1, 1, 1]} : vector<12x24x32xf32> to vector<4x24x32xf32>
    %50 = vector.extract_strided_slice %48 {offsets = [4, 0, 0], sizes = [4, 24, 32], strides = [1, 1, 1]} : vector<12x24x32xf32> to vector<4x24x32xf32>
    %51 = vector.extract_strided_slice %48 {offsets = [8, 0, 0], sizes = [4, 24, 32], strides = [1, 1, 1]} : vector<12x24x32xf32> to vector<4x24x32xf32>
    %52 = arith.truncf %49 : vector<4x24x32xf32> to vector<4x24x32xbf16>
    %53 = arith.truncf %50 : vector<4x24x32xf32> to vector<4x24x32xbf16>
    %cst_20 = arith.constant dense<0.000000e+00> : vector<4x24x24xf32>
    %54 = tpu.matmul %52, %53, %cst_20 {dimension_numbers = #tpu.dot_dimension_numbers<[2], [2], [1], [1], [0, 0, 0, 1, 1, 1], [0], [0]>} : vector<4x24x32xbf16>, vector<4x24x32xbf16>, vector<4x24x24xf32> -> vector<4x24x24xf32>
    %cst_21 = arith.constant 0.176776692 : f32
    %55 = vector.broadcast %cst_21 : f32 to vector<4x24x24xf32>
    %56 = arith.mulf %54, %55 : vector<4x24x24xf32>
    %cst_22 = arith.constant -1.000000e+30 : f32
    %57 = vector.broadcast %cst_22 : f32 to vector<4x24x24xf32>
    %58 = arith.select %28, %56, %57 : vector<4x24x24xi1>, vector<4x24x24xf32>
    %cst_23 = arith.constant dense<0xFF800000> : vector<4x24xf32>
    %59 = vector.multi_reduction <maximumf>, %58, %cst_23 [2] : vector<4x24x24xf32> to vector<4x24xf32>
    %60 = vector.shape_cast %59 : vector<4x24xf32> to vector<4x24x1xf32>
    %61 = vector.broadcast %60 : vector<4x24x1xf32> to vector<4x24x24xf32>
    %62 = arith.subf %58, %61 : vector<4x24x24xf32>
    %63 = math.exp %62 : vector<4x24x24xf32>
    %cst_24 = arith.constant dense<0.000000e+00> : vector<4x24xf32>
    %64 = vector.multi_reduction <add>, %63, %cst_24 [2] : vector<4x24x24xf32> to vector<4x24xf32>
    %65 = vector.shape_cast %64 : vector<4x24xf32> to vector<4x24x1xf32>
    %66 = tpu.reciprocal %65 {approx = true} : vector<4x24x1xf32> -> vector<4x24x1xf32>
    %67 = vector.broadcast %66 : vector<4x24x1xf32> to vector<4x24x24xf32>
    %68 = arith.mulf %63, %67 : vector<4x24x24xf32>
    %69 = arith.truncf %68 : vector<4x24x24xf32> to vector<4x24x24xbf16>
    %70 = arith.truncf %51 : vector<4x24x32xf32> to vector<4x24x32xbf16>
    %cst_25 = arith.constant dense<0.000000e+00> : vector<4x24x32xf32>
    %71 = tpu.matmul %69, %70, %cst_25 {dimension_numbers = #tpu.dot_dimension_numbers<[2], [1], [1], [2], [0, 0, 0, 1, 1, 2], [0], [0]>} : vector<4x24x24xbf16>, vector<4x24x32xbf16>, vector<4x24x32xf32> -> vector<4x24x32xf32>
    %72 = tpu.transpose %71, [1, 0, 2] : vector<4x24x32xf32> -> vector<24x4x32xf32>
    %73 = vector.shape_cast %72 : vector<24x4x32xf32> to vector<24x128xf32>
    %74 = arith.truncf %73 : vector<24x128xf32> to vector<24x128xbf16>
    %c0_26 = arith.constant 0 : index
    %c0_27 = arith.constant 0 : index
    %c0_28 = arith.constant 0 : index
    %75 = vector.load %arg7[%c0_26, %c0_27, %c0_28] : memref<2x128x128xbf16, #tpu.memory_space<vmem>>, vector<1x128x128xbf16>
    %76 = vector.shape_cast %75 : vector<1x128x128xbf16> to vector<128x128xbf16>
    %cst_29 = arith.constant dense<0.000000e+00> : vector<24x128xf32>
    %77 = tpu.matmul %74, %76, %cst_29 {dimension_numbers = #tpu.dot_dimension_numbers<[1], [0], [0], [1], [0, 0, 1, 1], [], []>} : vector<24x128xbf16>, vector<128x128xbf16>, vector<24x128xf32> -> vector<24x128xf32>
    %78 = arith.addf %22, %77 : vector<24x128xf32>
    %c0_30 = arith.constant 0 : index
    %c0_31 = arith.constant 0 : index
    %c0_32 = arith.constant 0 : index
    %79 = vector.load %arg5[%c0_30, %c0_31, %c0_32] : memref<2x1x128xf32, #tpu.memory_space<vmem>>, vector<1x1x128xf32>
    %80 = vector.shape_cast %79 : vector<1x1x128xf32> to vector<1x128xf32>
    %81 = arith.mulf %78, %78 : vector<24x128xf32>
    %cst_33 = arith.constant dense<0.000000e+00> : vector<24xf32>
    %82 = vector.multi_reduction <add>, %81, %cst_33 [1] : vector<24x128xf32> to vector<24xf32>
    %83 = vector.shape_cast %82 : vector<24xf32> to vector<24x1xf32>
    %cst_34 = arith.constant 1.280000e+02 : f32
    %84 = vector.broadcast %cst_34 : f32 to vector<24x1xf32>
    %85 = arith.divf %83, %84 : vector<24x1xf32>
    %cst_35 = arith.constant 9.99999997E-7 : f32
    %86 = vector.broadcast %cst_35 : f32 to vector<24x1xf32>
    %87 = arith.addf %85, %86 : vector<24x1xf32>
    %88 = math.rsqrt %87 : vector<24x1xf32>
    %89 = vector.broadcast %88 : vector<24x1xf32> to vector<24x128xf32>
    %90 = arith.mulf %78, %89 : vector<24x128xf32>
    %91 = vector.broadcast %80 : vector<1x128xf32> to vector<24x128xf32>
    %92 = arith.mulf %90, %91 : vector<24x128xf32>
    %93 = arith.truncf %92 : vector<24x128xf32> to vector<24x128xbf16>
    %c0_36 = arith.constant 0 : index
    %c0_37 = arith.constant 0 : index
    %c0_38 = arith.constant 0 : index
    %94 = vector.load %arg8[%c0_36, %c0_37, %c0_38] : memref<2x128x512xbf16, #tpu.memory_space<vmem>>, vector<1x128x512xbf16>
    %95 = vector.shape_cast %94 : vector<1x128x512xbf16> to vector<128x512xbf16>
    %cst_39 = arith.constant dense<0.000000e+00> : vector<24x512xf32>
    %96 = tpu.matmul %93, %95, %cst_39 {dimension_numbers = #tpu.dot_dimension_numbers<[1], [0], [0], [1], [0, 0, 1, 1], [], []>} : vector<24x128xbf16>, vector<128x512xbf16>, vector<24x512xf32> -> vector<24x512xf32>
    %97 = vector.extract_strided_slice %96 {offsets = [0, 0], sizes = [24, 256], strides = [1, 1]} : vector<24x512xf32> to vector<24x256xf32>
    %98 = vector.extract_strided_slice %96 {offsets = [0, 256], sizes = [24, 256], strides = [1, 1]} : vector<24x512xf32> to vector<24x256xf32>
    %99 = arith.negf %97 : vector<24x256xf32>
    %100 = math.exp %99 : vector<24x256xf32>
    %cst_40 = arith.constant 1.000000e+00 : f32
    %101 = vector.broadcast %cst_40 : f32 to vector<24x256xf32>
    %102 = arith.addf %101, %100 : vector<24x256xf32>
    %103 = arith.divf %101, %102 : vector<24x256xf32>
    %104 = arith.mulf %97, %103 : vector<24x256xf32>
    %105 = arith.mulf %104, %98 : vector<24x256xf32>
    %106 = arith.truncf %105 : vector<24x256xf32> to vector<24x256xbf16>
    %c0_41 = arith.constant 0 : index
    %c0_42 = arith.constant 0 : index
    %c0_43 = arith.constant 0 : index
    %107 = vector.load %arg9[%c0_41, %c0_42, %c0_43] : memref<2x256x128xbf16, #tpu.memory_space<vmem>>, vector<1x256x128xbf16>
    %108 = vector.shape_cast %107 : vector<1x256x128xbf16> to vector<256x128xbf16>
    %cst_44 = arith.constant dense<0.000000e+00> : vector<24x128xf32>
    %109 = tpu.matmul %106, %108, %cst_44 {dimension_numbers = #tpu.dot_dimension_numbers<[1], [0], [0], [1], [0, 0, 1, 1], [], []>} : vector<24x256xbf16>, vector<256x128xbf16>, vector<24x128xf32> -> vector<24x128xf32>
    %110 = arith.addf %78, %109 : vector<24x128xf32>
    %c1 = arith.constant 1 : index
    %c0_45 = arith.constant 0 : index
    %c0_46 = arith.constant 0 : index
    %111 = vector.load %arg4[%c1, %c0_45, %c0_46] : memref<2x1x128xf32, #tpu.memory_space<vmem>>, vector<1x1x128xf32>
    %112 = vector.shape_cast %111 : vector<1x1x128xf32> to vector<1x128xf32>
    %113 = arith.mulf %110, %110 : vector<24x128xf32>
    %cst_47 = arith.constant dense<0.000000e+00> : vector<24xf32>
    %114 = vector.multi_reduction <add>, %113, %cst_47 [1] : vector<24x128xf32> to vector<24xf32>
    %115 = vector.shape_cast %114 : vector<24xf32> to vector<24x1xf32>
    %cst_48 = arith.constant 1.280000e+02 : f32
    %116 = vector.broadcast %cst_48 : f32 to vector<24x1xf32>
    %117 = arith.divf %115, %116 : vector<24x1xf32>
    %cst_49 = arith.constant 9.99999997E-7 : f32
    %118 = vector.broadcast %cst_49 : f32 to vector<24x1xf32>
    %119 = arith.addf %117, %118 : vector<24x1xf32>
    %120 = math.rsqrt %119 : vector<24x1xf32>
    %121 = vector.broadcast %120 : vector<24x1xf32> to vector<24x128xf32>
    %122 = arith.mulf %110, %121 : vector<24x128xf32>
    %123 = vector.broadcast %112 : vector<1x128xf32> to vector<24x128xf32>
    %124 = arith.mulf %122, %123 : vector<24x128xf32>
    %125 = arith.truncf %124 : vector<24x128xf32> to vector<24x128xbf16>
    %c1_50 = arith.constant 1 : index
    %c0_51 = arith.constant 0 : index
    %c0_52 = arith.constant 0 : index
    %126 = vector.load %arg6[%c1_50, %c0_51, %c0_52] : memref<2x128x384xbf16, #tpu.memory_space<vmem>>, vector<1x128x384xbf16>
    %127 = vector.shape_cast %126 : vector<1x128x384xbf16> to vector<128x384xbf16>
    %cst_53 = arith.constant dense<0.000000e+00> : vector<24x384xf32>
    %128 = tpu.matmul %125, %127, %cst_53 {dimension_numbers = #tpu.dot_dimension_numbers<[1], [0], [0], [1], [0, 0, 1, 1], [], []>} : vector<24x128xbf16>, vector<128x384xbf16>, vector<24x384xf32> -> vector<24x384xf32>
    %129 = vector.shape_cast %128 : vector<24x384xf32> to vector<24x12x32xf32>
    %130 = tpu.transpose %129, [1, 0, 2] : vector<24x12x32xf32> -> vector<12x24x32xf32>
    %131 = vector.extract_strided_slice %130 {offsets = [0, 0, 0], sizes = [4, 24, 32], strides = [1, 1, 1]} : vector<12x24x32xf32> to vector<4x24x32xf32>
    %132 = vector.extract_strided_slice %130 {offsets = [4, 0, 0], sizes = [4, 24, 32], strides = [1, 1, 1]} : vector<12x24x32xf32> to vector<4x24x32xf32>
    %133 = vector.extract_strided_slice %130 {offsets = [8, 0, 0], sizes = [4, 24, 32], strides = [1, 1, 1]} : vector<12x24x32xf32> to vector<4x24x32xf32>
    %134 = arith.truncf %131 : vector<4x24x32xf32> to vector<4x24x32xbf16>
    %135 = arith.truncf %132 : vector<4x24x32xf32> to vector<4x24x32xbf16>
    %cst_54 = arith.constant dense<0.000000e+00> : vector<4x24x24xf32>
    %136 = tpu.matmul %134, %135, %cst_54 {dimension_numbers = #tpu.dot_dimension_numbers<[2], [2], [1], [1], [0, 0, 0, 1, 1, 1], [0], [0]>} : vector<4x24x32xbf16>, vector<4x24x32xbf16>, vector<4x24x24xf32> -> vector<4x24x24xf32>
    %cst_55 = arith.constant 0.176776692 : f32
    %137 = vector.broadcast %cst_55 : f32 to vector<4x24x24xf32>
    %138 = arith.mulf %136, %137 : vector<4x24x24xf32>
    %cst_56 = arith.constant -1.000000e+30 : f32
    %139 = vector.broadcast %cst_56 : f32 to vector<4x24x24xf32>
    %140 = arith.select %28, %138, %139 : vector<4x24x24xi1>, vector<4x24x24xf32>
    %cst_57 = arith.constant dense<0xFF800000> : vector<4x24xf32>
    %141 = vector.multi_reduction <maximumf>, %140, %cst_57 [2] : vector<4x24x24xf32> to vector<4x24xf32>
    %142 = vector.shape_cast %141 : vector<4x24xf32> to vector<4x24x1xf32>
    %143 = vector.broadcast %142 : vector<4x24x1xf32> to vector<4x24x24xf32>
    %144 = arith.subf %140, %143 : vector<4x24x24xf32>
    %145 = math.exp %144 : vector<4x24x24xf32>
    %cst_58 = arith.constant dense<0.000000e+00> : vector<4x24xf32>
    %146 = vector.multi_reduction <add>, %145, %cst_58 [2] : vector<4x24x24xf32> to vector<4x24xf32>
    %147 = vector.shape_cast %146 : vector<4x24xf32> to vector<4x24x1xf32>
    %148 = tpu.reciprocal %147 {approx = true} : vector<4x24x1xf32> -> vector<4x24x1xf32>
    %149 = vector.broadcast %148 : vector<4x24x1xf32> to vector<4x24x24xf32>
    %150 = arith.mulf %145, %149 : vector<4x24x24xf32>
    %151 = arith.truncf %150 : vector<4x24x24xf32> to vector<4x24x24xbf16>
    %152 = arith.truncf %133 : vector<4x24x32xf32> to vector<4x24x32xbf16>
    %cst_59 = arith.constant dense<0.000000e+00> : vector<4x24x32xf32>
    %153 = tpu.matmul %151, %152, %cst_59 {dimension_numbers = #tpu.dot_dimension_numbers<[2], [1], [1], [2], [0, 0, 0, 1, 1, 2], [0], [0]>} : vector<4x24x24xbf16>, vector<4x24x32xbf16>, vector<4x24x32xf32> -> vector<4x24x32xf32>
    %154 = tpu.transpose %153, [1, 0, 2] : vector<4x24x32xf32> -> vector<24x4x32xf32>
    %155 = vector.shape_cast %154 : vector<24x4x32xf32> to vector<24x128xf32>
    %156 = arith.truncf %155 : vector<24x128xf32> to vector<24x128xbf16>
    %c1_60 = arith.constant 1 : index
    %c0_61 = arith.constant 0 : index
    %c0_62 = arith.constant 0 : index
    %157 = vector.load %arg7[%c1_60, %c0_61, %c0_62] : memref<2x128x128xbf16, #tpu.memory_space<vmem>>, vector<1x128x128xbf16>
    %158 = vector.shape_cast %157 : vector<1x128x128xbf16> to vector<128x128xbf16>
    %cst_63 = arith.constant dense<0.000000e+00> : vector<24x128xf32>
    %159 = tpu.matmul %156, %158, %cst_63 {dimension_numbers = #tpu.dot_dimension_numbers<[1], [0], [0], [1], [0, 0, 1, 1], [], []>} : vector<24x128xbf16>, vector<128x128xbf16>, vector<24x128xf32> -> vector<24x128xf32>
    %160 = arith.addf %110, %159 : vector<24x128xf32>
    %c1_64 = arith.constant 1 : index
    %c0_65 = arith.constant 0 : index
    %c0_66 = arith.constant 0 : index
    %161 = vector.load %arg5[%c1_64, %c0_65, %c0_66] : memref<2x1x128xf32, #tpu.memory_space<vmem>>, vector<1x1x128xf32>
    %162 = vector.shape_cast %161 : vector<1x1x128xf32> to vector<1x128xf32>
    %163 = arith.mulf %160, %160 : vector<24x128xf32>
    %cst_67 = arith.constant dense<0.000000e+00> : vector<24xf32>
    %164 = vector.multi_reduction <add>, %163, %cst_67 [1] : vector<24x128xf32> to vector<24xf32>
    %165 = vector.shape_cast %164 : vector<24xf32> to vector<24x1xf32>
    %cst_68 = arith.constant 1.280000e+02 : f32
    %166 = vector.broadcast %cst_68 : f32 to vector<24x1xf32>
    %167 = arith.divf %165, %166 : vector<24x1xf32>
    %cst_69 = arith.constant 9.99999997E-7 : f32
    %168 = vector.broadcast %cst_69 : f32 to vector<24x1xf32>
    %169 = arith.addf %167, %168 : vector<24x1xf32>
    %170 = math.rsqrt %169 : vector<24x1xf32>
    %171 = vector.broadcast %170 : vector<24x1xf32> to vector<24x128xf32>
    %172 = arith.mulf %160, %171 : vector<24x128xf32>
    %173 = vector.broadcast %162 : vector<1x128xf32> to vector<24x128xf32>
    %174 = arith.mulf %172, %173 : vector<24x128xf32>
    %175 = arith.truncf %174 : vector<24x128xf32> to vector<24x128xbf16>
    %c1_70 = arith.constant 1 : index
    %c0_71 = arith.constant 0 : index
    %c0_72 = arith.constant 0 : index
    %176 = vector.load %arg8[%c1_70, %c0_71, %c0_72] : memref<2x128x512xbf16, #tpu.memory_space<vmem>>, vector<1x128x512xbf16>
    %177 = vector.shape_cast %176 : vector<1x128x512xbf16> to vector<128x512xbf16>
    %cst_73 = arith.constant dense<0.000000e+00> : vector<24x512xf32>
    %178 = tpu.matmul %175, %177, %cst_73 {dimension_numbers = #tpu.dot_dimension_numbers<[1], [0], [0], [1], [0, 0, 1, 1], [], []>} : vector<24x128xbf16>, vector<128x512xbf16>, vector<24x512xf32> -> vector<24x512xf32>
    %179 = vector.extract_strided_slice %178 {offsets = [0, 0], sizes = [24, 256], strides = [1, 1]} : vector<24x512xf32> to vector<24x256xf32>
    %180 = vector.extract_strided_slice %178 {offsets = [0, 256], sizes = [24, 256], strides = [1, 1]} : vector<24x512xf32> to vector<24x256xf32>
    %181 = arith.negf %179 : vector<24x256xf32>
    %182 = math.exp %181 : vector<24x256xf32>
    %cst_74 = arith.constant 1.000000e+00 : f32
    %183 = vector.broadcast %cst_74 : f32 to vector<24x256xf32>
    %184 = arith.addf %183, %182 : vector<24x256xf32>
    %185 = arith.divf %183, %184 : vector<24x256xf32>
    %186 = arith.mulf %179, %185 : vector<24x256xf32>
    %187 = arith.mulf %186, %180 : vector<24x256xf32>
    %188 = arith.truncf %187 : vector<24x256xf32> to vector<24x256xbf16>
    %c1_75 = arith.constant 1 : index
    %c0_76 = arith.constant 0 : index
    %c0_77 = arith.constant 0 : index
    %189 = vector.load %arg9[%c1_75, %c0_76, %c0_77] : memref<2x256x128xbf16, #tpu.memory_space<vmem>>, vector<1x256x128xbf16>
    %190 = vector.shape_cast %189 : vector<1x256x128xbf16> to vector<256x128xbf16>
    %cst_78 = arith.constant dense<0.000000e+00> : vector<24x128xf32>
    %191 = tpu.matmul %188, %190, %cst_78 {dimension_numbers = #tpu.dot_dimension_numbers<[1], [0], [0], [1], [0, 0, 1, 1], [], []>} : vector<24x256xbf16>, vector<256x128xbf16>, vector<24x128xf32> -> vector<24x128xf32>
    %192 = arith.addf %160, %191 : vector<24x128xf32>
    %c0_79 = arith.constant 0 : index
    %c0_80 = arith.constant 0 : index
    %193 = vector.load %arg3[%c0_79, %c0_80] : memref<1x128xf32, #tpu.memory_space<vmem>>, vector<1x128xf32>
    %194 = arith.mulf %192, %192 : vector<24x128xf32>
    %cst_81 = arith.constant dense<0.000000e+00> : vector<24xf32>
    %195 = vector.multi_reduction <add>, %194, %cst_81 [1] : vector<24x128xf32> to vector<24xf32>
    %196 = vector.shape_cast %195 : vector<24xf32> to vector<24x1xf32>
    %cst_82 = arith.constant 1.280000e+02 : f32
    %197 = vector.broadcast %cst_82 : f32 to vector<24x1xf32>
    %198 = arith.divf %196, %197 : vector<24x1xf32>
    %cst_83 = arith.constant 9.99999997E-7 : f32
    %199 = vector.broadcast %cst_83 : f32 to vector<24x1xf32>
    %200 = arith.addf %198, %199 : vector<24x1xf32>
    %201 = math.rsqrt %200 : vector<24x1xf32>
    %202 = vector.broadcast %201 : vector<24x1xf32> to vector<24x128xf32>
    %203 = arith.mulf %192, %202 : vector<24x128xf32>
    %204 = vector.broadcast %193 : vector<1x128xf32> to vector<24x128xf32>
    %205 = arith.mulf %203, %204 : vector<24x128xf32>
    %c0_84 = arith.constant 0 : index
    %c0_85 = arith.constant 0 : index
    %206 = vector.load %arg10[%c0_84, %c0_85] : memref<24x128xf32, #tpu.memory_space<vmem>>, vector<24x128xf32>
    tpu.vector_store %arg10[%c0_84, %c0_85], %205 {strides = array<i32>} : memref<24x128xf32, #tpu.memory_space<vmem>>, vector<24x128xf32>,
    return
  }
}

</mosaic_0001>

<bundles_post_ra>
// kernel: tpu_custom_call.1
= control target key start
LH: loop header
LB: loop body
LE: loop exit
PB: predicated region body
PF: predicated region fallthrough
CT: control target
= control target key end

     0   :  { %15 = vsyncpa [#allocation3], 0  ;;  %s10624_s0 = inlined_call_operand.vmem [shape: s32[24,1], index: 0, kind: input, shape index: {}]   ;;  %s10625_s1 = inlined_call_operand.hbm [shape: bf16[384,128], index: 1, kind: input, shape index: {}]   ;;  %s10626_s2 = inlined_call_operand.vmem [shape: f32[1,128], index: 2, kind: input, shape index: {}]   ;;  %s10627_s3 = inlined_call_operand.vmem [shape: f32[1,128], index: 3, kind: input, shape index: {}]   ;;  %s10628_s4 = inlined_call_operand.vmem [shape: f32[2,1,128], index: 4, kind: input, shape index: {}]   ;;  %s10629_s5 = inlined_call_operand.vmem [shape: f32[2,1,128], index: 5, kind: input, shape index: {}]   ;;  %s10630_s6 = inlined_call_operand.hbm [shape: bf16[2,128,384], index: 6, kind: input, shape index: {}]   ;;  %s10631_s7 = inlined_call_operand.hbm [shape: bf16[2,128,128], index: 7, kind: input, shape index: {}]   ;;  %s10632_s8 = inlined_call_operand.hbm [shape: bf16[2,128,512], index: 8, kind: input, shape index: {}]   ;;  %s10633_s9 = inlined_call_operand.hbm [shape: bf16[2,256,128], index: 9, kind: input, shape index: {}]   ;;  %s10634_s10 = inlined_call_operand.hbm [shape: f32[24,128], index: 10, kind: output, shape index: {}]  }
   0x1   :  { %16 = vsyncpa [#allocation6], 0 }
   0x2   :  { %17 = vsyncpa [#allocation9], 0  ;;  %s46_s15 = sshll.u32 %s10630_s6, 4  ;;  %s47_s15 = int_to_ptr.hbm [resolvable:$true] %s46_s15 }
   0x3   :  { %18 = vsyncpa [#allocation4], 0  ;;  %s8080_s16 = smov [#allocation5]   ;;  %s72_s20 = sshll.u32 %s10632_s8, 4  ;;  %s73_s20 = int_to_ptr.hbm [resolvable:$true] %s72_s20 }
   0x4   :  { %s48_s17 = sshll.u32 %s8080_s16, 4  ;;  %s8081_s21 = smov 192   ;;  %s49_s17 = int_to_ptr.vmem [resolvable:$true] %s48_s17 }
   0x5   :  { %s8082_s22 = smov 12   ;;  %s8083_s23 = smov [#allocation8]  }
   0x6   :  { %54 = dma.hbm_to_vmem [thread:$0]  %s47_s15, 6144, %s49_s17, [#allocation6], %s8081_s21, %s8081_s21, %s8082_s22  }
   0x7   :  { %s74_s24 = sshll.u32 %s8083_s23, 4  ;;  %s8084_s25 = smov 256   ;;  %s75_s24 = int_to_ptr.vmem [resolvable:$true] %s74_s24 }
   0x8   :  { %s8085_s26 = smov 16   ;;  %s25_s28 = sshll.u32 %s10625_s1, 4  ;;  %s26_s28 = int_to_ptr.hbm [resolvable:$true] %s25_s28 }
   0x9   :  { %80 = dma.hbm_to_vmem [thread:$0]  %s73_s20, 8192, %s75_s24, [#allocation9], %s8084_s25, %s8084_s25, %s8085_s26  }
   0xa   :  { %s8086_s29 = smov [#allocation2]   ;;  %s59_s12 = sshll.u32 %s10631_s7, 4  ;;  %s60_s12 = int_to_ptr.hbm [resolvable:$true] %s59_s12 }
   0xb   :  { %s27_s30 = sshll.u32 %s8086_s29, 4  ;;  %s8087_s13 = smov 64   ;;  %s28_s30 = int_to_ptr.vmem [resolvable:$true] %s27_s30 }
   0xc   :  { %s8088_s14 = smov 4   ;;  %s8089_s15 = smov [#allocation7]  }
   0xd   :  { %33 = dma.hbm_to_vmem [thread:$0]  %s26_s28, 3072, %s28_s30, [#allocation3], %s8087_s13, %s8087_s13, %s8088_s14  }
   0xe   :  { %s61_s16 = sshll.u32 %s8089_s15, 4  ;;  %s85_s1 = sshll.u32 %s10633_s9, 4  ;;  %s62_s16 = int_to_ptr.vmem [resolvable:$true] %s61_s16  ;;  %s86_s1 = int_to_ptr.hbm [resolvable:$true] %s85_s1 }
   0xf   :  { %67 = dma.hbm_to_vmem [thread:$0]  %s60_s12, 2048, %s62_s16, [#allocation6], %s8087_s13, %s8087_s13, %s8088_s14  }
  0x10   :  { %s8090_s19 = smov [#allocation10]  }
  0x11   :  { %s87_s20 = sshll.u32 %s8090_s19, 4  ;;  %s88_s20 = int_to_ptr.vmem [resolvable:$true] %s87_s20 }
  0x12   :  { %93 = dma.hbm_to_vmem [thread:$0]  %s86_s1, 4096, %s88_s20, [#allocation9], %s8087_s13, %s8087_s13, %s8088_s14  }
  0x13   :  { %8072 = dma.done.wait [#allocation3], 3072  }
  0x14   :  { %8073 = vsyncadd [#allocation3], 4294964224 }
  0x15   :  { %8074 = dma.done.wait [#allocation6], 8192  }
  0x16   :  { %8075 = vsyncadd [#allocation6], 4294959104 }
  0x17   :  { %8076 = dma.done.wait [#allocation9], 12288  }
  0x18   :  { %8077 = vsyncadd [#allocation9], 4294955008  ;;  %v8091_v0 = vmov 0   ;;  %v115_v1 = vld [vmem:[%s10624_s0] sm:$0xff]  ;;  %v117_v2 = vld [vmem:[%s10624_s0 + $0x10] sm:$0xff]  ;;  %v10635_v28 = vlaneseq  ;;  %v8093_v57 = vmov 128.0  }
  0x19   :  { %7588 = vset.pattern.permute.xlu0 %v8091_v0  ;;  %7589 = vset.pattern.permute.xlu1 %v8091_v0  ;;  %v7382_v3 = vld [vmem:[#allocation2 + $0x38] sm:$0xff]  ;;  %v7381_v6 = vld [vmem:[#allocation2 + $0x30] sm:$0xff]  ;;  %v116_v9 = vld [vmem:[%s10624_s0 + $0x8] sm:$0xff]  ;;  %v8092_v34 = vmov 1.0|1.0   ;;  %7746 = vrcp.f32 %v8093_v57  ;;  %s8094_s6 = smov 96  }
  0x1a   :  { %123 = vperm.xlu0 %7588, %v115_v1   ;;  %129 = vperm.xlu1 %7589, %v117_v2   ;;  %v7390_v4 = vld [vmem:[#allocation2 + $0x78] sm:$0xff]  ;;  %v7389_v7 = vld [vmem:[#allocation2 + $0x70] sm:$0xff]  ;;  %v7380_v10 = vld [vmem:[#allocation2 + $0x28] sm:$0xff]  ;;  %v8187_v30 = vand.u32 127, %v10635_v28  ;;  %s8095_s27 = smov 32   ;;  %s6566_s16 = sshll.u32 %s10634_s10, 4  ;;  %s6567_s16 = int_to_ptr.hbm [resolvable:$true] %s6566_s16 }
  0x1b   :  { %v7398_v5 = vld [vmem:[#allocation2 + $0xb8] sm:$0xff]  ;;  %347 = vmatpush.bf16.msra.mxu0 %v7382_v3  ;;  %365 = vmatpush.bf16.msra.mxu1 %v7390_v4  ;;  %v7397_v8 = vld [vmem:[#allocation2 + $0xb0] sm:$0xff]  ;;  %v7388_v11 = vld [vmem:[#allocation2 + $0x68] sm:$0xff]  ;;  %s8099_s17 = smov 128   ;;  %s8100_s18 = smov 8  }
  0x1c   :  { %383 = vmatpush.bf16.msra.mxu2 %v7398_v5  ;;  %v7396_v12 = vld [vmem:[#allocation2 + $0xa8] sm:$0xff]  ;;  %v7379_v13 = vld [vmem:[#allocation2 + $0x20] sm:$0xff]  ;;  %v7378_v16 = vld [vmem:[#allocation2 + $0x18] sm:$0xff]  ;;  %v120_v31 = vadd.s32 128, %v8187_v30  ;;  %v121_v32 = vadd.s32 256, %v8187_v30 }
  0x1d   :  { %v7387_v14 = vld [vmem:[#allocation2 + $0x60] sm:$0xff]  ;;  %v7386_v17 = vld [vmem:[#allocation2 + $0x58] sm:$0xff]  ;;  %v7377_v19 = vld [vmem:[#allocation2 + $0x10] sm:$0xff] }
  0x1e   :  { %v7395_v15 = vld [vmem:[#allocation2 + $0xa0] sm:$0xff]  ;;  %v7394_v18 = vld [vmem:[#allocation2 + $0x98] sm:$0xff]  ;;  %v7385_v20 = vld [vmem:[#allocation2 + $0x50] sm:$0xff] }
  0x1f   :  { %348 = vmatpush.bf16.msra.mxu0 %v7381_v6  ;;  %366 = vmatpush.bf16.msra.mxu1 %v7389_v7  ;;  %v7393_v21 = vld [vmem:[#allocation2 + $0x90] sm:$0xff]  ;;  %v7376_v22 = vld [vmem:[#allocation2 + $0x8] sm:$0xff]  ;;  %v7375_v25 = vld [vmem:[#allocation2] sm:$0xff]  ;;  %v7747_v58 = vpop.eup %7746 }
  0x20   :  { %384 = vmatpush.bf16.msra.mxu2 %v7397_v8  ;;  %v7384_v23 = vld [vmem:[#allocation2 + $0x48] sm:$0xff]  ;;  %v7383_v26 = vld [vmem:[#allocation2 + $0x40] sm:$0xff]  ;;  %v412_v59 = vmul.f32 128.0, %v7747_v58  ;;  %vm416_vm15 = vweird.f32 %v7747_v58 }
  0x21   :  { %v7392_v24 = vld [vmem:[#allocation2 + $0x88] sm:$0xff]  ;;  %v7391_v27 = vld [vmem:[#allocation2 + $0x80] sm:$0xff] }
  0x22   :  { %126 = vperm.xlu0 %7588, %v116_v9   ;;  %v413_v60 = vsub.f32 1.0, %v412_v59  ;;  %v7419_v57 = vld [vmem:[#allocation5 + $0xa0] sm:$0xf0] }
  0x23   :  { %349 = vmatpush.bf16.msra.mxu0 %v7380_v10  ;;  %367 = vmatpush.bf16.msra.mxu1 %v7388_v11 }
  0x24   :  { %385 = vmatpush.bf16.msra.mxu2 %v7396_v12  ;;  %v414_v61 = vmul.f32 %v7747_v58, %v413_v60  ;;  %v6751_v60 = vld [vmem:[#allocation5 + $0x78] sm:$0xf] }
  0x26   :  { %v415_v62 = vadd.f32 %v7747_v58, %v414_v61  ;;  %v7415_v61 = vld [vmem:[#allocation5 + $0x80] sm:$0xf0] }
  0x27   :  { %350 = vmatpush.bf16.msra.mxu0 %v7379_v13  ;;  %368 = vmatpush.bf16.msra.mxu1 %v7387_v14 }
  0x28   :  { %386 = vmatpush.bf16.msra.mxu2 %v7395_v15  ;;  %v8198_v63 = vsel %vm416_vm15, %v7747_v58, %v415_v62  ;;  %v7414_v62 = vld [vmem:[#allocation5 + $0x7c] sm:$0xf] }
  0x29   :  { %10649 = vst [vmem:[#allocation16_spill] sm:$0xff] %v8198_v63 }
  0x2b   :  { %351 = vmatpush.bf16.msra.mxu0 %v7378_v16  ;;  %369 = vmatpush.bf16.msra.mxu1 %v7386_v17  ;;  %v7740_v17 = vld [vmem:[%s10626_s2] ss:$0 sm:$0xff] }
  0x2c   :  { %387 = vmatpush.bf16.msra.mxu2 %v7394_v18 }
  0x2f   :  { %352 = vmatpush.bf16.msra.mxu0 %v7377_v19  ;;  %370 = vmatpush.bf16.msra.mxu1 %v7385_v20 }
  0x30   :  { %388 = vmatpush.bf16.msra.mxu2 %v7393_v21 }
  0x33   :  { %353 = vmatpush.bf16.msra.mxu0 %v7376_v22  ;;  %371 = vmatpush.bf16.msra.mxu1 %v7384_v23 }
  0x34   :  { %389 = vmatpush.bf16.msra.mxu2 %v7392_v24 }
  0x37   :  { %354 = vmatpush.bf16.msra.mxu0 %v7375_v25  ;;  %372 = vmatpush.bf16.msra.mxu1 %v7383_v26 }
  0x38   :  { %390 = vmatpush.bf16.msra.mxu2 %v7391_v27 }
  0x8c   :  { %v124_v29 = vpop.permute.xlu0 %123  ;;  %v130_v35 = vpop.permute.xlu1 %129 }
  0x8d   :  { %vm131_vm0 = vcmp.eq.s32.totalorder %v124_v29, %v8187_v30  ;;  %vm132_vm5 = vcmp.eq.s32.totalorder %v124_v29, %v120_v31  ;;  %vm133_vm7 = vcmp.eq.s32.totalorder %v124_v29, %v121_v32  ;;  %vm137_vm9 = vcmp.eq.s32.totalorder %v130_v35, %v8187_v30 }
  0x8e   :  { %vm138_vm10 = vcmp.eq.s32.totalorder %v130_v35, %v120_v31  ;;  %vm139_vm11 = vcmp.eq.s32.totalorder %v130_v35, %v121_v32  ;;  %vm6679_vm12 = vmpackc.low %vm137_vm9, %vm137_vm9 }
  0x8f   :  { %vm6683_vm13 = vmpackc.low %vm138_vm10, %vm138_vm10 }
  0x90   :  { %vm6687_vm14 = vmpackc.low %vm139_vm11, %vm139_vm11 }
  0x94   :  { %v127_v33 = vpop.permute.xlu0 %126 }
  0x95   :  { %vm134_vm1 = vcmp.eq.s32.totalorder %v127_v33, %v8187_v30  ;;  %vm135_vm2 = vcmp.eq.s32.totalorder %v127_v33, %v120_v31  ;;  %vm136_vm3 = vcmp.eq.s32.totalorder %v127_v33, %v121_v32 }
  0x96   :  { %vm6677_vm4 = vmpackc.low %vm134_vm1, %vm131_vm0 }
  0x97   :  { %6678 = vmatmul.msk.bf16.vlgmr.msra.gmra.mxu0 %vm6677_vm4, %v8092_v34  ;;  %vm6681_vm6 = vmpackc.low %vm135_vm2, %vm132_vm5 }
  0x98   :  { %6682 = vmatmul.msk.bf16.vlgmr.msra.gmra.mxu1 %vm6681_vm6, %v8092_v34  ;;  %vm6685_vm8 = vmpackc.low %vm136_vm3, %vm133_vm7 }
  0x99   :  { %6686 = vmatmul.msk.bf16.vlgmr.msra.gmra.mxu2 %vm6685_vm8, %v8092_v34 }
  0xa7   :  { %6680 = vmatmul.msk.bf16.gmra.mxu0 %vm6679_vm12, %v8092_v34 }
  0xa8   :  { %6684 = vmatmul.msk.bf16.gmra.mxu1 %vm6683_vm13, %v8092_v34 }
  0xa9   :  { %6688 = vmatmul.msk.bf16.gmra.mxu2 %vm6687_vm14, %v8092_v34 }
 0x114   :  { %v356_v36 = vpop.f32.mrf.mxu0 }
 0x115   :  { %v374_v37 = vpop.f32.mrf.mxu1 }
 0x116   :  { %v375_v38 = vadd.f32 %v374_v37, %v356_v36 }
 0x11c   :  { %v392_v39 = vpop.f32.mrf.mxu2  ;;  %v358_v40 = vpop.f32.mrf.mxu0 }
 0x11d   :  { %v393_v41 = vadd.f32 %v392_v39, %v375_v38  ;;  %v376_v42 = vpop.f32.mrf.mxu1 }
 0x11e   :  { %v377_v44 = vadd.f32 %v376_v42, %v358_v40  ;;  %v6775_v42 = vld [vmem:[#allocation5 + $0xa8] sm:$0xf] }
 0x11f   :  { %v402_v43 = vmul.f32 %v393_v41, %v393_v41 }
 0x121   :  { %405 = vadd.xlane.f32.xlu1 %v402_v43  ;;  %v7421_v43 = vld [vmem:[#allocation5 + $0xb0] sm:$0xf0] }
 0x124   :  { %v394_v45 = vpop.f32.mrf.mxu2  ;;  %v361_v46 = vpop.f32.mrf.mxu0 }
 0x125   :  { %v395_v47 = vadd.f32 %v394_v45, %v377_v44  ;;  %v379_v48 = vpop.f32.mrf.mxu1  ;;  %v7420_v44 = vld [vmem:[#allocation5 + $0xac] sm:$0xf]  ;;  %v6776_v45 = vor.u32 %v7421_v43, %v6775_v42  ;;  %v6705_v42 = vld [vmem:[#allocation5 + $0x24] sm:$0xf0]  ;;  %v6711_v43 = vld [vmem:[#allocation5 + $0x20] sm:$0xf] }
 0x126   :  { %v380_v50 = vadd.f32 %v379_v48, %v361_v46  ;;  %v6777_v46 = vld [vmem:[#allocation5 + $0xb4] sm:$0xf0]  ;;  %v7422_v48 = vld [vmem:[#allocation5 + $0xb8] sm:$0xf0] }
 0x127   :  { %v403_v49 = vmul.f32 %v395_v47, %v395_v47  ;;  %693 = vmatpush.bf16.msra.mxu3 %v6776_v45 }
 0x129   :  { %407 = vadd.xlane.f32.xlu2 %v403_v49  ;;  %v8219_v49 = vor.u32 %v7420_v44, %v6777_v46  ;;  %v7404_v44 = vld [vmem:[#allocation5 + $0x28] sm:$0xf0] }
 0x12a   :  { %v6712_v46 = vor.u32 %v7404_v44, %v6711_v43 }
 0x12b   :  { %711 = vmatpush.bf16.msrb.mxu0 %v8219_v49 }
 0x12c   :  { %v397_v51 = vpop.f32.mrf.mxu2  ;;  %v363_v52 = vpop.f32.mrf.mxu0 }
 0x12d   :  { %v8194_v53 = vadd.f32 %v397_v51, %v380_v50  ;;  %v381_v54 = vpop.f32.mrf.mxu1  ;;  %v6763_v51 = vld [vmem:[#allocation5 + $0x90] sm:$0xf]  ;;  %v7418_v52 = vld [vmem:[#allocation5 + $0x98] sm:$0xf0] }
 0x12e   :  { %v6764_v54 = vor.u32 %v7418_v52, %v6763_v51 }
 0x12f   :  { %v404_v55 = vmul.f32 %v8194_v53, %v8194_v53 }
 0x130   :  { %694 = vmatpush.bf16.msra.mxu3 %v6764_v54  ;;  %v6699_v54 = vld [vmem:[#allocation5 + $0x8] sm:$0xf] }
 0x131   :  { %409 = vadd.xlane.f32.xlu2 %v404_v55  ;;  %v6765_v55 = vld [vmem:[#allocation5 + $0x9c] sm:$0xf0] }
 0x134   :  { %v399_v56 = vpop.f32.mrf.mxu2 }
 0x135   :  { %v6771_v56 = vld [vmem:[#allocation5 + $0x98] sm:$0xf] }
 0x136   :  { %v6772_v59 = vor.u32 %v7419_v57, %v6771_v56 }
 0x194   :  { %v406_v0 = vpop.xlane.xlu1 %405 }
 0x195   :  { %v418_v1 = vmul.f32 %v8198_v63, %v406_v0  ;;  %v6752_v0 = vor.u32 %v7415_v61, %v6751_v60 }
 0x197   :  { %v421_v2 = vadd.f32 1e-06, %v418_v1  ;;  %v6753_v1 = vld [vmem:[#allocation5 + $0x84] sm:$0xf0]  ;;  %695 = vmatpush.bf16.msra.mxu3 %v6752_v0 }
 0x199   :  { %7748 = vrsqrt.f32 %v421_v2  ;;  %vm430_vm1 = vweird.f32 %v421_v2 }
 0x19c   :  { %v408_v3 = vpop.xlane.xlu2 %407 }
 0x19d   :  { %v419_v4 = vmul.f32 %v8198_v63, %v408_v3  ;;  %v7416_v3 = vld [vmem:[#allocation5 + $0x88] sm:$0xf0] }
 0x19f   :  { %v7749_v5 = vpop.eup %7748  ;;  %v422_v6 = vadd.f32 1e-06, %v419_v4  ;;  %v8225_v4 = vor.u32 %v7414_v62, %v6753_v1 }
 0x1a0   :  { %v425_v7 = vmul.f32 %v7749_v5, %v421_v2  ;;  %vm431_vm0 = vweird.f32 %v7749_v5  ;;  %v6759_v2 = vld [vmem:[#allocation5 + $0x80] sm:$0xf] }
 0x1a1   :  { %7750 = vrsqrt.f32 %v422_v6  ;;  %vm432_vm2 = vmor %vm430_vm1, %vm431_vm0  ;;  %vm440_vm4 = vweird.f32 %v422_v6 }
 0x1a2   :  { %v426_v8 = vmul.f32 %v7749_v5, %v425_v7  ;;  %v7412_v7 = vld [vmem:[#allocation5 + $0x68] sm:$0xf0] }
 0x1a4   :  { %v427_v9 = vmul.f32 0.5, %v426_v8  ;;  %v410_v10 = vpop.xlane.xlu2 %409  ;;  %v7411_v8 = vld [vmem:[#allocation5 + $0x64] sm:$0xf] }
 0x1a5   :  { %v420_v11 = vmul.f32 %v8198_v63, %v410_v10  ;;  %v6741_v10 = vld [vmem:[#allocation5 + $0x6c] sm:$0xf0] }
 0x1a6   :  { %v428_v12 = vsub.f32 1.5, %v427_v9 }
 0x1a7   :  { %v7751_v13 = vpop.eup %7750  ;;  %v423_v14 = vadd.f32 1e-06, %v420_v11  ;;  %v6747_v11 = vld [vmem:[#allocation5 + $0x68] sm:$0xf] }
 0x1a8   :  { %v429_v15 = vmul.f32 %v7749_v5, %v428_v12  ;;  %v435_v16 = vmul.f32 %v7751_v13, %v422_v6  ;;  %vm441_vm3 = vweird.f32 %v7751_v13  ;;  %v6739_v6 = vld [vmem:[#allocation5 + $0x60] sm:$0xf]  ;;  %v7413_v12 = vld [vmem:[#allocation5 + $0x70] sm:$0xf0] }
 0x1a9   :  { %7752 = vrsqrt.f32 %v423_v14  ;;  %vm442_vm5 = vmor %vm440_vm4, %vm441_vm3  ;;  %vm450_vm7 = vweird.f32 %v423_v14  ;;  %v6740_v9 = vor.u32 %v7412_v7, %v6739_v6  ;;  %vm1880_vm3 = vcmask 261120  }
 0x1aa   :  { %v433_v18 = vsel %vm432_vm2, %v7749_v5, %v429_v15  ;;  %v436_v19 = vmul.f32 %v7751_v13, %v435_v16  ;;  %v6760_v5 = vor.u32 %v7416_v3, %v6759_v2  ;;  %v6727_v15 = vld [vmem:[#allocation5 + $0x48] sm:$0xf]  ;;  %v7409_v16 = vld [vmem:[#allocation5 + $0x50] sm:$0xf0]  ;;  %vm838_vm2 = vcmask 1047556  }
 0x1ab   :  { %v454_v20 = vmul.f32 %v433_v18, %v393_v41  ;;  %696 = vmatpush.bf16.msra.mxu3 %v6740_v9  ;;  %v6728_v18 = vor.u32 %v7409_v16, %v6727_v15  ;;  %vm2253_vm4 = vcmask 1043456  }
 0x1ac   :  { %v437_v21 = vmul.f32 0.5, %v436_v19  ;;  %v6729_v19 = vld [vmem:[#allocation5 + $0x54] sm:$0xf0] }
 0x1ad   :  { %v8206_v22 = vmul.f32 %v7740_v17, %v454_v20  ;;  %v6735_v20 = vld [vmem:[#allocation5 + $0x50] sm:$0xf] }
 0x1ae   :  { %v438_v23 = vsub.f32 1.5, %v437_v21  ;;  %v7410_v21 = vld [vmem:[#allocation5 + $0x58] sm:$0xf0] }
 0x1af   :  { %10650 = vst [vmem:[#allocation17_spill] sm:$0xff] %v8206_v22  ;;  %v7753_v24 = vpop.eup %7752  ;;  %v477_v25 = vmul.f32 %v8206_v22, %v8206_v22  ;;  %697 = vmatpush.bf16.msra.mxu3 %v6728_v18  ;;  %v7741_v18 = vld [vmem:[%s10628_s4] ss:$0 sm:$0xff] }
 0x1b0   :  { %v439_v26 = vmul.f32 %v7751_v13, %v438_v23  ;;  %v445_v27 = vmul.f32 %v7753_v24, %v423_v14  ;;  %vm451_vm6 = vweird.f32 %v7753_v24  ;;  %v6748_v14 = vor.u32 %v7413_v12, %v6747_v11 }
 0x1b1   :  { %480 = vadd.xlane.f32.xlu0 %v477_v25  ;;  %vm452_vm8 = vmor %vm450_vm7, %vm451_vm6  ;;  %v6715_v25 = vld [vmem:[#allocation5 + $0x30] sm:$0xf]  ;;  %vm2073_vm6 = vcmask 195584  }
 0x1b2   :  { %v443_v29 = vsel %vm442_vm5, %v7751_v13, %v439_v26  ;;  %v446_v31 = vmul.f32 %v7753_v24, %v445_v27  ;;  %v8228_v13 = vor.u32 %v7411_v8, %v6741_v10  ;;  %v7406_v26 = vld [vmem:[#allocation5 + $0x38] sm:$0xf0]  ;;  %v7405_v27 = vld [vmem:[#allocation5 + $0x34] sm:$0xf] }
 0x1b3   :  { %v455_v32 = vmul.f32 %v443_v29, %v395_v47  ;;  %v6783_v47 = vld [vmem:[#allocation5 + $0xb0] sm:$0xf]  ;;  %v6716_v29 = vor.u32 %v7406_v26, %v6715_v25 }
 0x1b4   :  { %v447_v33 = vmul.f32 0.5, %v446_v31  ;;  %v6784_v50 = vor.u32 %v7422_v48, %v6783_v47  ;;  %v6717_v31 = vld [vmem:[#allocation5 + $0x3c] sm:$0xf0]  ;;  %v7400_v48 = vld [vmem:[#allocation5 + $0x8] sm:$0xf0] }
 0x1b5   :  { %v8210_v34 = vmul.f32 %v7740_v17, %v455_v32  ;;  %v6723_v32 = vld [vmem:[#allocation5 + $0x38] sm:$0xf]  ;;  %698 = vmatpush.bf16.msra.mxu3 %v6716_v29  ;;  %v6691_v47 = vld [vmem:[#allocation5] sm:$0xf] }
 0x1b6   :  { %v448_v35 = vsub.f32 1.5, %v447_v33  ;;  %729 = vmatpush.bf16.msrb.mxu1 %v6784_v50  ;;  %v7407_v33 = vld [vmem:[#allocation5 + $0x40] sm:$0xf0]  ;;  %v6692_v52 = vor.u32 %v7400_v48, %v6691_v47 }
 0x1b7   :  { %10651 = vst [vmem:[#allocation18_spill] sm:$0xff] %v8210_v34  ;;  %v478_v36 = vmul.f32 %v8210_v34, %v8210_v34  ;;  %v7399_v50 = vld [vmem:[#allocation5 + $0x4] sm:$0xf] }
 0x1b8   :  { %v449_v37 = vmul.f32 %v7753_v24, %v448_v35  ;;  %v6720_v35 = vor.u32 %v7405_v27, %v6717_v31 }
 0x1b9   :  { %482 = vadd.xlane.f32.xlu2 %v478_v36  ;;  %v6724_v36 = vor.u32 %v7407_v33, %v6723_v32 }
 0x1ba   :  { %v453_v38 = vsel %vm452_vm8, %v7753_v24, %v449_v37  ;;  %730 = vmatpush.bf16.msrb.mxu1 %v6772_v59  ;;  %v6736_v24 = vor.u32 %v7410_v21, %v6735_v20  ;;  %v6703_v37 = vld [vmem:[#allocation5 + $0x18] sm:$0xf] }
 0x1bb   :  { %v456_v39 = vmul.f32 %v453_v38, %v8194_v53  ;;  %v7417_v53 = vld [vmem:[#allocation5 + $0x94] sm:$0xf]  ;;  %v7403_v38 = vld [vmem:[#allocation5 + $0x20] sm:$0xf0] }
 0x1bc   :  { %v8222_v58 = vor.u32 %v7417_v53, %v6765_v55  ;;  %v6693_v53 = vld [vmem:[#allocation5 + $0xc] sm:$0xf0]  ;;  %v7401_v55 = vld [vmem:[#allocation5 + $0x10] sm:$0xf0] }
 0x1bd   :  { %v8215_v40 = vmul.f32 %v7740_v17, %v456_v39  ;;  %v7408_v17 = vld [vmem:[#allocation5 + $0x4c] sm:$0xf]  ;;  %v7402_v39 = vld [vmem:[#allocation5 + $0x1c] sm:$0xf]  ;;  %v6696_v57 = vor.u32 %v7399_v50, %v6693_v53  ;;  %v6700_v59 = vor.u32 %v7401_v55, %v6699_v54 }
 0x1be   :  { %712 = vmatpush.bf16.msrb.mxu0 %v8222_v58  ;;  %731 = vmatpush.bf16.msrb.mxu1 %v6760_v5  ;;  %v8231_v23 = vor.u32 %v7408_v17, %v6729_v19  ;;  %v6708_v45 = vor.u32 %v7402_v39, %v6705_v42 }
 0x1bf   :  { %10652 = vst [vmem:[#allocation19_spill] sm:$0xff] %v8215_v40  ;;  %v479_v41 = vmul.f32 %v8215_v40, %v8215_v40 }
 0x1c1   :  { %484 = vadd.xlane.f32.xlu2 %v479_v41  ;;  %v6704_v41 = vor.u32 %v7403_v38, %v6703_v37 }
 0x1c2   :  { %713 = vmatpush.bf16.msrb.mxu0 %v8225_v4  ;;  %732 = vmatpush.bf16.msrb.mxu1 %v6748_v14 }
 0x1c3   :  { %699 = vmatpush.bf16.msra.mxu3 %v6704_v41 }
 0x1c6   :  { %714 = vmatpush.bf16.msrb.mxu0 %v8228_v13  ;;  %733 = vmatpush.bf16.msrb.mxu1 %v6736_v24 }
 0x1c7   :  { %700 = vmatpush.bf16.msra.mxu3 %v6692_v52 }
 0x1ca   :  { %715 = vmatpush.bf16.msrb.mxu0 %v8231_v23  ;;  %734 = vmatpush.bf16.msrb.mxu1 %v6724_v36 }
 0x1cb   :  { %7559 = vmatpush.bf16.msrb.mxu3 %v8219_v49 }
 0x1ce   :  { %716 = vmatpush.bf16.msrb.mxu0 %v6720_v35  ;;  %735 = vmatpush.bf16.msrb.mxu1 %v6712_v46 }
 0x1cf   :  { %7560 = vmatpush.bf16.msrb.mxu3 %v8222_v58 }
 0x1d2   :  { %717 = vmatpush.bf16.msrb.mxu0 %v6708_v45  ;;  %736 = vmatpush.bf16.msrb.mxu1 %v6700_v59  ;;  %v8096_v59 = vmov 1983009808  }
 0x1d3   :  { %7561 = vmatpush.bf16.msrb.mxu3 %v8225_v4 }
 0x1d6   :  { %718 = vmatpush.bf16.msrb.mxu0 %v6696_v57 }
 0x1d7   :  { %7562 = vmatpush.bf16.msrb.mxu3 %v8228_v13 }
 0x1db   :  { %7563 = vmatpush.bf16.msrb.mxu3 %v8231_v23 }
 0x1df   :  { %7564 = vmatpush.bf16.msrb.mxu3 %v6720_v35 }
 0x1e3   :  { %7565 = vmatpush.bf16.msrb.mxu3 %v6708_v45 }
 0x1e7   :  { %7566 = vmatpush.bf16.msrb.mxu3 %v6696_v57 }
 0x224   :  { %v481_v51 = vpop.xlane.xlu0 %480 }
 0x225   :  { %v486_v56 = vmul.f32 %v481_v51, %v8198_v63 }
 0x227   :  { %v489_v60 = vadd.f32 1e-06, %v486_v56 }
 0x229   :  { %7754 = vrsqrt.f32 %v489_v60  ;;  %vm498_vm10 = vweird.f32 %v489_v60 }
 0x22c   :  { %v483_v61 = vpop.xlane.xlu2 %482 }
 0x22d   :  { %v487_v62 = vmul.f32 %v483_v61, %v8198_v63 }
 0x22f   :  { %v7755_v0 = vpop.eup %7754  ;;  %v490_v1 = vadd.f32 1e-06, %v487_v62 }
 0x230   :  { %v493_v2 = vmul.f32 %v7755_v0, %v489_v60  ;;  %vm499_vm9 = vweird.f32 %v7755_v0  ;;  %v843_v60 = vunpack.c.l.s4 %v8096_v59 }
 0x231   :  { %7756 = vrsqrt.f32 %v490_v1  ;;  %vm500_vm11 = vmor %vm498_vm10, %vm499_vm9  ;;  %vm508_vm13 = vweird.f32 %v490_v1  ;;  %vm2776_vm9 = vcmask 523264   ;;  %vm10641_vm10 = vcmask 785408  }
 0x232   :  { %v494_v3 = vmul.f32 %v7755_v0, %v493_v2 }
 0x234   :  { %v495_v5 = vmul.f32 0.5, %v494_v3  ;;  %v485_v6 = vpop.xlane.xlu2 %484 }
 0x235   :  { %v488_v7 = vmul.f32 %v485_v6, %v8198_v63 }
 0x236   :  { %v496_v49 = vsub.f32 1.5, %v495_v5 }
 0x237   :  { %v7757_v8 = vpop.eup %7756  ;;  %v491_v9 = vadd.f32 1e-06, %v488_v7 }
 0x238   :  { %v503_v10 = vmul.f32 %v7757_v8, %v490_v1  ;;  %v497_v58 = vmul.f32 %v7755_v0, %v496_v49  ;;  %vm509_vm12 = vweird.f32 %v7757_v8 }
 0x239   :  { %7758 = vrsqrt.f32 %v491_v9  ;;  %vm510_vm14 = vmor %vm508_vm13, %vm509_vm12  ;;  %vm518_vm0 = vweird.f32 %v491_v9 }
 0x23a   :  { %v504_v11 = vmul.f32 %v7757_v8, %v503_v10  ;;  %v501_v12 = vsel %vm500_vm11, %v7755_v0, %v497_v58 }
 0x23b   :  { %v522_v17 = vmul.f32 %v501_v12, %v8206_v22 }
 0x23c   :  { %v505_v4 = vmul.f32 0.5, %v504_v11  ;;  %v8293_v11 = vunpack.c.0.s8 %v843_v60 }
 0x23d   :  { %v528_v24 = vmul.f32 %v7741_v18, %v522_v17 }
 0x23e   :  { %v506_v14 = vsub.f32 1.5, %v505_v4 }
 0x23f   :  { %v7759_v13 = vpop.eup %7758 }
 0x240   :  { %v507_v15 = vmul.f32 %v7757_v8, %v506_v14  ;;  %v513_v16 = vmul.f32 %v7759_v13, %v491_v9  ;;  %vm519_vm15 = vweird.f32 %v7759_v13 }
 0x241   :  { %vm520_vm1 = vmor %vm518_vm0, %vm519_vm15 }
 0x242   :  { %v511_v19 = vsel %vm510_vm14, %v7757_v8, %v507_v15  ;;  %v514_v20 = vmul.f32 %v7759_v13, %v513_v16 }
 0x243   :  { %v523_v21 = vmul.f32 %v511_v19, %v8210_v34 }
 0x244   :  { %v515_v23 = vmul.f32 0.5, %v514_v20 }
 0x245   :  { %v529_v25 = vmul.f32 %v7741_v18, %v523_v21 }
 0x246   :  { %v516_v26 = vsub.f32 1.5, %v515_v23 }
 0x247   :  { %v531_v27 = vpack.c.bf16 %v529_v25, %v528_v24 }
 0x248   :  { %v517_v29 = vmul.f32 %v7759_v13, %v516_v26 }
 0x249   :  { %701 = vmatmul.bf16.vlgmr.msra.gmra.mxu3 %v531_v27  ;;  %719 = vmatmul.bf16.vlgmr.msrb.gmra.mxu0 %v531_v27 }
 0x24a   :  { %737 = vmatmul.bf16.vlgmr.msrb.gmra.mxu1 %v531_v27  ;;  %v521_v31 = vsel %vm520_vm1, %v7759_v13, %v517_v29  ;;  %v8097_v27 = vmov 1934713408  }
 0x24b   :  { %v524_v32 = vmul.f32 %v521_v31, %v8215_v40  ;;  %v891_v29 = vunpack.c.l.s4 %v8097_v27 }
 0x24d   :  { %v530_v33 = vmul.f32 %v7741_v18, %v524_v32  ;;  %v8316_v59 = vunpack.c.0.s8 %v891_v29 }
 0x24f   :  { %v532_v35 = vpack.c.bf16 %v530_v33, %v530_v33 }
 0x259   :  { %706 = vmatmul.bf16.gmra.mxu3 %v532_v35 }
 0x25a   :  { %742 = vmatmul.bf16.gmra.mxu1 %v532_v35 }
 0x269   :  { %724 = vmatmul.bf16.vlgmr.msrb.gmra.mxu3 %v532_v35 }
 0x2c6   :  { %v8254_v39 = vpop.f32.mrf.mxu0 }
 0x2c7   :  { %v8248_v36 = vpop.f32.mrf.mxu1  ;;  %v864_v61 = vrot.slane %v8254_v39, 4 }
 0x2cc   :  { %v8250_v37 = vpop.f32.mrf.mxu3 }
 0x2cd   :  { %v840_v62 = vrot.slane %v8250_v37, 4 }
 0x2ce   :  { %v8263_v44 = vpop.f32.mrf.mxu0 }
 0x2cf   :  { %v8252_v38 = vpop.f32.mrf.mxu1  ;;  %v7625_v46 = vpack.i.bf16 %v8263_v44, %v8254_v39  ;;  %v1032_v1 = vrot.slane %v8263_v44, 4 }
 0x2d4   :  { %v8256_v41 = vpop.f32.mrf.mxu3 }
 0x2d5   :  { %v7600_v42 = vpack.i.bf16 %v8256_v41, %v8250_v37  ;;  %v1008_v0 = vrot.slane %v8256_v41, 4 }
 0x2d7   :  { %v8260_v43 = vpop.f32.mrf.mxu1  ;;  %7601 = vrot.lane.b32.xlu0 %v7600_v42, %s8094_s6 }
 0x2d8   :  { %v7645_v50 = vpack.i.bf16 %v8248_v36, %v8260_v43  ;;  %v1288_v7 = vrot.slane %v8260_v43, 4 }
 0x2dc   :  { %v8265_v45 = vpop.f32.mrf.mxu3 }
 0x2dd   :  { %v1176_v49 = vrot.slane %v8265_v45, 4 }
 0x2df   :  { %v745_v47 = vpop.f32.mrf.mxu1  ;;  %7626 = vrot.lane.b32.xlu0 %v7625_v46, %s8095_s27 }
 0x2e4   :  { %v709_v48 = vpop.f32.mrf.mxu3 }
 0x2e7   :  { %7646 = vrot.lane.b32.xlu0 %v7645_v50, %s8095_s27 }
 0x2ec   :  { %v8273_v51 = vpop.f32.mrf.mxu3 }
 0x2ed   :  { %v7595_v52 = vpack.i.bf16 %v8273_v51, %v8265_v45  ;;  %v1200_v10 = vrot.slane %v8273_v51, 4 }
 0x2ef   :  { %7596 = vrot.lane.b32.xlu1 %v7595_v52, %s8095_s27  ;;  %7591 = vrot.lane.b32.xlu2 %v7595_v52, %s8094_s6 }
 0x2f4   :  { %v727_v53 = vpop.f32.mrf.mxu3 }
 0x2f7   :  { %7621 = vrot.lane.b32.xlu1 %v7600_v42, %s8087_s13  ;;  %7606 = vrot.lane.b32.xlu2 %v7600_v42, %s8095_s27 }
 0x2ff   :  { %7641 = vrot.lane.b32.xlu1 %v7645_v50, %s8087_s13  ;;  %7611 = vrot.lane.b32.xlu2 %v7595_v52, %s8087_s13 }
 0x307   :  { %7616 = vrot.lane.b32.xlu2 %v7625_v46, %s8094_s6 }
 0x30f   :  { %7631 = vrot.lane.b32.xlu2 %v7625_v46, %s8087_s13 }
 0x317   :  { %7636 = vrot.lane.b32.xlu2 %v7645_v50, %s8094_s6 }
 0x349   :  { %v7592_v54 = vpop.permute.xlu2 %7591  ;;  %v7602_v56 = vpop.permute.xlu0 %7601 }
 0x34a   :  { %v7604_v2 = vunpack.i.h.bf16 %v7602_v56  ;;  %v7594_v3 = vunpack.i.h.bf16 %v7592_v54  ;;  %v7593_v8 = vunpack.i.l.bf16 %v7592_v54  ;;  %v7603_v58 = vunpack.i.l.bf16 %v7602_v56 }
 0x34c   :  { %v1020_v16 = vrot.slane %v7604_v2, 4  ;;  %v1212_v17 = vrot.slane %v7594_v3, 4  ;;  %v1188_v20 = vrot.slane %v7593_v8, 4  ;;  %v852_v25 = vrot.slane %v7603_v58, 4 }
 0x351   :  { %v7607_v55 = vpop.permute.xlu2 %7606  ;;  %v8295_v4 = vpop.permute.xlu0 %7626 }
 0x352   :  { %v7609_v5 = vunpack.i.h.bf16 %v7607_v55  ;;  %v7608_v14 = vunpack.i.l.bf16 %v7607_v55  ;;  %v7629_v26 = vunpack.i.h.bf16 %v8295_v4  ;;  %v7628_v35 = vunpack.i.l.bf16 %v8295_v4 }
 0x354   :  { %v1018_v18 = vrot.slane %v7609_v5, 4  ;;  %v1021_v32 = vsel %vm838_vm2, %v7609_v5, %v1020_v16  ;;  %v850_v33 = vrot.slane %v7608_v14, 4  ;;  %v853_v47 = vsel %vm838_vm2, %v7608_v14, %v852_v25 }
 0x355   :  { %v8313_v56 = vperm.slane %v1021_v32, %v8293_v11 }
 0x356   :  { %v1019_v46 = vsel %vm838_vm2, %v1018_v18, %v7604_v2  ;;  %v8324_v2 = vperm.slane %v853_v47, %v8293_v11 }
 0x357   :  { %v8320_v60 = vperm.slane %v1019_v46, %v8293_v11 }
 0x359   :  { %v7612_v57 = vpop.permute.xlu2 %7611 }
 0x35a   :  { %v7614_v6 = vunpack.i.h.bf16 %v7612_v57  ;;  %v7613_v9 = vunpack.i.l.bf16 %v7612_v57 }
 0x35c   :  { %v1198_v19 = vrot.slane %v7614_v6, 4  ;;  %v1174_v21 = vrot.slane %v7613_v9, 4  ;;  %v1177_v50 = vsel %vm838_vm2, %v7613_v9, %v1176_v49  ;;  %v1201_v57 = vsel %vm838_vm2, %v7614_v6, %v1200_v10  ;;  %v8329_v6 = vpop.permute.xlu0 %7646 }
 0x35d   :  { %v1209_v14 = vperm.slane %v1201_v57, %v8293_v11 }
 0x35e   :  { %v1199_v48 = vsel %vm838_vm2, %v1198_v19, %v8273_v51  ;;  %v1175_v52 = vsel %vm838_vm2, %v1174_v21, %v8265_v45  ;;  %v851_v45 = vsel %vm838_vm2, %v850_v33, %v7603_v58  ;;  %v874_v58 = vrot.slane %v7628_v35, 4 }
 0x35f   :  { %v1205_v49 = vperm.slane %v1199_v48, %v8293_v11  ;;  %v8340_v16 = vperm.slane %v851_v45, %v8293_v11  ;;  %v1054_v19 = vrot.slane %v8320_v60, 4  ;;  %v1260_v32 = vrot.slane %v1209_v14, 4 }
 0x361   :  { %v7597_v12 = vpop.permute.xlu1 %7596  ;;  %v7617_v5 = vpop.permute.xlu2 %7616 }
 0x362   :  { %v7599_v13 = vunpack.i.h.bf16 %v7597_v12  ;;  %v7598_v15 = vunpack.i.l.bf16 %v7597_v12  ;;  %v1042_v12 = vrot.slane %v7629_v26, 4  ;;  %v7619_v18 = vunpack.i.h.bf16 %v7617_v5 }
 0x363   :  { %v7618_v46 = vunpack.i.l.bf16 %v7617_v5 }
 0x364   :  { %v1210_v23 = vrot.slane %v7599_v13, 4  ;;  %v1186_v24 = vrot.slane %v7598_v15, 4  ;;  %v1213_v31 = vsel %vm838_vm2, %v7599_v13, %v1212_v17  ;;  %v1189_v42 = vsel %vm838_vm2, %v7598_v15, %v1188_v20 }
 0x365   :  { %v1221_v55 = vperm.slane %v1213_v31, %v8293_v11  ;;  %v1197_v51 = vperm.slane %v1189_v42, %v8293_v11  ;;  %v1066_v15 = vrot.slane %v8313_v56, 4  ;;  %v898_v20 = vrot.slane %v8324_v2, 4 }
 0x366   :  { %v1187_v53 = vsel %vm838_vm2, %v1186_v24, %v7593_v8  ;;  %v1211_v54 = vsel %vm838_vm2, %v1210_v23, %v7594_v3  ;;  %v1185_v3 = vperm.slane %v1177_v50, %v8293_v11  ;;  %v1181_v8 = vperm.slane %v1175_v52, %v8293_v11 }
 0x367   :  { %v1193_v9 = vperm.slane %v1187_v53, %v8293_v11  ;;  %v1217_v10 = vperm.slane %v1211_v54, %v8293_v11  ;;  %v1258_v13 = vrot.slane %v1221_v55, 4  ;;  %v1234_v17 = vrot.slane %v1197_v51, 4 }
 0x368   :  { %v1236_v21 = vrot.slane %v1185_v3, 4  ;;  %v7648_v23 = vunpack.i.l.bf16 %v8329_v6  ;;  %v1248_v24 = vrot.slane %v1205_v49, 4  ;;  %v1224_v25 = vrot.slane %v1181_v8, 4 }
 0x369   :  { %v1222_v27 = vrot.slane %v1193_v9, 4  ;;  %v1246_v29 = vrot.slane %v1217_v10, 4  ;;  %v7622_v31 = vpop.permute.xlu1 %7621  ;;  %v1259_v42 = vsel %vm838_vm2, %v1258_v13, %v1209_v14  ;;  %v1235_v48 = vsel %vm838_vm2, %v1234_v17, %v1185_v3 }
 0x36a   :  { %v1237_v33 = vsel %vm838_vm2, %v1197_v51, %v1236_v21  ;;  %v1225_v47 = vsel %vm838_vm2, %v1193_v9, %v1224_v25  ;;  %v1249_v50 = vsel %vm838_vm2, %v1217_v10, %v1248_v24  ;;  %v1043_v52 = vsel %vm838_vm2, %v1042_v12, %v7619_v18  ;;  %v7632_v12 = vpop.permute.xlu2 %7631 }
 0x36b   :  { %v1261_v53 = vsel %vm838_vm2, %v1221_v55, %v1260_v32  ;;  %v1044_v54 = vrot.slane %v7619_v18, 4  ;;  %v7624_v57 = vunpack.i.h.bf16 %v7622_v31  ;;  %v7623_v45 = vunpack.i.l.bf16 %v7622_v31 }
 0x36c   :  { %v1223_v28 = vsel %vm838_vm2, %v1222_v27, %v1181_v8  ;;  %v1245_v51 = vperm.slane %v1237_v33, %v8316_v59  ;;  %v1247_v14 = vsel %vm838_vm2, %v1246_v29, %v1205_v49  ;;  %v1265_v5 = vperm.slane %v1259_v42, %v8316_v59 }
 0x36d   :  { %v886_v9 = vrot.slane %v8340_v16, 4  ;;  %v8358_v3 = vperm.slane %v1225_v47, %v8316_v59  ;;  %v1241_v10 = vperm.slane %v1235_v48, %v8316_v59  ;;  %v8362_v55 = vperm.slane %v1249_v50, %v8316_v59 }
 0x36e   :  { %v8366_v8 = vrot.slane %v7648_v23, 4  ;;  %v1269_v13 = vperm.slane %v1261_v53, %v8316_v59  ;;  %v8370_v49 = vperm.slane %v1043_v52, %v8293_v11  ;;  %v875_v17 = vsel %vm838_vm2, %v874_v58, %v7618_v46 }
 0x36f   :  { %v8374_v18 = vperm.slane %v1223_v28, %v8316_v59  ;;  %v8377_v21 = vperm.slane %v1247_v14, %v8316_v59  ;;  %v1006_v24 = vrot.slane %v7624_v57, 4  ;;  %v837_v25 = vrot.slane %v7623_v45, 4 }
 0x370   :  { %v1278_v27 = vrot.slane %v1265_v5, 4  ;;  %v1284_v29 = vrot.slane %v1245_v51, 4  ;;  %v1045_v31 = vsel %vm838_vm2, %v7629_v26, %v1044_v54  ;;  %v7633_v32 = vunpack.i.l.bf16 %v7632_v12 }
 0x371   :  { %v1274_v33 = vrot.slane %v8362_v55, 4  ;;  %v1276_v42 = vrot.slane %v8358_v3, 4  ;;  %v1280_v58 = vrot.slane %v1241_v10, 4  ;;  %v876_v47 = vrot.slane %v7618_v46, 4 }
 0x372   :  { %v1282_v28 = vrot.slane %v1269_v13, 4  ;;  %v1009_v48 = vsel %vm838_vm2, %v7624_v57, %v1008_v0  ;;  %v841_v50 = vsel %vm838_vm2, %v7623_v45, %v840_v62  ;;  %v7634_v52 = vunpack.i.h.bf16 %v7632_v12 }
 0x373   :  { %v1270_v53 = vrot.slane %v8377_v21, 4  ;;  %v1272_v26 = vrot.slane %v8374_v18, 4  ;;  %v1007_v54 = vsel %vm838_vm2, %v1006_v24, %v8256_v41  ;;  %v839_v46 = vsel %vm838_vm2, %v837_v25, %v8250_v37 }
 0x374   :  { %v8397_v14 = vsel %vm838_vm2, %v1278_v27, %v1241_v10  ;;  %v8400_v0 = vsel %vm838_vm2, %v1269_v13, %v1284_v29  ;;  %v8403_v57 = vperm.slane %v1045_v31, %v8293_v11  ;;  %v862_v62 = vrot.slane %v7633_v32, 4 }
 0x375   :  { %v8406_v45 = vsel %vm838_vm2, %v1265_v5, %v1280_v58  ;;  %v877_v41 = vsel %vm838_vm2, %v7628_v35, %v876_v47  ;;  %v1017_v12 = vperm.slane %v1009_v48, %v8293_v11  ;;  %v849_v37 = vperm.slane %v841_v50, %v8293_v11 }
 0x376   :  { %v8414_v10 = vsel %vm838_vm2, %v1282_v28, %v1245_v51  ;;  %v1013_v13 = vperm.slane %v1007_v54, %v8293_v11  ;;  %v845_v24 = vperm.slane %v839_v46, %v8293_v11  ;;  %v1030_v25 = vrot.slane %v7634_v52, 4 }
 0x377   :  { %v8420_v5 = vsel %vm838_vm2, %v8377_v21, %v1272_v26  ;;  %v1592_v4 = vrot.slane %v8397_v14, 4  ;;  %v1078_v27 = vrot.slane %v8370_v49, 4  ;;  %v881_v29 = vperm.slane %v875_v17, %v8293_v11 }
 0x378   :  { %v885_v51 = vperm.slane %v877_v41, %v8293_v11  ;;  %v863_v31 = vsel %vm838_vm2, %v862_v62, %v8254_v39  ;;  %v865_v58 = vsel %vm838_vm2, %v7633_v32, %v864_v61  ;;  %v1068_v48 = vrot.slane %v1017_v12, 4 }
 0x379   :  { %v900_v50 = vrot.slane %v849_v37, 4  ;;  %v1056_v26 = vrot.slane %v1013_v13, 4  ;;  %v888_v54 = vrot.slane %v845_v24, 4  ;;  %v899_v17 = vsel %vm838_vm2, %v898_v20, %v849_v37 }
 0x37a   :  { %v1031_v46 = vsel %vm838_vm2, %v1030_v25, %v8263_v44  ;;  %v1090_v62 = vrot.slane %v8403_v57, 4  ;;  %v1055_v39 = vsel %vm838_vm2, %v1054_v19, %v1013_v13  ;;  %v869_v61 = vperm.slane %v863_v31, %v8293_v11 }
 0x37b   :  { %v873_v32 = vperm.slane %v865_v58, %v8293_v11  ;;  %v910_v41 = vrot.slane %v881_v29, 4  ;;  %v922_v35 = vrot.slane %v885_v51, 4  ;;  %v1067_v47 = vsel %vm838_vm2, %v1066_v15, %v1017_v12 }
 0x37c   :  { %v1033_v20 = vsel %vm838_vm2, %v7634_v52, %v1032_v1  ;;  %v887_v37 = vsel %vm838_vm2, %v886_v9, %v845_v24  ;;  %v901_v19 = vsel %vm838_vm2, %v8324_v2, %v900_v50  ;;  %v905_v13 = vperm.slane %v899_v17, %v8316_v59  ;;  %v8467_v9 = vpop.permute.xlu1 %7641 }
 0x37d   :  { %v1037_v25 = vperm.slane %v1031_v46, %v8293_v11  ;;  %v889_v31 = vsel %vm838_vm2, %v8340_v16, %v888_v54  ;;  %v1057_v15 = vsel %vm838_vm2, %v8320_v60, %v1056_v26  ;;  %v8463_v44 = vperm.slane %v1055_v39, %v8316_v59 }
 0x37e   :  { %v1069_v1 = vsel %vm838_vm2, %v8313_v56, %v1068_v48  ;;  %v911_v2 = vsel %vm838_vm2, %v910_v41, %v869_v61  ;;  %v912_v52 = vrot.slane %v869_v61, 4  ;;  %v924_v12 = vrot.slane %v873_v32, 4 }
 0x37f   :  { %v1041_v24 = vperm.slane %v1033_v20, %v8293_v11  ;;  %v893_v58 = vperm.slane %v887_v37, %v8316_v59  ;;  %v8473_v16 = vperm.slane %v901_v19, %v8316_v59  ;;  %v1073_v60 = vperm.slane %v1067_v47, %v8316_v59 }
 0x380   :  { %v923_v50 = vsel %vm838_vm2, %v922_v35, %v873_v32  ;;  %v8478_v26 = vperm.slane %v1057_v15, %v8316_v59  ;;  %v8481_v56 = vperm.slane %v1069_v1, %v8316_v59  ;;  %v1080_v48 = vrot.slane %v1037_v25, 4 }
 0x381   :  { %v7643_v54 = vunpack.i.l.bf16 %v8467_v9  ;;  %v8485_v17 = vperm.slane %v889_v31, %v8316_v59  ;;  %v944_v46 = vrot.slane %v905_v13, 4  ;;  %v1104_v39 = vrot.slane %v8463_v44, 4 }
 0x382   :  { %v917_v61 = vperm.slane %v911_v2, %v8316_v59  ;;  %v913_v47 = vsel %vm838_vm2, %v881_v29, %v912_v52  ;;  %v925_v35 = vsel %vm838_vm2, %v885_v51, %v924_v12  ;;  %v929_v32 = vperm.slane %v923_v50, %v8316_v59 }
 0x383   :  { %v1092_v41 = vrot.slane %v1041_v24, 4  ;;  %v936_v20 = vrot.slane %v893_v58, 4  ;;  %v948_v37 = vrot.slane %v8473_v16, 4  ;;  %v1112_v19 = vrot.slane %v1073_v60, 4 }
 0x384   :  { %v1091_v15 = vsel %vm838_vm2, %v1090_v62, %v1041_v24  ;;  %v1116_v1 = vrot.slane %v8481_v56, 4  ;;  %v1079_v28 = vsel %vm838_vm2, %v1078_v27, %v1037_v25  ;;  %v1081_v29 = vsel %vm838_vm2, %v8370_v49, %v1080_v48  ;;  %v8509_v27 = vpop.permute.xlu2 %7636 }
 0x385   :  { %v8500_v51 = vperm.slane %v913_v47, %v8316_v59  ;;  %v8503_v2 = vperm.slane %v925_v35, %v8316_v59  ;;  %v934_v52 = vrot.slane %v917_v61, 4  ;;  %v1286_v12 = vrot.slane %v7643_v54, 4 }
 0x386   :  { %v940_v50 = vrot.slane %v8485_v17, 4  ;;  %v942_v62 = vrot.slane %v929_v32, 4  ;;  %v1093_v24 = vsel %vm838_vm2, %v8403_v57, %v1092_v41  ;;  %v1097_v31 = vperm.slane %v1091_v15, %v8316_v59 }
 0x387   :  { %v8512_v49 = vsel %vm838_vm2, %v917_v61, %v936_v20  ;;  %v8516_v25 = vsel %vm838_vm2, %v8503_v2, %v948_v37  ;;  %v1085_v48 = vperm.slane %v1079_v28, %v8316_v59  ;;  %v1287_v47 = vsel %vm838_vm2, %v1286_v12, %v8260_v43 }
 0x388   :  { %v8522_v35 = vsel %vm838_vm2, %v929_v32, %v944_v46  ;;  %v8525_v57 = vperm.slane %v1081_v29, %v8316_v59  ;;  %v1289_v61 = vsel %vm838_vm2, %v7643_v54, %v1288_v7  ;;  %v1293_v41 = vperm.slane %v1287_v47, %v8293_v11 }
 0x389   :  { %v8532_v20 = vsel %vm838_vm2, %v934_v52, %v893_v58  ;;  %v938_v28 = vrot.slane %v8500_v51, 4  ;;  %v8536_v37 = vperm.slane %v1093_v24, %v8316_v59  ;;  %v7638_v46 = vunpack.i.l.bf16 %v8509_v27 }
 0x38a   :  { %v8540_v32 = vsel %vm838_vm2, %v942_v62, %v905_v13  ;;  %v1110_v43 = vrot.slane %v1097_v31, 4  ;;  %v1378_v7 = vrot.slane %v8516_v25, 4  ;;  %v1297_v58 = vperm.slane %v1289_v61, %v8293_v11 }
 0x38b   :  { %v8546_v54 = vsel %vm838_vm2, %v8536_v37, %v1116_v1  ;;  %v1312_v29 = vrot.slane %v1293_v41, 4  ;;  %v1299_v52 = vsel %vm838_vm2, %v8366_v8, %v7638_v46  ;;  %v1102_v12 = vrot.slane %v1085_v48, 4 }
 0x38c   :  { %v8552_v24 = vsel %vm838_vm2, %v1085_v48, %v1104_v39  ;;  %v1300_v13 = vrot.slane %v7638_v46, 4  ;;  %v1305_v62 = vperm.slane %v1299_v52, %v8293_v11  ;;  %v1106_v47 = vrot.slane %v8525_v57, 4 }
 0x38d   :  { %v8557_v15 = vsel %vm838_vm2, %v1097_v31, %v1112_v19  ;;  %v1356_v1 = vrot.slane %v8512_v49, 4  ;;  %v8564_v61 = vsel %vm838_vm2, %v1270_v53, %v8374_v18  ;;  %v8567_v8 = vsel %vm838_vm2, %v1110_v43, %v1073_v60 }
 0x38e   :  { %v1379_v39 = vsel %vm838_vm2, %v1378_v7, %v8522_v35  ;;  %v1490_v48 = vrot.slane %v8546_v54, 4  ;;  %v1301_v19 = vsel %vm838_vm2, %v7648_v23, %v1300_v13  ;;  %v1324_v31 = vrot.slane %v1297_v58, 4 }
 0x38f   :  { %v1309_v46 = vperm.slane %v1301_v19, %v8293_v11  ;;  %v1310_v52 = vrot.slane %v1305_v62, 4  ;;  %v1313_v21 = vsel %vm838_vm2, %v1305_v62, %v1312_v29  ;;  %v8579_v18 = vsel %vm838_vm2, %v1102_v12, %v8463_v44 }
 0x390   :  { %v1568_v43 = vrot.slane %v8564_v61, 4  ;;  %v1114_v7 = vrot.slane %v8536_v37, 4  ;;  %v1321_v19 = vperm.slane %v1313_v21, %v8316_v59  ;;  %v8589_v29 = vperm.slane %v1379_v39, %v8293_v11 }
 0x391   :  { %v1311_v13 = vsel %vm838_vm2, %v1310_v52, %v1293_v41  ;;  %v1491_v12 = vsel %vm838_vm2, %v1490_v48, %v8557_v15  ;;  %v1322_v53 = vrot.slane %v1309_v46, 4  ;;  %v1325_v37 = vsel %vm838_vm2, %v1309_v46, %v1324_v31 }
 0x392   :  { %v1317_v60 = vperm.slane %v1311_v13, %v8316_v59  ;;  %v8601_v41 = vsel %vm838_vm2, %v1274_v33, %v8358_v3  ;;  %v1333_v39 = vperm.slane %v1325_v37, %v8316_v59  ;;  %v1336_v52 = vrot.slane %v1321_v19, 4 }
 0x393   :  { %v8608_v48 = vsel %vm838_vm2, %v8362_v55, %v1276_v42  ;;  %v1569_v21 = vsel %vm838_vm2, %v8601_v41, %v1568_v43  ;;  %v8613_v31 = vperm.slane %v1491_v12, %v8293_v11  ;;  %v1323_v46 = vsel %vm838_vm2, %v1322_v53, %v1297_v58 }
 0x394   :  { %v1334_v13 = vrot.slane %v1317_v60, 4  ;;  %v1577_v33 = vperm.slane %v1569_v21, %v8293_v11  ;;  %v1329_v37 = vperm.slane %v1323_v46, %v8316_v59  ;;  %v8619_v19 = vsel %vm838_vm2, 0.0, %v1336_v52 }
 0x395   :  { %v1340_v3 = vrot.slane %v1333_v39, 4  ;;  %v8623_v42 = vsel %vm838_vm2, %v1336_v52, %v1317_v60  ;;  %v1580_v12 = vrot.slane %v8420_v5, 4  ;;  %v1593_v58 = vsel %vm838_vm2, %v8414_v10, %v1592_v4 }
 0x396   :  { %v8632_v53 = vsel %vm838_vm2, 0.0, %v1334_v13  ;;  %v1338_v21 = vrot.slane %v1329_v37, 4  ;;  %v1601_v46 = vperm.slane %v1593_v58, %v8293_v11  ;;  %v10653_v43 = vrot.slane %v8406_v45, 4 }
 0x397   :  { %v8635_v39 = vsel %vm838_vm2, 0.0, %v1340_v3  ;;  %v1581_v52 = vsel %vm838_vm2, %v8608_v48, %v1580_v12  ;;  %v1628_v4 = vrot.slane %v1577_v33, 4  ;;  %v8646_v13 = vsel %vm838_vm2, %v1340_v3, %v1329_v37 }
 0x398   :  { %v1605_v55 = vsel %vm838_vm2, %v8400_v0, %v10653_v43  ;;  %v1589_v62 = vperm.slane %v1581_v52, %v8293_v11  ;;  %v1652_v23 = vrot.slane %v1601_v46, 4  ;;  %v8651_v58 = vsel %vm838_vm2, 0.0, %v1338_v21 }
 0x399   :  { %v1613_v44 = vperm.slane %v1605_v55, %v8293_v11  ;;  %v8658_v12 = vsel %vm838_vm2, %v938_v28, %v8485_v17  ;;  %v8664_v37 = vsel %vm838_vm2, %v8500_v51, %v940_v50  ;;  %v10654_v28 = vrot.slane %v8503_v2, 4 }
 0x39a   :  { %v1626_v3 = vrot.slane %v1589_v62, 4  ;;  %v1629_v43 = vsel %vm838_vm2, %v1589_v62, %v1628_v4  ;;  %v8680_v51 = vsel %vm838_vm2, %v1106_v47, %v8478_v26 }
 0x39b   :  { %v1650_v55 = vrot.slane %v1613_v44, 4  ;;  %v1653_v21 = vsel %vm838_vm2, %v1613_v44, %v1652_v23  ;;  %v1637_v52 = vperm.slane %v1629_v43, %v8316_v59  ;;  %v8674_v17 = vsel %vm838_vm2, %v10654_v28, %v8473_v16 }
 0x39c   :  { %v1661_v60 = vperm.slane %v1653_v21, %v8316_v59  ;;  %v1627_v50 = vsel %vm838_vm2, %v1626_v3, %v1577_v33  ;;  %v10655_v44 = vrot.slane %v8478_v26, 4  ;;  %v8692_v16 = vsel %vm838_vm2, %v1114_v7, %v8481_v56 }
 0x39d   :  { %v1651_v23 = vsel %vm838_vm2, %v1650_v55, %v1601_v46  ;;  %v1633_v2 = vperm.slane %v1627_v50, %v8316_v59  ;;  %v1676_v43 = vrot.slane %v1637_v52, 4  ;;  %v1344_v46 = vrot.slane %v8532_v20, 4 }
 0x39e   :  { %v8688_v62 = vsel %vm838_vm2, %v8525_v57, %v10655_v44  ;;  %v1657_v4 = vperm.slane %v1651_v23, %v8316_v59  ;;  %v1674_v47 = vrot.slane %v1661_v60, 4  ;;  %v1357_v57 = vsel %vm838_vm2, %v8664_v37, %v1356_v1 }
 0x39f   :  { %v1672_v56 = vrot.slane %v1633_v2, 4  ;;  %v1677_v55 = vsel %vm838_vm2, %v1661_v60, %v1676_v43  ;;  %v1345_v50 = vsel %vm838_vm2, %v8658_v12, %v1344_v46  ;;  %v1365_v23 = vperm.slane %v1357_v57, %v8293_v11 }
 0x3a0   :  { %v1670_v3 = vrot.slane %v1657_v4, 4  ;;  %v1675_v7 = vsel %vm838_vm2, %v1674_v47, %v1637_v52  ;;  %v1863_v28 = vpack.c.bf16 %v1677_v55, %v1677_v55  ;;  %v10656_v1 = vrot.slane %v8540_v32, 4 }
 0x3a1   :  { %v1860_v21 = vpack.c.bf16 %v1675_v7, %v1675_v7  ;;  %v1673_v26 = vsel %vm838_vm2, %v1657_v4, %v1672_v56  ;;  %v1353_v55 = vperm.slane %v1345_v50, %v8293_v11  ;;  %v10657_v57 = vrot.slane %v8522_v35, 4 }
 0x3a2   :  { %v1671_v44 = vsel %vm838_vm2, %v1670_v3, %v1633_v2  ;;  %v1369_v52 = vsel %vm838_vm2, %v8674_v17, %v10656_v1  ;;  %v1857_v43 = vpack.c.bf16 %v1673_v26, %v1673_v26  ;;  %v2016_v7 = vunpack.c.l.b16 %v1863_v28 }
 0x3a3   :  { %v1854_v47 = vpack.c.bf16 %v1671_v44, %v1671_v44  ;;  %v1970_v60 = vunpack.c.l.b16 %v1860_v21  ;;  %v1377_v46 = vperm.slane %v1369_v52, %v8293_v11  ;;  %v1381_v2 = vsel %vm838_vm2, %v8516_v25, %v10657_v57 }
 0x3a4   :  { %v1402_v4 = vrot.slane %v1365_v23, 4  ;;  %v1924_v33 = vunpack.c.l.b16 %v1857_v43  ;;  %v2018_v63 = vpack.c.b16 %v2016_v7, %v2016_v7  ;;  %v1389_v1 = vperm.slane %v1381_v2, %v8293_v11 }
 0x3a5   :  { %v1877_v3 = vunpack.c.l.b16 %v1854_v47  ;;  %v1972_v56 = vpack.c.b16 %v1970_v60, %v1970_v60  ;;  %v1456_v28 = vrot.slane %v8579_v18, 4  ;;  %v10658_v43 = vrot.slane %v8552_v24, 4 }
 0x3a6   :  { %v1403_v21 = vsel %vm838_vm2, %v1402_v4, %v1353_v55  ;;  %v1926_v35 = vpack.c.b16 %v1924_v33, %v1924_v33  ;;  %v2029_v52 = vsel %vm1880_vm3, %v2018_v63, 0  ;;  %v1426_v47 = vrot.slane %v1389_v1, 4 }
 0x3a7   :  { %v1879_v50 = vpack.c.b16 %v1877_v3, %v1877_v3  ;;  %v1983_v44 = vsel %vm1880_vm3, %v1972_v56, 0  ;;  %2037 = vmatpush.bf16.xpose.msra.mxu1 %v2029_v52  ;;  %v1409_v25 = vperm.slane %v1403_v21, %v8316_v59  ;;  %v1457_v60 = vsel %vm838_vm2, %v8680_v51, %v1456_v28 }
 0x3a8   :  { %1991 = vmatpush.bf16.xpose.msra.mxu0 %v1983_v44  ;;  %v1469_v7 = vsel %vm838_vm2, %v8688_v62, %v10658_v43  ;;  %v1937_v2 = vsel %vm1880_vm3, %v1926_v35, 0  ;;  %v1465_v33 = vperm.slane %v1457_v60, %v8293_v11  ;;  %v1427_v4 = vsel %vm838_vm2, %v1426_v47, %v1377_v46 }
 0x3a9   :  { %v1891_v57 = vsel %vm1880_vm3, %v1879_v50, 0  ;;  %v1477_v63 = vperm.slane %v1469_v7, %v8293_v11  ;;  %1945 = vmatpush.bf16.xpose.msra.mxu3 %v1937_v2  ;;  %v10659_v56 = vrot.slane %v8567_v8, 4  ;;  %v10660_v28 = vrot.slane %v8557_v15, 4 }
 0x3aa   :  { %1899 = vmatpush.bf16.xpose.msrb.mxu2 %v1891_v57  ;;  %v1433_v44 = vperm.slane %v1427_v4, %v8316_v59  ;;  %v1404_v47 = vrot.slane %v1353_v55, 4  ;;  %v1428_v43 = vrot.slane %v1377_v46, 4  ;;  %v1516_v7 = vrot.slane %v1465_v33, 4 }
 0x3ab   :  { %v1481_v21 = vsel %vm838_vm2, %v8692_v16, %v10659_v56  ;;  %v1493_v50 = vsel %vm838_vm2, %v8546_v54, %v10660_v28  ;;  %v1514_v60 = vrot.slane %v1477_v63, 4  ;;  %v1448_v57 = vrot.slane %v1409_v25, 4 }
 0x3ac   :  { %v1489_v35 = vperm.slane %v1481_v21, %v8293_v11  ;;  %v1501_v52 = vperm.slane %v1493_v50, %v8293_v11  ;;  %v1446_v2 = vrot.slane %v1433_v44, 4  ;;  %v1405_v54 = vsel %vm838_vm2, %v1365_v23, %v1404_v47 }
 0x3ad   :  { %v1515_v3 = vsel %vm838_vm2, %v1514_v60, %v1465_v33  ;;  %v1429_v4 = vsel %vm838_vm2, %v1389_v1, %v1428_v43  ;;  %v1517_v21 = vsel %vm838_vm2, %v1477_v63, %v1516_v7  ;;  %v1413_v46 = vperm.slane %v1405_v54, %v8316_v59 }
 0x3ae   :  { %v1538_v56 = vrot.slane %v1501_v52, 4  ;;  %v1540_v26 = vrot.slane %v1489_v35, 4  ;;  %v1521_v15 = vperm.slane %v1515_v3, %v8316_v59  ;;  %v1447_v28 = vsel %vm838_vm2, %v1446_v2, %v1409_v25 }
 0x3af   :  { %v1437_v50 = vperm.slane %v1429_v4, %v8316_v59  ;;  %v1852_v60 = vpack.c.bf16 %v1447_v28, %v1447_v28  ;;  %v1525_v40 = vperm.slane %v1517_v21, %v8316_v59  ;;  %v1449_v63 = vsel %vm838_vm2, %v1433_v44, %v1448_v57 }
 0x3b0   :  { %v1539_v55 = vsel %vm838_vm2, %v1538_v56, %v1489_v35  ;;  %v1541_v3 = vsel %vm838_vm2, %v1501_v52, %v1540_v26  ;;  %v1560_v47 = vrot.slane %v1521_v15, 4  ;;  %v1855_v35 = vpack.c.bf16 %v1449_v63, %v1449_v63 }
 0x3b1   :  { %v1545_v33 = vperm.slane %v1539_v55, %v8316_v59  ;;  %v1450_v23 = vrot.slane %v1437_v50, 4  ;;  %v1549_v1 = vperm.slane %v1541_v3, %v8316_v59  ;;  %v1875_v43 = vunpack.c.l.b16 %v1852_v60 }
 0x3b2   :  { %v1452_v7 = vrot.slane %v1413_v46, 4  ;;  %v1564_v4 = vrot.slane %v1525_v40, 4  ;;  %v1922_v52 = vunpack.c.l.b16 %v1855_v35 }
 0x3b3   :  { %v1558_v25 = vrot.slane %v1545_v33, 4  ;;  %v1451_v2 = vsel %vm838_vm2, %v1450_v23, %v1413_v46  ;;  %v1562_v56 = vrot.slane %v1549_v1, 4  ;;  %v1561_v54 = vsel %vm838_vm2, %v1545_v33, %v1560_v47 }
 0x3b4   :  { %v1858_v28 = vpack.c.bf16 %v1451_v2, %v1451_v2  ;;  %v1856_v26 = vpack.c.bf16 %v1561_v54, %v1561_v54  ;;  %v1453_v44 = vsel %vm838_vm2, %v1437_v50, %v1452_v7  ;;  %v1565_v57 = vsel %vm838_vm2, %v1549_v1, %v1564_v4 }
 0x3b5   :  { %v1559_v21 = vsel %vm838_vm2, %v1558_v25, %v1521_v15  ;;  %v1563_v3 = vsel %vm838_vm2, %v1562_v56, %v1525_v40  ;;  %v1861_v46 = vpack.c.bf16 %v1453_v44, %v1453_v44  ;;  %v1862_v22 = vpack.c.bf16 %v1565_v57, %v1565_v57 }
 0x3b6   :  { %v1853_v55 = vpack.c.bf16 %v1559_v21, %v1559_v21  ;;  %v1859_v60 = vpack.c.bf16 %v1563_v3, %v1563_v3  ;;  %v1968_v63 = vunpack.c.l.b16 %v1858_v28  ;;  %v1923_v34 = vunpack.c.l.b16 %v1856_v26 }
 0x3b7   :  { %v8773_v33 = vperm.slane %v8623_v42, %v8293_v11  ;;  %v10661_v15 = vrot.slane %v8619_v19, 4  ;;  %v2014_v50 = vunpack.c.l.b16 %v1861_v46  ;;  %v2015_v7 = vunpack.c.l.b16 %v1862_v22 }
 0x3b8   :  { %v1876_v23 = vunpack.c.l.b16 %v1853_v55  ;;  %v1969_v40 = vunpack.c.l.b16 %v1859_v60  ;;  %v1925_v25 = vpack.c.b16 %v1923_v34, %v1922_v52  ;;  %v8784_v2 = vperm.slane %v8646_v13, %v8293_v11 }
 0x3b9   :  { %v1792_v47 = vsel %vm838_vm2, %v10661_v15, %v8632_v53  ;;  %v10662_v42 = vrot.slane %v8635_v39, 4  ;;  %v1810_v54 = vrot.slane %v8773_v33, 4  ;;  %v2017_v13 = vpack.c.b16 %v2015_v7, %v2014_v50 }
 0x3ba   :  { %v8780_v1 = vperm.slane %v1792_v47, %v8293_v11  ;;  %v1878_v35 = vpack.c.b16 %v1876_v23, %v1875_v43  ;;  %v1971_v19 = vpack.c.b16 %v1969_v40, %v1968_v63  ;;  %v1934_v53 = vsel %vm1880_vm3, %v1925_v25, 0 }
 0x3bb   :  { %v1803_v56 = vsel %vm838_vm2, %v10662_v42, %v8651_v58  ;;  %v1478_v43 = vrot.slane %v8692_v16, 4  ;;  %1946 = vmatpush.bf16.xpose.msra.mxu3 %v1934_v53  ;;  %v1822_v4 = vrot.slane %v8784_v2, 4  ;;  %v10663_v21 = vrot.slane %v8658_v12, 4 }
 0x3bc   :  { %v8792_v34 = vperm.slane %v1803_v56, %v8293_v11  ;;  %v1888_v22 = vsel %vm1880_vm3, %v1878_v35, 0  ;;  %v1980_v39 = vsel %vm1880_vm3, %v1971_v19, 0  ;;  %v1811_v58 = vsel %vm838_vm2, %v8780_v1, %v1810_v54 }
 0x3bd   :  { %1900 = vmatpush.bf16.xpose.msrb.mxu2 %v1888_v22  ;;  %v1343_v28 = vsel %vm838_vm2, %v10663_v21, %v8532_v20  ;;  %v10664_v16 = vrot.slane %v8664_v37, 4  ;;  %1992 = vmatpush.bf16.xpose.msra.mxu0 %v1980_v39  ;;  %v2026_v52 = vsel %vm1880_vm3, %v2017_v13, 0  ;;  %v8811_v55 = vperm.slane %v1811_v58, %v8316_v59 }
 0x3be   :  { %v1823_v3 = vsel %vm838_vm2, %v8792_v34, %v1822_v4  ;;  %v1349_v44 = vperm.slane %v1343_v28, %v8293_v11  ;;  %2038 = vmatpush.bf16.xpose.msra.mxu1 %v2026_v52  ;;  %v1414_v57 = vrot.slane %v8589_v29, 4  ;;  %v10666_v46 = vrot.slane %v8680_v51, 4 }
 0x3bf   :  { %v1355_v26 = vsel %vm838_vm2, %v10664_v16, %v8512_v49  ;;  %v8817_v12 = vperm.slane %v1823_v3, %v8316_v59  ;;  %v10665_v49 = vrot.slane %v8674_v17, 4  ;;  %v10667_v15 = vrot.slane %v8688_v62, 4 }
 0x3c0   :  { %v1361_v20 = vperm.slane %v1355_v26, %v8293_v11  ;;  %v1392_v63 = vrot.slane %v1349_v44, 4  ;;  %v1455_v23 = vsel %vm838_vm2, %v10666_v46, %v8579_v18  ;;  %v1479_v51 = vsel %vm838_vm2, %v1478_v43, %v8567_v8 }
 0x3c1   :  { %v1367_v37 = vsel %vm838_vm2, %v10665_v49, %v8540_v32  ;;  %v1467_v47 = vsel %vm838_vm2, %v10667_v15, %v8552_v24  ;;  %v1836_v40 = vrot.slane %v8817_v12, 4  ;;  %v1461_v32 = vperm.slane %v1455_v23, %v8293_v11 }
 0x3c2   :  { %v1373_v60 = vperm.slane %v1367_v37, %v8293_v11  ;;  %v1390_v17 = vrot.slane %v1361_v20, 4  ;;  %v1473_v25 = vperm.slane %v1467_v47, %v8293_v11  ;;  %v1526_v18 = vrot.slane %v8613_v31, 4 }
 0x3c3   :  { %v1837_v62 = vsel %vm838_vm2, %v1836_v40, %v8811_v55  ;;  %v1485_v42 = vperm.slane %v1479_v51, %v8293_v11  ;;  %v1504_v54 = vrot.slane %v1461_v32, 4  ;;  %v1393_v43 = vsel %vm838_vm2, %v1361_v20, %v1392_v63 }
 0x3c4   :  { %v1415_v50 = vsel %vm838_vm2, %v1414_v57, %v1373_v60  ;;  %v1416_v35 = vrot.slane %v1373_v60, 4  ;;  %v1391_v24 = vsel %vm838_vm2, %v1390_v17, %v1349_v44  ;;  %v2226_v56 = vpack.c.bf16 %v1837_v62, %v1837_v62 }
 0x3c5   :  { %v1421_v7 = vperm.slane %v1415_v50, %v8316_v59  ;;  %v1397_v19 = vperm.slane %v1391_v24, %v8316_v59  ;;  %v1502_v53 = vrot.slane %v1473_v25, 4  ;;  %v1527_v13 = vsel %vm838_vm2, %v1526_v18, %v1485_v42 }
 0x3c6   :  { %v1528_v8 = vrot.slane %v1485_v42, 4  ;;  %v2332_v4 = vunpack.c.l.b16 %v2226_v56  ;;  %v1533_v21 = vperm.slane %v1527_v13, %v8316_v59  ;;  %v1401_v26 = vperm.slane %v1393_v43, %v8316_v59 }
 0x3c7   :  { %v1438_v22 = vrot.slane %v1421_v7, 4  ;;  %v1440_v39 = vrot.slane %v1397_v19, 4  ;;  %v1503_v58 = vsel %vm838_vm2, %v1502_v53, %v1461_v32  ;;  %v1417_v52 = vsel %vm838_vm2, %v8589_v29, %v1416_v35 }
 0x3c8   :  { %v1509_v16 = vperm.slane %v1503_v58, %v8316_v59  ;;  %v2334_v3 = vpack.c.b16 %v2332_v4, %v2332_v4  ;;  %v1550_v44 = vrot.slane %v1533_v21, 4  ;;  %v1425_v20 = vperm.slane %v1417_v52, %v8316_v59 }
 0x3c9   :  { %v1439_v28 = vsel %vm838_vm2, %v1438_v22, %v1397_v19  ;;  %v1505_v57 = vsel %vm838_vm2, %v1473_v25, %v1504_v54  ;;  %v1529_v60 = vsel %vm838_vm2, %v8613_v31, %v1528_v8  ;;  %v1808_v63 = vrot.slane %v8780_v1, 4 }
 0x3ca   :  { %v1840_v49 = vpack.c.bf16 %v1439_v28, %v1439_v28  ;;  %v1552_v37 = vrot.slane %v1509_v16, 4  ;;  %v2343_v46 = vsel %vm2253_vm4, %v2334_v3, 0  ;;  %v1551_v23 = vsel %vm838_vm2, %v1550_v44, %v1509_v16 }
 0x3cb   :  { %v1442_v47 = vrot.slane %v1425_v20, 4  ;;  %2351 = vmatpush.bf16.msrb.mxu0 %v2343_v46  ;;  %v1841_v29 = vpack.c.bf16 %v1551_v23, %v1551_v23  ;;  %v1513_v40 = vperm.slane %v1505_v57, %v8316_v59  ;;  %v1537_v17 = vperm.slane %v1529_v60, %v8316_v59 }
 0x3cc   :  { %v1867_v15 = vunpack.c.l.b16 %v1840_v49  ;;  %v1809_v32 = vsel %vm838_vm2, %v1808_v63, %v8773_v33  ;;  %v1820_v1 = vrot.slane %v8792_v34, 4  ;;  %v1838_v50 = vrot.slane %v8811_v55, 4 }
 0x3cd   :  { %v1443_v25 = vsel %vm838_vm2, %v1442_v47, %v1401_v26  ;;  %v1815_v31 = vperm.slane %v1809_v32, %v8316_v59  ;;  %v1868_v35 = vunpack.c.l.b16 %v1841_v29  ;;  %v1554_v51 = vrot.slane %v1537_v17, 4 }
 0x3ce   :  { %v1846_v18 = vpack.c.bf16 %v1443_v25, %v1443_v25  ;;  %v1441_v62 = vsel %vm838_vm2, %v1421_v7, %v1440_v39  ;;  %v1821_v24 = vsel %vm838_vm2, %v1820_v1, %v8784_v2  ;;  %v1839_v42 = vsel %vm838_vm2, %v8817_v12, %v1838_v50 }
 0x3cf   :  { %v1553_v33 = vsel %vm838_vm2, %v1533_v21, %v1552_v37  ;;  %v1843_v56 = vpack.c.bf16 %v1441_v62, %v1441_v62  ;;  %v1870_v19 = vpack.c.b16 %v1868_v35, %v1867_v15  ;;  %v1555_v53 = vsel %vm838_vm2, %v1554_v51, %v1513_v40 }
 0x3d0   :  { %v1960_v34 = vunpack.c.l.b16 %v1846_v18  ;;  %v1827_v55 = vperm.slane %v1821_v24, %v8316_v59  ;;  %v1847_v54 = vpack.c.bf16 %v1555_v53, %v1555_v53  ;;  %v2229_v22 = vpack.c.bf16 %v1839_v42, %v1839_v42 }
 0x3d1   :  { %v1844_v13 = vpack.c.bf16 %v1553_v33, %v1553_v33  ;;  %v1914_v8 = vunpack.c.l.b16 %v1843_v56  ;;  %6785 = vmatmul.msk.bf16.vlgmr.msrb.gmra.mxu2 %vm1880_vm3, %v1870_v19  ;;  %v1444_v2 = vrot.slane %v1401_v26, 4  ;;  %v1556_v43 = vrot.slane %v1513_v40, 4 }
 0x3d2   :  { %v1832_v7 = vrot.slane %v1827_v55, 4  ;;  %v1834_v4 = vrot.slane %v1815_v31, 4  ;;  %v1961_v12 = vunpack.c.l.b16 %v1847_v54  ;;  %v2376_v39 = vunpack.c.l.b16 %v2229_v22 }
 0x3d3   :  { %v1915_v58 = vunpack.c.l.b16 %v1844_v13  ;;  %v10668_v21 = vrot.slane %v8601_v41, 4  ;;  %v1445_v52 = vsel %vm838_vm2, %v1425_v20, %v1444_v2  ;;  %v1557_v3 = vsel %vm838_vm2, %v1537_v17, %v1556_v43 }
 0x3d4   :  { %v1833_v16 = vsel %vm838_vm2, %v1832_v7, %v1815_v31  ;;  %v1835_v44 = vsel %vm838_vm2, %v1827_v55, %v1834_v4  ;;  %v1963_v49 = vpack.c.b16 %v1961_v12, %v1960_v34  ;;  %v2378_v37 = vpack.c.b16 %v2376_v39, %v2376_v39 }
 0x3d5   :  { %v1567_v28 = vsel %vm838_vm2, %v10668_v21, %v8564_v61  ;;  %v2220_v26 = vpack.c.bf16 %v1833_v16, %v1833_v16  ;;  %v1917_v57 = vpack.c.b16 %v1915_v58, %v1914_v8  ;;  %v1849_v60 = vpack.c.bf16 %v1445_v52, %v1445_v52 }
 0x3d6   :  { %v1850_v63 = vpack.c.bf16 %v1557_v3, %v1557_v3  ;;  %v2223_v46 = vpack.c.bf16 %v1835_v44, %v1835_v44  ;;  %v1573_v23 = vperm.slane %v1567_v28, %v8293_v11  ;;  %6789 = vmatmul.msk.bf16.vlgmr.msra.gmra.mxu0 %vm1880_vm3, %v1963_v49  ;;  %v2387_v41 = vsel %vm2253_vm4, %v2378_v37, 0 }
 0x3d7   :  { %v2243_v61 = vunpack.c.l.b16 %v2220_v26  ;;  %6787 = vmatmul.msk.bf16.vlgmr.msra.gmra.mxu3 %vm1880_vm3, %v1917_v57  ;;  %v10669_v20 = vrot.slane %v8608_v48, 4  ;;  %v10670_v47 = vrot.slane %v8414_v10, 4  ;;  %2395 = vmatpush.bf16.msrb.mxu1 %v2387_v41  ;;  %v2006_v40 = vunpack.c.l.b16 %v1849_v60 }
 0x3d8   :  { %v2007_v17 = vunpack.c.l.b16 %v1850_v63  ;;  %v2288_v32 = vunpack.c.l.b16 %v2223_v46  ;;  %v10671_v50 = vrot.slane %v8400_v0, 4  ;;  %v10672_v57 = vlaneseq }
 0x3d9   :  { %v1579_v15 = vsel %vm838_vm2, %v10669_v20, %v8420_v5  ;;  %v1591_v29 = vsel %vm838_vm2, %v10670_v47, %v8397_v14  ;;  %v2245_v31 = vpack.c.b16 %v2243_v61, %v2243_v61  ;;  %v1616_v5 = vrot.slane %v1573_v23, 4 }
 0x3da   :  { %v1585_v25 = vperm.slane %v1579_v15, %v8293_v11  ;;  %v1597_v1 = vperm.slane %v1591_v29, %v8293_v11  ;;  %v1603_v48 = vsel %vm838_vm2, %v10671_v50, %v8406_v45  ;;  %v2009_v35 = vpack.c.b16 %v2007_v17, %v2006_v40 }
 0x3db   :  { %v2290_v51 = vpack.c.b16 %v2288_v32, %v2288_v32  ;;  %v1609_v10 = vperm.slane %v1603_v48, %v8293_v11  ;;  %v2255_v18 = vsel %vm2253_vm4, %v2245_v31, 0  ;;  %v464_v60 = vshrl.u32 %v10672_v57, 7 }
 0x3dc   :  { %v1614_v14 = vrot.slane %v1585_v25, 4  ;;  %v1617_v62 = vsel %vm838_vm2, %v1585_v25, %v1616_v5  ;;  %v1640_v24 = vrot.slane %v1597_v1, 4  ;;  %2263 = vmatpush.bf16.msra.mxu2 %v2255_v18  ;;  %6791 = vmatmul.msk.bf16.vlgmr.msra.gmra.mxu1 %vm1880_vm3, %v2009_v35 }
 0x3dd   :  { %v2299_v42 = vsel %vm2253_vm4, %v2290_v51, 0  ;;  %v1638_v33 = vrot.slane %v1609_v10, 4  ;;  %v1625_v45 = vperm.slane %v1617_v62, %v8316_v59  ;;  %vm8928_vm5 = vcmp.ge.s32.totalorder %v464_v60, %v8187_v30 }
 0x3de   :  { %v1615_v0 = vsel %vm838_vm2, %v1614_v14, %v1573_v23  ;;  %2307 = vmatpush.bf16.msrb.mxu3 %v2299_v42  ;;  %v1641_v19 = vsel %vm838_vm2, %v1609_v10, %v1640_v24  ;;  %v465_v25 = vadd.s32 8, %v464_v60 }
 0x3df   :  { %v1621_v56 = vperm.slane %v1615_v0, %v8316_v59  ;;  %v1639_v53 = vsel %vm838_vm2, %v1638_v33, %v1597_v1  ;;  %v1649_v34 = vperm.slane %v1641_v19, %v8316_v59  ;;  %v1668_v55 = vrot.slane %v1625_v45, 4 }
 0x3e0   :  { %v1645_v54 = vperm.slane %v1639_v53, %v8316_v59  ;;  %vm8951_vm7 = vcmp.ge.s32.totalorder %v465_v25, %v8187_v30 }
 0x3e1   :  { %v1664_v22 = vrot.slane %v1621_v56, 4  ;;  %v1666_v13 = vrot.slane %v1649_v34, 4  ;;  %v1669_v8 = vsel %vm838_vm2, %v1649_v34, %v1668_v55 }
 0x3e2   :  { %v1662_v7 = vrot.slane %v1645_v54, 4  ;;  %v1851_v12 = vpack.c.bf16 %v1669_v8, %v1669_v8 }
 0x3e3   :  { %v1665_v2 = vsel %vm838_vm2, %v1645_v54, %v1664_v22  ;;  %v1667_v43 = vsel %vm838_vm2, %v1666_v13, %v1625_v45 }
 0x3e4   :  { %v1845_v4 = vpack.c.bf16 %v1665_v2, %v1665_v2  ;;  %v1663_v39 = vsel %vm838_vm2, %v1662_v7, %v1621_v56  ;;  %v1848_v58 = vpack.c.bf16 %v1667_v43, %v1667_v43  ;;  %v2008_v44 = vunpack.c.l.b16 %v1851_v12 }
 0x3e5   :  { %v1842_v21 = vpack.c.bf16 %v1663_v39, %v1663_v39  ;;  %v466_v39 = vadd.s32 16, %v464_v60 }
 0x3e6   :  { %v1916_v28 = vunpack.c.l.b16 %v1845_v4  ;;  %v1962_v16 = vunpack.c.l.b16 %v1848_v58  ;;  %v2010_v37 = vpack.c.b16 %v2008_v44, %v2008_v44 }
 0x3e7   :  { %v1869_v52 = vunpack.c.l.b16 %v1842_v21  ;;  %vm8992_vm8 = vcmp.ge.s32.totalorder %v466_v39, %v8187_v30 }
 0x3e8   :  { %v1918_v3 = vpack.c.b16 %v1916_v28, %v1916_v28  ;;  %v1964_v49 = vpack.c.b16 %v1962_v16, %v1962_v16 }
 0x3e9   :  { %v1871_v26 = vpack.c.b16 %v1869_v52, %v1869_v52 }
 0x3ea   :  { %6788 = vmatmul.msk.bf16.gmra.mxu3 %vm1880_vm3, %v1918_v3  ;;  %6790 = vmatmul.msk.bf16.gmra.mxu0 %vm1880_vm3, %v1964_v49 }
 0x3eb   :  { %6786 = vmatmul.msk.bf16.gmra.mxu2 %vm1880_vm3, %v1871_v26 }
 0x3ec   :  { %6792 = vmatmul.msk.bf16.gmra.mxu1 %vm1880_vm3, %v2010_v37 }
 0x453   :  { %v1994_v63 = vpop.f32.mrf.mxu0 }
 0x454   :  { %v2055_v23 = vmul.f32 0.17677669, %v1994_v63  ;;  %v1902_v15 = vpop.f32.mrf.mxu2  ;;  %v7644_v63 = vunpack.i.h.bf16 %v8467_v9 }
 0x455   :  { %v2049_v50 = vmul.f32 0.17677669, %v1902_v15 }
 0x456   :  { %v8934_v61 = vsel %vm8928_vm5, %v2055_v23, -1e+30  ;;  %v950_v15 = vrot.slane %v7644_v63, 4 }
 0x457   :  { %v2092_v41 = vsel %vm2073_vm6, %v8934_v61, -inf  ;;  %v8957_v14 = vsel %vm8928_vm5, %v2049_v50, -1e+30 }
 0x458   :  { %2093 = vmax.xlane.f32.xlu0 %v2092_v41  ;;  %v2074_v33 = vsel %vm2073_vm6, %v8957_v14, -inf  ;;  %v951_v25 = vsel %vm838_vm2, %v950_v15, %v8248_v36 }
 0x459   :  { %v2040_v20 = vpop.f32.mrf.mxu1 }
 0x45a   :  { %v2058_v47 = vmul.f32 0.17677669, %v2040_v20  ;;  %v1948_v29 = vpop.f32.mrf.mxu3 }
 0x45b   :  { %v2052_v40 = vmul.f32 0.17677669, %v1948_v29  ;;  %v1996_v32 = vpop.f32.mrf.mxu0 }
 0x45c   :  { %v8940_v17 = vsel %vm8928_vm5, %v2058_v47, -1e+30  ;;  %v2056_v5 = vmul.f32 0.17677669, %v1996_v32  ;;  %v1904_v62 = vpop.f32.mrf.mxu2  ;;  %v7639_v47 = vunpack.i.h.bf16 %v8509_v27  ;;  %v7649_v32 = vunpack.i.h.bf16 %v8329_v6 }
 0x45d   :  { %v2101_v31 = vsel %vm2073_vm6, %v8940_v17, -inf  ;;  %v8946_v1 = vsel %vm8928_vm5, %v2052_v40, -1e+30  ;;  %v2050_v45 = vmul.f32 0.17677669, %v1904_v62  ;;  %v952_v40 = vrot.slane %v8248_v36, 4 }
 0x45e   :  { %2102 = vmax.xlane.f32.xlu1 %v2101_v31  ;;  %v2083_v48 = vsel %vm2073_vm6, %v8946_v1, -inf  ;;  %v8961_v24 = vsel %vm8951_vm7, %v2056_v5, -1e+30  ;;  %v964_v9 = vrot.slane %v7639_v47, 4  ;;  %v962_v5 = vrot.slane %v7649_v32, 4 }
 0x45f   :  { %2084 = vmax.xlane.f32.xlu2 %v2083_v48  ;;  %v2095_v53 = vsel %vm2073_vm6, %v8961_v24, -inf  ;;  %v8979_v54 = vsel %vm8951_vm7, %v2050_v45, -1e+30  ;;  %v953_v31 = vsel %vm838_vm2, %v7644_v63, %v952_v40 }
 0x460   :  { %v2077_v7 = vsel %vm2073_vm6, %v8979_v54, -inf  ;;  %v961_v48 = vperm.slane %v953_v31, %v8293_v11  ;;  %v963_v36 = vsel %vm838_vm2, %v962_v5, %v7639_v47 }
 0x461   :  { %v2042_v51 = vpop.f32.mrf.mxu1 }
 0x462   :  { %v2059_v10 = vmul.f32 0.17677669, %v2042_v51  ;;  %v1950_v18 = vpop.f32.mrf.mxu3  ;;  %v965_v51 = vsel %vm838_vm2, %v7649_v32, %v964_v9  ;;  %v988_v45 = vrot.slane %v961_v48, 4 }
 0x463   :  { %v2053_v56 = vmul.f32 0.17677669, %v1950_v18 }
 0x464   :  { %v8965_v42 = vsel %vm8951_vm7, %v2059_v10, -1e+30 }
 0x465   :  { %v2104_v0 = vsel %vm2073_vm6, %v8965_v42, -inf  ;;  %v8975_v55 = vsel %vm8951_vm7, %v2053_v56, -1e+30  ;;  %v973_v56 = vperm.slane %v965_v51, %v8293_v11 }
 0x466   :  { %2105 = vmax.xlane.f32.xlu0 %v2104_v0  ;;  %2075 = vmax.xlane.f32.xlu1 %v2074_v33  ;;  %v2086_v8 = vsel %vm2073_vm6, %v8975_v55, -inf }
 0x467   :  { %v1999_v19 = vpop.f32.mrf.mxu0  ;;  %2096 = vmax.xlane.f32.xlu2 %v2095_v53 }
 0x468   :  { %v2057_v44 = vmul.f32 0.17677669, %v1999_v19 }
 0x469   :  { %v2045_v34 = vpop.f32.mrf.mxu1 }
 0x46a   :  { %v9010_v49 = vsel %vm8992_vm8, %v2057_v44, -1e+30  ;;  %v2060_v37 = vmul.f32 0.17677669, %v2045_v34  ;;  %v969_v34 = vperm.slane %v963_v36, %v8293_v11 }
 0x46b   :  { %v2098_v26 = vsel %vm2073_vm6, %v9010_v49, -inf }
 0x46c   :  { %v9016_v57 = vsel %vm8992_vm8, %v2060_v37, -1e+30 }
 0x46d   :  { %v1953_v22 = vpop.f32.mrf.mxu3  ;;  %v2107_v60 = vsel %vm2073_vm6, %v9016_v57, -inf }
 0x46e   :  { %v1907_v13 = vpop.f32.mrf.mxu2  ;;  %2087 = vmax.xlane.f32.xlu1 %v2086_v8  ;;  %2078 = vmax.xlane.f32.xlu0 %v2077_v7  ;;  %v2054_v28 = vmul.f32 0.17677669, %v1953_v22  ;;  %v986_v8 = vrot.slane %v973_v56, 4  ;;  %v989_v7 = vsel %vm838_vm2, %v973_v56, %v988_v45  ;;  %v1120_v56 = vrot.slane %v8252_v38, 4 }
 0x46f   :  { %v2001_v2 = vpop.f32.mrf.mxu0  ;;  %v2051_v58 = vmul.f32 0.17677669, %v1907_v13 }
 0x470   :  { %v9004_v3 = vsel %vm8992_vm8, %v2054_v28, -1e+30 }
 0x471   :  { %v2047_v43 = vpop.f32.mrf.mxu1  ;;  %v8998_v16 = vsel %vm8992_vm8, %v2051_v58, -1e+30  ;;  %v2089_v30 = vsel %vm2073_vm6, %v9004_v3, -inf }
 0x472   :  { %v2080_v52 = vsel %vm2073_vm6, %v8998_v16, -inf }
 0x475   :  { %v1955_v4 = vpop.f32.mrf.mxu3 }
 0x476   :  { %v1909_v12 = vpop.f32.mrf.mxu2 }
 0x477   :  { %v997_v12 = vperm.slane %v989_v7, %v8316_v59 }
 0x47f   :  { %812 = vrot.lane.b32.xlu2 %v8252_v38, %s8094_s6 }
 0x482   :  { %821 = vrot.lane.b32.xlu0 %v8252_v38, %s8087_s13 }
 0x487   :  { %830 = vrot.lane.b32.xlu1 %v8252_v38, %s8095_s27 }
 0x4a8   :  { %2081 = vmax.xlane.f32.xlu2 %v2080_v52 }
 0x4ac   :  { %2090 = vmax.xlane.f32.xlu0 %v2089_v30 }
 0x4b1   :  { %2099 = vmax.xlane.f32.xlu1 %v2098_v26 }
 0x4b9   :  { %2108 = vmax.xlane.f32.xlu1 %v2107_v60 }
 0x4cb   :  { %v2094_v23 = vpop.xlane.xlu0 %2093 }
 0x4cc   :  { %v2116_v41 = vsub.f32 %v8934_v61, %v2094_v23  ;;  %v957_v61 = vperm.slane %v951_v25, %v8293_v11  ;;  %v1004_v23 = vrot.slane %v997_v12, 4 }
 0x4ce   :  { %v2134_v20 = vmul.f32 1.442695, %v2116_v41  ;;  %v976_v33 = vrot.slane %v957_v61, 4  ;;  %v1005_v40 = vsel %vm838_vm2, 0.0, %v1004_v23 }
 0x4d0   :  { %7760 = vpow2.f32 %v2134_v20  ;;  %v977_v13 = vsel %vm838_vm2, %v969_v34, %v976_v33 }
 0x4d1   :  { %v9023_v29 = vpop.xlane.xlu1 %2102  ;;  %v985_v4 = vperm.slane %v977_v13, %v8316_v59 }
 0x4d2   :  { %v2085_v27 = vpop.xlane.xlu2 %2084 }
 0x4d3   :  { %v2113_v22 = vsub.f32 %v8946_v1, %v2085_v27  ;;  %v987_v1 = vsel %vm838_vm2, %v986_v8, %v961_v48  ;;  %v1694_v48 = vrot.slane %v1005_v40, 4  ;;  %v2119_v27 = vsub.f32 %v8940_v17, %v9023_v29 }
 0x4d4   :  { %v993_v63 = vperm.slane %v987_v1, %v8316_v59 }
 0x4d5   :  { %v2128_v2 = vmul.f32 1.442695, %v2113_v22 }
 0x4d6   :  { %v9030_v50 = vpop.eup %7760  ;;  %v1689_v51 = vsel %vm838_vm2, %v1004_v23, %v993_v63 }
 0x4d7   :  { %v2164_v10 = vsel %vm2073_vm6, %v9030_v50, 0.0  ;;  %v1693_v29 = vperm.slane %v1689_v51, %v8293_v11 }
 0x4d8   :  { %2165 = vadd.xlane.f32.xlu1 %v2164_v10 }
 0x4d9   :  { %v2106_v6 = vpop.xlane.xlu0 %2105  ;;  %v2076_v18 = vpop.xlane.xlu1 %2075 }
 0x4da   :  { %v2120_v62 = vsub.f32 %v8965_v42, %v2106_v6  ;;  %v2110_v0 = vsub.f32 %v8957_v14, %v2076_v18  ;;  %v974_v42 = vrot.slane %v969_v34, 4  ;;  %v2097_v14 = vpop.xlane.xlu2 %2096 }
 0x4db   :  { %v2117_v52 = vsub.f32 %v8961_v24, %v2097_v14 }
 0x4dc   :  { %v2142_v19 = vmul.f32 1.442695, %v2120_v62  ;;  %v2122_v53 = vmul.f32 1.442695, %v2110_v0  ;;  %v975_v26 = vsel %vm838_vm2, %v974_v42, %v957_v61  ;;  %v2140_v62 = vmul.f32 1.442695, %v2119_v27 }
 0x4dd   :  { %v981_v24 = vperm.slane %v975_v26, %v8316_v59  ;;  %v2136_v20 = vmul.f32 1.442695, %v2117_v52  ;;  %v1714_v42 = vrot.slane %v1693_v29, 4 }
 0x4de   :  { %7762 = vpow2.f32 %v2142_v19 }
 0x4df   :  { %7764 = vpow2.f32 %v2122_v53  ;;  %v998_v25 = vrot.slane %v981_v24, 4 }
 0x4e0   :  { %7766 = vpow2.f32 %v2128_v2 }
 0x4e1   :  { %v2079_v43 = vpop.xlane.xlu0 %2078  ;;  %v2088_v39 = vpop.xlane.xlu1 %2087  ;;  %v999_v18 = vsel %vm838_vm2, 0.0, %v998_v25 }
 0x4e2   :  { %v2111_v58 = vsub.f32 %v8979_v54, %v2079_v43  ;;  %v2114_v37 = vsub.f32 %v8975_v55, %v2088_v39  ;;  %v1000_v54 = vrot.slane %v985_v4, 4  ;;  %v1002_v55 = vrot.slane %v993_v63, 4  ;;  %v813_v13 = vpop.permute.xlu2 %812 }
 0x4e3   :  { %v1132_v12 = vrot.slane %v813_v13, 4 }
 0x4e4   :  { %v9049_v28 = vpop.eup %7762  ;;  %v2124_v44 = vmul.f32 1.442695, %v2111_v58  ;;  %v2130_v15 = vmul.f32 1.442695, %v2114_v37  ;;  %v1001_v47 = vsel %vm838_vm2, 0.0, %v1000_v54  ;;  %v1678_v31 = vsel %vm838_vm2, %v1000_v54, %v981_v24 }
 0x4e5   :  { %v9052_v30 = vpop.eup %7764  ;;  %v2176_v60 = vsel %vm2073_vm6, %v9049_v28, 0.0  ;;  %v1683_v61 = vrot.slane %v1001_v47, 4  ;;  %v1003_v5 = vsel %vm838_vm2, 0.0, %v1002_v55  ;;  %v1682_v36 = vperm.slane %v1678_v31, %v8293_v11 }
 0x4e6   :  { %2177 = vadd.xlane.f32.xlu1 %v2176_v60  ;;  %v2146_v41 = vsel %vm2073_vm6, %v9052_v30, 0.0  ;;  %7768 = vpow2.f32 %v2124_v44  ;;  %v9064_v32 = vpop.eup %7766  ;;  %v1695_v0 = vsel %vm838_vm2, %v1694_v48, %v1003_v5 }
 0x4e7   :  { %2147 = vadd.xlane.f32.xlu2 %v2146_v41  ;;  %7770 = vpow2.f32 %v2136_v20  ;;  %v2155_v6 = vsel %vm2073_vm6, %v9064_v32, 0.0  ;;  %v1684_v17 = vsel %vm838_vm2, %v1683_v61, %v999_v18  ;;  %v1699_v34 = vperm.slane %v1695_v0, %v8293_v11 }
 0x4e8   :  { %7772 = vpow2.f32 %v2130_v15  ;;  %v1688_v53 = vperm.slane %v1684_v17, %v8293_v11  ;;  %v1702_v22 = vrot.slane %v1682_v36, 4 }
 0x4e9   :  { %7774 = vpow2.f32 %v2140_v62  ;;  %v1715_v52 = vsel %vm838_vm2, %v1699_v34, %v1714_v42  ;;  %v1712_v24 = vrot.slane %v1699_v34, 4 }
 0x4ea   :  { %v1703_v1 = vsel %vm838_vm2, %v1688_v53, %v1702_v22  ;;  %v1700_v63 = vrot.slane %v1688_v53, 4  ;;  %v1723_v41 = vperm.slane %v1715_v52, %v8316_v59 }
 0x4eb   :  { %v1711_v23 = vperm.slane %v1703_v1, %v8316_v59 }
 0x4ec   :  { %v9067_v9 = vpop.eup %7768  ;;  %v1701_v27 = vsel %vm838_vm2, %v1700_v63, %v1682_v36  ;;  %v1728_v62 = vrot.slane %v1723_v41, 4 }
 0x4ed   :  { %v2149_v10 = vsel %vm2073_vm6, %v9067_v9, 0.0  ;;  %v9082_v33 = vpop.eup %7770  ;;  %v1730_v17 = vrot.slane %v1711_v23, 4  ;;  %v1707_v22 = vperm.slane %v1701_v27, %v8316_v59 }
 0x4ee   :  { %2150 = vadd.xlane.f32.xlu0 %v2149_v10  ;;  %v9084_v45 = vpop.eup %7772  ;;  %v2167_v14 = vsel %vm2073_vm6, %v9082_v33, 0.0 }
 0x4ef   :  { %2156 = vadd.xlane.f32.xlu2 %v2155_v6  ;;  %v2158_v2 = vsel %vm2073_vm6, %v9084_v45, 0.0  ;;  %v9101_v37 = vpop.eup %7774  ;;  %v1713_v6 = vsel %vm838_vm2, %v1712_v24, %v1693_v29  ;;  %v1726_v24 = vrot.slane %v1707_v22, 4 }
 0x4f0   :  { %v2173_v25 = vsel %vm2073_vm6, %v9101_v37, 0.0 }
 0x4f4   :  { %v822_v19 = vpop.permute.xlu0 %821 }
 0x4f5   :  { %v1118_v8 = vrot.slane %v822_v19, 4  ;;  %v1121_v7 = vsel %vm838_vm2, %v822_v19, %v1120_v56 }
 0x4f6   :  { %v1129_v4 = vperm.slane %v1121_v7, %v8293_v11  ;;  %2159 = vadd.xlane.f32.xlu0 %v2158_v2 }
 0x4f7   :  { %v1119_v43 = vsel %vm838_vm2, %v1118_v8, %v8252_v38  ;;  %2168 = vadd.xlane.f32.xlu2 %v2167_v14 }
 0x4f8   :  { %v1125_v39 = vperm.slane %v1119_v43, %v8293_v11  ;;  %v1156_v60 = vrot.slane %v1129_v4, 4 }
 0x4f9   :  { %v831_v58 = vpop.permute.xlu1 %830 }
 0x4fa   :  { %v1130_v44 = vrot.slane %v831_v58, 4  ;;  %v1133_v26 = vsel %vm838_vm2, %v831_v58, %v1132_v12  ;;  %v1144_v20 = vrot.slane %v1125_v39, 4 }
 0x4fb   :  { %v1141_v38 = vperm.slane %v1133_v26, %v8293_v11 }
 0x4fc   :  { %v1131_v54 = vsel %vm838_vm2, %v1130_v44, %v813_v13  ;;  %v1719_v13 = vperm.slane %v1713_v6, %v8316_v59 }
 0x4fd   :  { %v1137_v15 = vperm.slane %v1131_v54, %v8293_v11  ;;  %v1154_v47 = vrot.slane %v1141_v38, 4  ;;  %v1157_v55 = vsel %vm838_vm2, %v1141_v38, %v1156_v60  ;;  %v1729_v38 = vsel %vm838_vm2, %v1728_v62, %v1711_v23 }
 0x4fe   :  { %v1165_v40 = vperm.slane %v1157_v55, %v8316_v59  ;;  %2174 = vadd.xlane.f32.xlu0 %v2173_v25  ;;  %v1724_v44 = vrot.slane %v1719_v13, 4  ;;  %v1731_v54 = vsel %vm838_vm2, %v1723_v41, %v1730_v17  ;;  %v2224_v23 = vpack.c.bf16 %v1729_v38, %v1729_v38 }
 0x4ff   :  { %v1142_v31 = vrot.slane %v1137_v15, 4  ;;  %v1145_v61 = vsel %vm838_vm2, %v1137_v15, %v1144_v20  ;;  %v1155_v48 = vsel %vm838_vm2, %v1154_v47, %v1129_v4  ;;  %v2227_v27 = vpack.c.bf16 %v1731_v54, %v1731_v54 }
 0x500   :  { %v1153_v5 = vperm.slane %v1145_v61, %v8316_v59  ;;  %v1161_v51 = vperm.slane %v1155_v48, %v8316_v59  ;;  %v1172_v10 = vrot.slane %v1165_v40, 4  ;;  %v1725_v25 = vsel %vm838_vm2, %v1724_v44, %v1707_v22 }
 0x501   :  { %v1143_v18 = vsel %vm838_vm2, %v1142_v31, %v1125_v39 }
 0x502   :  { %v1149_v0 = vperm.slane %v1143_v18, %v8316_v59  ;;  %v1168_v56 = vrot.slane %v1153_v5, 4  ;;  %v1170_v19 = vrot.slane %v1161_v51, 4  ;;  %v1173_v53 = vsel %vm838_vm2, 0.0, %v1172_v10 }
 0x503   :  { %v1743_v34 = vsel %vm838_vm2, %v1172_v10, %v1161_v51  ;;  %v1748_v36 = vrot.slane %v1173_v53, 4  ;;  %v1727_v10 = vsel %vm838_vm2, %v1719_v13, %v1726_v24  ;;  %v2218_v18 = vpack.c.bf16 %v1725_v25, %v1725_v25 }
 0x504   :  { %v1166_v8 = vrot.slane %v1149_v0, 4  ;;  %v1169_v29 = vsel %vm838_vm2, 0.0, %v1168_v56  ;;  %v1171_v7 = vsel %vm838_vm2, 0.0, %v1170_v19  ;;  %v1732_v42 = vsel %vm838_vm2, %v1168_v56, %v1149_v0 }
 0x505   :  { %v1737_v2 = vrot.slane %v1169_v29, 4  ;;  %v1747_v14 = vperm.slane %v1743_v34, %v8293_v11  ;;  %v1749_v43 = vsel %vm838_vm2, %v1748_v36, %v1171_v7  ;;  %v1736_v4 = vperm.slane %v1732_v42, %v8293_v11 }
 0x506   :  { %v1167_v12 = vsel %vm838_vm2, 0.0, %v1166_v8  ;;  %v1753_v39 = vperm.slane %v1749_v43, %v8293_v11  ;;  %v2221_v34 = vpack.c.bf16 %v1727_v10, %v1727_v10  ;;  %v2330_v36 = vunpack.c.l.b16 %v2224_v23 }
 0x507   :  { %v1768_v58 = vrot.slane %v1747_v14, 4  ;;  %v1738_v1 = vsel %vm838_vm2, %v1737_v2, %v1167_v12  ;;  %v1756_v52 = vrot.slane %v1736_v4, 4  ;;  %v2374_v8 = vunpack.c.l.b16 %v2227_v27 }
 0x508   :  { %v1766_v26 = vrot.slane %v1753_v39, 4  ;;  %v1742_v60 = vperm.slane %v1738_v1, %v8293_v11  ;;  %v2241_v7 = vunpack.c.l.b16 %v2218_v18  ;;  %v2286_v12 = vunpack.c.l.b16 %v2221_v34 }
 0x509   :  { %v1769_v63 = vsel %vm838_vm2, %v1753_v39, %v1768_v58 }
 0x50a   :  { %v1757_v20 = vsel %vm838_vm2, %v1742_v60, %v1756_v52  ;;  %v1777_v15 = vperm.slane %v1769_v63, %v8316_v59  ;;  %v1754_v47 = vrot.slane %v1742_v60, 4  ;;  %v1767_v55 = vsel %vm838_vm2, %v1766_v26, %v1747_v14 }
 0x50b   :  { %v1765_v40 = vperm.slane %v1757_v20, %v8316_v59  ;;  %v1773_v31 = vperm.slane %v1767_v55, %v8316_v59 }
 0x50c   :  { %v1782_v61 = vrot.slane %v1777_v15, 4  ;;  %v1755_v48 = vsel %vm838_vm2, %v1754_v47, %v1736_v4 }
 0x50d   :  { %v1761_v41 = vperm.slane %v1755_v48, %v8316_v59  ;;  %v1778_v5 = vrot.slane %v1773_v31, 4  ;;  %v1784_v51 = vrot.slane %v1765_v40, 4 }
 0x50e   :  { %v1783_v6 = vsel %vm838_vm2, %v1782_v61, %v1765_v40 }
 0x50f   :  { %v2225_v62 = vpack.c.bf16 %v1783_v6, %v1783_v6  ;;  %v1779_v17 = vsel %vm838_vm2, %v1778_v5, %v1761_v41  ;;  %v1785_v0 = vsel %vm838_vm2, %v1777_v15, %v1784_v51  ;;  %v1780_v56 = vrot.slane %v1761_v41, 4 }
 0x510   :  { %v2219_v19 = vpack.c.bf16 %v1779_v17, %v1779_v17  ;;  %v2228_v53 = vpack.c.bf16 %v1785_v0, %v1785_v0 }
 0x511   :  { %v2331_v22 = vunpack.c.l.b16 %v2225_v62  ;;  %v1781_v29 = vsel %vm838_vm2, %v1773_v31, %v1780_v56 }
 0x512   :  { %v2242_v42 = vunpack.c.l.b16 %v2219_v19  ;;  %v2375_v13 = vunpack.c.l.b16 %v2228_v53  ;;  %v2222_v2 = vpack.c.bf16 %v1781_v29, %v1781_v29 }
 0x513   :  { %v2333_v14 = vpack.c.b16 %v2331_v22, %v2330_v36 }
 0x514   :  { %v2244_v43 = vpack.c.b16 %v2242_v42, %v2241_v7  ;;  %v2377_v4 = vpack.c.b16 %v2375_v13, %v2374_v8  ;;  %v2287_v39 = vunpack.c.l.b16 %v2222_v2 }
 0x515   :  { %2352 = vmatpush.bf16.msrb.mxu0 %v2333_v14 }
 0x516   :  { %2264 = vmatpush.bf16.msra.mxu2 %v2244_v43  ;;  %2396 = vmatpush.bf16.msrb.mxu1 %v2377_v4  ;;  %v2289_v58 = vpack.c.b16 %v2287_v39, %v2286_v12 }
 0x518   :  { %2308 = vmatpush.bf16.msrb.mxu3 %v2289_v58 }
 0x51b   :  { %v2082_v1 = vpop.xlane.xlu2 %2081 }
 0x51c   :  { %v2112_v52 = vsub.f32 %v8998_v16, %v2082_v1 }
 0x51e   :  { %v2126_v44 = vmul.f32 1.442695, %v2112_v52 }
 0x51f   :  { %v2091_v26 = vpop.xlane.xlu0 %2090 }
 0x520   :  { %v2115_v60 = vsub.f32 %v9004_v3, %v2091_v26  ;;  %7776 = vpow2.f32 %v2126_v44 }
 0x522   :  { %v2132_v38 = vmul.f32 1.442695, %v2115_v60 }
 0x524   :  { %7778 = vpow2.f32 %v2132_v38  ;;  %v2100_v63 = vpop.xlane.xlu1 %2099 }
 0x525   :  { %v2118_v54 = vsub.f32 %v9010_v49, %v2100_v63 }
 0x526   :  { %v9153_v24 = vpop.eup %7776 }
 0x527   :  { %v2138_v20 = vmul.f32 1.442695, %v2118_v54  ;;  %v2152_v15 = vsel %vm2073_vm6, %v9153_v24, 0.0 }
 0x528   :  { %2153 = vadd.xlane.f32.xlu2 %v2152_v15 }
 0x529   :  { %7780 = vpow2.f32 %v2138_v20 }
 0x52a   :  { %v9157_v47 = vpop.eup %7778 }
 0x52b   :  { %v2161_v16 = vsel %vm2073_vm6, %v9157_v47, 0.0 }
 0x52c   :  { %v2109_v3 = vpop.xlane.xlu1 %2108  ;;  %2162 = vadd.xlane.f32.xlu0 %v2161_v16 }
 0x52d   :  { %v2121_v55 = vsub.f32 %v9016_v57, %v2109_v3 }
 0x52f   :  { %v9162_v40 = vpop.eup %7780  ;;  %v2144_v49 = vmul.f32 1.442695, %v2121_v55 }
 0x530   :  { %v2170_v25 = vsel %vm2073_vm6, %v9162_v40, 0.0 }
 0x531   :  { %7782 = vpow2.f32 %v2144_v49  ;;  %2171 = vadd.xlane.f32.xlu1 %v2170_v25 }
 0x537   :  { %v9166_v31 = vpop.eup %7782 }
 0x538   :  { %v2179_v61 = vsel %vm2073_vm6, %v9166_v31, 0.0 }
 0x539   :  { %2180 = vadd.xlane.f32.xlu2 %v2179_v61 }
 0x54b   :  { %v2166_v48 = vpop.xlane.xlu1 %2165 }
 0x559   :  { %v2178_v10 = vpop.xlane.xlu1 %2177 }
 0x55a   :  { %v2148_v23 = vpop.xlane.xlu2 %2147 }
 0x55b   :  { %7784 = vrcp.f32 %v2148_v23 }
 0x561   :  { %v2151_v27 = vpop.xlane.xlu0 %2150  ;;  %v7785_v57 = vpop.eup %7784 }
 0x562   :  { %v2157_v41 = vpop.xlane.xlu2 %2156  ;;  %7786 = vrcp.f32 %v2151_v27  ;;  %v2194_v5 = vmul.f32 %v7785_v57, %v9052_v30 }
 0x563   :  { %7788 = vrcp.f32 %v2157_v41 }
 0x564   :  { %7790 = vrcp.f32 %v2166_v48  ;;  %v2206_v6 = vpack.c.bf16 %v2194_v5, %v2194_v5 }
 0x566   :  { %v2233_v53 = vunpack.c.l.b16 %v2206_v6 }
 0x568   :  { %v7787_v51 = vpop.eup %7786 }
 0x569   :  { %v2195_v18 = vmul.f32 %v7787_v51, %v9067_v9  ;;  %v2160_v62 = vpop.xlane.xlu0 %2159  ;;  %v7789_v0 = vpop.eup %7788 }
 0x56a   :  { %v2169_v17 = vpop.xlane.xlu2 %2168  ;;  %7792 = vrcp.f32 %v2160_v62  ;;  %v7791_v56 = vpop.eup %7790  ;;  %v2197_v36 = vmul.f32 %v7789_v0, %v9064_v32 }
 0x56b   :  { %v2207_v19 = vpack.c.bf16 %v2195_v18, %v2195_v18  ;;  %7794 = vrcp.f32 %v2169_v17  ;;  %v2200_v22 = vmul.f32 %v7791_v56, %v9030_v50 }
 0x56c   :  { %7796 = vrcp.f32 %v2178_v10  ;;  %v2209_v7 = vpack.c.bf16 %v2197_v36, %v2197_v36 }
 0x56d   :  { %v2234_v34 = vunpack.c.l.b16 %v2207_v19  ;;  %v2212_v2 = vpack.c.bf16 %v2200_v22, %v2200_v22 }
 0x56e   :  { %v2278_v12 = vunpack.c.l.b16 %v2209_v7 }
 0x56f   :  { %v2236_v30 = vpack.c.b16 %v2234_v34, %v2233_v53  ;;  %v2322_v39 = vunpack.c.l.b16 %v2212_v2 }
 0x570   :  { %v7793_v8 = vpop.eup %7792 }
 0x571   :  { %v7795_v29 = vpop.eup %7794  ;;  %v2198_v9 = vmul.f32 %v7793_v8, %v9084_v45  ;;  %v2175_v42 = vpop.xlane.xlu0 %2174  ;;  %6793 = vmatmul.msk.bf16.vlgmr.msra.gmra.mxu2 %vm2073_vm6, %v2236_v30 }
 0x572   :  { %v7797_v13 = vpop.eup %7796  ;;  %v2201_v14 = vmul.f32 %v7795_v29, %v9082_v33  ;;  %7798 = vrcp.f32 %v2175_v42 }
 0x573   :  { %v2210_v43 = vpack.c.bf16 %v2198_v9, %v2198_v9  ;;  %v2204_v32 = vmul.f32 %v7797_v13, %v9049_v28 }
 0x574   :  { %v2213_v4 = vpack.c.bf16 %v2201_v14, %v2201_v14 }
 0x575   :  { %v2279_v50 = vunpack.c.l.b16 %v2210_v43  ;;  %v2216_v45 = vpack.c.bf16 %v2204_v32, %v2204_v32 }
 0x576   :  { %v2323_v58 = vunpack.c.l.b16 %v2213_v4 }
 0x577   :  { %v2281_v1 = vpack.c.b16 %v2279_v50, %v2278_v12  ;;  %v2367_v60 = vunpack.c.l.b16 %v2216_v45 }
 0x578   :  { %v7799_v52 = vpop.eup %7798  ;;  %v2325_v44 = vpack.c.b16 %v2323_v58, %v2322_v39 }
 0x579   :  { %v2203_v26 = vmul.f32 %v7799_v52, %v9101_v37  ;;  %6795 = vmatmul.msk.bf16.vlgmr.msrb.gmra.mxu3 %vm2073_vm6, %v2281_v1 }
 0x57a   :  { %6797 = vmatmul.msk.bf16.vlgmr.msrb.gmra.mxu0 %vm2073_vm6, %v2325_v44 }
 0x57b   :  { %v2215_v33 = vpack.c.bf16 %v2203_v26, %v2203_v26 }
 0x57d   :  { %v2366_v38 = vunpack.c.l.b16 %v2215_v33 }
 0x57f   :  { %v2369_v63 = vpack.c.b16 %v2367_v60, %v2366_v38 }
 0x581   :  { %6799 = vmatmul.msk.bf16.vlgmr.msrb.gmra.mxu1 %vm2073_vm6, %v2369_v63 }
 0x59b   :  { %v2154_v28 = vpop.xlane.xlu2 %2153 }
 0x59c   :  { %7800 = vrcp.f32 %v2154_v28 }
 0x59f   :  { %v2163_v54 = vpop.xlane.xlu0 %2162 }
 0x5a0   :  { %7802 = vrcp.f32 %v2163_v54 }
 0x5a2   :  { %v7801_v20 = vpop.eup %7800 }
 0x5a3   :  { %v2196_v15 = vmul.f32 %v7801_v20, %v9153_v24 }
 0x5a4   :  { %v2172_v16 = vpop.xlane.xlu1 %2171 }
 0x5a5   :  { %7804 = vrcp.f32 %v2172_v16  ;;  %v2208_v37 = vpack.c.bf16 %v2196_v15, %v2196_v15 }
 0x5a6   :  { %v7803_v3 = vpop.eup %7802 }
 0x5a7   :  { %v2199_v55 = vmul.f32 %v7803_v3, %v9157_v47  ;;  %v2235_v49 = vunpack.c.l.b16 %v2208_v37 }
 0x5a9   :  { %v2211_v25 = vpack.c.bf16 %v2199_v55, %v2199_v55  ;;  %v2237_v61 = vpack.c.b16 %v2235_v49, %v2235_v49 }
 0x5ab   :  { %v7805_v23 = vpop.eup %7804  ;;  %v2280_v48 = vunpack.c.l.b16 %v2211_v25  ;;  %6794 = vmatmul.msk.bf16.gmra.mxu2 %vm2073_vm6, %v2237_v61 }
 0x5ac   :  { %v2181_v27 = vpop.xlane.xlu2 %2180  ;;  %v2202_v41 = vmul.f32 %v7805_v23, %v9162_v40 }
 0x5ad   :  { %7806 = vrcp.f32 %v2181_v27  ;;  %v2282_v57 = vpack.c.b16 %v2280_v48, %v2280_v48 }
 0x5ae   :  { %v2214_v5 = vpack.c.bf16 %v2202_v41, %v2202_v41 }
 0x5af   :  { %6796 = vmatmul.msk.bf16.gmra.mxu3 %vm2073_vm6, %v2282_v57 }
 0x5b0   :  { %v2324_v24 = vunpack.c.l.b16 %v2214_v5 }
 0x5b2   :  { %v2326_v51 = vpack.c.b16 %v2324_v24, %v2324_v24 }
 0x5b3   :  { %v7807_v10 = vpop.eup %7806 }
 0x5b4   :  { %6798 = vmatmul.msk.bf16.gmra.mxu0 %vm2073_vm6, %v2326_v51  ;;  %v2205_v47 = vmul.f32 %v7807_v10, %v9166_v31 }
 0x5b6   :  { %v2217_v6 = vpack.c.bf16 %v2205_v47, %v2205_v47 }
 0x5b8   :  { %v2368_v18 = vunpack.c.l.b16 %v2217_v6 }
 0x5ba   :  { %v2370_v62 = vpack.c.b16 %v2368_v18, %v2368_v18 }
 0x5bc   :  { %6800 = vmatmul.msk.bf16.gmra.mxu1 %vm2073_vm6, %v2370_v62 }
 0x5f4   :  { %v2266_v17 = vpop.f32.mrf.mxu2 }
 0x5f5   :  { %v2409_v0 = vrot.slane %v2266_v17, 4 }
 0x5f7   :  { %v2354_v40 = vpop.f32.mrf.mxu0 }
 0x5f8   :  { %v2407_v56 = vrot.slane %v2354_v40, 4  ;;  %v2410_v19 = vsel %vm838_vm2, %v2354_v40, %v2409_v0 }
 0x5f9   :  { %v2418_v34 = vperm.slane %v2410_v19, %v8293_v11 }
 0x5fa   :  { %v2408_v53 = vsel %vm838_vm2, %v2407_v56, %v2266_v17 }
 0x5fb   :  { %v2414_v30 = vperm.slane %v2408_v53, %v8293_v11  ;;  %v2445_v13 = vrot.slane %v2418_v34, 4 }
 0x5fc   :  { %v2268_v36 = vpop.f32.mrf.mxu2  ;;  %v2310_v22 = vpop.f32.mrf.mxu3 }
 0x5fd   :  { %v2465_v31 = vrot.slane %v2268_v36, 4  ;;  %v2421_v8 = vrot.slane %v2310_v22, 4  ;;  %v2433_v4 = vrot.slane %v2414_v30, 4 }
 0x5fe   :  { %v2398_v29 = vpop.f32.mrf.mxu1 }
 0x5ff   :  { %v2356_v7 = vpop.f32.mrf.mxu0  ;;  %v2419_v9 = vrot.slane %v2398_v29, 4  ;;  %v2422_v42 = vsel %vm838_vm2, %v2398_v29, %v2421_v8 }
 0x600   :  { %v2463_v2 = vrot.slane %v2356_v7, 4  ;;  %v2466_v14 = vsel %vm838_vm2, %v2356_v7, %v2465_v31  ;;  %v2430_v43 = vperm.slane %v2422_v42, %v8293_v11 }
 0x601   :  { %v2474_v32 = vperm.slane %v2466_v14, %v8293_v11  ;;  %v2420_v12 = vsel %vm838_vm2, %v2419_v9, %v2310_v22 }
 0x602   :  { %v2464_v50 = vsel %vm838_vm2, %v2463_v2, %v2268_v36  ;;  %v2426_v39 = vperm.slane %v2420_v12, %v8293_v11  ;;  %v2443_v58 = vrot.slane %v2430_v43, 4  ;;  %v2446_v1 = vsel %vm838_vm2, %v2430_v43, %v2445_v13 }
 0x603   :  { %v2470_v52 = vperm.slane %v2464_v50, %v8293_v11  ;;  %v2454_v44 = vperm.slane %v2446_v1, %v8316_v59  ;;  %v2501_v20 = vrot.slane %v2474_v32, 4 }
 0x604   :  { %v2431_v45 = vrot.slane %v2426_v39, 4  ;;  %v2434_v26 = vsel %vm838_vm2, %v2426_v39, %v2433_v4  ;;  %v2444_v33 = vsel %vm838_vm2, %v2443_v58, %v2418_v34  ;;  %v2312_v60 = vpop.f32.mrf.mxu3 }
 0x605   :  { %v2442_v38 = vperm.slane %v2434_v26, %v8316_v59  ;;  %v2450_v63 = vperm.slane %v2444_v33, %v8316_v59  ;;  %v2461_v28 = vrot.slane %v2454_v44, 4  ;;  %v2489_v54 = vrot.slane %v2470_v52, 4 }
 0x606   :  { %v2432_v15 = vsel %vm838_vm2, %v2431_v45, %v2414_v30  ;;  %v2477_v16 = vrot.slane %v2312_v60, 4  ;;  %v2400_v37 = vpop.f32.mrf.mxu1 }
 0x607   :  { %v2438_v3 = vperm.slane %v2432_v15, %v8316_v59  ;;  %v2457_v55 = vrot.slane %v2442_v38, 4  ;;  %v2459_v49 = vrot.slane %v2450_v63, 4  ;;  %v2462_v25 = vsel %vm838_vm2, 0.0, %v2461_v28 }
 0x608   :  { %v2586_v61 = vsel %vm838_vm2, %v2461_v28, %v2450_v63  ;;  %v2591_v23 = vrot.slane %v2462_v25, 4  ;;  %v2475_v48 = vrot.slane %v2400_v37, 4  ;;  %v2478_v27 = vsel %vm838_vm2, %v2400_v37, %v2477_v16 }
 0x609   :  { %v2455_v41 = vrot.slane %v2438_v3, 4  ;;  %v2458_v57 = vsel %vm838_vm2, 0.0, %v2457_v55  ;;  %v2460_v5 = vsel %vm838_vm2, 0.0, %v2459_v49  ;;  %v2590_v24 = vperm.slane %v2586_v61, %v8293_v11 }
 0x60a   :  { %v2580_v51 = vrot.slane %v2458_v57, 4  ;;  %v2476_v10 = vsel %vm838_vm2, %v2475_v48, %v2312_v60  ;;  %v2486_v47 = vperm.slane %v2478_v27, %v8293_v11  ;;  %v2575_v6 = vsel %vm838_vm2, %v2457_v55, %v2438_v3 }
 0x60b   :  { %v2482_v18 = vperm.slane %v2476_v10, %v8293_v11  ;;  %v2456_v62 = vsel %vm838_vm2, 0.0, %v2455_v41  ;;  %v2579_v17 = vperm.slane %v2575_v6, %v8293_v11  ;;  %v2592_v0 = vsel %vm838_vm2, %v2591_v23, %v2460_v5 }
 0x60c   :  { %v2499_v40 = vrot.slane %v2486_v47, 4  ;;  %v2502_v56 = vsel %vm838_vm2, %v2486_v47, %v2501_v20  ;;  %v2581_v19 = vsel %vm838_vm2, %v2580_v51, %v2456_v62  ;;  %v2596_v53 = vperm.slane %v2592_v0, %v8293_v11 }
 0x60d   :  { %v2487_v34 = vrot.slane %v2482_v18, 4  ;;  %v2490_v36 = vsel %vm838_vm2, %v2482_v18, %v2489_v54  ;;  %v2510_v22 = vperm.slane %v2502_v56, %v8316_v59  ;;  %v2585_v30 = vperm.slane %v2581_v19, %v8293_v11 }
 0x60e   :  { %v2498_v31 = vperm.slane %v2490_v36, %v8316_v59  ;;  %v2500_v8 = vsel %vm838_vm2, %v2499_v40, %v2474_v32  ;;  %v2599_v29 = vrot.slane %v2579_v17, 4  ;;  %v2611_v7 = vrot.slane %v2590_v24, 4 }
 0x60f   :  { %v2488_v9 = vsel %vm838_vm2, %v2487_v34, %v2470_v52  ;;  %v2506_v42 = vperm.slane %v2500_v8, %v8316_v59  ;;  %v2517_v13 = vrot.slane %v2510_v22, 4  ;;  %v2597_v43 = vrot.slane %v2585_v30, 4 }
 0x610   :  { %v2494_v2 = vperm.slane %v2488_v9, %v8316_v59  ;;  %v2513_v14 = vrot.slane %v2498_v31, 4  ;;  %v2612_v4 = vsel %vm838_vm2, %v2596_v53, %v2611_v7  ;;  %v2600_v32 = vsel %vm838_vm2, %v2585_v30, %v2599_v29 }
 0x611   :  { %v2515_v12 = vrot.slane %v2506_v42, 4  ;;  %v2518_v50 = vsel %vm838_vm2, 0.0, %v2517_v13  ;;  %v2640_v39 = vsel %vm838_vm2, %v2517_v13, %v2506_v42  ;;  %v2620_v33 = vperm.slane %v2612_v4, %v8316_v59 }
 0x612   :  { %v2514_v58 = vsel %vm838_vm2, 0.0, %v2513_v14  ;;  %v2644_v1 = vperm.slane %v2640_v39, %v8293_v11  ;;  %v2645_v52 = vrot.slane %v2518_v50, 4  ;;  %v2511_v44 = vrot.slane %v2494_v2, 4 }
 0x613   :  { %v2516_v45 = vsel %vm838_vm2, 0.0, %v2515_v12  ;;  %v2634_v26 = vrot.slane %v2514_v58, 4  ;;  %v2629_v38 = vsel %vm838_vm2, %v2513_v14, %v2494_v2  ;;  %v2608_v54 = vperm.slane %v2600_v32, %v8316_v59 }
 0x614   :  { %v2512_v60 = vsel %vm838_vm2, 0.0, %v2511_v44  ;;  %v2646_v63 = vsel %vm838_vm2, %v2645_v52, %v2516_v45  ;;  %v2665_v28 = vrot.slane %v2644_v1, 4  ;;  %v2633_v20 = vperm.slane %v2629_v38, %v8293_v11 }
 0x615   :  { %v2635_v15 = vsel %vm838_vm2, %v2634_v26, %v2512_v60  ;;  %v2650_v16 = vperm.slane %v2646_v63, %v8293_v11  ;;  %v2598_v3 = vsel %vm838_vm2, %v2597_v43, %v2579_v17  ;;  %v2609_v55 = vrot.slane %v2596_v53, 4 }
 0x616   :  { %v2639_v37 = vperm.slane %v2635_v15, %v8293_v11  ;;  %v2625_v49 = vrot.slane %v2620_v33, 4  ;;  %v2653_v25 = vrot.slane %v2633_v20, 4  ;;  %v2604_v23 = vperm.slane %v2598_v3, %v8316_v59 }
 0x617   :  { %v2666_v61 = vsel %vm838_vm2, %v2650_v16, %v2665_v28  ;;  %v2610_v41 = vsel %vm838_vm2, %v2609_v55, %v2590_v24  ;;  %v2663_v57 = vrot.slane %v2650_v16, 4  ;;  %v2627_v5 = vrot.slane %v2608_v54, 4 }
 0x618   :  { %v2674_v48 = vperm.slane %v2666_v61, %v8316_v59  ;;  %v2651_v27 = vrot.slane %v2639_v37, 4  ;;  %v2654_v51 = vsel %vm838_vm2, %v2639_v37, %v2653_v25  ;;  %v2616_v10 = vperm.slane %v2610_v41, %v8316_v59 }
 0x619   :  { %v2662_v47 = vperm.slane %v2654_v51, %v8316_v59  ;;  %v2664_v62 = vsel %vm838_vm2, %v2663_v57, %v2644_v1  ;;  %v2623_v0 = vrot.slane %v2604_v23, 4  ;;  %v2626_v24 = vsel %vm838_vm2, %v2625_v49, %v2608_v54 }
 0x61a   :  { %v2679_v6 = vrot.slane %v2674_v48, 4  ;;  %v2652_v18 = vsel %vm838_vm2, %v2651_v27, %v2633_v20  ;;  %v2621_v17 = vrot.slane %v2616_v10, 4  ;;  %v2670_v56 = vperm.slane %v2664_v62, %v8316_v59 }
 0x61b   :  { %v2658_v40 = vperm.slane %v2652_v18, %v8316_v59  ;;  %v2681_v53 = vrot.slane %v2662_v47, 4  ;;  %v2628_v31 = vsel %vm838_vm2, %v2620_v33, %v2627_v5  ;;  %v2624_v7 = vsel %vm838_vm2, %v2616_v10, %v2623_v0 }
 0x61c   :  { %v2680_v19 = vsel %vm838_vm2, %v2679_v6, %v2662_v47  ;;  %v2675_v36 = vrot.slane %v2670_v56, 4  ;;  %v9265_v30 = vsel %vm838_vm2, %v2621_v17, %v2604_v23 }
 0x61d   :  { %v7655_v34 = vpack.i.bf16 %v2680_v19, %v2626_v24  ;;  %v2677_v22 = vrot.slane %v2658_v40, 4  ;;  %v2682_v8 = vsel %vm838_vm2, %v2674_v48, %v2681_v53 }
 0x61e   :  { %v7660_v29 = vpack.i.bf16 %v2682_v8, %v2628_v31  ;;  %v9273_v42 = vsel %vm838_vm2, %v2675_v36, %v2658_v40 }
 0x61f   :  { %7656 = vrot.lane.b32.xlu1 %v7655_v34, %s8087_s13  ;;  %v2678_v9 = vsel %vm838_vm2, %v2670_v56, %v2677_v22 }
 0x620   :  { %v7650_v13 = vpack.i.bf16 %v2678_v9, %v2624_v7  ;;  %7661 = vrot.lane.b32.xlu2 %v7660_v29, %s8094_s6 }
 0x622   :  { %7651 = vrot.lane.b32.xlu0 %v7650_v13, %s8095_s27 }
 0x62e   :  { %v2271_v2 = vpop.f32.mrf.mxu2 }
 0x62f   :  { %v2521_v14 = vrot.slane %v2271_v2, 4 }
 0x631   :  { %v2359_v43 = vpop.f32.mrf.mxu0 }
 0x632   :  { %v2519_v4 = vrot.slane %v2359_v43, 4  ;;  %v2315_v12 = vpop.f32.mrf.mxu3  ;;  %v2522_v50 = vsel %vm838_vm2, %v2359_v43, %v2521_v14 }
 0x633   :  { %v2530_v58 = vperm.slane %v2522_v50, %v8293_v11  ;;  %v2533_v1 = vrot.slane %v2315_v12, 4 }
 0x634   :  { %v2520_v39 = vsel %vm838_vm2, %v2519_v4, %v2271_v2 }
 0x635   :  { %v2526_v52 = vperm.slane %v2520_v39, %v8293_v11  ;;  %v2557_v38 = vrot.slane %v2530_v58, 4 }
 0x636   :  { %v2273_v32 = vpop.f32.mrf.mxu2 }
 0x637   :  { %v2545_v54 = vrot.slane %v2526_v52, 4 }
 0x639   :  { %v2361_v44 = vpop.f32.mrf.mxu0  ;;  %v2403_v45 = vpop.f32.mrf.mxu1 }
 0x63a   :  { %v2531_v26 = vrot.slane %v2403_v45, 4  ;;  %v2534_v33 = vsel %vm838_vm2, %v2403_v45, %v2533_v1  ;;  %v2317_v60 = vpop.f32.mrf.mxu3 }
 0x63b   :  { %v2542_v63 = vperm.slane %v2534_v33, %v8293_v11  ;;  %v7429_v33 = vld [vmem:[#allocation7 + $0x30] sm:$0xff]  ;;  %v7428_v60 = vld [vmem:[#allocation7 + $0x28] sm:$0xff] }
 0x63c   :  { %v2532_v28 = vsel %vm838_vm2, %v2531_v26, %v2315_v12  ;;  %v7430_v26 = vld [vmem:[#allocation7 + $0x38] sm:$0xff] }
 0x63d   :  { %v2538_v20 = vperm.slane %v2532_v28, %v8293_v11  ;;  %v2555_v15 = vrot.slane %v2542_v63, 4  ;;  %v2558_v16 = vsel %vm838_vm2, %v2542_v63, %v2557_v38  ;;  %2850 = vmatpush.bf16.msrb.mxu2 %v7430_v26  ;;  %v7427_v38 = vld [vmem:[#allocation7 + $0x20] sm:$0xff]  ;;  %v7426_v63 = vld [vmem:[#allocation7 + $0x18] sm:$0xff]  ;;  %v7425_v28 = vld [vmem:[#allocation7 + $0x10] sm:$0xff] }
 0x63e   :  { %v2566_v37 = vperm.slane %v2558_v16, %v8316_v59 }
 0x63f   :  { %v2543_v3 = vrot.slane %v2538_v20, 4  ;;  %v2546_v55 = vsel %vm838_vm2, %v2538_v20, %v2545_v54  ;;  %v2556_v49 = vsel %vm838_vm2, %v2555_v15, %v2530_v58  ;;  %v7424_v54 = vld [vmem:[#allocation7 + $0x8] sm:$0xff]  ;;  %v7423_v20 = vld [vmem:[#allocation7] sm:$0xff] }
 0x640   :  { %v2554_v25 = vperm.slane %v2546_v55, %v8316_v59  ;;  %v2562_v61 = vperm.slane %v2556_v49, %v8316_v59  ;;  %v2573_v23 = vrot.slane %v2566_v37, 4 }
 0x641   :  { %v2544_v48 = vsel %vm838_vm2, %v2543_v3, %v2526_v52  ;;  %v2405_v27 = vpop.f32.mrf.mxu1  ;;  %2851 = vmatpush.bf16.msrb.mxu2 %v7429_v33 }
 0x642   :  { %v2550_v41 = vperm.slane %v2544_v48, %v8316_v59  ;;  %v2569_v57 = vrot.slane %v2554_v25, 4  ;;  %v2571_v5 = vrot.slane %v2562_v61, 4  ;;  %v2574_v51 = vsel %vm838_vm2, 0.0, %v2573_v23 }
 0x643   :  { %v2694_v10 = vsel %vm838_vm2, %v2573_v23, %v2562_v61  ;;  %v2699_v47 = vrot.slane %v2574_v51, 4 }
 0x644   :  { %v2570_v6 = vsel %vm838_vm2, 0.0, %v2569_v57  ;;  %v2572_v18 = vsel %vm838_vm2, 0.0, %v2571_v5  ;;  %v2698_v62 = vperm.slane %v2694_v10, %v8293_v11  ;;  %v2567_v17 = vrot.slane %v2550_v41, 4 }
 0x645   :  { %v2688_v0 = vrot.slane %v2570_v6, 4  ;;  %v2683_v40 = vsel %vm838_vm2, %v2569_v57, %v2550_v41  ;;  %v2700_v56 = vsel %vm838_vm2, %v2699_v47, %v2572_v18  ;;  %2852 = vmatpush.bf16.msrb.mxu2 %v7428_v60  ;;  %v6933_v60 = vld [vmem:[#allocation8 + $0xd0] sm:$0xf0] }
 0x646   :  { %v2568_v24 = vsel %vm838_vm2, 0.0, %v2567_v17  ;;  %v2687_v19 = vperm.slane %v2683_v40, %v8293_v11  ;;  %v2704_v53 = vperm.slane %v2700_v56, %v8293_v11  ;;  %v2719_v34 = vrot.slane %v2698_v62, 4  ;;  %v10679_v40 = vld [vmem:[#allocation17_spill] sm:$0xff] }
 0x647   :  { %v2689_v36 = vsel %vm838_vm2, %v2688_v0, %v2568_v24 }
 0x648   :  { %v2693_v22 = vperm.slane %v2689_v36, %v8293_v11  ;;  %v2707_v31 = vrot.slane %v2687_v19, 4  ;;  %v2720_v8 = vsel %vm838_vm2, %v2704_v53, %v2719_v34  ;;  %v2717_v29 = vrot.slane %v2704_v53, 4  ;;  %v10680_v53 = vld [vmem:[#allocation18_spill] sm:$0xff] }
 0x649   :  { %v2728_v7 = vperm.slane %v2720_v8, %v8316_v59  ;;  %2853 = vmatpush.bf16.msrb.mxu2 %v7427_v38  ;;  %v6939_v38 = vld [vmem:[#allocation8 + $0xc8] sm:$0xf] }
 0x64a   :  { %v2708_v9 = vsel %vm838_vm2, %v2693_v22, %v2707_v31  ;;  %v2705_v13 = vrot.slane %v2693_v22, 4  ;;  %v2718_v2 = vsel %vm838_vm2, %v2717_v29, %v2698_v62  ;;  %v10681_v31 = vld [vmem:[#allocation19_spill] sm:$0xff] }
 0x64b   :  { %v2716_v14 = vperm.slane %v2708_v9, %v8316_v59  ;;  %v2733_v43 = vrot.slane %v2728_v7, 4  ;;  %v2724_v4 = vperm.slane %v2718_v2, %v8316_v59  ;;  %v6947_v9 = vld [vmem:[#allocation8 + $0xe0] sm:$0xf]  ;;  %v7459_v2 = vld [vmem:[#allocation8 + $0xe4] sm:$0xf] }
 0x64c   :  { %v2706_v12 = vsel %vm838_vm2, %v2705_v13, %v2687_v19  ;;  %v7461_v13 = vld [vmem:[#allocation8 + $0xec] sm:$0xf0] }
 0x64d   :  { %v2734_v50 = vsel %vm838_vm2, %v2733_v43, %v2716_v14  ;;  %v2712_v39 = vperm.slane %v2706_v12, %v8316_v59  ;;  %v2729_v32 = vrot.slane %v2724_v4, 4  ;;  %v2735_v44 = vrot.slane %v2716_v14, 4  ;;  %2854 = vmatpush.bf16.msrb.mxu2 %v7426_v63  ;;  %v6949_v43 = vld [vmem:[#allocation8 + $0xf0] sm:$0xf0]  ;;  %v7462_v12 = vld [vmem:[#allocation8 + $0xf4] sm:$0xf0] }
 0x64e   :  { %2756 = vrot.lane.b32.xlu1 %v2734_v50, %s8087_s13  ;;  %v6948_v14 = vor.u32 %v7461_v13, %v6947_v9  ;;  %v6952_v50 = vor.u32 %v7459_v2, %v6949_v43  ;;  %v7458_v63 = vld [vmem:[#allocation8 + $0xd4] sm:$0xf0]  ;;  %v6885_v9 = vld [vmem:[#allocation8 + $0x70] sm:$0xf0]  ;;  %v6891_v13 = vld [vmem:[#allocation8 + $0x68] sm:$0xf] }
 0x64f   :  { %v2731_v58 = vrot.slane %v2712_v39, 4  ;;  %v2730_v52 = vsel %vm838_vm2, %v2729_v32, %v2712_v39  ;;  %v2736_v45 = vsel %vm838_vm2, %v2728_v7, %v2735_v44  ;;  %v7460_v32 = vld [vmem:[#allocation8 + $0xec] sm:$0xf]  ;;  %v7457_v44 = vld [vmem:[#allocation8 + $0xcc] sm:$0xf0] }
 0x650   :  { %3120 = vmatpush.bf16.msra.mxu3 %v6948_v14  ;;  %3138 = vmatpush.bf16.msra.mxu0 %v6952_v50  ;;  %v7446_v14 = vld [vmem:[#allocation8 + $0x74] sm:$0xf0]  ;;  %v7444_v43 = vld [vmem:[#allocation8 + $0x6c] sm:$0xf]  ;;  %v6867_v50 = vld [vmem:[#allocation8 + $0x40] sm:$0xf] }
 0x651   :  { %v2732_v1 = vsel %vm838_vm2, %v2724_v4, %v2731_v58  ;;  %2855 = vmatpush.bf16.msrb.mxu2 %v7425_v28  ;;  %v6955_v4 = vld [vmem:[#allocation8 + $0xe8] sm:$0xf]  ;;  %v6957_v58 = vld [vmem:[#allocation8 + $0xf8] sm:$0xf0] }
 0x652   :  { %2744 = vrot.lane.b32.xlu0 %v2732_v1, %s8095_s27  ;;  %v6956_v39 = vor.u32 %v7462_v12, %v6955_v4  ;;  %v6960_v1 = vor.u32 %v7460_v32, %v6957_v58  ;;  %v10682_v28 = vld [vmem:[#allocation16_spill] sm:$0xff] }
 0x653   :  { %v6893_v4 = vld [vmem:[#allocation8 + $0x78] sm:$0xf0] }
 0x654   :  { %3156 = vmatpush.bf16.msra.mxu1 %v6956_v39 }
 0x655   :  { %2856 = vmatpush.bf16.msrb.mxu2 %v7424_v54 }
 0x659   :  { %2857 = vmatpush.bf16.msrb.mxu2 %v7423_v20 }
 0x65a   :  { %2768 = vrot.lane.b32.xlu0 %v2736_v45, %s8094_s6  ;;  %v7455_v45 = vld [vmem:[#allocation8 + $0xc4] sm:$0xf] }
 0x65b   :  { %v6936_v20 = vor.u32 %v7455_v45, %v6933_v60  ;;  %v6875_v60 = vld [vmem:[#allocation8 + $0x48] sm:$0xf] }
 0x65d   :  { %3174 = vmatpush.bf16.msra.mxu2 %v6960_v1  ;;  %3139 = vmatpush.bf16.msra.mxu0 %v6936_v20  ;;  %v6892_v1 = vor.u32 %v7446_v14, %v6891_v13 }
 0x67a   :  { %v7662_v16 = vpop.permute.xlu2 %7661 }
 0x67b   :  { %v7664_v61 = vunpack.i.h.bf16 %v7662_v16  ;;  %v7663_v23 = vunpack.i.l.bf16 %v7662_v16  ;;  %v7456_v16 = vld [vmem:[#allocation8 + $0xcc] sm:$0xf] }
 0x691   :  { %v7657_v15 = vpop.permute.xlu1 %7656 }
 0x692   :  { %v7659_v49 = vunpack.i.h.bf16 %v7657_v15  ;;  %v7658_v25 = vunpack.i.l.bf16 %v7657_v15  ;;  %v6940_v15 = vor.u32 %v7458_v63, %v6939_v38  ;;  %v7442_v38 = vld [vmem:[#allocation8 + $0x54] sm:$0xf0]  ;;  %v7440_v63 = vld [vmem:[#allocation8 + $0x4c] sm:$0xf] }
 0x694   :  { %v7652_v37 = vpop.permute.xlu0 %7651  ;;  %3157 = vmatpush.bf16.msra.mxu1 %v6940_v15 }
 0x695   :  { %v7654_v3 = vunpack.i.h.bf16 %v7652_v37  ;;  %v7653_v55 = vunpack.i.l.bf16 %v7652_v37  ;;  %v6941_v37 = vld [vmem:[#allocation8 + $0xd8] sm:$0xf0] }
 0x697   :  { %v2773_v48 = vsel %vm1880_vm3, %v9265_v30, %v7653_v55  ;;  %v2774_v27 = vsel %vm1880_vm3, %v9273_v42, %v7654_v3  ;;  %v6915_v3 = vld [vmem:[#allocation8 + $0xa0] sm:$0xf]  ;;  %v6944_v55 = vor.u32 %v7456_v16, %v6941_v37 }
 0x698   :  { %v2777_v41 = vsel %vm2776_vm9, %v2773_v48, %v7658_v25  ;;  %v2778_v57 = vsel %vm2776_vm9, %v2774_v27, %v7659_v49  ;;  %v7453_v49 = vld [vmem:[#allocation8 + $0xac] sm:$0xf0]  ;;  %v7451_v25 = vld [vmem:[#allocation8 + $0xa4] sm:$0xf]  ;;  %v6851_v16 = vld [vmem:[#allocation8 + $0x20] sm:$0xf] }
 0x699   :  { %v2781_v5 = vsel %vm10641_vm10, %v2777_v41, %v7663_v23  ;;  %v2782_v51 = vsel %vm10641_vm10, %v2778_v57, %v7664_v61  ;;  %v6917_v61 = vld [vmem:[#allocation8 + $0xb0] sm:$0xf0]  ;;  %v6916_v48 = vor.u32 %v7453_v49, %v6915_v3  ;;  %v6923_v41 = vld [vmem:[#allocation8 + $0xa8] sm:$0xf]  ;;  %v7454_v57 = vld [vmem:[#allocation8 + $0xb4] sm:$0xf0]  ;;  %3175 = vmatpush.bf16.msra.mxu2 %v6944_v55  ;;  %v6876_v3 = vor.u32 %v7442_v38, %v6875_v60 }
 0x69a   :  { %v2784_v10 = vpack.c.bf16 %v2782_v51, %v2781_v5  ;;  %v6920_v27 = vor.u32 %v7451_v25, %v6917_v61  ;;  %v6924_v5 = vor.u32 %v7454_v57, %v6923_v41  ;;  %v7452_v51 = vld [vmem:[#allocation8 + $0xac] sm:$0xf]  ;;  %v7437_v55 = vld [vmem:[#allocation8 + $0x2c] sm:$0xf0]  ;;  %v7435_v49 = vld [vmem:[#allocation8 + $0x24] sm:$0xf] }
 0x69b   :  { %v6853_v25 = vld [vmem:[#allocation8 + $0x30] sm:$0xf0]  ;;  %v7438_v41 = vld [vmem:[#allocation8 + $0x34] sm:$0xf0]  ;;  %v7436_v57 = vld [vmem:[#allocation8 + $0x2c] sm:$0xf] }
 0x69c   :  { %2858 = vmatmul.bf16.vlgmr.msrb.gmra.mxu2 %v2784_v10  ;;  %v6925_v10 = vld [vmem:[#allocation8 + $0xb8] sm:$0xf0]  ;;  %3140 = vmatpush.bf16.msra.mxu0 %v6920_v27  ;;  %v6859_v27 = vld [vmem:[#allocation8 + $0x28] sm:$0xf] }
 0x69d   :  { %3158 = vmatpush.bf16.msra.mxu1 %v6924_v5  ;;  %v6861_v5 = vld [vmem:[#allocation8 + $0x38] sm:$0xf0] }
 0x6c0   :  { %v2757_v18 = vpop.permute.xlu1 %2756 }
 0x6c4   :  { %v2745_v47 = vpop.permute.xlu0 %2744 }
 0x6c5   :  { %v2775_v6 = vsel %vm1880_vm3, %v2730_v52, %v2745_v47  ;;  %v6931_v52 = vld [vmem:[#allocation8 + $0xc0] sm:$0xf] }
 0x6c6   :  { %v2779_v30 = vsel %vm2776_vm9, %v2775_v6, %v2757_v18  ;;  %v6932_v33 = vor.u32 %v7457_v44, %v6931_v52  ;;  %v6899_v47 = vld [vmem:[#allocation8 + $0x80] sm:$0xf]  ;;  %v6928_v6 = vor.u32 %v7452_v51, %v6925_v10  ;;  %v7449_v18 = vld [vmem:[#allocation8 + $0x8c] sm:$0xf0]  ;;  %v7439_v44 = vld [vmem:[#allocation8 + $0x44] sm:$0xf]  ;;  %v6852_v10 = vor.u32 %v7437_v55, %v6851_v16 }
 0x6c7   :  { %v7441_v52 = vld [vmem:[#allocation8 + $0x4c] sm:$0xf0] }
 0x6c8   :  { %3121 = vmatpush.bf16.msra.mxu3 %v6932_v33  ;;  %3176 = vmatpush.bf16.msra.mxu2 %v6928_v6  ;;  %v6869_v33 = vld [vmem:[#allocation8 + $0x50] sm:$0xf0]  ;;  %v6868_v15 = vor.u32 %v7441_v52, %v6867_v50  ;;  %v6856_v6 = vor.u32 %v7435_v49, %v6853_v25  ;;  %v7478_v25 = vld [vmem:[#allocation10 + $0x78] sm:$0xff] }
 0x6c9   :  { %v6872_v37 = vor.u32 %v7439_v44, %v6869_v33 }
 0x6cc   :  { %v2769_v62 = vpop.permute.xlu0 %2768  ;;  %3122 = vmatpush.bf16.msra.mxu3 %v6916_v48 }
 0x6cd   :  { %v2783_v17 = vsel %vm10641_vm10, %v2779_v30, %v2769_v62  ;;  %v7447_v62 = vld [vmem:[#allocation8 + $0x84] sm:$0xf]  ;;  %v6901_v30 = vld [vmem:[#allocation8 + $0x90] sm:$0xf0] }
 0x6ce   :  { %v2785_v42 = vpack.c.bf16 %v2783_v17, %v2783_v17  ;;  %v6900_v17 = vor.u32 %v7449_v18, %v6899_v47  ;;  %v6860_v18 = vor.u32 %v7438_v41, %v6859_v27 }
 0x6d0   :  { %2863 = vmatmul.bf16.gmra.mxu2 %v2785_v42  ;;  %v6907_v42 = vld [vmem:[#allocation8 + $0x88] sm:$0xf]  ;;  %3123 = vmatpush.bf16.msra.mxu3 %v6900_v17  ;;  %v7431_v17 = vld [vmem:[#allocation8 + $0x4] sm:$0xf] }
 0x71f   :  { %v2859_v0 = vpop.f32.mrf.mxu2 }
 0x720   :  { %v9332_v56 = vadd.f32 %v2859_v0, %v10679_v40  ;;  %v7450_v0 = vld [vmem:[#allocation8 + $0x94] sm:$0xf0]  ;;  %v7448_v40 = vld [vmem:[#allocation8 + $0x8c] sm:$0xf] }
 0x722   :  { %v2872_v24 = vmul.f32 %v9332_v56, %v9332_v56 }
 0x724   :  { %2875 = vadd.xlane.f32.xlu2 %v2872_v24  ;;  %v6904_v24 = vor.u32 %v7447_v62, %v6901_v30  ;;  %v6835_v62 = vld [vmem:[#allocation8] sm:$0xf]  ;;  %v7433_v30 = vld [vmem:[#allocation8 + $0xc] sm:$0xf0] }
 0x726   :  { %3141 = vmatpush.bf16.msra.mxu0 %v6904_v24  ;;  %v6843_v24 = vld [vmem:[#allocation8 + $0x8] sm:$0xf] }
 0x727   :  { %v2861_v19 = vpop.f32.mrf.mxu2 }
 0x728   :  { %v9337_v34 = vadd.f32 %v2861_v19, %v10680_v53  ;;  %v6908_v19 = vor.u32 %v7450_v0, %v6907_v42  ;;  %v6909_v53 = vld [vmem:[#allocation8 + $0x98] sm:$0xf0]  ;;  %v6864_v0 = vor.u32 %v7436_v57, %v6861_v5 }
 0x72a   :  { %v2873_v36 = vmul.f32 %v9337_v34, %v9337_v34  ;;  %3159 = vmatpush.bf16.msra.mxu1 %v6908_v19  ;;  %v7434_v19 = vld [vmem:[#allocation8 + $0x14] sm:$0xf0] }
 0x72c   :  { %2877 = vadd.xlane.f32.xlu1 %v2873_v36  ;;  %v6883_v36 = vld [vmem:[#allocation8 + $0x60] sm:$0xf] }
 0x72e   :  { %3160 = vmatpush.bf16.msra.mxu1 %v6892_v1 }
 0x732   :  { %3161 = vmatpush.bf16.msra.mxu1 %v6876_v3 }
 0x736   :  { %3162 = vmatpush.bf16.msra.mxu1 %v6860_v18 }
 0x753   :  { %v2864_v22 = vpop.f32.mrf.mxu2 }
 0x754   :  { %v9342_v8 = vadd.f32 %v2864_v22, %v10681_v31  ;;  %v7445_v22 = vld [vmem:[#allocation8 + $0x6c] sm:$0xf0] }
 0x755   :  { %v6884_v12 = vor.u32 %v7445_v22, %v6883_v36  ;;  %v6845_v36 = vld [vmem:[#allocation8 + $0x18] sm:$0xf0] }
 0x756   :  { %v2874_v29 = vmul.f32 %v9342_v8, %v9342_v8 }
 0x757   :  { %3124 = vmatpush.bf16.msra.mxu3 %v6884_v12 }
 0x758   :  { %2879 = vadd.xlane.f32.xlu0 %v2874_v29  ;;  %v6912_v29 = vor.u32 %v7448_v40, %v6909_v53  ;;  %v6837_v40 = vld [vmem:[#allocation8 + $0x10] sm:$0xf0]  ;;  %v7432_v53 = vld [vmem:[#allocation8 + $0xc] sm:$0xf] }
 0x75a   :  { %3177 = vmatpush.bf16.msra.mxu2 %v6912_v29  ;;  %v6836_v29 = vor.u32 %v7433_v30, %v6835_v62  ;;  %v7476_v62 = vld [vmem:[#allocation10 + $0x68] sm:$0xff] }
 0x75b   :  { %v2866_v7 = vpop.f32.mrf.mxu2  ;;  %3125 = vmatpush.bf16.msra.mxu3 %v6868_v15 }
 0x75c   :  { %v7443_v7 = vld [vmem:[#allocation8 + $0x64] sm:$0xf] }
 0x75d   :  { %v6888_v58 = vor.u32 %v7443_v7, %v6885_v9  ;;  %v6840_v7 = vor.u32 %v7431_v17, %v6837_v40  ;;  %v6844_v9 = vor.u32 %v7434_v19, %v6843_v24  ;;  %v7469_v17 = vld [vmem:[#allocation10 + $0x30] sm:$0xff]  ;;  %v7475_v24 = vld [vmem:[#allocation10 + $0x60] sm:$0xff] }
 0x75f   :  { %3142 = vmatpush.bf16.msra.mxu0 %v6888_v58  ;;  %3126 = vmatpush.bf16.msra.mxu3 %v6852_v10 }
 0x760   :  { %3163 = vmatpush.bf16.msra.mxu1 %v6844_v9 }
 0x763   :  { %3143 = vmatpush.bf16.msra.mxu0 %v6872_v37  ;;  %3127 = vmatpush.bf16.msra.mxu3 %v6836_v29 }
 0x767   :  { %3144 = vmatpush.bf16.msra.mxu0 %v6856_v6  ;;  %v7470_v6 = vld [vmem:[#allocation10 + $0x38] sm:$0xff] }
 0x768   :  { %3450 = vmatpush.bf16.msrb.mxu3 %v7470_v6 }
 0x76b   :  { %3145 = vmatpush.bf16.msra.mxu0 %v6840_v7  ;;  %v7474_v7 = vld [vmem:[#allocation10 + $0x58] sm:$0xff] }
 0x76c   :  { %3451 = vmatpush.bf16.msrb.mxu3 %v7469_v17  ;;  %v7471_v17 = vld [vmem:[#allocation10 + $0x40] sm:$0xff] }
 0x76f   :  { %3468 = vmatpush.bf16.msrb.mxu0 %v7478_v25  ;;  %v7465_v25 = vld [vmem:[#allocation10 + $0x10] sm:$0xff] }
 0x797   :  { %v2876_v26 = vpop.xlane.xlu2 %2875 }
 0x798   :  { %v2881_v54 = vmul.f32 %v2876_v26, %v10682_v28  ;;  %v6896_v26 = vor.u32 %v7444_v43, %v6893_v4 }
 0x79a   :  { %v9347_v23 = vadd.f32 1e-06, %v2881_v54  ;;  %v6877_v54 = vld [vmem:[#allocation8 + $0x58] sm:$0xf0]  ;;  %3178 = vmatpush.bf16.msra.mxu2 %v6896_v26 }
 0x79b   :  { %v6880_v48 = vor.u32 %v7440_v63, %v6877_v54 }
 0x79c   :  { %7808 = vrsqrt.f32 %v9347_v23  ;;  %vm2893_vm12 = vweird.f32 %v9347_v23 }
 0x79e   :  { %3179 = vmatpush.bf16.msra.mxu2 %v6880_v48 }
 0x79f   :  { %v2878_v31 = vpop.xlane.xlu1 %2877 }
 0x7a0   :  { %v2882_v2 = vmul.f32 %v2878_v31, %v10682_v28 }
 0x7a2   :  { %v9351_v39 = vpop.eup %7808  ;;  %v9353_v32 = vadd.f32 1e-06, %v2882_v2  ;;  %3180 = vmatpush.bf16.msra.mxu2 %v6864_v0  ;;  %v6848_v2 = vor.u32 %v7432_v53, %v6845_v36  ;;  %v7468_v53 = vld [vmem:[#allocation10 + $0x28] sm:$0xff] }
 0x7a3   :  { %v2888_v45 = vmul.f32 %v9351_v39, %v9347_v23  ;;  %vm2894_vm11 = vweird.f32 %v9351_v39  ;;  %v7742_v23 = vld [vmem:[%s10629_s5] ss:$0 sm:$0xff]  ;;  %3452 = vmatpush.bf16.msrb.mxu3 %v7468_v53 }
 0x7a4   :  { %7810 = vrsqrt.f32 %v9353_v32  ;;  %vm2895_vm13 = vmor %vm2893_vm12, %vm2894_vm11  ;;  %vm2903_vm15 = vweird.f32 %v9353_v32 }
 0x7a5   :  { %v2889_v20 = vmul.f32 %v9351_v39, %v2888_v45 }
 0x7a6   :  { %3181 = vmatpush.bf16.msra.mxu2 %v6848_v2 }
 0x7a7   :  { %v2890_v61 = vmul.f32 0.5, %v2889_v20 }
 0x7a9   :  { %v2891_v51 = vsub.f32 1.5, %v2890_v61 }
 0x7aa   :  { %v7811_v47 = vpop.eup %7810 }
 0x7ab   :  { %v2898_v42 = vmul.f32 %v7811_v47, %v9353_v32  ;;  %v2892_v22 = vmul.f32 %v9351_v39, %v2891_v51  ;;  %vm2904_vm14 = vweird.f32 %v7811_v47  ;;  %v7477_v51 = vld [vmem:[#allocation10 + $0x70] sm:$0xff] }
 0x7ac   :  { %vm2905_vm0 = vmor %vm2903_vm15, %vm2904_vm14  ;;  %3469 = vmatpush.bf16.msrb.mxu0 %v7477_v51 }
 0x7ad   :  { %v2899_v31 = vmul.f32 %v7811_v47, %v2898_v42  ;;  %v2896_v14 = vsel %vm2895_vm13, %v9351_v39, %v2892_v22 }
 0x7ae   :  { %v2917_v12 = vmul.f32 %v2896_v14, %v9332_v56 }
 0x7af   :  { %v2900_v13 = vmul.f32 0.5, %v2899_v31 }
 0x7b0   :  { %v2923_v39 = vmul.f32 %v7742_v23, %v2917_v12  ;;  %3470 = vmatpush.bf16.msrb.mxu0 %v7476_v62 }
 0x7b1   :  { %v2901_v43 = vsub.f32 1.5, %v2900_v13  ;;  %v7467_v13 = vld [vmem:[#allocation10 + $0x20] sm:$0xff] }
 0x7b2   :  { %3453 = vmatpush.bf16.msrb.mxu3 %v7467_v13 }
 0x7b3   :  { %v2902_v4 = vmul.f32 %v7811_v47, %v2901_v43 }
 0x7b4   :  { %3471 = vmatpush.bf16.msrb.mxu0 %v7475_v24  ;;  %v7464_v24 = vld [vmem:[#allocation10 + $0x8] sm:$0xff] }
 0x7b5   :  { %v2906_v50 = vsel %vm2905_vm0, %v7811_v47, %v2902_v4 }
 0x7b6   :  { %v2918_v58 = vmul.f32 %v2906_v50, %v9337_v34 }
 0x7b8   :  { %v2924_v1 = vmul.f32 %v7742_v23, %v2918_v58  ;;  %3472 = vmatpush.bf16.msrb.mxu0 %v7474_v7  ;;  %v7473_v58 = vld [vmem:[#allocation10 + $0x50] sm:$0xff] }
 0x7ba   :  { %v2926_v52 = vpack.c.bf16 %v2924_v1, %v2923_v39 }
 0x7bc   :  { %3128 = vmatmul.bf16.vlgmr.msra.gmra.mxu3 %v2926_v52  ;;  %3146 = vmatmul.bf16.vlgmr.msra.gmra.mxu0 %v2926_v52 }
 0x7bd   :  { %3164 = vmatmul.bf16.vlgmr.msra.gmra.mxu1 %v2926_v52  ;;  %3182 = vmatmul.bf16.vlgmr.msra.gmra.mxu2 %v2926_v52 }
 0x7be   :  { %3473 = vmatpush.bf16.msrb.mxu0 %v7473_v58 }
 0x7cb   :  { %v2880_v44 = vpop.xlane.xlu0 %2879 }
 0x7cc   :  { %v2883_v32 = vmul.f32 %v2880_v44, %v10682_v28  ;;  %v7466_v44 = vld [vmem:[#allocation10 + $0x18] sm:$0xff] }
 0x7cd   :  { %3454 = vmatpush.bf16.msrb.mxu3 %v7466_v44 }
 0x7ce   :  { %v2886_v45 = vadd.f32 1e-06, %v2883_v32 }
 0x7d0   :  { %7812 = vrsqrt.f32 %v2886_v45  ;;  %vm2913_vm11 = vweird.f32 %v2886_v45 }
 0x7d1   :  { %3455 = vmatpush.bf16.msrb.mxu3 %v7465_v25 }
 0x7d5   :  { %3456 = vmatpush.bf16.msrb.mxu3 %v7464_v24 }
 0x7d6   :  { %v7813_v26 = vpop.eup %7812 }
 0x7d7   :  { %v2908_v33 = vmul.f32 %v7813_v26, %v2886_v45  ;;  %vm2914_vm1 = vweird.f32 %v7813_v26 }
 0x7d8   :  { %vm2915_vm12 = vmor %vm2913_vm11, %vm2914_vm1 }
 0x7d9   :  { %v2909_v60 = vmul.f32 %v7813_v26, %v2908_v33 }
 0x7db   :  { %v2910_v38 = vmul.f32 0.5, %v2909_v60 }
 0x7dd   :  { %v2911_v63 = vsub.f32 1.5, %v2910_v38 }
 0x7df   :  { %v2912_v54 = vmul.f32 %v7813_v26, %v2911_v63 }
 0x7e1   :  { %v2916_v20 = vsel %vm2915_vm12, %v7813_v26, %v2912_v54 }
 0x7e2   :  { %v2919_v15 = vmul.f32 %v2916_v20, %v9342_v8 }
 0x7e4   :  { %v2925_v16 = vmul.f32 %v7742_v23, %v2919_v15 }
 0x7e6   :  { %v2927_v37 = vpack.c.bf16 %v2925_v16, %v2925_v16  ;;  %v7472_v16 = vld [vmem:[#allocation10 + $0x48] sm:$0xff] }
 0x7e7   :  { %3474 = vmatpush.bf16.msrb.mxu0 %v7472_v16 }
 0x7e8   :  { %3133 = vmatmul.bf16.gmra.mxu3 %v2927_v37  ;;  %3151 = vmatmul.bf16.gmra.mxu0 %v2927_v37 }
 0x7e9   :  { %3169 = vmatmul.bf16.gmra.mxu1 %v2927_v37  ;;  %3187 = vmatmul.bf16.gmra.mxu2 %v2927_v37 }
 0x7eb   :  { %3475 = vmatpush.bf16.msrb.mxu0 %v7471_v17 }
 0x839   :  { %v9372_v3 = vpop.f32.mrf.mxu0 }
 0x83a   :  { %v6962_v55 = vmul.f32 -1.442695, %v9372_v3  ;;  %v9396_v43 = vpop.f32.mrf.mxu1 }
 0x83c   :  { %7814 = vpow2.f32 %v6962_v55 }
 0x83f   :  { %v9375_v49 = vpop.f32.mrf.mxu3 }
 0x840   :  { %v6961_v61 = vmul.f32 -1.442695, %v9375_v49  ;;  %v3183_v52 = vpop.f32.mrf.mxu2 }
 0x841   :  { %v9378_v48 = vpop.f32.mrf.mxu0 }
 0x842   :  { %v7815_v27 = vpop.eup %7814  ;;  %7816 = vpow2.f32 %v6961_v61  ;;  %v6964_v41 = vmul.f32 -1.442695, %v9378_v48  ;;  %v3167_v62 = vpop.f32.mrf.mxu1 }
 0x843   :  { %v3211_v57 = vadd.f32 1.0, %v7815_v27 }
 0x844   :  { %7818 = vpow2.f32 %v6964_v41 }
 0x845   :  { %7820 = vrcp.f32 %v3211_v57  ;;  %v3242_v14 = vand.u32 2147483648, %v3211_v57  ;;  %vm3236_vm14 = vweird.f32 %v3211_v57  ;;  %v3240_v23 = vand.u32 2147483647, %v3211_v57 }
 0x847   :  { %v9381_v5 = vpop.f32.mrf.mxu3  ;;  %v3243_v45 = vor.u32 1.1754944e-38, %v3242_v14  ;;  %vm3241_vm1 = vcmp.eq.f32.partialorder %v3240_v23, 8.507059e+37 }
 0x848   :  { %v7817_v10 = vpop.eup %7816  ;;  %v6963_v47 = vmul.f32 -1.442695, %v9381_v5 }
 0x849   :  { %v9384_v18 = vadd.f32 1.0, %v7817_v10 }
 0x84a   :  { %v7819_v30 = vpop.eup %7818  ;;  %7822 = vpow2.f32 %v6963_v47 }
 0x84b   :  { %v7821_v42 = vpop.eup %7820  ;;  %7824 = vrcp.f32 %v9384_v18  ;;  %v9387_v40 = vadd.f32 1.0, %v7819_v30  ;;  %v3225_v26 = vand.u32 2147483647, %v9384_v18  ;;  %v3227_v38 = vand.u32 2147483648, %v9384_v18 }
 0x84c   :  { %v3232_v0 = vmul.f32 %v7821_v42, %v3211_v57  ;;  %vm3237_vm13 = vweird.f32 %v7821_v42  ;;  %vm3221_vm12 = vweird.f32 %v9384_v18 }
 0x84d   :  { %7826 = vrcp.f32 %v9387_v40  ;;  %vm9400_vm15 = vmor %vm3236_vm14, %vm3237_vm13  ;;  %v3272_v63 = vand.u32 2147483648, %v9387_v40  ;;  %v3270_v15 = vand.u32 2147483647, %v9387_v40  ;;  %vm9421_vm14 = vcmp.eq.f32.partialorder %v3225_v26, 8.507059e+37 }
 0x84e   :  { %v3233_v19 = vsub.f32 1.0, %v3232_v0  ;;  %v3228_v51 = vor.u32 1.1754944e-38, %v3227_v38 }
 0x84f   :  { %v3273_v10 = vor.u32 1.1754944e-38, %v3272_v63 }
 0x850   :  { %v7823_v36 = vpop.eup %7822  ;;  %v3234_v22 = vmul.f32 %v7821_v42, %v3233_v19 }
 0x851   :  { %v9390_v31 = vpop.eup %7824  ;;  %v9392_v29 = vadd.f32 1.0, %v7823_v36  ;;  %v3185_v36 = vpop.f32.mrf.mxu2 }
 0x852   :  { %v3217_v9 = vmul.f32 %v9390_v31, %v9384_v18  ;;  %v3235_v2 = vadd.f32 %v7821_v42, %v3234_v22  ;;  %vm3222_vm0 = vweird.f32 %v9390_v31 }
 0x853   :  { %7828 = vrcp.f32 %v9392_v29  ;;  %v7827_v4 = vpop.eup %7826  ;;  %vm9417_vm13 = vmor %vm3221_vm12, %vm3222_vm0  ;;  %vm3271_vm0 = vcmp.eq.f32.partialorder %v3270_v15, 8.507059e+37  ;;  %v3257_v30 = vand.u32 2147483648, %v9392_v29 }
 0x854   :  { %v3218_v12 = vsub.f32 1.0, %v3217_v9  ;;  %v3262_v50 = vmul.f32 %v7827_v4, %v9387_v40  ;;  %v3239_v32 = vsel %vm9400_vm15, %v7821_v42, %v3235_v2  ;;  %vm3267_vm11 = vweird.f32 %v7827_v4  ;;  %v7463_v2 = vld [vmem:[#allocation10] sm:$0xff] }
 0x855   :  { %v3244_v37 = vsel %vm3241_vm1, %v3243_v45, %v3239_v32  ;;  %vm3266_vm15 = vweird.f32 %v9387_v40  ;;  %v3255_v40 = vand.u32 2147483647, %v9392_v29  ;;  %3457 = vmatpush.bf16.msrb.mxu3 %v7463_v2 }
 0x856   :  { %v3219_v1 = vmul.f32 %v9390_v31, %v3218_v12  ;;  %v3263_v33 = vsub.f32 1.0, %v3262_v50  ;;  %vm3268_vm1 = vmor %vm3266_vm15, %vm3267_vm11  ;;  %v3307_v6 = vmul.f32 %v3244_v37, %v9372_v3  ;;  %vm3251_vm11 = vweird.f32 %v9392_v29 }
 0x857   :  { %vm3256_vm15 = vcmp.eq.f32.partialorder %v3255_v40, 8.507059e+37 }
 0x858   :  { %v3220_v60 = vadd.f32 %v9390_v31, %v3219_v1  ;;  %v3264_v20 = vmul.f32 %v7827_v4, %v3263_v33  ;;  %v3313_v22 = vmul.f32 %v3307_v6, %v3183_v52 }
 0x859   :  { %v7829_v54 = vpop.eup %7828 }
 0x85a   :  { %v3247_v55 = vmul.f32 %v7829_v54, %v9392_v29  ;;  %v3265_v41 = vadd.f32 %v7827_v4, %v3264_v20  ;;  %v3224_v57 = vsel %vm9417_vm13, %v9390_v31, %v3220_v60  ;;  %vm3252_vm12 = vweird.f32 %v7829_v54 }
 0x85b   :  { %v3229_v19 = vsel %vm9421_vm14, %v3228_v51, %v3224_v57  ;;  %vm3253_vm13 = vmor %vm3251_vm11, %vm3252_vm12  ;;  %v3258_v31 = vor.u32 1.1754944e-38, %v3257_v30 }
 0x85c   :  { %v3248_v47 = vsub.f32 1.0, %v3247_v55  ;;  %v3269_v18 = vsel %vm3268_vm1, %v7827_v4, %v3265_v41  ;;  %v3306_v9 = vmul.f32 %v3229_v19, %v9375_v49 }
 0x85d   :  { %v3274_v42 = vsel %vm3271_vm0, %v3273_v10, %v3269_v18 }
 0x85e   :  { %v3249_v0 = vmul.f32 %v7829_v54, %v3248_v47  ;;  %v3309_v53 = vmul.f32 %v3274_v42, %v9378_v48  ;;  %v3312_v50 = vmul.f32 %v3306_v9, %v9396_v43 }
 0x860   :  { %v3250_v3 = vadd.f32 %v7829_v54, %v3249_v0  ;;  %v3315_v7 = vmul.f32 %v3309_v53, %v3185_v36 }
 0x862   :  { %v3254_v13 = vsel %vm3253_vm13, %v7829_v54, %v3250_v3  ;;  %v3319_v4 = vpack.c.bf16 %v3315_v7, %v3313_v22 }
 0x863   :  { %v3259_v14 = vsel %vm3256_vm15, %v3258_v31, %v3254_v13 }
 0x864   :  { %v3308_v12 = vmul.f32 %v3259_v14, %v9381_v5  ;;  %3476 = vmatmul.bf16.vlgmr.msrb.gmra.mxu0 %v3319_v4 }
 0x865   :  { %v3152_v48 = vpop.f32.mrf.mxu0 }
 0x866   :  { %v6966_v23 = vmul.f32 -1.442695, %v3152_v48  ;;  %v3170_v29 = vpop.f32.mrf.mxu1  ;;  %v3314_v58 = vmul.f32 %v3308_v12, %v3167_v62 }
 0x868   :  { %7830 = vpow2.f32 %v6966_v23  ;;  %v3318_v39 = vpack.c.bf16 %v3314_v58, %v3312_v50  ;;  %v7118_v58 = vld [vmem:[#allocation5 + $0x168] sm:$0xf] }
 0x86a   :  { %3458 = vmatmul.bf16.vlgmr.msrb.gmra.mxu3 %v3318_v39  ;;  %v7501_v39 = vld [vmem:[#allocation5 + $0x170] sm:$0xf0] }
 0x86b   :  { %v3134_v49 = vpop.f32.mrf.mxu3 }
 0x86c   :  { %v6965_v1 = vmul.f32 -1.442695, %v3134_v49  ;;  %v3188_v52 = vpop.f32.mrf.mxu2 }
 0x86d   :  { %v3154_v44 = vpop.f32.mrf.mxu0 }
 0x86e   :  { %v7831_v32 = vpop.eup %7830  ;;  %7832 = vpow2.f32 %v6965_v1  ;;  %v3172_v45 = vpop.f32.mrf.mxu1  ;;  %v7120_v1 = vld [vmem:[#allocation5 + $0x174] sm:$0xf0]  ;;  %v7502_v44 = vld [vmem:[#allocation5 + $0x178] sm:$0xf0] }
 0x86f   :  { %v3215_v26 = vadd.f32 1.0, %v7831_v32 }
 0x871   :  { %7834 = vrcp.f32 %v3215_v26  ;;  %v3302_v20 = vand.u32 2147483648, %v3215_v26  ;;  %v3300_v16 = vand.u32 2147483647, %v3215_v26  ;;  %vm3296_vm1 = vweird.f32 %v3215_v26 }
 0x873   :  { %v3136_v5 = vpop.f32.mrf.mxu3  ;;  %v3303_v61 = vor.u32 1.1754944e-38, %v3302_v20  ;;  %vm3301_vm12 = vcmp.eq.f32.partialorder %v3300_v16, 8.507059e+37  ;;  %v7094_v16 = vld [vmem:[#allocation5 + $0x138] sm:$0xf] }
 0x874   :  { %v7833_v33 = vpop.eup %7832  ;;  %v3190_v60 = vpop.f32.mrf.mxu2  ;;  %v7497_v5 = vld [vmem:[#allocation5 + $0x154] sm:$0xf] }
 0x875   :  { %v3214_v38 = vadd.f32 1.0, %v7833_v33 }
 0x877   :  { %v7835_v63 = vpop.eup %7834  ;;  %7836 = vrcp.f32 %v3214_v38  ;;  %v3287_v51 = vand.u32 2147483648, %v3214_v38  ;;  %v3285_v6 = vand.u32 2147483647, %v3214_v38  ;;  %vm3281_vm13 = vweird.f32 %v3214_v38 }
 0x878   :  { %v3292_v43 = vmul.f32 %v7835_v63, %v3215_v26  ;;  %vm3297_vm14 = vweird.f32 %v7835_v63  ;;  %v7106_v26 = vld [vmem:[#allocation5 + $0x150] sm:$0xf] }
 0x879   :  { %vm3298_vm0 = vmor %vm3296_vm1, %vm3297_vm14  ;;  %v3288_v30 = vor.u32 1.1754944e-38, %v3287_v51  ;;  %vm3286_vm10 = vcmp.eq.f32.partialorder %v3285_v6, 8.507059e+37  ;;  %v7492_v6 = vld [vmem:[#allocation5 + $0x128] sm:$0xf0] }
 0x87a   :  { %v3293_v54 = vsub.f32 1.0, %v3292_v43  ;;  %v7499_v43 = vld [vmem:[#allocation5 + $0x160] sm:$0xf0] }
 0x87c   :  { %v3294_v15 = vmul.f32 %v7835_v63, %v3293_v54 }
 0x87d   :  { %v7837_v37 = vpop.eup %7836 }
 0x87e   :  { %v3295_v55 = vadd.f32 %v7835_v63, %v3294_v15  ;;  %v3277_v25 = vmul.f32 %v7837_v37, %v3214_v38  ;;  %vm3282_vm11 = vweird.f32 %v7837_v37  ;;  %v7108_v38 = vld [vmem:[#allocation5 + $0x15c] sm:$0xf0] }
 0x87f   :  { %vm3283_vm15 = vmor %vm3281_vm13, %vm3282_vm11  ;;  %v7111_v20 = vor.u32 %v7497_v5, %v7108_v38  ;;  %v7048_v5 = vld [vmem:[#allocation5 + $0xe4] sm:$0xf0]  ;;  %v7484_v38 = vld [vmem:[#allocation5 + $0xe8] sm:$0xf0] }
 0x880   :  { %v3299_v27 = vsel %vm3298_vm0, %v7835_v63, %v3295_v55  ;;  %v3278_v41 = vsub.f32 1.0, %v3277_v25  ;;  %v7114_v63 = vld [vmem:[#allocation5 + $0x158] sm:$0xf]  ;;  %v7494_v55 = vld [vmem:[#allocation5 + $0x13c] sm:$0xf] }
 0x881   :  { %v3304_v57 = vsel %vm3301_vm12, %v3303_v61, %v3299_v27  ;;  %v7115_v15 = vor.u32 %v7499_v43, %v7114_v63  ;;  %v7096_v61 = vld [vmem:[#allocation5 + $0x144] sm:$0xf0]  ;;  %v7102_v27 = vld [vmem:[#allocation5 + $0x140] sm:$0xf] }
 0x882   :  { %v3311_v10 = vmul.f32 %v3304_v57, %v3152_v48  ;;  %v3279_v47 = vmul.f32 %v7837_v37, %v3278_v41  ;;  %v7496_v41 = vld [vmem:[#allocation5 + $0x148] sm:$0xf0]  ;;  %v7099_v51 = vor.u32 %v7494_v55, %v7096_v61  ;;  %v7479_v55 = vld [vmem:[#allocation5 + $0xc4] sm:$0xf]  ;;  %v7036_v61 = vld [vmem:[#allocation5 + $0xcc] sm:$0xf0] }
 0x884   :  { %v3280_v18 = vadd.f32 %v7837_v37, %v3279_v47  ;;  %v3317_v62 = vmul.f32 %v3311_v10, %v3188_v52  ;;  %v7126_v52 = vld [vmem:[#allocation5 + $0x170] sm:$0xf]  ;;  %v7103_v10 = vor.u32 %v7496_v41, %v7102_v27  ;;  %v7082_v47 = vld [vmem:[#allocation5 + $0x120] sm:$0xf]  ;;  %v7042_v27 = vld [vmem:[#allocation5 + $0xc8] sm:$0xf] }
 0x885   :  { %v7127_v45 = vor.u32 %v7502_v44, %v7126_v52  ;;  %v7046_v44 = vld [vmem:[#allocation5 + $0xd8] sm:$0xf]  ;;  %v7481_v41 = vld [vmem:[#allocation5 + $0xd0] sm:$0xf0] }
 0x886   :  { %v3284_v17 = vsel %vm3283_vm15, %v7837_v37, %v3280_v18  ;;  %v3321_v42 = vpack.c.bf16 %v3317_v62, %v3317_v62  ;;  %v7495_v37 = vld [vmem:[#allocation5 + $0x140] sm:$0xf0]  ;;  %v7084_v62 = vld [vmem:[#allocation5 + $0x12c] sm:$0xf0] }
 0x887   :  { %v3289_v0 = vsel %vm3286_vm10, %v3288_v30, %v3284_v17  ;;  %3744 = vmatpush.bf16.msra.mxu3 %v7127_v45  ;;  %v7095_v25 = vor.u32 %v7495_v37, %v7094_v16  ;;  %v7491_v18 = vld [vmem:[#allocation5 + $0x124] sm:$0xf]  ;;  %v7090_v30 = vld [vmem:[#allocation5 + $0x128] sm:$0xf]  ;;  %v7493_v17 = vld [vmem:[#allocation5 + $0x130] sm:$0xf0] }
 0x888   :  { %v3310_v40 = vmul.f32 %v3289_v0, %v3134_v49  ;;  %3481 = vmatmul.bf16.gmra.mxu0 %v3321_v42  ;;  %v7119_v49 = vor.u32 %v7501_v39, %v7118_v58  ;;  %v7083_v42 = vor.u32 %v7492_v6, %v7082_v47  ;;  %v7087_v0 = vor.u32 %v7491_v18, %v7084_v62  ;;  %v7060_v39 = vld [vmem:[#allocation5 + $0xfc] sm:$0xf0]  ;;  %v7480_v37 = vld [vmem:[#allocation5 + $0xc8] sm:$0xf0] }
 0x889   :  { %v7034_v16 = vld [vmem:[#allocation5 + $0xc0] sm:$0xf]  ;;  %v7039_v6 = vor.u32 %v7479_v55, %v7036_v61  ;;  %v7043_v18 = vor.u32 %v7481_v41, %v7042_v27 }
 0x88a   :  { %v3316_v24 = vmul.f32 %v3310_v40, %v3170_v29  ;;  %3708 = vmatpush.bf16.msrb.mxu1 %v7119_v49  ;;  %v7091_v40 = vor.u32 %v7493_v17, %v7090_v30  ;;  %v7487_v49 = vld [vmem:[#allocation5 + $0x100] sm:$0xf0]  ;;  %v7035_v47 = vor.u32 %v7480_v37, %v7034_v16 }
 0x88b   :  { %3745 = vmatpush.bf16.msra.mxu3 %v7115_v15 }
 0x88c   :  { %v3320_v19 = vpack.c.bf16 %v3316_v24, %v3316_v24  ;;  %v7070_v24 = vld [vmem:[#allocation5 + $0x108] sm:$0xf] }
 0x88e   :  { %3463 = vmatmul.bf16.gmra.mxu3 %v3320_v19  ;;  %v7489_v19 = vld [vmem:[#allocation5 + $0x110] sm:$0xf0] }
 0x88f   :  { %3746 = vmatpush.bf16.msra.mxu3 %v7103_v10 }
 0x893   :  { %3747 = vmatpush.bf16.msra.mxu3 %v7091_v40  ;;  %v7743_v40 = vld [vmem:[%s10628_s4 + $0x1] ss:$0 sm:$0xff] }
 0x8e1   :  { %v3477_v53 = vpop.f32.mrf.mxu0 }
 0x8e9   :  { %v3479_v7 = vpop.f32.mrf.mxu0 }
 0x8ed   :  { %v3459_v3 = vpop.f32.mrf.mxu3 }
 0x8ee   :  { %v3478_v36 = vadd.f32 %v3477_v53, %v3459_v3  ;;  %v7488_v53 = vld [vmem:[#allocation5 + $0x10c] sm:$0xf] }
 0x8f0   :  { %v9441_v22 = vadd.f32 %v3478_v36, %v9332_v56  ;;  %v7072_v36 = vld [vmem:[#allocation5 + $0x114] sm:$0xf0] }
 0x8f2   :  { %10689 = vst [vmem:[#allocation17_spill] sm:$0xff] %v9441_v22  ;;  %v3491_v31 = vmul.f32 %v9441_v22, %v9441_v22 }
 0x8f4   :  { %3494 = vadd.xlane.f32.xlu2 %v3491_v31  ;;  %v7078_v31 = vld [vmem:[#allocation5 + $0x110] sm:$0xf] }
 0x8f5   :  { %v3461_v9 = vpop.f32.mrf.mxu3 }
 0x8f6   :  { %v3480_v13 = vadd.f32 %v3479_v7, %v3461_v9  ;;  %v7490_v7 = vld [vmem:[#allocation5 + $0x118] sm:$0xf0] }
 0x8f8   :  { %v9446_v2 = vadd.f32 %v3480_v13, %v9337_v34  ;;  %v7500_v34 = vld [vmem:[#allocation5 + $0x16c] sm:$0xf]  ;;  %v7071_v13 = vor.u32 %v7489_v19, %v7070_v24 }
 0x8f9   :  { %v7123_v32 = vor.u32 %v7500_v34, %v7120_v1  ;;  %v7066_v34 = vld [vmem:[#allocation5 + $0xf8] sm:$0xf] }
 0x8fa   :  { %10690 = vst [vmem:[#allocation18_spill] sm:$0xff] %v9446_v2  ;;  %v3492_v14 = vmul.f32 %v9446_v2, %v9446_v2  ;;  %v7067_v45 = vor.u32 %v7487_v49, %v7066_v34 }
 0x8fb   :  { %3726 = vmatpush.bf16.msrb.mxu2 %v7123_v32 }
 0x8fc   :  { %3496 = vadd.xlane.f32.xlu1 %v3492_v14  ;;  %v7058_v14 = vld [vmem:[#allocation5 + $0xf0] sm:$0xf] }
 0x8ff   :  { %3727 = vmatpush.bf16.msrb.mxu2 %v7111_v20 }
 0x903   :  { %3728 = vmatpush.bf16.msrb.mxu2 %v7099_v51 }
 0x905   :  { %v3482_v4 = vpop.f32.mrf.mxu0 }
 0x907   :  { %3729 = vmatpush.bf16.msrb.mxu2 %v7087_v0 }
 0x90d   :  { %v3484_v12 = vpop.f32.mrf.mxu0 }
 0x911   :  { %v3464_v48 = vpop.f32.mrf.mxu3 }
 0x912   :  { %v3483_v23 = vadd.f32 %v3482_v4, %v3464_v48  ;;  %v7075_v48 = vor.u32 %v7488_v53, %v7072_v36 }
 0x914   :  { %v9451_v56 = vadd.f32 %v3483_v23, %v9342_v8  ;;  %v7498_v8 = vld [vmem:[#allocation5 + $0x158] sm:$0xf0]  ;;  %v7079_v23 = vor.u32 %v7490_v7, %v7078_v31  ;;  %3730 = vmatpush.bf16.msrb.mxu2 %v7075_v48 }
 0x915   :  { %v7107_v60 = vor.u32 %v7498_v8, %v7106_v26  ;;  %v7483_v26 = vld [vmem:[#allocation5 + $0xe0] sm:$0xf0]  ;;  %v7482_v8 = vld [vmem:[#allocation5 + $0xdc] sm:$0xf] }
 0x916   :  { %10691 = vst [vmem:[#allocation19_spill] sm:$0xff] %v9451_v56  ;;  %v3493_v29 = vmul.f32 %v9451_v56, %v9451_v56  ;;  %3748 = vmatpush.bf16.msra.mxu3 %v7079_v23  ;;  %v7047_v43 = vor.u32 %v7483_v26, %v7046_v44  ;;  %v7051_v20 = vor.u32 %v7482_v8, %v7048_v5 }
 0x917   :  { %3709 = vmatpush.bf16.msrb.mxu1 %v7107_v60  ;;  %v7054_v60 = vld [vmem:[#allocation5 + $0xe0] sm:$0xf] }
 0x918   :  { %3498 = vadd.xlane.f32.xlu2 %v3493_v29  ;;  %v7486_v29 = vld [vmem:[#allocation5 + $0xf8] sm:$0xf0]  ;;  %v7055_v15 = vor.u32 %v7484_v38, %v7054_v60 }
 0x919   :  { %v3466_v50 = vpop.f32.mrf.mxu3  ;;  %v7059_v52 = vor.u32 %v7486_v29, %v7058_v14 }
 0x91a   :  { %v7485_v50 = vld [vmem:[#allocation5 + $0xf4] sm:$0xf]  ;;  %3749 = vmatpush.bf16.msra.mxu3 %v7067_v45 }
 0x91b   :  { %3710 = vmatpush.bf16.msrb.mxu1 %v7095_v25  ;;  %v7063_v32 = vor.u32 %v7485_v50, %v7060_v39 }
 0x91d   :  { %3731 = vmatpush.bf16.msrb.mxu2 %v7063_v32 }
 0x91e   :  { %3750 = vmatpush.bf16.msra.mxu3 %v7055_v15 }
 0x91f   :  { %3711 = vmatpush.bf16.msrb.mxu1 %v7083_v42 }
 0x921   :  { %3732 = vmatpush.bf16.msrb.mxu2 %v7051_v20 }
 0x922   :  { %3751 = vmatpush.bf16.msra.mxu3 %v7043_v18 }
 0x923   :  { %3712 = vmatpush.bf16.msrb.mxu1 %v7071_v13 }
 0x925   :  { %3733 = vmatpush.bf16.msrb.mxu2 %v7039_v6 }
 0x927   :  { %3713 = vmatpush.bf16.msrb.mxu1 %v7059_v52 }
 0x92b   :  { %3714 = vmatpush.bf16.msrb.mxu1 %v7047_v43 }
 0x92f   :  { %3715 = vmatpush.bf16.msrb.mxu1 %v7035_v47 }
 0x967   :  { %v3495_v33 = vpop.xlane.xlu2 %3494 }
 0x968   :  { %v3500_v54 = vmul.f32 %v3495_v33, %v10682_v28 }
 0x96a   :  { %v9456_v57 = vadd.f32 1e-06, %v3500_v54 }
 0x96c   :  { %7838 = vrsqrt.f32 %v9456_v57  ;;  %vm3512_vm14 = vweird.f32 %v9456_v57 }
 0x96f   :  { %v3497_v3 = vpop.xlane.xlu1 %3496 }
 0x970   :  { %v3501_v9 = vmul.f32 %v3497_v3, %v10682_v28 }
 0x972   :  { %v9460_v4 = vpop.eup %7838  ;;  %v3504_v12 = vadd.f32 1e-06, %v3501_v9 }
 0x973   :  { %v3507_v58 = vmul.f32 %v9460_v4, %v9456_v57  ;;  %vm3513_vm10 = vweird.f32 %v9460_v4 }
 0x974   :  { %7840 = vrsqrt.f32 %v3504_v12  ;;  %vm3514_vm1 = vmor %vm3512_vm14, %vm3513_vm10  ;;  %vm3522_vm12 = vweird.f32 %v3504_v12 }
 0x975   :  { %v3508_v1 = vmul.f32 %v9460_v4, %v3507_v58 }
 0x977   :  { %v3509_v33 = vmul.f32 0.5, %v3508_v1 }
 0x979   :  { %v3510_v63 = vsub.f32 1.5, %v3509_v33 }
 0x97a   :  { %v7841_v54 = vpop.eup %7840 }
 0x97b   :  { %v3517_v25 = vmul.f32 %v7841_v54, %v3504_v12  ;;  %v3511_v51 = vmul.f32 %v9460_v4, %v3510_v63  ;;  %vm3523_vm0 = vweird.f32 %v7841_v54 }
 0x97c   :  { %vm3524_vm11 = vmor %vm3522_vm12, %vm3523_vm0 }
 0x97d   :  { %v3518_v10 = vmul.f32 %v7841_v54, %v3517_v25  ;;  %v3515_v30 = vsel %vm3514_vm1, %v9460_v4, %v3511_v51 }
 0x97e   :  { %v3536_v0 = vmul.f32 %v3515_v30, %v9441_v22 }
 0x97f   :  { %v3519_v62 = vmul.f32 0.5, %v3518_v10 }
 0x980   :  { %v3542_v19 = vmul.f32 %v7743_v40, %v3536_v0 }
 0x981   :  { %v3520_v17 = vsub.f32 1.5, %v3519_v62 }
 0x983   :  { %v3521_v42 = vmul.f32 %v7841_v54, %v3520_v17 }
 0x985   :  { %v3525_v24 = vsel %vm3524_vm11, %v7841_v54, %v3521_v42 }
 0x986   :  { %v3537_v57 = vmul.f32 %v3525_v24, %v9446_v2 }
 0x988   :  { %v3543_v53 = vmul.f32 %v7743_v40, %v3537_v57 }
 0x98a   :  { %v3545_v3 = vpack.c.bf16 %v3543_v53, %v3542_v19 }
 0x98b   :  { %v3499_v36 = vpop.xlane.xlu2 %3498 }
 0x98c   :  { %v3502_v31 = vmul.f32 %v3499_v36, %v10682_v28  ;;  %3716 = vmatmul.bf16.vlgmr.msrb.gmra.mxu1 %v3545_v3  ;;  %3734 = vmatmul.bf16.vlgmr.msrb.gmra.mxu2 %v3545_v3 }
 0x98d   :  { %3752 = vmatmul.bf16.vlgmr.msra.gmra.mxu3 %v3545_v3 }
 0x98e   :  { %v3505_v7 = vadd.f32 1e-06, %v3502_v31 }
 0x990   :  { %7842 = vrsqrt.f32 %v3505_v7  ;;  %vm3532_vm15 = vweird.f32 %v3505_v7 }
 0x996   :  { %v7843_v9 = vpop.eup %7842 }
 0x997   :  { %v3527_v13 = vmul.f32 %v7843_v9, %v3505_v7  ;;  %vm3533_vm13 = vweird.f32 %v7843_v9 }
 0x998   :  { %vm3534_vm10 = vmor %vm3532_vm15, %vm3533_vm13 }
 0x999   :  { %v3528_v14 = vmul.f32 %v7843_v9, %v3527_v13 }
 0x99b   :  { %v3529_v4 = vmul.f32 0.5, %v3528_v14 }
 0x99d   :  { %v3530_v12 = vsub.f32 1.5, %v3529_v4 }
 0x99f   :  { %v3531_v48 = vmul.f32 %v7843_v9, %v3530_v12 }
 0x9a1   :  { %v3535_v23 = vsel %vm3534_vm10, %v7843_v9, %v3531_v48 }
 0x9a2   :  { %v3538_v29 = vmul.f32 %v3535_v23, %v9451_v56 }
 0x9a4   :  { %v3544_v50 = vmul.f32 %v7743_v40, %v3538_v29 }
 0x9a6   :  { %v3546_v58 = vpack.c.bf16 %v3544_v50, %v3544_v50 }
 0x9a8   :  { %3721 = vmatmul.bf16.gmra.mxu1 %v3546_v58  ;;  %3739 = vmatmul.bf16.gmra.mxu2 %v3546_v58 }
 0x9a9   :  { %3757 = vmatmul.bf16.gmra.mxu3 %v3546_v58 }
 0xa09   :  { %v9476_v39 = vpop.f32.mrf.mxu1 }
 0xa0a   :  { %v3854_v50 = vrot.slane %v9476_v39, 4 }
 0xa0f   :  { %v9478_v34 = vpop.f32.mrf.mxu2 }
 0xa10   :  { %v9480_v49 = vpop.f32.mrf.mxu3 }
 0xa11   :  { %10692 = vst [vmem:[#allocation20_spill] sm:$0xff] %v9480_v49  ;;  %v9482_v1 = vpop.f32.mrf.mxu1 }
 0xa12   :  { %v7695_v63 = vpack.i.bf16 %v9482_v1, %v9476_v39 }
 0xa17   :  { %v9484_v52 = vpop.f32.mrf.mxu2 }
 0xa18   :  { %v9486_v44 = vpop.f32.mrf.mxu3  ;;  %v7690_v38 = vpack.i.bf16 %v9484_v52, %v9478_v34 }
 0xa25   :  { %v3722_v32 = vpop.f32.mrf.mxu1 }
 0xa26   :  { %v4190_v61 = vrot.slane %v3722_v32, 4 }
 0xa2b   :  { %v3740_v45 = vpop.f32.mrf.mxu2 }
 0xa2c   :  { %v9488_v26 = vpop.f32.mrf.mxu3  ;;  %v7685_v8 = vpack.i.bf16 %v3722_v32, %v3740_v45  ;;  %v4214_v10 = vrot.slane %v3740_v45, 4 }
 0xa2d   :  { %v3724_v5 = vpop.f32.mrf.mxu1  ;;  %v7715_v43 = vpack.i.bf16 %v9480_v49, %v9488_v26 }
 0xa2e   :  { %7686 = vrot.lane.b32.xlu2 %v7685_v8, %s8087_s13  ;;  %7671 = vrot.lane.b32.xlu1 %v7685_v8, %s8095_s27 }
 0xa2f   :  { %7666 = vrot.lane.b32.xlu0 %v7685_v8, %s8094_s6 }
 0xa33   :  { %v3742_v33 = vpop.f32.mrf.mxu2 }
 0xa34   :  { %v3760_v60 = vpop.f32.mrf.mxu3 }
 0xa35   :  { %v3878_v60 = vrot.slane %v9478_v34, 4 }
 0xa36   :  { %7691 = vrot.lane.b32.xlu2 %v7690_v38, %s8095_s27  ;;  %7696 = vrot.lane.b32.xlu1 %v7695_v63, %s8095_s27 }
 0xa37   :  { %7676 = vrot.lane.b32.xlu0 %v7690_v38, %s8094_s6 }
 0xa3e   :  { %7706 = vrot.lane.b32.xlu2 %v7695_v63, %s8087_s13  ;;  %7716 = vrot.lane.b32.xlu1 %v7715_v43, %s8087_s13 }
 0xa3f   :  { %7681 = vrot.lane.b32.xlu0 %v7695_v63, %s8094_s6 }
 0xa46   :  { %7711 = vrot.lane.b32.xlu2 %v7715_v43, %s8094_s6 }
 0xa47   :  { %7701 = vrot.lane.b32.xlu0 %v7690_v38, %s8087_s13  ;;  %v4022_v38 = vrot.slane %v9482_v1, 4 }
 0xa4f   :  { %7721 = vrot.lane.b32.xlu0 %v7715_v43, %s8095_s27 }
 0xa88   :  { %v7687_v54 = vpop.permute.xlu2 %7686 }
 0xa89   :  { %v7689_v15 = vunpack.i.h.bf16 %v7687_v54  ;;  %v7688_v16 = vunpack.i.l.bf16 %v7687_v54 }
 0xa8b   :  { %v4188_v37 = vrot.slane %v7689_v15, 4  ;;  %v4212_v55 = vrot.slane %v7688_v16, 4  ;;  %v4191_v30 = vsel %vm838_vm2, %v7689_v15, %v4190_v61  ;;  %v4215_v40 = vsel %vm838_vm2, %v7688_v16, %v4214_v10 }
 0xa8c   :  { %v4199_v48 = vperm.slane %v4191_v30, %v8293_v11  ;;  %v4223_v23 = vperm.slane %v4215_v40, %v8293_v11 }
 0xa8d   :  { %v4189_v47 = vsel %vm838_vm2, %v4188_v37, %v3722_v32  ;;  %v4213_v0 = vsel %vm838_vm2, %v4212_v55, %v3740_v45 }
 0xa8e   :  { %v4195_v19 = vperm.slane %v4189_v47, %v8293_v11  ;;  %v4219_v14 = vperm.slane %v4213_v0, %v8293_v11  ;;  %v4250_v54 = vrot.slane %v4199_v48, 4  ;;  %v4274_v15 = vrot.slane %v4223_v23, 4 }
 0xa90   :  { %v9508_v20 = vpop.permute.xlu2 %7691  ;;  %v4238_v45 = vrot.slane %v4195_v19, 4  ;;  %v4262_v63 = vrot.slane %v4219_v14, 4 }
 0xa98   :  { %v7707_v6 = vpop.permute.xlu2 %7706 }
 0xa99   :  { %v7709_v53 = vunpack.i.h.bf16 %v7707_v6  ;;  %v7708_v5 = vunpack.i.l.bf16 %v7707_v6 }
 0xa9b   :  { %v4020_v8 = vrot.slane %v7709_v53, 4  ;;  %v4023_v61 = vsel %vm838_vm2, %v7709_v53, %v4022_v38  ;;  %v3852_v10 = vrot.slane %v7708_v5, 4  ;;  %v3855_v47 = vsel %vm838_vm2, %v7708_v5, %v3854_v50 }
 0xaa0   :  { %v7672_v25 = vpop.permute.xlu1 %7671 }
 0xaa1   :  { %v7674_v27 = vunpack.i.h.bf16 %v7672_v25  ;;  %v7673_v41 = vunpack.i.l.bf16 %v7672_v25  ;;  %v7667_v51 = vpop.permute.xlu0 %7666  ;;  %v7694_v25 = vunpack.i.h.bf16 %v9508_v20 }
 0xaa2   :  { %v7669_v18 = vunpack.i.h.bf16 %v7667_v51  ;;  %v7668_v62 = vunpack.i.l.bf16 %v7667_v51  ;;  %v4021_v51 = vsel %vm838_vm2, %v4020_v8, %v9482_v1 }
 0xaa3   :  { %v4200_v17 = vrot.slane %v7674_v27, 4  ;;  %v4224_v42 = vrot.slane %v7673_v41, 4 }
 0xaa4   :  { %v4202_v24 = vrot.slane %v7669_v18, 4  ;;  %v4226_v57 = vrot.slane %v7668_v62, 4 }
 0xaa5   :  { %v4201_v3 = vsel %vm838_vm2, %v4200_v17, %v7669_v18  ;;  %v4225_v36 = vsel %vm838_vm2, %v4224_v42, %v7668_v62  ;;  %v7693_v42 = vunpack.i.l.bf16 %v9508_v20 }
 0xaa6   :  { %v4203_v31 = vsel %vm838_vm2, %v7674_v27, %v4202_v24  ;;  %v4207_v7 = vperm.slane %v4201_v3, %v8293_v11  ;;  %v4227_v9 = vsel %vm838_vm2, %v7673_v41, %v4226_v57  ;;  %v4231_v13 = vperm.slane %v4225_v36, %v8293_v11 }
 0xaa7   :  { %v4211_v4 = vperm.slane %v4203_v31, %v8293_v11  ;;  %v4235_v12 = vperm.slane %v4227_v9, %v8293_v11  ;;  %v4046_v24 = vrot.slane %v9484_v52, 4  ;;  %v9553_v57 = vperm.slane %v4023_v61, %v8293_v11  ;;  %v9564_v31 = vpop.permute.xlu2 %7711 }
 0xaa8   :  { %v4260_v29 = vrot.slane %v4231_v13, 4  ;;  %v4236_v58 = vrot.slane %v4207_v7, 4  ;;  %v4239_v16 = vsel %vm838_vm2, %v4207_v7, %v4238_v45  ;;  %v9533_v55 = vpop.permute.xlu1 %7696  ;;  %v4263_v41 = vsel %vm838_vm2, %v4231_v13, %v4262_v63 }
 0xaa9   :  { %v9527_v32 = vpop.permute.xlu0 %7676  ;;  %v4248_v33 = vrot.slane %v4211_v4, 4  ;;  %v4272_v43 = vrot.slane %v4235_v12, 4  ;;  %v4247_v18 = vperm.slane %v4239_v16, %v8316_v59  ;;  %v4251_v62 = vsel %vm838_vm2, %v4211_v4, %v4250_v54 }
 0xaaa   :  { %v4261_v37 = vsel %vm838_vm2, %v4260_v29, %v4219_v14  ;;  %v4237_v27 = vsel %vm838_vm2, %v4236_v58, %v4195_v19  ;;  %v4271_v40 = vperm.slane %v4263_v41, %v8316_v59  ;;  %v4275_v1 = vsel %vm838_vm2, %v4235_v12, %v4274_v15 }
 0xaab   :  { %v4249_v6 = vsel %vm838_vm2, %v4248_v33, %v4199_v48  ;;  %v4267_v30 = vperm.slane %v4261_v37, %v8316_v59  ;;  %v4273_v17 = vsel %vm838_vm2, %v4272_v43, %v4223_v23  ;;  %v4243_v0 = vperm.slane %v4237_v27, %v8316_v59 }
 0xaac   :  { %v9556_v19 = vperm.slane %v3855_v47, %v8293_v11  ;;  %v4255_v53 = vperm.slane %v4249_v6, %v8316_v59  ;;  %v9560_v3 = vperm.slane %v4021_v51, %v8293_v11  ;;  %v3853_v36 = vsel %vm838_vm2, %v3852_v10, %v9476_v39 }
 0xaad   :  { %v4259_v7 = vperm.slane %v4251_v62, %v8316_v59  ;;  %v4279_v9 = vperm.slane %v4273_v17, %v8316_v59  ;;  %v4302_v14 = vrot.slane %v9488_v26, 4  ;;  %v4290_v4 = vrot.slane %v4247_v18, 4 }
 0xaae   :  { %v4283_v12 = vperm.slane %v4275_v1, %v8316_v59  ;;  %v4284_v48 = vrot.slane %v4267_v30, 4  ;;  %v4056_v23 = vrot.slane %v7694_v25, 4  ;;  %v3888_v39 = vrot.slane %v7693_v42, 4 }
 0xaaf   :  { %v4286_v29 = vrot.slane %v4243_v0, 4  ;;  %v4288_v50 = vrot.slane %v4271_v40, 4  ;;  %v4082_v58 = vrot.slane %v9553_v57, 4  ;;  %v9578_v45 = vperm.slane %v3853_v36, %v8293_v11 }
 0xab0   :  { %v10642_v8 = vunpack.i.l.bf16 %v9564_v31  ;;  %v4294_v5 = vrot.slane %v4255_v53, 4  ;;  %v4070_v33 = vrot.slane %v9560_v3, 4  ;;  %v3914_v38 = vrot.slane %v9556_v19, 4  ;;  %v9583_v54 = vpop.permute.xlu1 %7716 }
 0xab1   :  { %v9568_v13 = vpop.permute.xlu0 %7681  ;;  %v4298_v63 = vrot.slane %v4259_v7, 4  ;;  %v4292_v43 = vrot.slane %v4279_v9, 4  ;;  %v9586_v15 = vsel %vm838_vm2, %v4284_v48, %v4243_v0  ;;  %v4291_v16 = vsel %vm838_vm2, %v4271_v40, %v4290_v4 }
 0xab2   :  { %v4296_v37 = vrot.slane %v4283_v12, 4  ;;  %v7679_v61 = vunpack.i.h.bf16 %v9527_v32  ;;  %v4287_v27 = vsel %vm838_vm2, %v4267_v30, %v4286_v29  ;;  %v9592_v41 = vsel %vm838_vm2, %v4288_v50, %v4247_v18 }
 0xab3   :  { %v7699_v51 = vunpack.i.h.bf16 %v9533_v55  ;;  %v7678_v10 = vunpack.i.l.bf16 %v9527_v32  ;;  %v3902_v47 = vrot.slane %v9578_v45, 4  ;;  %v9599_v6 = vrot.slane %v10642_v8, 4 }
 0xab4   :  { %v4295_v62 = vsel %vm838_vm2, %v4279_v9, %v4294_v5  ;;  %v7718_v17 = vunpack.i.l.bf16 %v9583_v54  ;;  %v9604_v0 = vsel %vm838_vm2, %v4292_v43, %v4255_v53  ;;  %v4299_v18 = vsel %vm838_vm2, %v4283_v12, %v4298_v63 }
 0xab5   :  { %v4592_v40 = vrot.slane %v4291_v16, 4  ;;  %v9609_v32 = vsel %vm838_vm2, %v4296_v37, %v4259_v7  ;;  %v4594_v36 = vrot.slane %v4287_v27, 4  ;;  %v4058_v4 = vrot.slane %v7679_v61, 4 }
 0xab6   :  { %v4032_v48 = vrot.slane %v7699_v51, 4  ;;  %v7698_v9 = vunpack.i.l.bf16 %v9533_v55  ;;  %v3890_v29 = vrot.slane %v7678_v10, 4  ;;  %v7684_v50 = vunpack.i.h.bf16 %v9568_v13 }
 0xab7   :  { %v4057_v5 = vsel %vm838_vm2, %v4056_v23, %v7679_v61  ;;  %v3889_v12 = vsel %vm838_vm2, %v3888_v39, %v7678_v10  ;;  %v4300_v63 = vrot.slane %v7718_v17, 4  ;;  %v7683_v43 = vunpack.i.l.bf16 %v9568_v13 }
 0xab8   :  { %v9618_v7 = vsel %vm838_vm2, %v4592_v40, %v4287_v27  ;;  %v4616_v8 = vrot.slane %v4299_v18, 4  ;;  %v4618_v55 = vrot.slane %v4295_v62, 4  ;;  %v4059_v30 = vsel %vm838_vm2, %v7694_v25, %v4058_v4 }
 0xab9   :  { %v7702_v53 = vpop.permute.xlu0 %7701  ;;  %v4033_v23 = vsel %vm838_vm2, %v4032_v48, %v7684_v50  ;;  %v3864_v39 = vrot.slane %v7698_v9, 4  ;;  %v9627_v10 = vperm.slane %v4057_v5, %v8293_v11  ;;  %v3891_v13 = vsel %vm838_vm2, %v7693_v42, %v3890_v29 }
 0xaba   :  { %v7704_v61 = vunpack.i.h.bf16 %v7702_v53  ;;  %v9633_v27 = vperm.slane %v3889_v12, %v8293_v11  ;;  %v4301_v40 = vsel %vm838_vm2, %v4300_v63, %v9488_v26  ;;  %v4034_v37 = vrot.slane %v7684_v50, 4 }
 0xabb   :  { %v3866_v1 = vrot.slane %v7683_v43, 4  ;;  %v7703_v25 = vunpack.i.l.bf16 %v7702_v53  ;;  %v9638_v4 = vsel %vm838_vm2, %v4291_v16, %v4594_v36  ;;  %v4067_v48 = vperm.slane %v4059_v30, %v8293_v11 }
 0xabc   :  { %v4039_v5 = vperm.slane %v4033_v23, %v8293_v11  ;;  %v3865_v20 = vsel %vm838_vm2, %v3864_v39, %v7683_v43  ;;  %v9644_v42 = vsel %vm838_vm2, %v4616_v8, %v4295_v62  ;;  %v9647_v29 = vsel %vm838_vm2, %v4299_v18, %v4618_v55 }
 0xabd   :  { %v3899_v12 = vperm.slane %v3891_v13, %v8293_v11  ;;  %v4044_v50 = vrot.slane %v7704_v61, 4  ;;  %v4092_v53 = vrot.slane %v9627_v10, 4  ;;  %v3924_v16 = vrot.slane %v9633_v27, 4 }
 0xabe   :  { %v4303_v30 = vsel %vm838_vm2, %v7718_v17, %v4302_v14  ;;  %v9656_v36 = vperm.slane %v4301_v40, %v8293_v11  ;;  %v4035_v8 = vsel %vm838_vm2, %v7699_v51, %v4034_v37  ;;  %v3867_v62 = vsel %vm838_vm2, %v7698_v9, %v3866_v1 }
 0xabf   :  { %v3871_v18 = vperm.slane %v3865_v20, %v8293_v11  ;;  %v3876_v63 = vrot.slane %v7703_v25, 4  ;;  %v4104_v43 = vrot.slane %v4067_v48, 4  ;;  %v4068_v55 = vrot.slane %v4039_v5, 4 }
 0xac0   :  { %v4047_v23 = vsel %vm838_vm2, %v7704_v61, %v4046_v24  ;;  %v3879_v26 = vsel %vm838_vm2, %v7703_v25, %v3878_v60  ;;  %v3936_v14 = vrot.slane %v3899_v12, 4  ;;  %v9668_v17 = vperm.slane %v4303_v30, %v8293_v11 }
 0xac1   :  { %v4071_v51 = vsel %vm838_vm2, %v4039_v5, %v4070_v33  ;;  %v4045_v1 = vsel %vm838_vm2, %v4044_v50, %v9484_v52  ;;  %v4043_v37 = vperm.slane %v4035_v8, %v8293_v11  ;;  %v3875_v24 = vperm.slane %v3867_v62, %v8293_v11 }
 0xac2   :  { %v4051_v61 = vperm.slane %v4045_v1, %v8293_v11  ;;  %v3903_v60 = vsel %vm838_vm2, %v3871_v18, %v3902_v47  ;;  %v4055_v39 = vperm.slane %v4047_v23, %v8293_v11  ;;  %v3877_v33 = vsel %vm838_vm2, %v3876_v63, %v9478_v34 }
 0xac3   :  { %v3887_v13 = vperm.slane %v3879_v26, %v8293_v11  ;;  %v4069_v52 = vsel %vm838_vm2, %v4068_v55, %v9560_v3  ;;  %v9689_v40 = vperm.slane %v4071_v51, %v8316_v59  ;;  %v3900_v25 = vrot.slane %v3871_v18, 4 }
 0xac4   :  { %v3883_v5 = vperm.slane %v3877_v33, %v8293_v11  ;;  %v4094_v20 = vrot.slane %v4051_v61, 4  ;;  %v4106_v50 = vrot.slane %v4055_v39, 4  ;;  %v4080_v8 = vrot.slane %v4043_v37, 4 }
 0xac5   :  { %v3937_v47 = vsel %vm838_vm2, %v3936_v14, %v3887_v13  ;;  %v3938_v30 = vrot.slane %v3887_v13, 4  ;;  %v4083_v34 = vsel %vm838_vm2, %v4043_v37, %v4082_v58  ;;  %v9697_v62 = vperm.slane %v3903_v60, %v8316_v59 }
 0xac6   :  { %v3926_v3 = vrot.slane %v3883_v5, 4  ;;  %v3912_v63 = vrot.slane %v3875_v24, 4  ;;  %v3915_v18 = vsel %vm838_vm2, %v3875_v24, %v3914_v38  ;;  %v4105_v23 = vsel %vm838_vm2, %v4104_v43, %v4055_v39 }
 0xac7   :  { %v3939_v55 = vsel %vm838_vm2, %v3899_v12, %v3938_v30  ;;  %v9705_v26 = vperm.slane %v4069_v52, %v8316_v59  ;;  %v3943_v58 = vperm.slane %v3937_v47, %v8316_v59  ;;  %v4091_v1 = vperm.slane %v4083_v34, %v8316_v59 }
 0xac8   :  { %v3927_v14 = vsel %vm838_vm2, %v9633_v27, %v3926_v3  ;;  %v3947_v51 = vperm.slane %v3939_v55, %v8316_v59  ;;  %v3901_v37 = vsel %vm838_vm2, %v3900_v25, %v9578_v45  ;;  %v4095_v38 = vsel %vm838_vm2, %v9627_v10, %v4094_v20 }
 0xac9   :  { %v4107_v12 = vsel %vm838_vm2, %v4067_v48, %v4106_v50  ;;  %v4081_v43 = vsel %vm838_vm2, %v4080_v8, %v9553_v57  ;;  %v3923_v24 = vperm.slane %v3915_v18, %v8316_v59  ;;  %v4111_v60 = vperm.slane %v4105_v23, %v8316_v59 }
 0xaca   :  { %v3960_v27 = vrot.slane %v3947_v51, 4  ;;  %v4122_v39 = vrot.slane %v9689_v40, 4  ;;  %v3913_v33 = vsel %vm838_vm2, %v3912_v63, %v9556_v19  ;;  %v9725_v45 = vperm.slane %v3927_v14, %v8316_v59 }
 0xacb   :  { %v4115_v13 = vperm.slane %v4107_v12, %v8316_v59  ;;  %v3907_v48 = vperm.slane %v3901_v37, %v8316_v59  ;;  %v3956_v52 = vrot.slane %v3943_v58, 4  ;;  %v9733_v25 = vperm.slane %v4095_v38, %v8316_v59 }
 0xacc   :  { %v9730_v57 = vsel %vm838_vm2, %v3960_v27, %v3923_v24  ;;  %v4087_v20 = vperm.slane %v4081_v43, %v8316_v59  ;;  %v3954_v50 = vrot.slane %v9697_v62, 4  ;;  %v3925_v19 = vsel %vm838_vm2, %v3924_v16, %v3883_v5 }
 0xacd   :  { %v4128_v47 = vrot.slane %v4115_v13, 4  ;;  %v4130_v30 = vrot.slane %v4091_v1, 4  ;;  %v3919_v8 = vperm.slane %v3913_v33, %v8316_v59  ;;  %v3962_v34 = vrot.slane %v3923_v24, 4 }
 0xace   :  { %v4124_v3 = vrot.slane %v4111_v60, 4  ;;  %v9741_v63 = vsel %vm838_vm2, %v9725_v45, %v3954_v50  ;;  %v4093_v18 = vsel %vm838_vm2, %v4092_v53, %v4051_v61  ;;  %v4380_v23 = vrot.slane %v9730_v57, 4 }
 0xacf   :  { %v9747_v55 = vsel %vm838_vm2, %v4128_v47, %v4091_v1  ;;  %v3931_v16 = vperm.slane %v3925_v19, %v8316_v59  ;;  %v9752_v5 = vsel %vm838_vm2, %v3956_v52, %v3919_v8  ;;  %v9755_v14 = vsel %vm838_vm2, %v3947_v51, %v3962_v34 }
 0xad0   :  { %v9759_v37 = vsel %vm838_vm2, %v9733_v25, %v4122_v39  ;;  %v9762_v10 = vsel %vm838_vm2, %v4115_v13, %v4130_v30  ;;  %v4381_v53 = vsel %vm838_vm2, %v4380_v23, %v9752_v5  ;;  %v4492_v61 = vrot.slane %v9747_v55, 4  ;;  %v9785_v30 = vpop.permute.xlu0 %7721 }
 0xad1   :  { %v10693_v1 = vrot.slane %v9586_v15, 4  ;;  %v4118_v51 = vrot.slane %v9705_v26, 4  ;;  %v4099_v12 = vperm.slane %v4093_v18, %v8316_v59  ;;  %v9774_v43 = vsel %vm838_vm2, %v4124_v3, %v4087_v20 }
 0xad2   :  { %v4368_v24 = vrot.slane %v9741_v63, 4  ;;  %v3950_v27 = vrot.slane %v3907_v48, 4  ;;  %v4392_v39 = vrot.slane %v9755_v14, 4  ;;  %v4480_v33 = vrot.slane %v9759_v37, 4 }
 0xad3   :  { %v4583_v38 = vsel %vm838_vm2, %v9592_v41, %v10693_v1  ;;  %v4493_v13 = vsel %vm838_vm2, %v4492_v61, %v9774_v43  ;;  %v3958_v52 = vrot.slane %v3919_v8, 4  ;;  %v3948_v50 = vrot.slane %v3931_v16, 4 }
 0xad4   :  { %v9782_v19 = vperm.slane %v4381_v53, %v8293_v11  ;;  %v4504_v47 = vrot.slane %v9762_v10, 4  ;;  %v4338_v34 = vrot.slane %v9668_v17, 4  ;;  %v4126_v3 = vrot.slane %v4087_v20, 4 }
 0xad5   :  { %v9789_v18 = vsel %vm838_vm2, %v3931_v16, %v3950_v27  ;;  %v9792_v23 = vperm.slane %v4493_v13, %v8293_v11  ;;  %v9795_v61 = vsel %vm838_vm2, %v3943_v58, %v3958_v52  ;;  %v4116_v8 = vrot.slane %v4099_v12, 4 }
 0xad6   :  { %v9798_v53 = vsel %vm838_vm2, %v4099_v12, %v4118_v51  ;;  %v4369_v1 = vsel %vm838_vm2, %v4368_v24, %v9789_v18  ;;  %v9803_v9 = vsel %vm838_vm2, %v4111_v60, %v4126_v3  ;;  %v4393_v20 = vsel %vm838_vm2, %v4392_v39, %v9795_v61 }
 0xad7   :  { %v4481_v16 = vsel %vm838_vm2, %v4480_v33, %v9798_v53  ;;  %v7723_v27 = vunpack.i.l.bf16 %v9785_v30  ;;  %v9811_v58 = vsel %vm838_vm2, %v3948_v50, %v3907_v48  ;;  %v3952_v51 = vrot.slane %v9725_v45, 4 }
 0xad8   :  { %v4430_v12 = vrot.slane %v9782_v19, 4  ;;  %v4505_v24 = vsel %vm838_vm2, %v4504_v47, %v9803_v9  ;;  %v9819_v13 = vperm.slane %v4369_v1, %v8293_v11  ;;  %v4542_v39 = vrot.slane %v9792_v23, 4 }
 0xad9   :  { %v4312_v33 = vrot.slane %v7723_v27, 4  ;;  %v9824_v52 = vsel %vm838_vm2, %v4116_v8, %v9705_v26  ;;  %v9828_v45 = vperm.slane %v4393_v20, %v8293_v11  ;;  %v9831_v50 = vperm.slane %v4481_v16, %v8293_v11 }
 0xada   :  { %v9836_v1 = vperm.slane %v4505_v24, %v8293_v11  ;;  %v10694_v60 = vunpack.i.l.bf16 %v9564_v31  ;;  %v4315_v16 = vsel %vm838_vm2, %v7723_v27, %v9599_v6  ;;  %v4603_v47 = vperm.slane %v9638_v4, %v8293_v11 }
 0xadb   :  { %v4431_v8 = vsel %vm838_vm2, %v9828_v45, %v4430_v12  ;;  %v10695_v12 = vrot.slane %v9656_v36, 4  ;;  %v10696_v4 = vrot.slane %v9604_v0, 4 }
 0xadc   :  { %v4313_v26 = vsel %vm838_vm2, %v4312_v33, %v10694_v60  ;;  %v4543_v28 = vsel %vm838_vm2, %v9836_v1, %v4542_v39  ;;  %v4323_v33 = vperm.slane %v4315_v16, %v8293_v11  ;;  %v9856_v6 = vperm.slane %v4431_v8, %v8316_v59 }
 0xadd   :  { %v4319_v48 = vperm.slane %v4313_v26, %v8293_v11  ;;  %v4591_v26 = vperm.slane %v4583_v38, %v8293_v11  ;;  %v9863_v24 = vperm.slane %v4543_v28, %v8316_v59  ;;  %v4607_v28 = vsel %vm838_vm2, %v9609_v32, %v10696_v4 }
 0xade   :  { %v4336_v60 = vrot.slane %v4323_v33, 4  ;;  %v4339_v38 = vsel %vm838_vm2, %v4323_v33, %v4338_v34  ;;  %v4640_v33 = vrot.slane %v4603_v47, 4 }
 0xadf   :  { %v4324_v20 = vrot.slane %v4319_v48, 4  ;;  %v4327_v16 = vsel %vm838_vm2, %v4319_v48, %v10695_v12  ;;  %v4615_v48 = vperm.slane %v4607_v28, %v8293_v11  ;;  %v4627_v12 = vperm.slane %v9647_v29, %v8293_v11 }
 0xae0   :  { %v4335_v27 = vperm.slane %v4327_v16, %v8316_v59  ;;  %v4642_v4 = vrot.slane %v4591_v26, 4  ;;  %v3953_v29 = vsel %vm838_vm2, %v3952_v51, %v9697_v62 }
 0xae1   :  { %v4325_v39 = vsel %vm838_vm2, %v4324_v20, %v9656_v36  ;;  %v4337_v20 = vsel %vm838_vm2, %v4336_v60, %v9668_v17  ;;  %v4347_v36 = vperm.slane %v4339_v38, %v8316_v59  ;;  %v4664_v56 = vrot.slane %v4627_v12, 4 }
 0xae2   :  { %v9871_v8 = vperm.slane %v4325_v39, %v8316_v59  ;;  %v4343_v39 = vperm.slane %v4337_v20, %v8316_v59  ;;  %v9887_v34 = vrot.slane %v4335_v27, 4  ;;  %v4666_v2 = vrot.slane %v4615_v48, 4 }
 0xae3   :  { %v4354_v3 = vrot.slane %v4347_v36, 4  ;;  %v4641_v38 = vsel %vm838_vm2, %v4640_v33, %v4591_v26  ;;  %v4665_v33 = vsel %vm838_vm2, %v4664_v56, %v4615_v48  ;;  %v4643_v49 = vsel %vm838_vm2, %v4603_v47, %v4642_v4 }
 0xae4   :  { %v9891_v17 = vsel %vm838_vm2, 0.0, %v9887_v34  ;;  %v4352_v60 = vrot.slane %v4343_v39, 4  ;;  %v4647_v36 = vperm.slane %v4641_v38, %v8316_v59  ;;  %v4671_v62 = vperm.slane %v4665_v33, %v8316_v59 }
 0xae5   :  { %v9897_v28 = vsel %vm838_vm2, 0.0, %v4354_v3  ;;  %v4811_v20 = vsel %vm838_vm2, %v4354_v3, %v4343_v39  ;;  %v4667_v27 = vsel %vm838_vm2, %v4627_v12, %v4666_v2  ;;  %v4651_v3 = vperm.slane %v4643_v49, %v8316_v59 }
 0xae6   :  { %v9903_v16 = vsel %vm838_vm2, 0.0, %v4352_v60  ;;  %v9906_v22 = vperm.slane %v4811_v20, %v8293_v11  ;;  %v4686_v51 = vrot.slane %v4647_v36, 4  ;;  %v4675_v39 = vperm.slane %v4667_v27, %v8316_v59 }
 0xae7   :  { %v10697_v60 = vrot.slane %v9733_v25, 4  ;;  %v4356_v20 = vrot.slane %v3953_v29, 4  ;;  %v4684_v26 = vrot.slane %v4671_v62, 4  ;;  %v4358_v48 = vrot.slane %v9811_v58, 4 }
 0xae8   :  { %v4687_v56 = vsel %vm838_vm2, %v4671_v62, %v4686_v51  ;;  %v10698_v33 = vrot.slane %v9789_v18, 4  ;;  %v4688_v49 = vrot.slane %v4675_v39, 4  ;;  %v4690_v12 = vrot.slane %v4651_v3, 4 }
 0xae9   :  { %v4121_v38 = vsel %vm838_vm2, %v10697_v60, %v9689_v40  ;;  %v4871_v47 = vpack.c.bf16 %v4687_v56, %v4687_v56  ;;  %v9927_v4 = vsel %vm838_vm2, %v4356_v20, %v9811_v58  ;;  %v4685_v40 = vsel %vm838_vm2, %v4684_v26, %v4647_v36 }
 0xaea   :  { %v4371_v2 = vsel %vm838_vm2, %v9741_v63, %v10698_v33  ;;  %v4359_v25 = vsel %vm838_vm2, %v3953_v29, %v4358_v48  ;;  %v10699_v62 = vrot.slane %v9752_v5, 4  ;;  %v4868_v51 = vpack.c.bf16 %v4685_v40, %v4685_v40 }
 0xaeb   :  { %v4379_v27 = vperm.slane %v4371_v2, %v8293_v11  ;;  %v4937_v63 = vunpack.c.l.b16 %v4871_v47  ;;  %v4689_v60 = vsel %vm838_vm2, %v4688_v49, %v4651_v3  ;;  %v4691_v56 = vsel %vm838_vm2, %v4675_v39, %v4690_v12 }
 0xaec   :  { %v4383_v18 = vsel %vm838_vm2, %v9730_v57, %v10699_v62  ;;  %v4874_v33 = vpack.c.bf16 %v4689_v60, %v4689_v60  ;;  %v4877_v58 = vpack.c.bf16 %v4691_v56, %v4691_v56  ;;  %v4367_v20 = vperm.slane %v4359_v25, %v8293_v11 }
 0xaed   :  { %v4391_v36 = vperm.slane %v4383_v18, %v8293_v11  ;;  %v4891_v29 = vunpack.c.l.b16 %v4868_v51  ;;  %v4939_v26 = vpack.c.b16 %v4937_v63, %v4937_v63  ;;  %v10700_v48 = vrot.slane %v9795_v61, 4 }
 0xaee   :  { %v4416_v57 = vrot.slane %v4379_v27, 4  ;;  %v4983_v2 = vunpack.c.l.b16 %v4874_v33  ;;  %v5029_v47 = vunpack.c.l.b16 %v4877_v58  ;;  %v4468_v49 = vrot.slane %v4121_v38, 4 }
 0xaef   :  { %v4395_v5 = vsel %vm838_vm2, %v9755_v14, %v10700_v48  ;;  %v4893_v39 = vpack.c.b16 %v4891_v29, %v4891_v29  ;;  %v4950_v12 = vsel %vm1880_vm3, %v4939_v26, 0  ;;  %v4470_v25 = vrot.slane %v9824_v52, 4 }
 0xaf0   :  { %v4403_v3 = vperm.slane %v4395_v5, %v8293_v11  ;;  %v4417_v40 = vsel %vm838_vm2, %v4416_v57, %v4367_v20  ;;  %4958 = vmatpush.bf16.xpose.msra.mxu1 %v4950_v12  ;;  %v4985_v62 = vpack.c.b16 %v4983_v2, %v4983_v2  ;;  %v5031_v18 = vpack.c.b16 %v5029_v47, %v5029_v47 }
 0xaf1   :  { %v4423_v61 = vperm.slane %v4417_v40, %v8316_v59  ;;  %v4904_v14 = vsel %vm1880_vm3, %v4893_v39, 0  ;;  %v9952_v63 = vsel %vm838_vm2, %v4468_v49, %v9824_v52  ;;  %v4471_v60 = vsel %vm838_vm2, %v4121_v38, %v4470_v25 }
 0xaf2   :  { %v4440_v51 = vrot.slane %v4403_v3, 4  ;;  %v10701_v56 = vrot.slane %v9798_v53, 4  ;;  %4912 = vmatpush.bf16.xpose.msra.mxu0 %v4904_v14  ;;  %v4996_v58 = vsel %vm1880_vm3, %v4985_v62, 0  ;;  %v5042_v29 = vsel %vm1880_vm3, %v5031_v18, 0 }
 0xaf3   :  { %v4479_v48 = vperm.slane %v4471_v60, %v8293_v11  ;;  %5004 = vmatpush.bf16.xpose.msra.mxu2 %v4996_v58  ;;  %5050 = vmatpush.bf16.xpose.msrb.mxu3 %v5042_v29  ;;  %v10702_v53 = vrot.slane %v9774_v43, 4  ;;  %v4462_v5 = vrot.slane %v4423_v61, 4  ;;  %v10703_v2 = vrot.slane %v9803_v9, 4 }
 0xaf4   :  { %v4483_v33 = vsel %vm838_vm2, %v9759_v37, %v10701_v56  ;;  %v4441_v26 = vsel %vm838_vm2, %v4440_v51, %v4391_v36  ;;  %v4418_v49 = vrot.slane %v4367_v20, 4  ;;  %v4442_v39 = vrot.slane %v4391_v36, 4 }
 0xaf5   :  { %v4447_v52 = vperm.slane %v4441_v26, %v8316_v59  ;;  %v4491_v38 = vperm.slane %v4483_v33, %v8293_v11  ;;  %v4495_v37 = vsel %vm838_vm2, %v9747_v55, %v10702_v53  ;;  %v4507_v47 = vsel %vm838_vm2, %v9762_v10, %v10703_v2 }
 0xaf6   :  { %v4503_v57 = vperm.slane %v4495_v37, %v8293_v11  ;;  %v4515_v40 = vperm.slane %v4507_v47, %v8293_v11  ;;  %v4419_v18 = vsel %vm838_vm2, %v4379_v27, %v4418_v49  ;;  %v4443_v55 = vsel %vm838_vm2, %v4403_v3, %v4442_v39 }
 0xaf7   :  { %v4460_v12 = vrot.slane %v4447_v52, 4  ;;  %v4528_v25 = vrot.slane %v4491_v38, 4  ;;  %v4463_v62 = vsel %vm838_vm2, %v4447_v52, %v4462_v5  ;;  %v4530_v51 = vrot.slane %v4479_v48, 4 }
 0xaf8   :  { %v4869_v43 = vpack.c.bf16 %v4463_v62, %v4463_v62  ;;  %v4552_v60 = vrot.slane %v4515_v40, 4  ;;  %v4427_v10 = vperm.slane %v4419_v18, %v8316_v59  ;;  %v4451_v33 = vperm.slane %v4443_v55, %v8316_v59 }
 0xaf9   :  { %v4461_v14 = vsel %vm838_vm2, %v4460_v12, %v4423_v61  ;;  %v4529_v9 = vsel %vm838_vm2, %v4528_v25, %v4479_v48  ;;  %v4531_v27 = vsel %vm838_vm2, %v4491_v38, %v4530_v51  ;;  %v4554_v29 = vrot.slane %v4503_v57, 4 }
 0xafa   :  { %v4535_v20 = vperm.slane %v4529_v9, %v8316_v59  ;;  %v4866_v36 = vpack.c.bf16 %v4461_v14, %v4461_v14  ;;  %v4935_v56 = vunpack.c.l.b16 %v4869_v43  ;;  %v4553_v58 = vsel %vm838_vm2, %v4552_v60, %v4503_v57 }
 0xafb   :  { %v4466_v3 = vrot.slane %v4427_v10, 4  ;;  %v4559_v26 = vperm.slane %v4553_v58, %v8316_v59  ;;  %v4464_v48 = vrot.slane %v4451_v33, 4  ;;  %v4539_v53 = vperm.slane %v4531_v27, %v8316_v59 }
 0xafc   :  { %v4889_v61 = vunpack.c.l.b16 %v4866_v36  ;;  %v4574_v52 = vrot.slane %v4535_v20, 4  ;;  %v4555_v37 = vsel %vm838_vm2, %v4515_v40, %v4554_v29  ;;  %v9991_v2 = vperm.slane %v9927_v4, %v8293_v11 }
 0xafd   :  { %v4467_v5 = vsel %vm838_vm2, %v4451_v33, %v4466_v3  ;;  %v4572_v47 = vrot.slane %v4559_v26, 4  ;;  %v4465_v57 = vsel %vm838_vm2, %v4464_v48, %v4427_v10  ;;  %v4563_v49 = vperm.slane %v4555_v37, %v8316_v59 }
 0xafe   :  { %v4575_v38 = vsel %vm838_vm2, %v4559_v26, %v4574_v52  ;;  %v4872_v12 = vpack.c.bf16 %v4465_v57, %v4465_v57  ;;  %v4578_v25 = vrot.slane %v4539_v53, 4  ;;  %v4875_v62 = vpack.c.bf16 %v4467_v5, %v4467_v5 }
 0xaff   :  { %v4870_v39 = vpack.c.bf16 %v4575_v38, %v4575_v38  ;;  %v4573_v43 = vsel %vm838_vm2, %v4572_v47, %v4535_v20  ;;  %v4576_v40 = vrot.slane %v4563_v49, 4  ;;  %v10704_v18 = vrot.slane %v9819_v13, 4 }
 0xb00   :  { %v4406_v55 = vrot.slane %v9991_v2, 4  ;;  %v4867_v51 = vpack.c.bf16 %v4573_v43, %v4573_v43  ;;  %v4981_v9 = vunpack.c.l.b16 %v4872_v12  ;;  %v4579_v60 = vsel %vm838_vm2, %v4563_v49, %v4578_v25 }
 0xb01   :  { %v4405_v4 = vsel %vm838_vm2, %v10704_v18, %v9991_v2  ;;  %v4936_v14 = vunpack.c.l.b16 %v4870_v39  ;;  %v4577_v10 = vsel %vm838_vm2, %v4576_v40, %v4539_v53  ;;  %v4876_v36 = vpack.c.bf16 %v4579_v60, %v4579_v60 }
 0xb02   :  { %v5027_v33 = vunpack.c.l.b16 %v4875_v62  ;;  %v4411_v58 = vperm.slane %v4405_v4, %v8316_v59  ;;  %v4890_v20 = vunpack.c.l.b16 %v4867_v51  ;;  %v4873_v29 = vpack.c.bf16 %v4577_v10, %v4577_v10 }
 0xb03   :  { %v4938_v27 = vpack.c.b16 %v4936_v14, %v4935_v56  ;;  %v10705_v3 = vrot.slane %v9828_v45, 4  ;;  %v5028_v52 = vunpack.c.l.b16 %v4876_v36  ;;  %v4475_v5 = vperm.slane %v9952_v63, %v8293_v11 }
 0xb04   :  { %v4454_v37 = vrot.slane %v4411_v58, 4  ;;  %v4892_v53 = vpack.c.b16 %v4890_v20, %v4889_v61  ;;  %v4982_v47 = vunpack.c.l.b16 %v4873_v29  ;;  %v10706_v56 = vrot.slane %v9836_v1, 4 }
 0xb05   :  { %v4429_v26 = vsel %vm838_vm2, %v10705_v3, %v9782_v19  ;;  %v4947_v2 = vsel %vm1880_vm3, %v4938_v27, 0  ;;  %v5030_v45 = vpack.c.b16 %v5028_v52, %v5027_v33  ;;  %v10707_v19 = vrot.slane %v9831_v50, 4 }
 0xb06   :  { %v4435_v48 = vperm.slane %v4429_v26, %v8316_v59  ;;  %v4541_v38 = vsel %vm838_vm2, %v10706_v56, %v9792_v23  ;;  %4959 = vmatpush.bf16.xpose.msra.mxu1 %v4947_v2  ;;  %v4518_v39 = vrot.slane %v4475_v5, 4  ;;  %v4901_v12 = vsel %vm1880_vm3, %v4892_v53, 0 }
 0xb07   :  { %v4517_v49 = vsel %vm838_vm2, %v10707_v19, %v4475_v5  ;;  %v4984_v63 = vpack.c.b16 %v4982_v47, %v4981_v9  ;;  %v4547_v25 = vperm.slane %v4541_v38, %v8316_v59  ;;  %4913 = vmatpush.bf16.xpose.msra.mxu0 %v4901_v12  ;;  %v5039_v1 = vsel %vm1880_vm3, %v5030_v45, 0 }
 0xb08   :  { %v4452_v57 = vrot.slane %v4435_v48, 4  ;;  %v4523_v61 = vperm.slane %v4517_v49, %v8316_v59  ;;  %v10708_v62 = vrot.slane %v9871_v8, 4  ;;  %v4800_v40 = vsel %vm838_vm2, %v9887_v34, %v9871_v8  ;;  %5051 = vmatpush.bf16.xpose.msrb.mxu3 %v5039_v1 }
 0xb09   :  { %v4993_v18 = vsel %vm1880_vm3, %v4984_v63, 0  ;;  %v4564_v4 = vrot.slane %v4547_v25, 4  ;;  %v4804_v9 = vperm.slane %v4800_v40, %v8293_v11  ;;  %v10709_v60 = vrot.slane %v9891_v17, 4 }
 0xb0a   :  { %v4453_v23 = vsel %vm838_vm2, %v4452_v57, %v4411_v58  ;;  %v4349_v43 = vsel %vm838_vm2, 0.0, %v10708_v62  ;;  %v4566_v51 = vrot.slane %v4523_v61, 4  ;;  %5005 = vmatpush.bf16.xpose.msra.mxu2 %v4993_v18  ;;  %v10710_v36 = vrot.slane %v9897_v28, 4 }
 0xb0b   :  { %v4854_v14 = vpack.c.bf16 %v4453_v23, %v4453_v23  ;;  %v4806_v10 = vsel %vm838_vm2, %v10709_v60, %v4349_v43  ;;  %v4836_v8 = vrot.slane %v9906_v22, 4  ;;  %v4565_v34 = vsel %vm838_vm2, %v4564_v4, %v4523_v61 }
 0xb0c   :  { %v4817_v33 = vsel %vm838_vm2, %v10710_v36, %v9903_v16  ;;  %v4810_v20 = vperm.slane %v4806_v10, %v8293_v11  ;;  %v4855_v29 = vpack.c.bf16 %v4565_v34, %v4565_v34  ;;  %v4824_v3 = vrot.slane %v4804_v9, 4 }
 0xb0d   :  { %v4881_v58 = vunpack.c.l.b16 %v4854_v14  ;;  %v4821_v27 = vperm.slane %v4817_v33, %v8293_v11  ;;  %v4455_v17 = vsel %vm838_vm2, %v4435_v48, %v4454_v37  ;;  %v4567_v26 = vsel %vm838_vm2, %v4547_v25, %v4566_v51 }
 0xb0e   :  { %v4857_v28 = vpack.c.bf16 %v4455_v17, %v4455_v17  ;;  %v4858_v5 = vpack.c.bf16 %v4567_v26, %v4567_v26  ;;  %v4407_v16 = vsel %vm838_vm2, %v9819_v13, %v4406_v55  ;;  %v4882_v53 = vunpack.c.l.b16 %v4855_v29 }
 0xb0f   :  { %v4837_v52 = vsel %vm838_vm2, %v4821_v27, %v4836_v8  ;;  %v4825_v2 = vsel %vm838_vm2, %v4810_v20, %v4824_v3  ;;  %v4415_v56 = vperm.slane %v4407_v16, %v8316_v59  ;;  %v4456_v37 = vrot.slane %v9856_v6, 4 }
 0xb10   :  { %v4845_v47 = vperm.slane %v4837_v52, %v8316_v59  ;;  %v4833_v38 = vperm.slane %v4825_v2, %v8316_v59  ;;  %v4927_v45 = vunpack.c.l.b16 %v4857_v28  ;;  %v4928_v48 = vunpack.c.l.b16 %v4858_v5 }
 0xb11   :  { %v4884_v57 = vpack.c.b16 %v4882_v53, %v4881_v58  ;;  %v4519_v49 = vsel %vm838_vm2, %v9831_v50, %v4518_v39  ;;  %v4568_v13 = vrot.slane %v9863_v24, 4  ;;  %v4457_v12 = vsel %vm838_vm2, %v4456_v37, %v4415_v56 }
 0xb12   :  { %v4850_v19 = vrot.slane %v4845_v47, 4  ;;  %v4930_v55 = vpack.c.b16 %v4928_v48, %v4927_v45  ;;  %v4527_v63 = vperm.slane %v4519_v49, %v8316_v59  ;;  %v4822_v61 = vrot.slane %v4810_v20, 4 }
 0xb13   :  { %7128 = vmatmul.msk.bf16.vlgmr.msra.gmra.mxu0 %vm1880_vm3, %v4884_v57  ;;  %v4860_v1 = vpack.c.bf16 %v4457_v12, %v4457_v12  ;;  %v4834_v23 = vrot.slane %v4821_v27, 4  ;;  %v4852_v62 = vrot.slane %v4833_v38, 4  ;;  %v4458_v40 = vrot.slane %v4415_v56, 4 }
 0xb14   :  { %v4851_v25 = vsel %vm838_vm2, %v4850_v19, %v4833_v38  ;;  %7130 = vmatmul.msk.bf16.vlgmr.msra.gmra.mxu1 %vm1880_vm3, %v4930_v55  ;;  %v4569_v50 = vsel %vm838_vm2, %v4568_v13, %v4527_v63  ;;  %v4823_v39 = vsel %vm838_vm2, %v4822_v61, %v4804_v9  ;;  %v4570_v58 = vrot.slane %v4527_v63, 4 }
 0xb15   :  { %v5238_v43 = vpack.c.bf16 %v4851_v25, %v4851_v25  ;;  %v4861_v18 = vpack.c.bf16 %v4569_v50, %v4569_v50  ;;  %v4973_v4 = vunpack.c.l.b16 %v4860_v1  ;;  %v4829_v51 = vperm.slane %v4823_v39, %v8316_v59 }
 0xb16   :  { %v4835_v14 = vsel %vm838_vm2, %v4834_v23, %v9906_v22  ;;  %v4853_v36 = vsel %vm838_vm2, %v4845_v47, %v4852_v62  ;;  %v4459_v33 = vsel %vm838_vm2, %v9856_v6, %v4458_v40  ;;  %v10711_v3 = vrot.slane %v9592_v41, 4 }
 0xb17   :  { %v5343_v60 = vunpack.c.l.b16 %v5238_v43  ;;  %v4841_v10 = vperm.slane %v4835_v14, %v8316_v59  ;;  %v4974_v8 = vunpack.c.l.b16 %v4861_v18  ;;  %v5241_v34 = vpack.c.bf16 %v4853_v36, %v4853_v36 }
 0xb18   :  { %v4863_v9 = vpack.c.bf16 %v4459_v33, %v4459_v33  ;;  %v4848_v29 = vrot.slane %v4829_v51, 4  ;;  %v4581_v22 = vsel %vm838_vm2, %v10711_v3, %v9586_v15  ;;  %v4571_v52 = vsel %vm838_vm2, %v9863_v24, %v4570_v58 }
 0xb19   :  { %v5345_v20 = vpack.c.b16 %v5343_v60, %v5343_v60  ;;  %v4846_v27 = vrot.slane %v4841_v10, 4  ;;  %v4976_v17 = vpack.c.b16 %v4974_v8, %v4973_v4  ;;  %v5387_v26 = vunpack.c.l.b16 %v5241_v34 }
 0xb1a   :  { %v5019_v28 = vunpack.c.l.b16 %v4863_v9  ;;  %v4864_v16 = vpack.c.bf16 %v4571_v52, %v4571_v52  ;;  %v4849_v53 = vsel %vm838_vm2, %v4841_v10, %v4848_v29  ;;  %v4587_v41 = vperm.slane %v4581_v22, %v8293_v11 }
 0xb1b   :  { %v5354_v6 = vsel %vm2253_vm4, %v5345_v20, 0  ;;  %v4847_v5 = vsel %vm838_vm2, %v4846_v27, %v4829_v51  ;;  %v5389_v47 = vpack.c.b16 %v5387_v26, %v5387_v26  ;;  %v5235_v56 = vpack.c.bf16 %v4849_v53, %v4849_v53  ;;  %7132 = vmatmul.msk.bf16.vlgmr.msra.gmra.mxu2 %vm1880_vm3, %v4976_v17 }
 0xb1c   :  { %5362 = vmatpush.bf16.msrb.mxu2 %v5354_v6  ;;  %v5232_v2 = vpack.c.bf16 %v4847_v5, %v4847_v5  ;;  %v5020_v15 = vunpack.c.l.b16 %v4864_v16  ;;  %v4599_v24 = vperm.slane %v9618_v7, %v8293_v11  ;;  %v10712_v38 = vrot.slane %v9609_v32, 4 }
 0xb1d   :  { %v4623_v48 = vperm.slane %v9644_v42, %v8293_v11  ;;  %v5398_v57 = vsel %vm2253_vm4, %v5389_v47, 0  ;;  %v5299_v19 = vunpack.c.l.b16 %v5235_v56  ;;  %v4630_v63 = vrot.slane %v4587_v41, 4 }
 0xb1e   :  { %v4605_v45 = vsel %vm838_vm2, %v10712_v38, %v9604_v0  ;;  %v5255_v37 = vunpack.c.l.b16 %v5232_v2  ;;  %5406 = vmatpush.bf16.msra.mxu3 %v5398_v57  ;;  %v5022_v13 = vpack.c.b16 %v5020_v15, %v5019_v28  ;;  %v4628_v55 = vrot.slane %v4599_v24, 4 }
 0xb1f   :  { %v4611_v49 = vperm.slane %v4605_v45, %v8293_v11  ;;  %v4652_v12 = vrot.slane %v4623_v48, 4  ;;  %v5301_v61 = vpack.c.b16 %v5299_v19, %v5299_v19  ;;  %v4631_v42 = vsel %vm838_vm2, %v4599_v24, %v4630_v63 }
 0xb20   :  { %v5257_v7 = vpack.c.b16 %v5255_v37, %v5255_v37  ;;  %7134 = vmatmul.msk.bf16.vlgmr.msrb.gmra.mxu3 %vm1880_vm3, %v5022_v13  ;;  %v4629_v0 = vsel %vm838_vm2, %v4628_v55, %v4587_v41  ;;  %v4639_v50 = vperm.slane %v4631_v42, %v8316_v59 }
 0xb21   :  { %v4654_v25 = vrot.slane %v4611_v49, 4  ;;  %v4653_v32 = vsel %vm838_vm2, %v4652_v12, %v4611_v49  ;;  %v5310_v23 = vsel %vm2253_vm4, %v5301_v61, 0  ;;  %v4635_v62 = vperm.slane %v4629_v0, %v8316_v59 }
 0xb22   :  { %v5266_v1 = vsel %vm2253_vm4, %v5257_v7, 0  ;;  %v4659_v43 = vperm.slane %v4653_v32, %v8316_v59  ;;  %5318 = vmatpush.bf16.msrb.mxu1 %v5310_v23  ;;  %v4682_v51 = vrot.slane %v4639_v50, 4 }
 0xb23   :  { %5274 = vmatpush.bf16.msrb.mxu0 %v5266_v1  ;;  %v4655_v39 = vsel %vm838_vm2, %v4623_v48, %v4654_v25  ;;  %v4678_v18 = vrot.slane %v4635_v62, 4 }
 0xb24   :  { %v4676_v40 = vrot.slane %v4659_v43, 4  ;;  %v4663_v4 = vperm.slane %v4655_v39, %v8316_v59 }
 0xb25   :  { %v4679_v60 = vsel %vm838_vm2, %v4659_v43, %v4678_v18 }
 0xb26   :  { %v4677_v14 = vsel %vm838_vm2, %v4676_v40, %v4635_v62  ;;  %v4680_v10 = vrot.slane %v4663_v4, 4  ;;  %v4859_v33 = vpack.c.bf16 %v4679_v60, %v4679_v60  ;;  %v4683_v8 = vsel %vm838_vm2, %v4663_v4, %v4682_v51 }
 0xb27   :  { %v4856_v36 = vpack.c.bf16 %v4677_v14, %v4677_v14  ;;  %v4865_v58 = vpack.c.bf16 %v4683_v8, %v4683_v8 }
 0xb28   :  { %v4681_v34 = vsel %vm838_vm2, %v4680_v10, %v4639_v50  ;;  %v4929_v20 = vunpack.c.l.b16 %v4859_v33 }
 0xb29   :  { %v4883_v9 = vunpack.c.l.b16 %v4856_v36  ;;  %v4862_v27 = vpack.c.bf16 %v4681_v34, %v4681_v34  ;;  %v5021_v17 = vunpack.c.l.b16 %v4865_v58 }
 0xb2a   :  { %v4931_v3 = vpack.c.b16 %v4929_v20, %v4929_v20 }
 0xb2b   :  { %v4885_v29 = vpack.c.b16 %v4883_v9, %v4883_v9  ;;  %v4975_v22 = vunpack.c.l.b16 %v4862_v27  ;;  %v5023_v52 = vpack.c.b16 %v5021_v17, %v5021_v17  ;;  %v7719_v17 = vunpack.i.h.bf16 %v9583_v54 }
 0xb2c   :  { %7131 = vmatmul.msk.bf16.gmra.mxu1 %vm1880_vm3, %v4931_v3 }
 0xb2d   :  { %7129 = vmatmul.msk.bf16.gmra.mxu0 %vm1880_vm3, %v4885_v29  ;;  %v4977_v26 = vpack.c.b16 %v4975_v22, %v4975_v22 }
 0xb2f   :  { %7133 = vmatmul.msk.bf16.gmra.mxu2 %vm1880_vm3, %v4977_v26  ;;  %v7724_v26 = vunpack.i.h.bf16 %v9785_v30 }
 0xb30   :  { %7135 = vmatmul.msk.bf16.gmra.mxu3 %vm1880_vm3, %v5023_v52  ;;  %v7714_v52 = vunpack.i.h.bf16 %v9564_v31 }
 0xb90   :  { %v4915_v28 = vpop.f32.mrf.mxu0 }
 0xb91   :  { %v5062_v6 = vmul.f32 0.17677669, %v4915_v28  ;;  %v4961_v5 = vpop.f32.mrf.mxu1  ;;  %v3964_v28 = vrot.slane %v7719_v17, 4 }
 0xb92   :  { %v5065_v16 = vmul.f32 0.17677669, %v4961_v5  ;;  %v10713_v5 = vld [vmem:[#allocation20_spill] sm:$0xff] }
 0xb93   :  { %v10113_v53 = vsel %vm8928_vm5, %v5062_v6, -1e+30  ;;  %v3966_v21 = vrot.slane %v10713_v5, 4 }
 0xb94   :  { %v5086_v2 = vsel %vm2073_vm6, %v10113_v53, -inf  ;;  %v10119_v47 = vsel %vm8928_vm5, %v5065_v16, -1e+30  ;;  %v3976_v16 = vrot.slane %v7724_v26, 4 }
 0xb95   :  { %5087 = vmax.xlane.f32.xlu0 %v5086_v2  ;;  %v5095_v56 = vsel %vm2073_vm6, %v10119_v47, -inf }
 0xb96   :  { %5096 = vmax.xlane.f32.xlu1 %v5095_v56  ;;  %v3978_v56 = vrot.slane %v7714_v52, 4 }
 0xb98   :  { %v4917_v45 = vpop.f32.mrf.mxu0  ;;  %v3979_v54 = vsel %vm838_vm2, %v7724_v26, %v3978_v56 }
 0xb99   :  { %v4963_v41 = vpop.f32.mrf.mxu1  ;;  %v5063_v7 = vmul.f32 0.17677669, %v4917_v45  ;;  %v3977_v45 = vsel %vm838_vm2, %v3976_v16, %v7714_v52 }
 0xb9a   :  { %v5066_v15 = vmul.f32 0.17677669, %v4963_v41  ;;  %v3967_v41 = vsel %vm838_vm2, %v7719_v17, %v3966_v21 }
 0xb9b   :  { %v10149_v23 = vsel %vm8951_vm7, %v5063_v7, -1e+30  ;;  %v3975_v31 = vperm.slane %v3967_v41, %v8293_v11 }
 0xb9c   :  { %v10125_v24 = vsel %vm8951_vm7, %v5066_v15, -1e+30  ;;  %v5089_v43 = vsel %vm2073_vm6, %v10149_v23, -inf }
 0xb9d   :  { %v5098_v38 = vsel %vm2073_vm6, %v10125_v24, -inf }
 0xb9e   :  { %5099 = vmax.xlane.f32.xlu0 %v5098_v38  ;;  %v5007_v48 = vpop.f32.mrf.mxu2  ;;  %v3965_v38 = vsel %vm838_vm2, %v3964_v28, %v10713_v5 }
 0xb9f   :  { %v5068_v37 = vmul.f32 0.17677669, %v5007_v48 }
 0xba1   :  { %v10131_v57 = vsel %vm8928_vm5, %v5068_v37, -1e+30  ;;  %v3971_v37 = vperm.slane %v3965_v38, %v8293_v11 }
 0xba2   :  { %v5104_v49 = vsel %vm2073_vm6, %v10131_v57, -inf }
 0xba3   :  { %v5053_v19 = vpop.f32.mrf.mxu3  ;;  %5105 = vmax.xlane.f32.xlu1 %v5104_v49  ;;  %v3987_v49 = vperm.slane %v3979_v54, %v8293_v11  ;;  %v3990_v7 = vrot.slane %v3971_v37, 4 }
 0xba4   :  { %v5071_v13 = vmul.f32 0.17677669, %v5053_v19 }
 0xba6   :  { %v10137_v55 = vsel %vm8928_vm5, %v5071_v13, -1e+30  ;;  %v5009_v63 = vpop.f32.mrf.mxu2 }
 0xba7   :  { %v5113_v12 = vsel %vm2073_vm6, %v10137_v55, -inf  ;;  %v5069_v61 = vmul.f32 0.17677669, %v5009_v63 }
 0xba8   :  { %5114 = vmax.xlane.f32.xlu2 %v5113_v12  ;;  %v4002_v12 = vrot.slane %v3975_v31, 4 }
 0xba9   :  { %v4966_v0 = vpop.f32.mrf.mxu1  ;;  %v10143_v32 = vsel %vm8951_vm7, %v5069_v61, -1e+30 }
 0xbaa   :  { %v4920_v25 = vpop.f32.mrf.mxu0  ;;  %v5107_v1 = vsel %vm2073_vm6, %v10143_v32, -inf  ;;  %v5067_v9 = vmul.f32 0.17677669, %v4966_v0  ;;  %v4003_v0 = vsel %vm838_vm2, %v3987_v49, %v4002_v12 }
 0xbab   :  { %v5055_v42 = vpop.f32.mrf.mxu3  ;;  %5108 = vmax.xlane.f32.xlu0 %v5107_v1  ;;  %v5064_v33 = vmul.f32 0.17677669, %v4920_v25  ;;  %v4000_v25 = vrot.slane %v3987_v49, 4  ;;  %v4134_v49 = vrot.slane %v9486_v44, 4 }
 0xbac   :  { %v5072_v46 = vmul.f32 0.17677669, %v5055_v42  ;;  %v10185_v27 = vsel %vm8992_vm8, %v5067_v9, -1e+30 }
 0xbad   :  { %v10177_v34 = vsel %vm8992_vm8, %v5064_v33, -1e+30  ;;  %v5101_v29 = vsel %vm2073_vm6, %v10185_v27, -inf }
 0xbae   :  { %v10153_v62 = vsel %vm8951_vm7, %v5072_v46, -1e+30  ;;  %v5092_v20 = vsel %vm2073_vm6, %v10177_v34, -inf }
 0xbaf   :  { %v5116_v50 = vsel %vm2073_vm6, %v10153_v62, -inf }
 0xbb0   :  { %5090 = vmax.xlane.f32.xlu2 %v5089_v43  ;;  %5117 = vmax.xlane.f32.xlu1 %v5116_v50 }
 0xbb1   :  { %v4968_v18 = vpop.f32.mrf.mxu1 }
 0xbb2   :  { %v4922_v39 = vpop.f32.mrf.mxu0  ;;  %v5012_v40 = vpop.f32.mrf.mxu2 }
 0xbb3   :  { %v5058_v4 = vpop.f32.mrf.mxu3  ;;  %v5070_v10 = vmul.f32 0.17677669, %v5012_v40 }
 0xbb4   :  { %v5073_v35 = vmul.f32 0.17677669, %v5058_v4 }
 0xbb5   :  { %v10173_v8 = vsel %vm8992_vm8, %v5070_v10, -1e+30 }
 0xbb6   :  { %v10167_v60 = vsel %vm8992_vm8, %v5073_v35, -1e+30  ;;  %v5110_v58 = vsel %vm2073_vm6, %v10173_v8, -inf }
 0xbb7   :  { %v5119_v36 = vsel %vm2073_vm6, %v10167_v60, -inf }
 0xbba   :  { %v5014_v51 = vpop.f32.mrf.mxu2 }
 0xbbb   :  { %v5060_v14 = vpop.f32.mrf.mxu3  ;;  %v4001_v51 = vsel %vm838_vm2, %v4000_v25, %v3975_v31 }
 0xbbc   :  { %v4011_v14 = vperm.slane %v4003_v0, %v8316_v59 }
 0xbbf   :  { %3836 = vrot.lane.b32.xlu0 %v9486_v44, %s8087_s13 }
 0xbc8   :  { %3827 = vrot.lane.b32.xlu2 %v9486_v44, %s8094_s6 }
 0xbc9   :  { %3845 = vrot.lane.b32.xlu1 %v9486_v44, %s8095_s27 }
 0xbe9   :  { %5120 = vmax.xlane.f32.xlu0 %v5119_v36 }
 0xbf1   :  { %5111 = vmax.xlane.f32.xlu2 %v5110_v58  ;;  %v4007_v58 = vperm.slane %v4001_v51, %v8316_v59 }
 0xbf3   :  { %5093 = vmax.xlane.f32.xlu1 %v5092_v20  ;;  %v4016_v28 = vrot.slane %v4007_v58, 4 }
 0xbf9   :  { %5102 = vmax.xlane.f32.xlu2 %v5101_v29  ;;  %v4018_v29 = vrot.slane %v4011_v14, 4 }
 0xbfb   :  { %v4019_v5 = vsel %vm838_vm2, 0.0, %v4018_v29  ;;  %v4703_v56 = vsel %vm838_vm2, %v4018_v29, %v4007_v58 }
 0xc08   :  { %v5088_v3 = vpop.xlane.xlu0 %5087 }
 0xc09   :  { %v10189_v22 = vpop.xlane.xlu1 %5096  ;;  %v5122_v46 = vsub.f32 %v10113_v53, %v5088_v3 }
 0xc0b   :  { %v5134_v10 = vmul.f32 1.442695, %v5122_v46 }
 0xc11   :  { %v10194_v6 = vpop.xlane.xlu0 %5099 }
 0xc12   :  { %v5126_v17 = vsub.f32 %v10125_v24, %v10194_v6 }
 0xc14   :  { %v5142_v16 = vmul.f32 1.442695, %v5126_v17 }
 0xc16   :  { %v5106_v2 = vpop.xlane.xlu1 %5105 }
 0xc17   :  { %v5128_v15 = vsub.f32 %v10131_v57, %v5106_v2  ;;  %v3983_v57 = vperm.slane %v3977_v45, %v8293_v11 }
 0xc19   :  { %v5146_v30 = vmul.f32 1.442695, %v5128_v15  ;;  %v3988_v1 = vrot.slane %v3983_v57, 4  ;;  %v4708_v15 = vrot.slane %v4019_v5, 4 }
 0xc1b   :  { %v5115_v48 = vpop.xlane.xlu2 %5114  ;;  %7844 = vpow2.f32 %v5146_v30  ;;  %v3989_v53 = vsel %vm838_vm2, %v3988_v1, %v3971_v37  ;;  %v4017_v30 = vsel %vm838_vm2, 0.0, %v4016_v28 }
 0xc1c   :  { %v5131_v19 = vsub.f32 %v10137_v55, %v5115_v48  ;;  %v3991_v55 = vsel %vm838_vm2, %v3983_v57, %v3990_v7  ;;  %v3995_v9 = vperm.slane %v3989_v53, %v8316_v59  ;;  %v4707_v48 = vperm.slane %v4703_v56, %v8293_v11 }
 0xc1d   :  { %v3999_v4 = vperm.slane %v3991_v55, %v8316_v59  ;;  %v4709_v12 = vsel %vm838_vm2, %v4708_v15, %v4017_v30 }
 0xc1e   :  { %v5152_v13 = vmul.f32 1.442695, %v5131_v19  ;;  %v5109_v63 = vpop.xlane.xlu0 %5108  ;;  %v4713_v0 = vperm.slane %v4709_v12, %v8293_v11  ;;  %v4728_v55 = vrot.slane %v4707_v48, 4 }
 0xc1f   :  { %v5129_v61 = vsub.f32 %v10143_v32, %v5109_v63  ;;  %v4014_v20 = vrot.slane %v3999_v4, 4 }
 0xc20   :  { %7846 = vpow2.f32 %v5152_v13  ;;  %v4729_v14 = vsel %vm838_vm2, %v4713_v0, %v4728_v55 }
 0xc21   :  { %v10210_v42 = vpop.eup %7844  ;;  %v5148_v43 = vmul.f32 1.442695, %v5129_v61  ;;  %v4015_v52 = vsel %vm838_vm2, 0.0, %v4014_v20  ;;  %v4692_v54 = vsel %vm838_vm2, %v4014_v20, %v3995_v9  ;;  %v4737_v58 = vperm.slane %v4729_v14, %v8316_v59 }
 0xc22   :  { %v5176_v40 = vsel %vm2073_vm6, %v10210_v42, 0.0  ;;  %v4697_v41 = vrot.slane %v4015_v52, 4  ;;  %v4696_v19 = vperm.slane %v4692_v54, %v8293_v11 }
 0xc23   :  { %v5091_v50 = vpop.xlane.xlu2 %5090  ;;  %v5118_v39 = vpop.xlane.xlu1 %5117  ;;  %7848 = vpow2.f32 %v5148_v43  ;;  %5177 = vadd.xlane.f32.xlu0 %v5176_v40 }
 0xc24   :  { %v5123_v18 = vsub.f32 %v10149_v23, %v5091_v50  ;;  %v5132_v32 = vsub.f32 %v10153_v62, %v5118_v39  ;;  %v5125_v23 = vsub.f32 %v10119_v47, %v10189_v22  ;;  %v4012_v22 = vrot.slane %v3995_v9, 4 }
 0xc25   :  { %v4716_v1 = vrot.slane %v4696_v19, 4  ;;  %v4726_v9 = vrot.slane %v4713_v0, 4 }
 0xc26   :  { %v10221_v35 = vpop.eup %7846  ;;  %v5136_v36 = vmul.f32 1.442695, %v5123_v18  ;;  %v5154_v33 = vmul.f32 1.442695, %v5132_v32  ;;  %v5140_v26 = vmul.f32 1.442695, %v5125_v23 }
 0xc27   :  { %v5185_v62 = vsel %vm2073_vm6, %v10221_v35, 0.0  ;;  %v4013_v31 = vsel %vm838_vm2, 0.0, %v4012_v22 }
 0xc28   :  { %7850 = vpow2.f32 %v5136_v36  ;;  %5186 = vadd.xlane.f32.xlu2 %v5185_v62  ;;  %v4698_v13 = vsel %vm838_vm2, %v4697_v41, %v4013_v31  ;;  %v4727_v41 = vsel %vm838_vm2, %v4726_v9, %v4707_v48 }
 0xc29   :  { %7852 = vpow2.f32 %v5154_v33  ;;  %v10230_v3 = vpop.eup %7848  ;;  %v4702_v25 = vperm.slane %v4698_v13, %v8293_v11  ;;  %v4733_v13 = vperm.slane %v4727_v41, %v8316_v59 }
 0xc2a   :  { %7854 = vpow2.f32 %v5134_v10  ;;  %v5179_v47 = vsel %vm2073_vm6, %v10230_v3, 0.0 }
 0xc2b   :  { %5180 = vadd.xlane.f32.xlu1 %v5179_v47  ;;  %7856 = vpow2.f32 %v5140_v26  ;;  %v3828_v61 = vpop.permute.xlu2 %3827  ;;  %v4717_v51 = vsel %vm838_vm2, %v4702_v25, %v4716_v1  ;;  %v4714_v33 = vrot.slane %v4702_v25, 4 }
 0xc2c   :  { %7858 = vpow2.f32 %v5142_v16  ;;  %v4146_v40 = vrot.slane %v3828_v61, 4  ;;  %v4725_v62 = vperm.slane %v4717_v51, %v8316_v59 }
 0xc2d   :  { %v4715_v5 = vsel %vm838_vm2, %v4714_v33, %v4696_v19 }
 0xc2e   :  { %v10238_v21 = vpop.eup %7850  ;;  %v4744_v54 = vrot.slane %v4725_v62, 4 }
 0xc2f   :  { %v10240_v2 = vpop.eup %7852  ;;  %v5161_v24 = vsel %vm2073_vm6, %v10238_v21, 0.0 }
 0xc30   :  { %v10245_v6 = vpop.eup %7854  ;;  %v5188_v38 = vsel %vm2073_vm6, %v10240_v2, 0.0  ;;  %5162 = vadd.xlane.f32.xlu2 %v5161_v24 }
 0xc31   :  { %5189 = vadd.xlane.f32.xlu0 %v5188_v38  ;;  %v3837_v45 = vpop.permute.xlu0 %3836  ;;  %v5158_v37 = vsel %vm2073_vm6, %v10245_v6, 0.0  ;;  %v10259_v63 = vpop.eup %7856  ;;  %v4742_v38 = vrot.slane %v4737_v58, 4 }
 0xc32   :  { %v4132_v57 = vrot.slane %v3837_v45, 4  ;;  %v4135_v7 = vsel %vm838_vm2, %v3837_v45, %v4134_v49  ;;  %v10264_v46 = vpop.eup %7858  ;;  %v5167_v50 = vsel %vm2073_vm6, %v10259_v63, 0.0 }
 0xc33   :  { %5159 = vadd.xlane.f32.xlu1 %v5158_v37  ;;  %v4143_v39 = vperm.slane %v4135_v7, %v8293_v11  ;;  %v5170_v4 = vsel %vm2073_vm6, %v10264_v46, 0.0  ;;  %v4743_v14 = vsel %vm838_vm2, %v4742_v38, %v4725_v62 }
 0xc34   :  { %v4133_v43 = vsel %vm838_vm2, %v4132_v57, %v9486_v44  ;;  %v4721_v57 = vperm.slane %v4715_v5, %v8316_v59  ;;  %v5236_v62 = vpack.c.bf16 %v4743_v14, %v4743_v14 }
 0xc35   :  { %v4139_v18 = vperm.slane %v4133_v43, %v8293_v11  ;;  %v4170_v10 = vrot.slane %v4143_v39, 4 }
 0xc37   :  { %v4158_v20 = vrot.slane %v4139_v18, 4 }
 0xc39   :  { %5168 = vadd.xlane.f32.xlu0 %v5167_v50 }
 0xc3b   :  { %v3846_v32 = vpop.permute.xlu1 %3845  ;;  %5171 = vadd.xlane.f32.xlu1 %v5170_v4 }
 0xc3c   :  { %v4144_v53 = vrot.slane %v3846_v32, 4  ;;  %v4147_v44 = vsel %vm838_vm2, %v3846_v32, %v4146_v40  ;;  %v4738_v32 = vrot.slane %v4733_v13, 4 }
 0xc3d   :  { %v4155_v36 = vperm.slane %v4147_v44, %v8293_v11  ;;  %v4745_v44 = vsel %vm838_vm2, %v4737_v58, %v4744_v54 }
 0xc3e   :  { %v4145_v23 = vsel %vm838_vm2, %v4144_v53, %v3828_v61 }
 0xc3f   :  { %v4151_v29 = vperm.slane %v4145_v23, %v8293_v11  ;;  %v4168_v17 = vrot.slane %v4155_v36, 4  ;;  %v4171_v26 = vsel %vm838_vm2, %v4155_v36, %v4170_v10  ;;  %v4740_v10 = vrot.slane %v4721_v57, 4 }
 0xc40   :  { %v4179_v47 = vperm.slane %v4171_v26, %v8316_v59 }
 0xc41   :  { %v4156_v22 = vrot.slane %v4151_v29, 4  ;;  %v4159_v52 = vsel %vm838_vm2, %v4151_v29, %v4158_v20  ;;  %v4169_v28 = vsel %vm838_vm2, %v4168_v17, %v4143_v39  ;;  %v4739_v29 = vsel %vm838_vm2, %v4738_v32, %v4721_v57 }
 0xc42   :  { %v4167_v16 = vperm.slane %v4159_v52, %v8316_v59  ;;  %v4175_v56 = vperm.slane %v4169_v28, %v8316_v59  ;;  %v4186_v24 = vrot.slane %v4179_v47, 4  ;;  %v4741_v5 = vsel %vm838_vm2, %v4733_v13, %v4740_v10 }
 0xc43   :  { %v4157_v15 = vsel %vm838_vm2, %v4156_v22, %v4139_v18  ;;  %v5239_v22 = vpack.c.bf16 %v4745_v44, %v4745_v44 }
 0xc44   :  { %v4163_v30 = vperm.slane %v4157_v15, %v8316_v59  ;;  %v4182_v31 = vrot.slane %v4167_v16, 4  ;;  %v4184_v45 = vrot.slane %v4175_v56, 4  ;;  %v4187_v37 = vsel %vm838_vm2, 0.0, %v4186_v24 }
 0xc45   :  { %v4757_v49 = vsel %vm838_vm2, %v4186_v24, %v4175_v56  ;;  %v4762_v19 = vrot.slane %v4187_v37, 4  ;;  %v5230_v56 = vpack.c.bf16 %v4739_v29, %v4739_v29 }
 0xc46   :  { %v4180_v12 = vrot.slane %v4163_v30, 4  ;;  %v4183_v48 = vsel %vm838_vm2, 0.0, %v4182_v31  ;;  %v4185_v7 = vsel %vm838_vm2, 0.0, %v4184_v45  ;;  %v4746_v61 = vsel %vm838_vm2, %v4182_v31, %v4163_v30 }
 0xc47   :  { %v4751_v25 = vrot.slane %v4183_v48, 4  ;;  %v4761_v0 = vperm.slane %v4757_v49, %v8293_v11  ;;  %v4763_v1 = vsel %vm838_vm2, %v4762_v19, %v4185_v7  ;;  %v4750_v55 = vperm.slane %v4746_v61, %v8293_v11 }
 0xc48   :  { %v4181_v43 = vsel %vm838_vm2, 0.0, %v4180_v12  ;;  %v4767_v50 = vperm.slane %v4763_v1, %v8293_v11  ;;  %v5233_v31 = vpack.c.bf16 %v4741_v5, %v4741_v5  ;;  %v5341_v45 = vunpack.c.l.b16 %v5236_v62 }
 0xc49   :  { %v4782_v39 = vrot.slane %v4761_v0, 4  ;;  %v4752_v40 = vsel %vm838_vm2, %v4751_v25, %v4181_v43  ;;  %v4770_v18 = vrot.slane %v4750_v55, 4  ;;  %v5385_v49 = vunpack.c.l.b16 %v5239_v22 }
 0xc4a   :  { %v4780_v4 = vrot.slane %v4767_v50, 4  ;;  %v4756_v51 = vperm.slane %v4752_v40, %v8293_v11  ;;  %v5253_v57 = vunpack.c.l.b16 %v5230_v56 }
 0xc4b   :  { %v4783_v53 = vsel %vm838_vm2, %v4767_v50, %v4782_v39 }
 0xc4c   :  { %v4771_v36 = vsel %vm838_vm2, %v4756_v51, %v4770_v18  ;;  %v4791_v33 = vperm.slane %v4783_v53, %v8316_v59  ;;  %v4768_v23 = vrot.slane %v4756_v51, 4  ;;  %v4781_v9 = vsel %vm838_vm2, %v4780_v4, %v4761_v0 }
 0xc4d   :  { %v4779_v20 = vperm.slane %v4771_v36, %v8316_v59  ;;  %v4787_v17 = vperm.slane %v4781_v9, %v8316_v59  ;;  %v5297_v0 = vunpack.c.l.b16 %v5233_v31 }
 0xc4e   :  { %v4796_v26 = vrot.slane %v4791_v33, 4  ;;  %v4769_v47 = vsel %vm838_vm2, %v4768_v23, %v4750_v55 }
 0xc4f   :  { %v4775_v58 = vperm.slane %v4769_v47, %v8316_v59  ;;  %v4792_v52 = vrot.slane %v4787_v17, 4  ;;  %v4798_v28 = vrot.slane %v4779_v20, 4 }
 0xc50   :  { %v4797_v16 = vsel %vm838_vm2, %v4796_v26, %v4779_v20 }
 0xc51   :  { %v5237_v24 = vpack.c.bf16 %v4797_v16, %v4797_v16  ;;  %v4793_v41 = vsel %vm838_vm2, %v4792_v52, %v4775_v58  ;;  %v4799_v15 = vsel %vm838_vm2, %v4791_v33, %v4798_v28  ;;  %v4794_v38 = vrot.slane %v4775_v58, 4 }
 0xc52   :  { %v5231_v54 = vpack.c.bf16 %v4793_v41, %v4793_v41  ;;  %v5240_v30 = vpack.c.bf16 %v4799_v15, %v4799_v15 }
 0xc53   :  { %v5342_v37 = vunpack.c.l.b16 %v5237_v24  ;;  %v4795_v19 = vsel %vm838_vm2, %v4787_v17, %v4794_v38 }
 0xc54   :  { %v5254_v12 = vunpack.c.l.b16 %v5231_v54  ;;  %v5386_v13 = vunpack.c.l.b16 %v5240_v30  ;;  %v5234_v48 = vpack.c.bf16 %v4795_v19, %v4795_v19 }
 0xc55   :  { %v5344_v7 = vpack.c.b16 %v5342_v37, %v5341_v45 }
 0xc56   :  { %v5256_v61 = vpack.c.b16 %v5254_v12, %v5253_v57  ;;  %v5388_v25 = vpack.c.b16 %v5386_v13, %v5385_v49  ;;  %v5298_v1 = vunpack.c.l.b16 %v5234_v48 }
 0xc57   :  { %5363 = vmatpush.bf16.msrb.mxu2 %v5344_v7 }
 0xc58   :  { %5275 = vmatpush.bf16.msrb.mxu0 %v5256_v61  ;;  %5407 = vmatpush.bf16.msra.mxu3 %v5388_v25  ;;  %v5300_v55 = vpack.c.b16 %v5298_v1, %v5297_v0 }
 0xc5a   :  { %5319 = vmatpush.bf16.msrb.mxu1 %v5300_v55 }
 0xc5c   :  { %v5121_v43 = vpop.xlane.xlu0 %5120 }
 0xc5d   :  { %v5133_v50 = vsub.f32 %v10167_v60, %v5121_v43 }
 0xc5f   :  { %v5156_v39 = vmul.f32 1.442695, %v5133_v50 }
 0xc61   :  { %7860 = vpow2.f32 %v5156_v39 }
 0xc64   :  { %v5112_v40 = vpop.xlane.xlu2 %5111 }
 0xc65   :  { %v5130_v18 = vsub.f32 %v10173_v8, %v5112_v40 }
 0xc66   :  { %v5094_v32 = vpop.xlane.xlu1 %5093 }
 0xc67   :  { %v5150_v4 = vmul.f32 1.442695, %v5130_v18  ;;  %v5124_v51 = vsub.f32 %v10177_v34, %v5094_v32  ;;  %v10325_v14 = vpop.eup %7860 }
 0xc68   :  { %v5191_v44 = vsel %vm2073_vm6, %v10325_v14, 0.0 }
 0xc69   :  { %7862 = vpow2.f32 %v5150_v4  ;;  %v5138_v53 = vmul.f32 1.442695, %v5124_v51  ;;  %5192 = vadd.xlane.f32.xlu0 %v5191_v44 }
 0xc6b   :  { %7864 = vpow2.f32 %v5138_v53 }
 0xc6c   :  { %v5103_v10 = vpop.xlane.xlu2 %5102 }
 0xc6d   :  { %v5127_v60 = vsub.f32 %v10185_v27, %v5103_v10 }
 0xc6f   :  { %v10330_v36 = vpop.eup %7862  ;;  %v5144_v33 = vmul.f32 1.442695, %v5127_v60 }
 0xc70   :  { %v5182_v8 = vsel %vm2073_vm6, %v10330_v36, 0.0 }
 0xc71   :  { %v10334_v23 = vpop.eup %7864  ;;  %7866 = vpow2.f32 %v5144_v33  ;;  %5183 = vadd.xlane.f32.xlu2 %v5182_v8 }
 0xc72   :  { %v5164_v34 = vsel %vm2073_vm6, %v10334_v23, 0.0 }
 0xc73   :  { %5165 = vadd.xlane.f32.xlu1 %v5164_v34 }
 0xc77   :  { %v10338_v9 = vpop.eup %7866 }
 0xc78   :  { %v5173_v20 = vsel %vm2073_vm6, %v10338_v9, 0.0 }
 0xc79   :  { %5174 = vadd.xlane.f32.xlu2 %v5173_v20 }
 0xc96   :  { %v5178_v27 = vpop.xlane.xlu0 %5177 }
 0xc97   :  { %7868 = vrcp.f32 %v5178_v27 }
 0xc9b   :  { %v5187_v29 = vpop.xlane.xlu2 %5186 }
 0xc9c   :  { %7870 = vrcp.f32 %v5187_v29 }
 0xc9d   :  { %v7869_v26 = vpop.eup %7868 }
 0xc9e   :  { %v5181_v17 = vpop.xlane.xlu1 %5180  ;;  %v5212_v62 = vmul.f32 %v7869_v26, %v10210_v42 }
 0xc9f   :  { %7872 = vrcp.f32 %v5181_v17 }
 0xca0   :  { %v5224_v28 = vpack.c.bf16 %v5212_v62, %v5212_v62 }
 0xca2   :  { %v7871_v58 = vpop.eup %7870  ;;  %v5333_v38 = vunpack.c.l.b16 %v5224_v28 }
 0xca3   :  { %v5163_v47 = vpop.xlane.xlu2 %5162  ;;  %v5215_v56 = vmul.f32 %v7871_v58, %v10221_v35 }
 0xca4   :  { %v5190_v22 = vpop.xlane.xlu0 %5189  ;;  %7874 = vrcp.f32 %v5163_v47 }
 0xca5   :  { %7876 = vrcp.f32 %v5190_v22  ;;  %v7873_v52 = vpop.eup %7872  ;;  %v5227_v30 = vpack.c.bf16 %v5215_v56, %v5215_v56 }
 0xca6   :  { %v5213_v5 = vmul.f32 %v7873_v52, %v10230_v3  ;;  %v5160_v16 = vpop.xlane.xlu1 %5159 }
 0xca7   :  { %7878 = vrcp.f32 %v5160_v16  ;;  %v5377_v12 = vunpack.c.l.b16 %v5227_v30 }
 0xca8   :  { %v5225_v24 = vpack.c.bf16 %v5213_v5, %v5213_v5 }
 0xcaa   :  { %v7875_v41 = vpop.eup %7874  ;;  %v5334_v54 = vunpack.c.l.b16 %v5225_v24 }
 0xcab   :  { %v7877_v15 = vpop.eup %7876  ;;  %v5207_v42 = vmul.f32 %v7875_v41, %v10238_v21 }
 0xcac   :  { %v5216_v31 = vmul.f32 %v7877_v15, %v10240_v2  ;;  %v5169_v45 = vpop.xlane.xlu0 %5168  ;;  %v5336_v37 = vpack.c.b16 %v5334_v54, %v5333_v38 }
 0xcad   :  { %7880 = vrcp.f32 %v5169_v45  ;;  %v7879_v49 = vpop.eup %7878  ;;  %v5219_v3 = vpack.c.bf16 %v5207_v42, %v5207_v42 }
 0xcae   :  { %v5228_v19 = vpack.c.bf16 %v5216_v31, %v5216_v31  ;;  %v5206_v57 = vmul.f32 %v7879_v49, %v10245_v6  ;;  %v5172_v35 = vpop.xlane.xlu1 %5171  ;;  %7140 = vmatmul.msk.bf16.vlgmr.msrb.gmra.mxu2 %vm2073_vm6, %v5336_v37 }
 0xcaf   :  { %7882 = vrcp.f32 %v5172_v35  ;;  %v5246_v61 = vunpack.c.l.b16 %v5219_v3 }
 0xcb0   :  { %v5378_v13 = vunpack.c.l.b16 %v5228_v19  ;;  %v5218_v48 = vpack.c.bf16 %v5206_v57, %v5206_v57 }
 0xcb2   :  { %v5380_v7 = vpack.c.b16 %v5378_v13, %v5377_v12  ;;  %v5245_v25 = vunpack.c.l.b16 %v5218_v48 }
 0xcb3   :  { %v7881_v21 = vpop.eup %7880 }
 0xcb4   :  { %v5209_v2 = vmul.f32 %v7881_v21, %v10259_v63  ;;  %7142 = vmatmul.msk.bf16.vlgmr.msra.gmra.mxu3 %vm2073_vm6, %v5380_v7  ;;  %v5248_v0 = vpack.c.b16 %v5246_v61, %v5245_v25 }
 0xcb5   :  { %v7883_v1 = vpop.eup %7882 }
 0xcb6   :  { %v5221_v55 = vpack.c.bf16 %v5209_v2, %v5209_v2  ;;  %v5210_v6 = vmul.f32 %v7883_v1, %v10264_v46  ;;  %7136 = vmatmul.msk.bf16.vlgmr.msrb.gmra.mxu0 %vm2073_vm6, %v5248_v0 }
 0xcb8   :  { %v5222_v43 = vpack.c.bf16 %v5210_v6, %v5210_v6  ;;  %v5289_v50 = vunpack.c.l.b16 %v5221_v55 }
 0xcba   :  { %v5290_v39 = vunpack.c.l.b16 %v5222_v43 }
 0xcbc   :  { %v5292_v40 = vpack.c.b16 %v5290_v39, %v5289_v50 }
 0xcbe   :  { %7138 = vmatmul.msk.bf16.vlgmr.msrb.gmra.mxu1 %vm2073_vm6, %v5292_v40 }
 0xcdc   :  { %v5193_v18 = vpop.xlane.xlu0 %5192 }
 0xcdd   :  { %7884 = vrcp.f32 %v5193_v18 }
 0xce3   :  { %v7885_v32 = vpop.eup %7884 }
 0xce4   :  { %v5184_v4 = vpop.xlane.xlu2 %5183  ;;  %v5217_v63 = vmul.f32 %v7885_v32, %v10325_v14 }
 0xce5   :  { %7886 = vrcp.f32 %v5184_v4 }
 0xce6   :  { %v5166_v51 = vpop.xlane.xlu1 %5165  ;;  %v5229_v53 = vpack.c.bf16 %v5217_v63, %v5217_v63 }
 0xce7   :  { %7888 = vrcp.f32 %v5166_v51 }
 0xce8   :  { %v5379_v44 = vunpack.c.l.b16 %v5229_v53 }
 0xcea   :  { %v5381_v10 = vpack.c.b16 %v5379_v44, %v5379_v44 }
 0xceb   :  { %v7887_v46 = vpop.eup %7886 }
 0xcec   :  { %v5214_v60 = vmul.f32 %v7887_v46, %v10330_v36  ;;  %v5175_v33 = vpop.xlane.xlu2 %5174  ;;  %7143 = vmatmul.msk.bf16.gmra.mxu3 %vm2073_vm6, %v5381_v10 }
 0xced   :  { %v7889_v8 = vpop.eup %7888  ;;  %7890 = vrcp.f32 %v5175_v33 }
 0xcee   :  { %v5226_v34 = vpack.c.bf16 %v5214_v60, %v5214_v60  ;;  %v5208_v20 = vmul.f32 %v7889_v8, %v10334_v23 }
 0xcf0   :  { %v5220_v27 = vpack.c.bf16 %v5208_v20, %v5208_v20  ;;  %v5335_v29 = vunpack.c.l.b16 %v5226_v34 }
 0xcf2   :  { %v5337_v14 = vpack.c.b16 %v5335_v29, %v5335_v29  ;;  %v5247_v17 = vunpack.c.l.b16 %v5220_v27 }
 0xcf3   :  { %v7891_v26 = vpop.eup %7890 }
 0xcf4   :  { %v5211_v62 = vmul.f32 %v7891_v26, %v10338_v9  ;;  %7141 = vmatmul.msk.bf16.gmra.mxu2 %vm2073_vm6, %v5337_v14  ;;  %v5249_v47 = vpack.c.b16 %v5247_v17, %v5247_v17 }
 0xcf6   :  { %v5223_v22 = vpack.c.bf16 %v5211_v62, %v5211_v62  ;;  %7137 = vmatmul.msk.bf16.gmra.mxu0 %vm2073_vm6, %v5249_v47 }
 0xcf8   :  { %v5291_v36 = vunpack.c.l.b16 %v5223_v22 }
 0xcfa   :  { %v5293_v58 = vpack.c.b16 %v5291_v36, %v5291_v36 }
 0xcfc   :  { %7139 = vmatmul.msk.bf16.gmra.mxu1 %vm2073_vm6, %v5293_v58 }
 0xd31   :  { %v5365_v52 = vpop.f32.mrf.mxu2 }
 0xd32   :  { %v5418_v28 = vrot.slane %v5365_v52, 4 }
 0xd33   :  { %v5277_v23 = vpop.f32.mrf.mxu0 }
 0xd34   :  { %v5420_v5 = vrot.slane %v5277_v23, 4  ;;  %v5419_v56 = vsel %vm838_vm2, %v5418_v28, %v5277_v23 }
 0xd35   :  { %v5425_v15 = vperm.slane %v5419_v56, %v8293_v11 }
 0xd36   :  { %v5421_v24 = vsel %vm838_vm2, %v5365_v52, %v5420_v5 }
 0xd37   :  { %v5409_v16 = vpop.f32.mrf.mxu3  ;;  %v5429_v54 = vperm.slane %v5421_v24, %v8293_v11  ;;  %v5444_v3 = vrot.slane %v5425_v15, 4 }
 0xd38   :  { %v5430_v41 = vrot.slane %v5409_v16, 4 }
 0xd39   :  { %v5367_v9 = vpop.f32.mrf.mxu2  ;;  %v5456_v13 = vrot.slane %v5429_v54, 4 }
 0xd3a   :  { %v5474_v38 = vrot.slane %v5367_v9, 4 }
 0xd3b   :  { %v5279_v42 = vpop.f32.mrf.mxu0  ;;  %v5321_v30 = vpop.f32.mrf.mxu1 }
 0xd3c   :  { %v5475_v31 = vsel %vm838_vm2, %v5474_v38, %v5279_v42  ;;  %v5476_v45 = vrot.slane %v5279_v42, 4  ;;  %v5431_v37 = vsel %vm838_vm2, %v5430_v41, %v5321_v30  ;;  %v5432_v49 = vrot.slane %v5321_v30, 4 }
 0xd3d   :  { %v5437_v19 = vperm.slane %v5431_v37, %v8293_v11  ;;  %v5481_v35 = vperm.slane %v5475_v31, %v8293_v11 }
 0xd3e   :  { %v5477_v57 = vsel %vm838_vm2, %v5367_v9, %v5476_v45  ;;  %v5433_v12 = vsel %vm838_vm2, %v5409_v16, %v5432_v49 }
 0xd3f   :  { %v5411_v48 = vpop.f32.mrf.mxu3  ;;  %v5485_v7 = vperm.slane %v5477_v57, %v8293_v11  ;;  %v5441_v21 = vperm.slane %v5433_v12, %v8293_v11  ;;  %v5442_v61 = vrot.slane %v5437_v19, 4  ;;  %v5445_v25 = vsel %vm838_vm2, %v5437_v19, %v5444_v3 }
 0xd40   :  { %v5453_v2 = vperm.slane %v5445_v25, %v8316_v59  ;;  %v5486_v55 = vrot.slane %v5411_v48, 4  ;;  %v5500_v6 = vrot.slane %v5481_v35, 4 }
 0xd41   :  { %v5454_v0 = vrot.slane %v5441_v21, 4  ;;  %v5457_v1 = vsel %vm838_vm2, %v5441_v21, %v5456_v13  ;;  %v5443_v43 = vsel %vm838_vm2, %v5442_v61, %v5425_v15  ;;  %v5512_v39 = vrot.slane %v5485_v7, 4 }
 0xd42   :  { %v5465_v50 = vperm.slane %v5457_v1, %v8316_v59  ;;  %v5449_v40 = vperm.slane %v5443_v43, %v8316_v59  ;;  %v5468_v32 = vrot.slane %v5453_v2, 4 }
 0xd43   :  { %v5455_v18 = vsel %vm838_vm2, %v5454_v0, %v5429_v54  ;;  %v5323_v4 = vpop.f32.mrf.mxu1 }
 0xd44   :  { %v5461_v63 = vperm.slane %v5455_v18, %v8316_v59  ;;  %v5472_v51 = vrot.slane %v5465_v50, 4  ;;  %v5487_v53 = vsel %vm838_vm2, %v5486_v55, %v5323_v4  ;;  %v5488_v44 = vrot.slane %v5323_v4, 4 }
 0xd45   :  { %v5466_v46 = vrot.slane %v5449_v40, 4  ;;  %v5469_v10 = vsel %vm838_vm2, 0.0, %v5468_v32  ;;  %v5586_v60 = vsel %vm838_vm2, %v5468_v32, %v5449_v40  ;;  %v5493_v33 = vperm.slane %v5487_v53, %v8293_v11 }
 0xd46   :  { %v5470_v8 = vrot.slane %v5461_v63, 4  ;;  %v5473_v34 = vsel %vm838_vm2, 0.0, %v5472_v51  ;;  %v5590_v20 = vperm.slane %v5586_v60, %v8293_v11  ;;  %v5591_v27 = vrot.slane %v5469_v10, 4 }
 0xd47   :  { %v5467_v29 = vsel %vm838_vm2, 0.0, %v5466_v46  ;;  %v5597_v14 = vsel %vm838_vm2, %v5472_v51, %v5461_v63  ;;  %v5602_v17 = vrot.slane %v5473_v34, 4  ;;  %v5489_v26 = vsel %vm838_vm2, %v5411_v48, %v5488_v44 }
 0xd48   :  { %v5592_v62 = vsel %vm838_vm2, %v5591_v27, %v5467_v29  ;;  %v5610_v47 = vrot.slane %v5590_v20, 4  ;;  %v5497_v22 = vperm.slane %v5489_v26, %v8293_v11  ;;  %v5498_v36 = vrot.slane %v5493_v33, 4 }
 0xd49   :  { %v5596_v58 = vperm.slane %v5592_v62, %v8293_v11  ;;  %v5501_v52 = vsel %vm838_vm2, %v5493_v33, %v5500_v6  ;;  %v5471_v28 = vsel %vm838_vm2, 0.0, %v5470_v8  ;;  %v5601_v23 = vperm.slane %v5597_v14, %v8293_v11 }
 0xd4a   :  { %v5499_v5 = vsel %vm838_vm2, %v5498_v36, %v5481_v35  ;;  %v5509_v16 = vperm.slane %v5501_v52, %v8316_v59  ;;  %v5510_v56 = vrot.slane %v5497_v22, 4  ;;  %v5513_v24 = vsel %vm838_vm2, %v5497_v22, %v5512_v39 }
 0xd4b   :  { %v5505_v9 = vperm.slane %v5499_v5, %v8316_v59  ;;  %v5521_v41 = vperm.slane %v5513_v24, %v8316_v59  ;;  %v5603_v15 = vsel %vm838_vm2, %v5602_v17, %v5471_v28  ;;  %v5611_v38 = vsel %vm838_vm2, %v5596_v58, %v5610_v47 }
 0xd4c   :  { %v5511_v54 = vsel %vm838_vm2, %v5510_v56, %v5485_v7  ;;  %v5524_v42 = vrot.slane %v5509_v16, 4  ;;  %v5607_v30 = vperm.slane %v5603_v15, %v8293_v11  ;;  %v5622_v49 = vrot.slane %v5601_v23, 4 }
 0xd4d   :  { %v5517_v31 = vperm.slane %v5511_v54, %v8316_v59  ;;  %v5522_v45 = vrot.slane %v5505_v9, 4  ;;  %v5528_v37 = vrot.slane %v5521_v41, 4  ;;  %v5619_v57 = vperm.slane %v5611_v38, %v8316_v59 }
 0xd4e   :  { %v5525_v19 = vsel %vm838_vm2, 0.0, %v5524_v42  ;;  %v5640_v3 = vsel %vm838_vm2, %v5524_v42, %v5505_v9  ;;  %v5608_v35 = vrot.slane %v5596_v58, 4  ;;  %v5623_v2 = vsel %vm838_vm2, %v5607_v30, %v5622_v49 }
 0xd4f   :  { %v5523_v12 = vsel %vm838_vm2, 0.0, %v5522_v45  ;;  %v5526_v13 = vrot.slane %v5517_v31, 4  ;;  %v5529_v48 = vsel %vm838_vm2, 0.0, %v5528_v37  ;;  %v5644_v7 = vperm.slane %v5640_v3, %v8293_v11 }
 0xd50   :  { %v5645_v21 = vrot.slane %v5525_v19, 4  ;;  %v5651_v61 = vsel %vm838_vm2, %v5528_v37, %v5517_v31  ;;  %v5656_v25 = vrot.slane %v5529_v48, 4  ;;  %v5631_v55 = vperm.slane %v5623_v2, %v8316_v59 }
 0xd51   :  { %v5664_v0 = vrot.slane %v5644_v7, 4  ;;  %v5527_v1 = vsel %vm838_vm2, 0.0, %v5526_v13  ;;  %v5655_v6 = vperm.slane %v5651_v61, %v8293_v11  ;;  %v5609_v39 = vsel %vm838_vm2, %v5608_v35, %v5590_v20 }
 0xd52   :  { %v5646_v43 = vsel %vm838_vm2, %v5645_v21, %v5523_v12  ;;  %v5657_v50 = vsel %vm838_vm2, %v5656_v25, %v5527_v1  ;;  %v5620_v40 = vrot.slane %v5607_v30, 4  ;;  %v5638_v63 = vrot.slane %v5619_v57, 4 }
 0xd53   :  { %v5650_v18 = vperm.slane %v5646_v43, %v8293_v11  ;;  %v5661_v32 = vperm.slane %v5657_v50, %v8293_v11  ;;  %v5676_v4 = vrot.slane %v5655_v6, 4  ;;  %v5615_v51 = vperm.slane %v5609_v39, %v8316_v59 }
 0xd54   :  { %v5621_v53 = vsel %vm838_vm2, %v5620_v40, %v5601_v23  ;;  %v5636_v10 = vrot.slane %v5631_v55, 4  ;;  %v5639_v62 = vsel %vm838_vm2, %v5631_v55, %v5638_v63 }
 0xd55   :  { %v5665_v44 = vsel %vm838_vm2, %v5650_v18, %v5664_v0  ;;  %v5677_v46 = vsel %vm838_vm2, %v5661_v32, %v5676_v4  ;;  %v5662_v60 = vrot.slane %v5650_v18, 4  ;;  %v5627_v34 = vperm.slane %v5621_v53, %v8316_v59 }
 0xd56   :  { %v5673_v33 = vperm.slane %v5665_v44, %v8316_v59  ;;  %v5685_v8 = vperm.slane %v5677_v46, %v8316_v59  ;;  %v5674_v27 = vrot.slane %v5661_v32, 4  ;;  %v5634_v17 = vrot.slane %v5615_v51, 4 }
 0xd57   :  { %v5663_v20 = vsel %vm838_vm2, %v5662_v60, %v5644_v7  ;;  %v5637_v47 = vsel %vm838_vm2, %v5636_v10, %v5619_v57  ;;  %v5632_v9 = vrot.slane %v5627_v34, 4 }
 0xd58   :  { %v5692_v29 = vrot.slane %v5673_v33, 4  ;;  %v5690_v14 = vrot.slane %v5685_v8, 4  ;;  %v5669_v26 = vperm.slane %v5663_v20, %v8316_v59  ;;  %v5675_v22 = vsel %vm838_vm2, %v5674_v27, %v5655_v6 }
 0xd59   :  { %v5681_v52 = vperm.slane %v5675_v22, %v8316_v59  ;;  %v5635_v16 = vsel %vm838_vm2, %v5627_v34, %v5634_v17  ;;  %v10444_v41 = vsel %vm838_vm2, %v5632_v9, %v5615_v51 }
 0xd5a   :  { %v5693_v36 = vsel %vm838_vm2, %v5685_v8, %v5692_v29  ;;  %v5691_v58 = vsel %vm838_vm2, %v5690_v14, %v5673_v33  ;;  %v5688_v28 = vrot.slane %v5669_v26, 4 }
 0xd5b   :  { %v7735_v23 = vpack.i.bf16 %v5693_v36, %v5639_v62  ;;  %v7730_v5 = vpack.i.bf16 %v5691_v58, %v5637_v47  ;;  %v5686_v15 = vrot.slane %v5681_v52, 4 }
 0xd5c   :  { %v5689_v56 = vsel %vm838_vm2, %v5681_v52, %v5688_v28 }
 0xd5d   :  { %7736 = vrot.lane.b32.xlu2 %v7735_v23, %s8094_s6  ;;  %7731 = vrot.lane.b32.xlu1 %v7730_v5, %s8087_s13  ;;  %v7725_v24 = vpack.i.bf16 %v5689_v56, %v5635_v16  ;;  %v10447_v38 = vsel %vm838_vm2, %v5686_v15, %v5669_v26 }
 0xd5f   :  { %7726 = vrot.lane.b32.xlu0 %v7725_v24, %s8095_s27 }
 0xd6f   :  { %v5414_v54 = vpop.f32.mrf.mxu3 }
 0xd70   :  { %v5542_v45 = vrot.slane %v5414_v54, 4 }
 0xd73   :  { %v5282_v42 = vpop.f32.mrf.mxu0 }
 0xd74   :  { %v5532_v30 = vrot.slane %v5282_v42, 4 }
 0xd77   :  { %v5370_v31 = vpop.f32.mrf.mxu2  ;;  %v5416_v19 = vpop.f32.mrf.mxu3 }
 0xd78   :  { %v5530_v37 = vrot.slane %v5370_v31, 4  ;;  %v5533_v49 = vsel %vm838_vm2, %v5370_v31, %v5532_v30  ;;  %v7510_v19 = vld [vmem:[#allocation7 + $0x78] sm:$0xff] }
 0xd79   :  { %v5541_v3 = vperm.slane %v5533_v49, %v8293_v11  ;;  %v5326_v57 = vpop.f32.mrf.mxu1  ;;  %5860 = vmatpush.bf16.msra.mxu0 %v7510_v19 }
 0xd7a   :  { %v5531_v35 = vsel %vm838_vm2, %v5530_v37, %v5282_v42  ;;  %v5543_v12 = vsel %vm838_vm2, %v5542_v45, %v5326_v57  ;;  %v5544_v13 = vrot.slane %v5326_v57, 4  ;;  %v7509_v57 = vld [vmem:[#allocation7 + $0x70] sm:$0xff] }
 0xd7b   :  { %v5537_v48 = vperm.slane %v5531_v35, %v8293_v11  ;;  %v5549_v7 = vperm.slane %v5543_v12, %v8293_v11  ;;  %v5284_v21 = vpop.f32.mrf.mxu0  ;;  %v5568_v2 = vrot.slane %v5541_v3, 4  ;;  %v7507_v12 = vld [vmem:[#allocation7 + $0x60] sm:$0xff] }
 0xd7c   :  { %v5545_v61 = vsel %vm838_vm2, %v5414_v54, %v5544_v13  ;;  %v7506_v13 = vld [vmem:[#allocation7 + $0x58] sm:$0xff]  ;;  %v7503_v21 = vld [vmem:[#allocation7 + $0x40] sm:$0xff] }
 0xd7d   :  { %v5556_v25 = vrot.slane %v5537_v48, 4  ;;  %v5553_v0 = vperm.slane %v5545_v61, %v8293_v11  ;;  %v5554_v1 = vrot.slane %v5549_v7, 4  ;;  %5861 = vmatpush.bf16.msra.mxu0 %v7509_v57  ;;  %v7283_v57 = vld [vmem:[#allocation8 + $0x1c8] sm:$0xf] }
 0xd7f   :  { %v5555_v55 = vsel %vm838_vm2, %v5554_v1, %v5537_v48  ;;  %v5557_v6 = vsel %vm838_vm2, %v5549_v7, %v5556_v25  ;;  %v5566_v43 = vrot.slane %v5553_v0, 4  ;;  %v5569_v50 = vsel %vm838_vm2, %v5553_v0, %v5568_v2  ;;  %v5372_v39 = vpop.f32.mrf.mxu2  ;;  %v7505_v48 = vld [vmem:[#allocation7 + $0x50] sm:$0xff]  ;;  %v7504_v7 = vld [vmem:[#allocation7 + $0x48] sm:$0xff] }
 0xd80   :  { %v5561_v40 = vperm.slane %v5555_v55, %v8316_v59  ;;  %v5565_v18 = vperm.slane %v5557_v6, %v8316_v59  ;;  %v5577_v32 = vperm.slane %v5569_v50, %v8316_v59 }
 0xd81   :  { %v5567_v4 = vsel %vm838_vm2, %v5566_v43, %v5541_v3  ;;  %v5328_v63 = vpop.f32.mrf.mxu1 }
 0xd82   :  { %v5573_v51 = vperm.slane %v5567_v4, %v8316_v59  ;;  %v5578_v53 = vrot.slane %v5561_v40, 4  ;;  %v5580_v44 = vrot.slane %v5565_v18, 4  ;;  %v5584_v46 = vrot.slane %v5577_v32, 4 }
 0xd84   :  { %v5581_v10 = vsel %vm838_vm2, 0.0, %v5580_v44  ;;  %v5582_v60 = vrot.slane %v5573_v51, 4  ;;  %v5585_v33 = vsel %vm838_vm2, 0.0, %v5584_v46  ;;  %v5694_v8 = vsel %vm838_vm2, %v5580_v44, %v5561_v40 }
 0xd85   :  { %v5699_v34 = vrot.slane %v5581_v10, 4  ;;  %v5710_v20 = vrot.slane %v5585_v33, 4  ;;  %v5698_v27 = vperm.slane %v5694_v8, %v8293_v11  ;;  %v5579_v29 = vsel %vm838_vm2, 0.0, %v5578_v53  ;;  %v10717_v8 = vld [vmem:[#allocation17_spill] sm:$0xff] }
 0xd86   :  { %v5583_v14 = vsel %vm838_vm2, 0.0, %v5582_v60  ;;  %v5705_v17 = vsel %vm838_vm2, %v5584_v46, %v5573_v51 }
 0xd87   :  { %v5700_v26 = vsel %vm838_vm2, %v5699_v34, %v5579_v29  ;;  %v5709_v62 = vperm.slane %v5705_v17, %v8293_v11  ;;  %v5711_v47 = vsel %vm838_vm2, %v5710_v20, %v5583_v14  ;;  %v5718_v22 = vrot.slane %v5698_v27, 4  ;;  %v10718_v29 = vld [vmem:[#allocation18_spill] sm:$0xff] }
 0xd88   :  { %v5704_v36 = vperm.slane %v5700_v26, %v8293_v11  ;;  %v5715_v58 = vperm.slane %v5711_v47, %v8293_v11 }
 0xd89   :  { %v5730_v52 = vrot.slane %v5709_v62, 4 }
 0xd8a   :  { %v5716_v28 = vrot.slane %v5704_v36, 4  ;;  %v5728_v23 = vrot.slane %v5715_v58, 4  ;;  %v5719_v5 = vsel %vm838_vm2, %v5704_v36, %v5718_v22 }
 0xd8b   :  { %v5731_v16 = vsel %vm838_vm2, %v5715_v58, %v5730_v52  ;;  %v5727_v54 = vperm.slane %v5719_v5, %v8316_v59  ;;  %v7291_v58 = vld [vmem:[#allocation8 + $0x1e0] sm:$0xf]  ;;  %v7541_v52 = vld [vmem:[#allocation8 + $0x1ec] sm:$0xf0]  ;;  %v7293_v5 = vld [vmem:[#allocation8 + $0x1f0] sm:$0xf0] }
 0xd8c   :  { %v5739_v56 = vperm.slane %v5731_v16, %v8316_v59  ;;  %v5717_v24 = vsel %vm838_vm2, %v5716_v28, %v5698_v27  ;;  %v5729_v9 = vsel %vm838_vm2, %v5728_v23, %v5709_v62  ;;  %v10719_v62 = vld [vmem:[#allocation19_spill] sm:$0xff]  ;;  %v7539_v28 = vld [vmem:[#allocation8 + $0x1e4] sm:$0xf]  ;;  %v7292_v23 = vor.u32 %v7541_v52, %v7291_v58  ;;  %v7299_v16 = vld [vmem:[#allocation8 + $0x1e8] sm:$0xf] }
 0xd8d   :  { %v5723_v15 = vperm.slane %v5717_v24, %v8316_v59  ;;  %v5735_v11 = vperm.slane %v5729_v9, %v8316_v59  ;;  %v5746_v37 = vrot.slane %v5727_v54, 4  ;;  %v7508_v59 = vld [vmem:[#allocation7 + $0x68] sm:$0xff]  ;;  %v7296_v24 = vor.u32 %v7539_v28, %v7293_v5  ;;  %v7526_v58 = vld [vmem:[#allocation8 + $0x174] sm:$0xf0]  ;;  %v7237_v5 = vld [vmem:[#allocation8 + $0x178] sm:$0xf0] }
 0xd8e   :  { %v5744_v42 = vrot.slane %v5739_v56, 4  ;;  %5862 = vmatpush.bf16.msra.mxu0 %v7508_v59  ;;  %6132 = vmatpush.bf16.msra.mxu1 %v7292_v23  ;;  %v7538_v59 = vld [vmem:[#allocation8 + $0x1d4] sm:$0xf0]  ;;  %v7524_v52 = vld [vmem:[#allocation8 + $0x16c] sm:$0xf] }
 0xd8f   :  { %v5742_v30 = vrot.slane %v5723_v15, 4  ;;  %v5747_v49 = vsel %vm838_vm2, %v5739_v56, %v5746_v37  ;;  %v5740_v3 = vrot.slane %v5735_v11, 4  ;;  %v7542_v56 = vld [vmem:[#allocation8 + $0x1f4] sm:$0xf0]  ;;  %6150 = vmatpush.bf16.msra.mxu2 %v7296_v24  ;;  %v7537_v37 = vld [vmem:[#allocation8 + $0x1cc] sm:$0xf0] }
 0xd90   :  { %v5745_v31 = vsel %vm838_vm2, %v5744_v42, %v5727_v54  ;;  %v7300_v9 = vor.u32 %v7542_v56, %v7299_v16  ;;  %v7301_v54 = vld [vmem:[#allocation8 + $0x1f8] sm:$0xf0]  ;;  %v7211_v24 = vld [vmem:[#allocation8 + $0x140] sm:$0xf] }
 0xd91   :  { %5767 = vrot.lane.b32.xlu1 %v5745_v31, %s8087_s13  ;;  %v5743_v45 = vsel %vm838_vm2, %v5735_v11, %v5742_v30  ;;  %v5741_v35 = vsel %vm838_vm2, %v5740_v3, %v5723_v15  ;;  %vm10714_vm2 = vcmask 785408   ;;  %v7540_v15 = vld [vmem:[#allocation8 + $0x1ec] sm:$0xf]  ;;  %v10720_v30 = vld [vmem:[#allocation16_spill] sm:$0xff]  ;;  %v7277_v3 = vld [vmem:[#allocation8 + $0x1d0] sm:$0xf0] }
 0xd92   :  { %5755 = vrot.lane.b32.xlu0 %v5743_v45, %s8095_s27  ;;  %5863 = vmatpush.bf16.msra.mxu0 %v7507_v12  ;;  %vm10715_vm4 = vmmov %vm10714_vm2  ;;  %v7304_v42 = vor.u32 %v7540_v15, %v7301_v54  ;;  %v7275_v45 = vld [vmem:[#allocation8 + $0x1c0] sm:$0xf]  ;;  %v7519_v15 = vld [vmem:[#allocation8 + $0x144] sm:$0xf] }
 0xd93   :  { %vm10716_vm5 = vmmov %vm10714_vm2  ;;  %6168 = vmatpush.bf16.msrb.mxu3 %v7300_v9  ;;  %v7276_v19 = vor.u32 %v7537_v37, %v7275_v45  ;;  %v7521_v9 = vld [vmem:[#allocation8 + $0x14c] sm:$0xf0]  ;;  %v7522_v45 = vld [vmem:[#allocation8 + $0x154] sm:$0xf0] }
 0xd94   :  { %v7520_v37 = vld [vmem:[#allocation8 + $0x14c] sm:$0xf] }
 0xd95   :  { %6133 = vmatpush.bf16.msra.mxu1 %v7276_v19 }
 0xd96   :  { %5864 = vmatpush.bf16.msra.mxu0 %v7506_v13  ;;  %v7284_v13 = vor.u32 %v7538_v59, %v7283_v57  ;;  %v7195_v57 = vld [vmem:[#allocation8 + $0x120] sm:$0xf] }
 0xd98   :  { %6169 = vmatpush.bf16.msrb.mxu3 %v7284_v13  ;;  %v7517_v13 = vld [vmem:[#allocation8 + $0x12c] sm:$0xf0] }
 0xd9a   :  { %5779 = vrot.lane.b32.xlu0 %v5747_v49, %s8094_s6  ;;  %5865 = vmatpush.bf16.msra.mxu0 %v7505_v48  ;;  %v7535_v49 = vld [vmem:[#allocation8 + $0x1c4] sm:$0xf]  ;;  %v7536_v48 = vld [vmem:[#allocation8 + $0x1cc] sm:$0xf] }
 0xd9b   :  { %v7280_v12 = vor.u32 %v7535_v49, %v7277_v3  ;;  %v7221_v49 = vld [vmem:[#allocation8 + $0x158] sm:$0xf0]  ;;  %v7212_v3 = vor.u32 %v7521_v9, %v7211_v24 }
 0xd9d   :  { %6151 = vmatpush.bf16.msra.mxu2 %v7280_v12 }
 0xd9e   :  { %5866 = vmatpush.bf16.msra.mxu0 %v7504_v7  ;;  %v7285_v7 = vld [vmem:[#allocation8 + $0x1d8] sm:$0xf0] }
 0xda2   :  { %5867 = vmatpush.bf16.msra.mxu0 %v7503_v21  ;;  %v7288_v21 = vor.u32 %v7536_v48, %v7285_v7  ;;  %v7515_v48 = vld [vmem:[#allocation8 + $0x124] sm:$0xf]  ;;  %v7197_v7 = vld [vmem:[#allocation8 + $0x130] sm:$0xf0] }
 0xda6   :  { %6186 = vmatpush.bf16.msrb.mxu0 %v7304_v42  ;;  %v7240_v42 = vor.u32 %v7524_v52, %v7237_v5 }
 0xdaa   :  { %6187 = vmatpush.bf16.msrb.mxu0 %v7288_v21 }
 0xdb7   :  { %v7737_v25 = vpop.permute.xlu2 %7736 }
 0xdb8   :  { %v7739_v43 = vunpack.i.h.bf16 %v7737_v25  ;;  %v7738_v50 = vunpack.i.l.bf16 %v7737_v25  ;;  %v7533_v25 = vld [vmem:[#allocation8 + $0x1ac] sm:$0xf0] }
 0xdcf   :  { %v7732_v61 = vpop.permute.xlu1 %7731 }
 0xdd0   :  { %v7734_v2 = vunpack.i.h.bf16 %v7732_v61  ;;  %v7733_v0 = vunpack.i.l.bf16 %v7732_v61  ;;  %v7259_v61 = vld [vmem:[#allocation8 + $0x1a0] sm:$0xf] }
 0xdd1   :  { %v7727_v1 = vpop.permute.xlu0 %7726 }
 0xdd2   :  { %v7729_v55 = vunpack.i.h.bf16 %v7727_v1  ;;  %v7728_v6 = vunpack.i.l.bf16 %v7727_v1  ;;  %v7261_v1 = vld [vmem:[#allocation8 + $0x1b0] sm:$0xf0] }
 0xdd4   :  { %v5784_v39 = vsel %vm1880_vm3, %v10444_v41, %v7728_v6  ;;  %v5785_v40 = vsel %vm1880_vm3, %v10447_v38, %v7729_v55  ;;  %v7267_v55 = vld [vmem:[#allocation8 + $0x1a8] sm:$0xf]  ;;  %v7534_v6 = vld [vmem:[#allocation8 + $0x1b4] sm:$0xf0] }
 0xdd5   :  { %v5787_v18 = vsel %vm2776_vm9, %v5784_v39, %v7733_v0  ;;  %v5788_v32 = vsel %vm2776_vm9, %v5785_v40, %v7734_v2  ;;  %v7531_v2 = vld [vmem:[#allocation8 + $0x1a4] sm:$0xf]  ;;  %v7260_v0 = vor.u32 %v7533_v25, %v7259_v61  ;;  %v7532_v39 = vld [vmem:[#allocation8 + $0x1ac] sm:$0xf]  ;;  %v7269_v40 = vld [vmem:[#allocation8 + $0x1b8] sm:$0xf0]  ;;  %v7224_v61 = vor.u32 %v7520_v37, %v7221_v49 }
 0xdd6   :  { %v5790_v4 = vsel %vm10714_vm2, %v5787_v18, %v7738_v50  ;;  %v5791_v63 = vsel %vm10715_vm4, %v5788_v32, %v7739_v43  ;;  %v7264_v43 = vor.u32 %v7531_v2, %v7261_v1  ;;  %v7268_v50 = vor.u32 %v7534_v6, %v7267_v55  ;;  %v7243_v18 = vld [vmem:[#allocation8 + $0x180] sm:$0xf]  ;;  %v7203_v25 = vld [vmem:[#allocation8 + $0x128] sm:$0xf]  ;;  %v7518_v2 = vld [vmem:[#allocation8 + $0x134] sm:$0xf0] }
 0xdd7   :  { %v5793_v51 = vpack.c.bf16 %v5791_v63, %v5790_v4  ;;  %v7272_v32 = vor.u32 %v7532_v39, %v7269_v40  ;;  %v7529_v4 = vld [vmem:[#allocation8 + $0x18c] sm:$0xf0]  ;;  %v7527_v63 = vld [vmem:[#allocation8 + $0x184] sm:$0xf]  ;;  %6134 = vmatpush.bf16.msra.mxu1 %v7260_v0  ;;  %v7516_v1 = vld [vmem:[#allocation8 + $0x12c] sm:$0xf]  ;;  %v7204_v39 = vor.u32 %v7518_v2, %v7203_v25 }
 0xdd8   :  { %6152 = vmatpush.bf16.msra.mxu2 %v7264_v43  ;;  %6170 = vmatpush.bf16.msrb.mxu3 %v7268_v50  ;;  %v7205_v55 = vld [vmem:[#allocation8 + $0x138] sm:$0xf0]  ;;  %v7196_v43 = vor.u32 %v7517_v13, %v7195_v57  ;;  %v7200_v50 = vor.u32 %v7515_v48, %v7197_v7  ;;  %v7179_v40 = vld [vmem:[#allocation8 + $0x100] sm:$0xf]  ;;  %v7549_v25 = vld [vmem:[#allocation10 + $0xb0] sm:$0xff] }
 0xdd9   :  { %5868 = vmatmul.bf16.vlgmr.msra.gmra.mxu0 %v5793_v51  ;;  %v7245_v51 = vld [vmem:[#allocation8 + $0x190] sm:$0xf0]  ;;  %v7558_v2 = vld [vmem:[#allocation10 + $0xf8] sm:$0xff] }
 0xdda   :  { %6188 = vmatpush.bf16.msrb.mxu0 %v7272_v32  ;;  %v7511_v32 = vld [vmem:[#allocation8 + $0x104] sm:$0xf] }
 0xe03   :  { %v5768_v46 = vpop.permute.xlu1 %5767 }
 0xe04   :  { %v5756_v53 = vpop.permute.xlu0 %5755 }
 0xe05   :  { %v5786_v44 = vsel %vm1880_vm3, %v5741_v35, %v5756_v53 }
 0xe06   :  { %v5789_v41 = vsel %vm2776_vm9, %v5786_v44, %v5768_v46  ;;  %v7244_v44 = vor.u32 %v7529_v4, %v7243_v18  ;;  %v7251_v46 = vld [vmem:[#allocation8 + $0x188] sm:$0xf]  ;;  %v7513_v18 = vld [vmem:[#allocation8 + $0x10c] sm:$0xf0] }
 0xe08   :  { %6135 = vmatpush.bf16.msra.mxu1 %v7244_v44  ;;  %v7187_v44 = vld [vmem:[#allocation8 + $0x108] sm:$0xf] }
 0xe0c   :  { %v5780_v10 = vpop.permute.xlu0 %5779 }
 0xe0d   :  { %v5792_v60 = vsel %vm10716_vm5, %v5789_v41, %v5780_v10  ;;  %v7530_v10 = vld [vmem:[#allocation8 + $0x194] sm:$0xf0]  ;;  %v7528_v41 = vld [vmem:[#allocation8 + $0x18c] sm:$0xf] }
 0xe0e   :  { %v5794_v38 = vpack.c.bf16 %v5792_v60, %v5792_v60 }
 0xe10   :  { %5873 = vmatmul.bf16.gmra.mxu0 %v5794_v38  ;;  %v7248_v38 = vor.u32 %v7527_v63, %v7245_v51  ;;  %v7208_v51 = vor.u32 %v7516_v1, %v7205_v55  ;;  %v7548_v55 = vld [vmem:[#allocation10 + $0xa8] sm:$0xff] }
 0xe12   :  { %6153 = vmatpush.bf16.msra.mxu2 %v7248_v38  ;;  %v7180_v38 = vor.u32 %v7513_v18, %v7179_v40  ;;  %v7547_v18 = vld [vmem:[#allocation10 + $0xa0] sm:$0xff] }
 0xe56   :  { %v5869_v33 = vpop.f32.mrf.mxu0 }
 0xe57   :  { %v10504_v34 = vadd.f32 %v5869_v33, %v10717_v8  ;;  %v7252_v33 = vor.u32 %v7530_v10, %v7251_v46  ;;  %v7253_v8 = vld [vmem:[#allocation8 + $0x198] sm:$0xf0]  ;;  %v7514_v46 = vld [vmem:[#allocation8 + $0x114] sm:$0xf0]  ;;  %v7512_v10 = vld [vmem:[#allocation8 + $0x10c] sm:$0xf] }
 0xe59   :  { %v5883_v20 = vmul.f32 %v10504_v34, %v10504_v34  ;;  %6171 = vmatpush.bf16.msrb.mxu3 %v7252_v33 }
 0xe5b   :  { %5886 = vadd.xlane.f32.xlu2 %v5883_v20  ;;  %v7227_v20 = vld [vmem:[#allocation8 + $0x160] sm:$0xf] }
 0xe5e   :  { %v5871_v27 = vpop.f32.mrf.mxu0 }
 0xe5f   :  { %v10509_v14 = vadd.f32 %v5871_v27, %v10718_v29  ;;  %v7525_v27 = vld [vmem:[#allocation8 + $0x16c] sm:$0xf0]  ;;  %v7256_v29 = vor.u32 %v7528_v41, %v7253_v8  ;;  %v7189_v41 = vld [vmem:[#allocation8 + $0x118] sm:$0xf0]  ;;  %v7188_v8 = vor.u32 %v7514_v46, %v7187_v44 }
 0xe60   :  { %v7228_v23 = vor.u32 %v7525_v27, %v7227_v20  ;;  %v7546_v46 = vld [vmem:[#allocation10 + $0x98] sm:$0xff] }
 0xe61   :  { %v5884_v17 = vmul.f32 %v10509_v14, %v10509_v14  ;;  %6189 = vmatpush.bf16.msrb.mxu0 %v7256_v29  ;;  %v7192_v29 = vor.u32 %v7512_v10, %v7189_v41  ;;  %v7555_v10 = vld [vmem:[#allocation10 + $0xe0] sm:$0xff] }
 0xe62   :  { %6136 = vmatpush.bf16.msra.mxu1 %v7228_v23 }
 0xe63   :  { %5888 = vadd.xlane.f32.xlu1 %v5884_v17  ;;  %v7523_v17 = vld [vmem:[#allocation8 + $0x164] sm:$0xf] }
 0xe65   :  { %6190 = vmatpush.bf16.msrb.mxu0 %v7240_v42 }
 0xe66   :  { %6137 = vmatpush.bf16.msra.mxu1 %v7212_v3  ;;  %v7550_v3 = vld [vmem:[#allocation10 + $0xb8] sm:$0xff] }
 0xe69   :  { %6191 = vmatpush.bf16.msrb.mxu0 %v7224_v61 }
 0xe6a   :  { %6138 = vmatpush.bf16.msra.mxu1 %v7196_v43 }
 0xe6d   :  { %6192 = vmatpush.bf16.msrb.mxu0 %v7208_v51 }
 0xe6e   :  { %6139 = vmatpush.bf16.msra.mxu1 %v7180_v38 }
 0xe71   :  { %6193 = vmatpush.bf16.msrb.mxu0 %v7192_v29 }
 0xe72   :  { %6463 = vmatpush.bf16.msrb.mxu1 %v7550_v3 }
 0xe76   :  { %6464 = vmatpush.bf16.msrb.mxu1 %v7549_v25 }
 0xe7a   :  { %6465 = vmatpush.bf16.msrb.mxu1 %v7548_v55 }
 0xe7e   :  { %6466 = vmatpush.bf16.msrb.mxu1 %v7547_v18 }
 0xe82   :  { %6467 = vmatpush.bf16.msrb.mxu1 %v7546_v46 }
 0xe8d   :  { %v5874_v26 = vpop.f32.mrf.mxu0 }
 0xe8e   :  { %v10514_v47 = vadd.f32 %v5874_v26, %v10719_v62  ;;  %v7229_v26 = vld [vmem:[#allocation8 + $0x170] sm:$0xf0]  ;;  %v7235_v62 = vld [vmem:[#allocation8 + $0x168] sm:$0xf] }
 0xe8f   :  { %v7232_v16 = vor.u32 %v7523_v17, %v7229_v26  ;;  %v7236_v56 = vor.u32 %v7526_v58, %v7235_v62 }
 0xe90   :  { %v5885_v22 = vmul.f32 %v10514_v47, %v10514_v47 }
 0xe91   :  { %6154 = vmatpush.bf16.msra.mxu2 %v7232_v16  ;;  %6172 = vmatpush.bf16.msrb.mxu3 %v7236_v56 }
 0xe92   :  { %5890 = vadd.xlane.f32.xlu0 %v5885_v22 }
 0xe95   :  { %v5876_v36 = vpop.f32.mrf.mxu0 }
 0xece   :  { %v5887_v11 = vpop.xlane.xlu2 %5886 }
 0xecf   :  { %v5892_v31 = vmul.f32 %v5887_v11, %v10720_v30  ;;  %v7213_v11 = vld [vmem:[#allocation8 + $0x150] sm:$0xf0] }
 0xed0   :  { %v7216_v59 = vor.u32 %v7519_v15, %v7213_v11 }
 0xed1   :  { %v10519_v35 = vadd.f32 1e-06, %v5892_v31  ;;  %v7219_v31 = vld [vmem:[#allocation8 + $0x148] sm:$0xf] }
 0xed2   :  { %v7220_v12 = vor.u32 %v7522_v45, %v7219_v31  ;;  %6155 = vmatpush.bf16.msra.mxu2 %v7216_v59 }
 0xed3   :  { %7892 = vrsqrt.f32 %v10519_v35  ;;  %vm5904_vm6 = vweird.f32 %v10519_v35 }
 0xed4   :  { %6173 = vmatpush.bf16.msrb.mxu3 %v7220_v12 }
 0xed6   :  { %v5889_v53 = vpop.xlane.xlu1 %5888  ;;  %6156 = vmatpush.bf16.msra.mxu2 %v7200_v50 }
 0xed7   :  { %v5893_v60 = vmul.f32 %v5889_v53, %v10720_v30  ;;  %v7181_v53 = vld [vmem:[#allocation8 + $0x110] sm:$0xf0] }
 0xed8   :  { %6174 = vmatpush.bf16.msrb.mxu3 %v7204_v39  ;;  %v7184_v33 = vor.u32 %v7511_v32, %v7181_v53  ;;  %v7556_v32 = vld [vmem:[#allocation10 + $0xe8] sm:$0xff] }
 0xed9   :  { %v10523_v22 = vpop.eup %7892  ;;  %v10525_v36 = vadd.f32 1e-06, %v5893_v60 }
 0xeda   :  { %v5899_v28 = vmul.f32 %v10523_v22, %v10519_v35  ;;  %vm5905_vm3 = vweird.f32 %v10523_v22  ;;  %v7744_v35 = vld [vmem:[%s10629_s5 + $0x1] ss:$0 sm:$0xff]  ;;  %6157 = vmatpush.bf16.msra.mxu2 %v7184_v33 }
 0xedb   :  { %7894 = vrsqrt.f32 %v10525_v36  ;;  %vm5906_vm7 = vmor %vm5904_vm6, %vm5905_vm3  ;;  %vm5914_vm9 = vweird.f32 %v10525_v36 }
 0xedc   :  { %v5900_v54 = vmul.f32 %v10523_v22, %v5899_v28  ;;  %6175 = vmatpush.bf16.msrb.mxu3 %v7188_v8 }
 0xede   :  { %v5901_v19 = vmul.f32 0.5, %v5900_v54  ;;  %6481 = vmatpush.bf16.msrb.mxu2 %v7558_v2 }
 0xee0   :  { %v5902_v21 = vsub.f32 1.5, %v5901_v19 }
 0xee1   :  { %v7895_v0 = vpop.eup %7894 }
 0xee2   :  { %v5909_v6 = vmul.f32 %v7895_v0, %v10525_v36  ;;  %v5903_v4 = vmul.f32 %v10523_v22, %v5902_v21  ;;  %vm5915_vm8 = vweird.f32 %v7895_v0 }
 0xee3   :  { %vm5916_vm14 = vmor %vm5914_vm9, %vm5915_vm8 }
 0xee4   :  { %v5910_v63 = vmul.f32 %v7895_v0, %v5909_v6  ;;  %v5907_v20 = vsel %vm5906_vm7, %v10523_v22, %v5903_v4  ;;  %v7557_v6 = vld [vmem:[#allocation10 + $0xf0] sm:$0xff] }
 0xee5   :  { %v5928_v26 = vmul.f32 %v5907_v20, %v10504_v34  ;;  %6482 = vmatpush.bf16.msrb.mxu2 %v7557_v6 }
 0xee6   :  { %v5911_v60 = vmul.f32 0.5, %v5910_v63 }
 0xee7   :  { %v5934_v58 = vmul.f32 %v7744_v35, %v5928_v26  ;;  %v7545_v26 = vld [vmem:[#allocation10 + $0x90] sm:$0xff] }
 0xee8   :  { %v5912_v27 = vsub.f32 1.5, %v5911_v60  ;;  %6468 = vmatpush.bf16.msrb.mxu1 %v7545_v26 }
 0xee9   :  { %6483 = vmatpush.bf16.msrb.mxu2 %v7556_v32 }
 0xeea   :  { %v5913_v17 = vmul.f32 %v7895_v0, %v5912_v27 }
 0xeec   :  { %v5917_v62 = vsel %vm5916_vm14, %v7895_v0, %v5913_v17 }
 0xeed   :  { %v5929_v22 = vmul.f32 %v5917_v62, %v10509_v14  ;;  %6484 = vmatpush.bf16.msrb.mxu2 %v7555_v10  ;;  %v7554_v62 = vld [vmem:[#allocation10 + $0xd8] sm:$0xff] }
 0xeef   :  { %v5935_v52 = vmul.f32 %v7744_v35, %v5929_v22 }
 0xef1   :  { %v5937_v28 = vpack.c.bf16 %v5935_v52, %v5934_v58  ;;  %6485 = vmatpush.bf16.msrb.mxu2 %v7554_v62 }
 0xef3   :  { %6140 = vmatmul.bf16.vlgmr.msra.gmra.mxu1 %v5937_v28  ;;  %6158 = vmatmul.bf16.vlgmr.msra.gmra.mxu2 %v5937_v28 }
 0xef4   :  { %6176 = vmatmul.bf16.vlgmr.msrb.gmra.mxu3 %v5937_v28  ;;  %6194 = vmatmul.bf16.vlgmr.msrb.gmra.mxu0 %v5937_v28 }
 0xf05   :  { %v5891_v36 = vpop.xlane.xlu0 %5890 }
 0xf06   :  { %v5894_v23 = vmul.f32 %v5891_v36, %v10720_v30 }
 0xf08   :  { %v5897_v5 = vadd.f32 1e-06, %v5894_v23 }
 0xf0a   :  { %7896 = vrsqrt.f32 %v5897_v5  ;;  %vm5924_vm0 = vweird.f32 %v5897_v5 }
 0xf10   :  { %v7897_v16 = vpop.eup %7896 }
 0xf11   :  { %v5919_v56 = vmul.f32 %v7897_v16, %v5897_v5  ;;  %vm5925_vm1 = vweird.f32 %v7897_v16 }
 0xf12   :  { %vm5926_vm12 = vmor %vm5924_vm0, %vm5925_vm1 }
 0xf13   :  { %v5920_v24 = vmul.f32 %v7897_v16, %v5919_v56 }
 0xf15   :  { %v5921_v9 = vmul.f32 0.5, %v5920_v24 }
 0xf17   :  { %v5922_v15 = vsub.f32 1.5, %v5921_v9 }
 0xf19   :  { %v5923_v54 = vmul.f32 %v7897_v16, %v5922_v15 }
 0xf1b   :  { %v5927_v42 = vsel %vm5926_vm12, %v7897_v16, %v5923_v54  ;;  %v7544_v54 = vld [vmem:[#allocation10 + $0x88] sm:$0xff] }
 0xf1c   :  { %v5930_v11 = vmul.f32 %v5927_v42, %v10514_v47  ;;  %v7553_v42 = vld [vmem:[#allocation10 + $0xd0] sm:$0xff]  ;;  %6469 = vmatpush.bf16.msrb.mxu1 %v7544_v54 }
 0xf1d   :  { %6486 = vmatpush.bf16.msrb.mxu2 %v7553_v42 }
 0xf1e   :  { %v5936_v31 = vmul.f32 %v7744_v35, %v5930_v11 }
 0xf20   :  { %v5938_v45 = vpack.c.bf16 %v5936_v31, %v5936_v31 }
 0xf22   :  { %6145 = vmatmul.bf16.gmra.mxu1 %v5938_v45  ;;  %6163 = vmatmul.bf16.gmra.mxu2 %v5938_v45 }
 0xf23   :  { %6181 = vmatmul.bf16.gmra.mxu3 %v5938_v45  ;;  %6199 = vmatmul.bf16.gmra.mxu0 %v5938_v45 }
 0xf70   :  { %v10544_v37 = vpop.f32.mrf.mxu1 }
 0xf71   :  { %v7305_v49 = vmul.f32 -1.442695, %v10544_v37  ;;  %v10574_v29 = vpop.f32.mrf.mxu0 }
 0xf73   :  { %7898 = vpow2.f32 %v7305_v49 }
 0xf76   :  { %v10547_v19 = vpop.f32.mrf.mxu2 }
 0xf77   :  { %v7306_v57 = vmul.f32 -1.442695, %v10547_v19  ;;  %v6177_v35 = vpop.f32.mrf.mxu3 }
 0xf78   :  { %v10550_v59 = vpop.f32.mrf.mxu1 }
 0xf79   :  { %v7899_v12 = vpop.eup %7898  ;;  %7900 = vpow2.f32 %v7306_v57  ;;  %v7307_v13 = vmul.f32 -1.442695, %v10550_v59 }
 0xf7a   :  { %v6222_v48 = vadd.f32 1.0, %v7899_v12 }
 0xf7b   :  { %7902 = vpow2.f32 %v7307_v13 }
 0xf7c   :  { %7904 = vrcp.f32 %v6222_v48  ;;  %v6239_v60 = vand.u32 2147483648, %v6222_v48  ;;  %vm6233_vm13 = vweird.f32 %v6222_v48  ;;  %v6237_v8 = vand.u32 2147483647, %v6222_v48 }
 0xf7e   :  { %v10553_v7 = vpop.f32.mrf.mxu2  ;;  %v6240_v58 = vor.u32 1.1754944e-38, %v6239_v60  ;;  %vm6238_vm2 = vcmp.eq.f32.partialorder %v6237_v8, 8.507059e+37 }
 0xf7f   :  { %v7901_v21 = vpop.eup %7900  ;;  %v7308_v61 = vmul.f32 -1.442695, %v10553_v7 }
 0xf80   :  { %v10556_v0 = vadd.f32 1.0, %v7901_v21 }
 0xf81   :  { %v7903_v1 = vpop.eup %7902  ;;  %7906 = vpow2.f32 %v7308_v61 }
 0xf82   :  { %v7905_v43 = vpop.eup %7904  ;;  %7908 = vrcp.f32 %v10556_v0  ;;  %v10559_v39 = vadd.f32 1.0, %v7903_v1  ;;  %v6252_v52 = vand.u32 2147483647, %v10556_v0  ;;  %v6254_v23 = vand.u32 2147483648, %v10556_v0  ;;  %v7552_v1 = vld [vmem:[#allocation10 + $0xc8] sm:$0xff] }
 0xf83   :  { %v6229_v50 = vmul.f32 %v7905_v43, %v6222_v48  ;;  %vm6234_vm11 = vweird.f32 %v7905_v43  ;;  %vm6248_vm5 = vweird.f32 %v10556_v0  ;;  %6487 = vmatpush.bf16.msrb.mxu2 %v7552_v1 }
 0xf84   :  { %7910 = vrcp.f32 %v10559_v39  ;;  %vm10570_vm15 = vmor %vm6233_vm13, %vm6234_vm11  ;;  %v6269_v5 = vand.u32 2147483648, %v10559_v39  ;;  %v6267_v24 = vand.u32 2147483647, %v10559_v39  ;;  %vm10593_vm6 = vcmp.eq.f32.partialorder %v6252_v52, 8.507059e+37 }
 0xf85   :  { %v6230_v40 = vsub.f32 1.0, %v6229_v50  ;;  %vm6263_vm7 = vweird.f32 %v10559_v39  ;;  %v6255_v3 = vor.u32 1.1754944e-38, %v6254_v23  ;;  %v6179_v50 = vpop.f32.mrf.mxu3 }
 0xf86   :  { %v6270_v57 = vor.u32 1.1754944e-38, %v6269_v5  ;;  %vm6268_vm9 = vcmp.eq.f32.partialorder %v6267_v24, 8.507059e+37 }
 0xf87   :  { %v7907_v4 = vpop.eup %7906  ;;  %v6231_v63 = vmul.f32 %v7905_v43, %v6230_v40 }
 0xf88   :  { %v10562_v51 = vpop.eup %7908  ;;  %v10564_v53 = vadd.f32 1.0, %v7907_v4 }
 0xf89   :  { %v6244_v44 = vmul.f32 %v10562_v51, %v10556_v0  ;;  %v6232_v41 = vadd.f32 %v7905_v43, %v6231_v63  ;;  %vm6249_vm10 = vweird.f32 %v10562_v51  ;;  %v7543_v0 = vld [vmem:[#allocation10 + $0x80] sm:$0xff] }
 0xf8a   :  { %7912 = vrcp.f32 %v10564_v53  ;;  %v7911_v38 = vpop.eup %7910  ;;  %vm10589_vm3 = vmor %vm6248_vm5, %vm6249_vm10  ;;  %v6284_v21 = vand.u32 2147483648, %v10564_v53  ;;  %v6282_v2 = vand.u32 2147483647, %v10564_v53  ;;  %vm6278_vm1 = vweird.f32 %v10564_v53  ;;  %6470 = vmatpush.bf16.msrb.mxu1 %v7543_v0 }
 0xf8b   :  { %v6245_v33 = vsub.f32 1.0, %v6244_v44  ;;  %v6259_v20 = vmul.f32 %v7911_v38, %v10559_v39  ;;  %v6236_v22 = vsel %vm10570_vm15, %v7905_v43, %v6232_v41  ;;  %vm6264_vm4 = vweird.f32 %v7911_v38  ;;  %v6197_v43 = vpop.f32.mrf.mxu0 }
 0xf8c   :  { %v6241_v9 = vsel %vm6238_vm2, %v6240_v58, %v6236_v22  ;;  %vm6265_vm8 = vmor %vm6263_vm7, %vm6264_vm4  ;;  %v6285_v40 = vor.u32 1.1754944e-38, %v6284_v21  ;;  %vm6283_vm12 = vcmp.eq.f32.partialorder %v6282_v2, 8.507059e+37 }
 0xf8d   :  { %v6246_v17 = vmul.f32 %v10562_v51, %v6245_v33  ;;  %v6260_v28 = vsub.f32 1.0, %v6259_v20  ;;  %v6318_v13 = vmul.f32 %v6241_v9, %v10544_v37 }
 0xf8f   :  { %v6247_v36 = vadd.f32 %v10562_v51, %v6246_v17  ;;  %v6261_v56 = vmul.f32 %v7911_v38, %v6260_v28  ;;  %v6324_v39 = vmul.f32 %v6318_v13, %v6177_v35 }
 0xf90   :  { %v7913_v16 = vpop.eup %7912 }
 0xf91   :  { %v6274_v15 = vmul.f32 %v7913_v16, %v10564_v53  ;;  %v6262_v45 = vadd.f32 %v7911_v38, %v6261_v56  ;;  %v6251_v49 = vsel %vm10589_vm3, %v10562_v51, %v6247_v36  ;;  %vm6279_vm14 = vweird.f32 %v7913_v16 }
 0xf92   :  { %v6256_v55 = vsel %vm10593_vm6, %v6255_v3, %v6251_v49  ;;  %vm6280_vm0 = vmor %vm6278_vm1, %vm6279_vm14 }
 0xf93   :  { %v6275_v12 = vsub.f32 1.0, %v6274_v15  ;;  %v6266_v48 = vsel %vm6265_vm8, %v7911_v38, %v6262_v45  ;;  %v6319_v32 = vmul.f32 %v6256_v55, %v10547_v19 }
 0xf94   :  { %v6271_v61 = vsel %vm6268_vm9, %v6270_v57, %v6266_v48 }
 0xf95   :  { %v6276_v25 = vmul.f32 %v7913_v16, %v6275_v12  ;;  %v6320_v6 = vmul.f32 %v6271_v61, %v10550_v59  ;;  %v7551_v59 = vld [vmem:[#allocation10 + $0xc0] sm:$0xff]  ;;  %v6325_v46 = vmul.f32 %v6319_v32, %v10574_v29 }
 0xf96   :  { %6488 = vmatpush.bf16.msrb.mxu2 %v7551_v59 }
 0xf97   :  { %v6277_v37 = vadd.f32 %v7913_v16, %v6276_v25  ;;  %v6326_v18 = vmul.f32 %v6320_v6, %v6179_v50 }
 0xf99   :  { %v6281_v4 = vsel %vm6280_vm0, %v7913_v16, %v6277_v37  ;;  %v6330_v51 = vpack.c.bf16 %v6326_v18, %v6324_v39 }
 0xf9a   :  { %v6286_v63 = vsel %vm6283_vm12, %v6285_v40, %v6281_v4 }
 0xf9b   :  { %v6321_v44 = vmul.f32 %v6286_v63, %v10553_v7  ;;  %6471 = vmatmul.bf16.vlgmr.msrb.gmra.mxu1 %v6330_v51 }
 0xf9d   :  { %v6327_v53 = vmul.f32 %v6321_v44, %v6197_v43 }
 0xf9f   :  { %v6146_v10 = vpop.f32.mrf.mxu1  ;;  %v6331_v41 = vpack.c.bf16 %v6327_v53, %v6325_v46 }
 0xfa0   :  { %v7309_v60 = vmul.f32 -1.442695, %v6146_v10  ;;  %v6200_v38 = vpop.f32.mrf.mxu0 }
 0xfa1   :  { %6489 = vmatmul.bf16.vlgmr.msrb.gmra.mxu2 %v6331_v41 }
 0xfa2   :  { %7914 = vpow2.f32 %v7309_v60 }
 0xfa5   :  { %v6164_v19 = vpop.f32.mrf.mxu2 }
 0xfa6   :  { %v7310_v33 = vmul.f32 -1.442695, %v6164_v19  ;;  %v6182_v8 = vpop.f32.mrf.mxu3 }
 0xfa7   :  { %v6148_v20 = vpop.f32.mrf.mxu1 }
 0xfa8   :  { %v7915_v27 = vpop.eup %7914  ;;  %7916 = vpow2.f32 %v7310_v33  ;;  %v6202_v17 = vpop.f32.mrf.mxu0 }
 0xfa9   :  { %v6226_v7 = vadd.f32 1.0, %v7915_v27  ;;  %v7745_v17 = vld [vmem:[%s10627_s3] ss:$0 sm:$0xff]  ;;  %s8098_s3 = smov [#allocation11]  }
 0xfaa   :  { %s6564_s13 = sshll.u32 %s8098_s3, 4  ;;  %s6565_s13 = int_to_ptr.vmem [resolvable:$true] %s6564_s13 }
 0xfab   :  { %7918 = vrcp.f32 %v6226_v7  ;;  %v6299_v28 = vand.u32 2147483648, %v6226_v7  ;;  %v6297_v23 = vand.u32 2147483647, %v6226_v7  ;;  %vm6293_vm13 = vweird.f32 %v6226_v7 }
 0xfad   :  { %v6166_v35 = vpop.f32.mrf.mxu2  ;;  %v6300_v24 = vor.u32 1.1754944e-38, %v6299_v28  ;;  %vm6298_vm10 = vcmp.eq.f32.partialorder %v6297_v23, 8.507059e+37 }
 0xfae   :  { %v7917_v26 = vpop.eup %7916  ;;  %v6184_v29 = vpop.f32.mrf.mxu3 }
 0xfaf   :  { %v6227_v62 = vadd.f32 1.0, %v7917_v26 }
 0xfb1   :  { %v7919_v22 = vpop.eup %7918  ;;  %7920 = vrcp.f32 %v6227_v62  ;;  %v6314_v42 = vand.u32 2147483648, %v6227_v62  ;;  %v6312_v45 = vand.u32 2147483647, %v6227_v62  ;;  %vm6308_vm4 = vweird.f32 %v6227_v62 }
 0xfb2   :  { %v6289_v58 = vmul.f32 %v7919_v22, %v6226_v7  ;;  %vm6294_vm11 = vweird.f32 %v7919_v22 }
 0xfb3   :  { %vm6295_vm15 = vmor %vm6293_vm13, %vm6294_vm11  ;;  %v6315_v57 = vor.u32 1.1754944e-38, %v6314_v42  ;;  %vm6313_vm3 = vcmp.eq.f32.partialorder %v6312_v45, 8.507059e+37 }
 0xfb4   :  { %v6290_v52 = vsub.f32 1.0, %v6289_v58 }
 0xfb6   :  { %v6291_v36 = vmul.f32 %v7919_v22, %v6290_v52 }
 0xfb7   :  { %v7921_v5 = vpop.eup %7920 }
 0xfb8   :  { %v6292_v16 = vadd.f32 %v7919_v22, %v6291_v36  ;;  %v6304_v56 = vmul.f32 %v7921_v5, %v6227_v62  ;;  %vm6309_vm2 = vweird.f32 %v7921_v5 }
 0xfb9   :  { %vm6310_vm5 = vmor %vm6308_vm4, %vm6309_vm2 }
 0xfba   :  { %v6296_v9 = vsel %vm6295_vm15, %v7919_v22, %v6292_v16  ;;  %v6305_v15 = vsub.f32 1.0, %v6304_v56 }
 0xfbb   :  { %v6301_v54 = vsel %vm6298_vm10, %v6300_v24, %v6296_v9 }
 0xfbc   :  { %v6322_v11 = vmul.f32 %v6301_v54, %v6146_v10  ;;  %v6306_v31 = vmul.f32 %v7921_v5, %v6305_v15 }
 0xfbe   :  { %v6307_v49 = vadd.f32 %v7921_v5, %v6306_v31  ;;  %v6328_v3 = vmul.f32 %v6322_v11, %v6182_v8 }
 0xfc0   :  { %v6311_v12 = vsel %vm6310_vm5, %v7921_v5, %v6307_v49  ;;  %v6332_v13 = vpack.c.bf16 %v6328_v3, %v6328_v3 }
 0xfc1   :  { %v6316_v48 = vsel %vm6313_vm3, %v6315_v57, %v6311_v12 }
 0xfc2   :  { %v6323_v21 = vmul.f32 %v6316_v48, %v6164_v19  ;;  %6476 = vmatmul.bf16.gmra.mxu1 %v6332_v13 }
 0xfc4   :  { %v6329_v61 = vmul.f32 %v6323_v21, %v6200_v38 }
 0xfc6   :  { %v6333_v25 = vpack.c.bf16 %v6329_v61, %v6329_v61 }
 0xfc8   :  { %6494 = vmatmul.bf16.gmra.mxu2 %v6333_v25 }
0x1018   :  { %v6472_v2 = vpop.f32.mrf.mxu1 }
0x1020   :  { %v6474_v43 = vpop.f32.mrf.mxu1 }
0x1024   :  { %v6490_v0 = vpop.f32.mrf.mxu2 }
0x1025   :  { %v6491_v1 = vadd.f32 %v6490_v0, %v6472_v2 }
0x1027   :  { %v6499_v55 = vadd.f32 %v6491_v1, %v10504_v34 }
0x1029   :  { %v6503_v6 = vmul.f32 %v6499_v55, %v6499_v55 }
0x102b   :  { %6506 = vadd.xlane.f32.xlu2 %v6503_v6 }
0x102c   :  { %v6492_v37 = vpop.f32.mrf.mxu2 }
0x102d   :  { %v6493_v50 = vadd.f32 %v6492_v37, %v6474_v43 }
0x102f   :  { %v6500_v39 = vadd.f32 %v6493_v50, %v10509_v14 }
0x1031   :  { %v6504_v40 = vmul.f32 %v6500_v39, %v6500_v39 }
0x1033   :  { %6508 = vadd.xlane.f32.xlu1 %v6504_v40 }
0x103f   :  { %v6477_v18 = vpop.f32.mrf.mxu1 }
0x1047   :  { %v6479_v32 = vpop.f32.mrf.mxu1 }
0x104b   :  { %v6495_v4 = vpop.f32.mrf.mxu2 }
0x104c   :  { %v6496_v63 = vadd.f32 %v6495_v4, %v6477_v18 }
0x104e   :  { %v6501_v51 = vadd.f32 %v6496_v63, %v10514_v47 }
0x1050   :  { %v6505_v44 = vmul.f32 %v6501_v51, %v6501_v51 }
0x1052   :  { %6510 = vadd.xlane.f32.xlu0 %v6505_v44 }
0x1053   :  { %v6497_v59 = vpop.f32.mrf.mxu2 }
0x109e   :  { %v6507_v46 = vpop.xlane.xlu2 %6506 }
0x109f   :  { %v6512_v34 = vmul.f32 %v6507_v46, %v10720_v30 }
0x10a1   :  { %v6515_v53 = vadd.f32 1e-06, %v6512_v34 }
0x10a3   :  { %7922 = vrsqrt.f32 %v6515_v53  ;;  %vm6524_vm7 = vweird.f32 %v6515_v53 }
0x10a6   :  { %v6509_v10 = vpop.xlane.xlu1 %6508 }
0x10a7   :  { %v6513_v41 = vmul.f32 %v6509_v10, %v10720_v30 }
0x10a9   :  { %v7923_v14 = vpop.eup %7922  ;;  %v6516_v60 = vadd.f32 1e-06, %v6513_v41 }
0x10aa   :  { %v6519_v38 = vmul.f32 %v7923_v14, %v6515_v53  ;;  %vm6525_vm6 = vweird.f32 %v7923_v14 }
0x10ab   :  { %7924 = vrsqrt.f32 %v6516_v60  ;;  %vm6526_vm8 = vmor %vm6524_vm7, %vm6525_vm6  ;;  %vm6534_vm14 = vweird.f32 %v6516_v60 }
0x10ac   :  { %v6520_v19 = vmul.f32 %v7923_v14, %v6519_v38 }
0x10ae   :  { %v6521_v33 = vmul.f32 0.5, %v6520_v19 }
0x10b0   :  { %v6522_v8 = vsub.f32 1.5, %v6521_v33 }
0x10b1   :  { %v7925_v47 = vpop.eup %7924 }
0x10b2   :  { %v6523_v20 = vmul.f32 %v7923_v14, %v6522_v8  ;;  %v6529_v27 = vmul.f32 %v7925_v47, %v6516_v60  ;;  %vm6535_vm9 = vweird.f32 %v7925_v47 }
0x10b3   :  { %vm6536_vm1 = vmor %vm6534_vm14, %vm6535_vm9 }
0x10b4   :  { %v6527_v7 = vsel %vm6526_vm8, %v7923_v14, %v6523_v20  ;;  %v6530_v35 = vmul.f32 %v7925_v47, %v6529_v27 }
0x10b5   :  { %v6548_v26 = vmul.f32 %v6527_v7, %v6499_v55 }
0x10b6   :  { %v6531_v29 = vmul.f32 0.5, %v6530_v35 }
0x10b7   :  { %v6554_v62 = vmul.f32 %v7745_v17, %v6548_v26 }
0x10b8   :  { %v6532_v22 = vsub.f32 1.5, %v6531_v29 }
0x10b9   :  { %6557 = vst [vmem:[#allocation11] sm:$0xff] %v6554_v62 }
0x10ba   :  { %v6533_v58 = vmul.f32 %v7925_v47, %v6532_v22 }
0x10bc   :  { %v6537_v52 = vsel %vm6536_vm1, %v7925_v47, %v6533_v58 }
0x10bd   :  { %v6549_v28 = vmul.f32 %v6537_v52, %v6500_v39 }
0x10bf   :  { %v6555_v36 = vmul.f32 %v7745_v17, %v6549_v28 }
0x10c1   :  { %6558 = vst [vmem:[#allocation11 + $0x8] sm:$0xff] %v6555_v36 }
0x10c5   :  { %v6511_v23 = vpop.xlane.xlu0 %6510 }
0x10c6   :  { %v6514_v5 = vmul.f32 %v6511_v23, %v10720_v30 }
0x10c8   :  { %v6517_v16 = vadd.f32 1e-06, %v6514_v5 }
0x10ca   :  { %7926 = vrsqrt.f32 %v6517_v16  ;;  %vm6544_vm12 = vweird.f32 %v6517_v16 }
0x10d0   :  { %v7927_v56 = vpop.eup %7926 }
0x10d1   :  { %v6539_v24 = vmul.f32 %v7927_v56, %v6517_v16  ;;  %vm6545_vm0 = vweird.f32 %v7927_v56 }
0x10d2   :  { %vm6546_vm11 = vmor %vm6544_vm12, %vm6545_vm0 }
0x10d3   :  { %v6540_v9 = vmul.f32 %v7927_v56, %v6539_v24 }
0x10d5   :  { %v6541_v15 = vmul.f32 0.5, %v6540_v9 }
0x10d7   :  { %v6542_v54 = vsub.f32 1.5, %v6541_v15 }
0x10d9   :  { %v6543_v42 = vmul.f32 %v7927_v56, %v6542_v54 }
0x10db   :  { %v6547_v11 = vsel %vm6546_vm11, %v7927_v56, %v6543_v42 }
0x10dc   :  { %v6550_v31 = vmul.f32 %v6547_v11, %v6501_v51 }
0x10de   :  { %v6556_v30 = vmul.f32 %v7745_v17, %v6550_v31 }
0x10e0   :  { %6559 = vst [vmem:[#allocation11 + $0x10] sm:$0xff] %v6556_v30 }
0x10e1   :  { %6572 = dma.vmem_to_hbm [thread:$0]  %s6565_s13, 384, %s6567_s16, [#allocation4], %s8099_s17, %s8099_s17, %s8100_s18  }
0x10e2   :  { %8078 = dma.done.wait [#allocation4], 384  }
0x10e3   :  { %8079 = vsyncadd [#allocation4], 4294966912 }
0x10e4   :  { %6577 = vsyncpa [#allocation3], 1 }
0x10e5   :  { %6578 = vsyncpa [#allocation6], 1 }
0x10e6   :  { %6579 = vsyncpa [#allocation9], 1 }
0x10e7   :  { %6580 = vsyncpa [#allocation4], 1 }

</bundles_post_ra>
